<compile_context>
chip_gen: v5e
topology: v5e:2x2
jax: 0.10.0
libtpu: 0.0.40
codegen_flags: <defaults>
</compile_context>

<pallas_src>
import math

import jax
import jax.numpy as jnp
from jax import lax
from jax.experimental import pallas as pl
from jax.experimental.pallas import tpu as pltpu

# ----------------------- model hyper-parameters (small) -----------------------
PRED_FEATS = 8          # predicate_feats
HID = 32                # hid_units (also context_features)
NUM_BINS = 30
NUM_BLOCKS = 3
MULT = 3 * NUM_BINS + 1   # tails=None -> widths + heights + (num_bins+1) derivs
MIN_BIN_WIDTH = 1e-3
MIN_BIN_HEIGHT = 1e-3
MIN_DERIVATIVE = 1e-3
INV_SQRT_H = 1.0 / math.sqrt(HID)   # nflows divides unnormalized widths/heights by sqrt(hidden)
BIN_PAD = 32                        # per-feature sublane slot (30/31 rows padded to 32)
HOFF = PRED_FEATS * BIN_PAD         # 256: heights-slab row offset in params
DOFF = 2 * HOFF                     # 512: derivs-slab row offset in params
FOFF = 2 * NUM_BLOCKS * HID         # 192: final-layer row offset inside packed hidden weights
XDIM = PRED_FEATS + HID             # 40 : concatenated [x^T ; ctx^T] rows


def _softplus(x):
    # numerically-stable softplus (matches jax.nn.softplus / F.softplus)
    return jnp.maximum(x, 0.0) + jnp.log(1.0 + jnp.exp(-jnp.abs(x)))


# --------------------------------- kernel ---------------------------------
def _autoregressive_cdf_kernel(xc_ref, w_in_ref, b_in_ref, w_hid_ref, b_hid_ref,
                               csum_ref, out_ref):
    f32 = jnp.float32
    xc = xc_ref[...].astype(f32)                  # (F+H, BT): rows 0..7 x^T, 8..39 ctx^T
    bt = xc.shape[1]
    nb = NUM_BINS
    xT = xc[0:PRED_FEATS, :]                      # (F, BT), batch on the lane axis

    # ------------- MADE (transposed), fused initial+context matmul -------------
    # rows [0,H) -> h0 ; rows [(k+1)H, (k+2)H) -> GLU gate for block k
    fused = jnp.dot(w_in_ref[...], xc, preferred_element_type=f32) + b_in_ref[...]   # (4H, BT)
    h = fused[0:HID, :]
    for k in range(NUM_BLOCKS):
        r0 = 2 * k * HID
        r1 = r0 + HID
        r2 = r1 + HID
        t = jnp.maximum(h, 0.0)                                               # relu
        t = jnp.dot(w_hid_ref[r0:r1, :], t, preferred_element_type=f32) + b_hid_ref[r0:r1, :]
        t = jnp.maximum(t, 0.0)                                               # relu (dropout p=0)
        t = jnp.dot(w_hid_ref[r1:r2, :], t, preferred_element_type=f32) + b_hid_ref[r1:r2, :]
        gate = fused[(k + 1) * HID:(k + 2) * HID, :]
        # exact sigmoid: its error would be amplified by 1/bw in the spline, so no approx here
        t = t * (1.0 / (1.0 + jnp.exp(-gate)))                                # F.glu gating
        h = h + t                                                             # residual
    # params layout: [widths | heights | derivs], feature f in rows [f*32, f*32+{30,30,31})
    params = (jnp.dot(w_hid_ref[FOFF:FOFF + 3 * HOFF, :], h, preferred_element_type=f32)
              + b_hid_ref[FOFF:FOFF + 3 * HOFF, :])                           # (768, BT)

    # ------------- softmax exps + block-diagonal cumsum (hoisted out of the loop) -------------
    wh = params[0:DOFF, :]                          # widths|heights logit slabs (512, BT)
    # One per-lane shift is an exact softmax shift (same constant in numerator and total);
    # the -80 clamp only guards the (unrealistic) >80-logit-spread case against 0-totals.
    mx = jnp.max(wh, axis=0, keepdims=True)
    e_wh = jnp.exp(jnp.maximum(wh - mx, -80.0))     # (512, BT), single big EUP slab
    # block-diag masked cumsum: row f*32+i = sum_{j<min(i,30)} e[f*32+j]; row 30 = total
    cw_all = jnp.dot(csum_ref[...], e_wh[0:HOFF, :], preferred_element_type=f32)      # (256, BT)
    ch_all = jnp.dot(csum_ref[...], e_wh[HOFF:DOFF, :], preferred_element_type=f32)   # (256, BT)

    # ------------- rational-quadratic spline per feature (bins on sublanes) -------------
    sub = lax.broadcasted_iota(jnp.int32, (BIN_PAD, bt), 0)        # (32, BT) bin-edge index
    subf = sub.astype(f32)
    edge_w = MIN_BIN_WIDTH * subf                                  # hoisted broadcasts
    edge_h = MIN_BIN_HEIGHT * subf
    scale_w = 1.0 - MIN_BIN_WIDTH * nb
    scale_h = 1.0 - MIN_BIN_HEIGHT * nb
    last = sub == nb                                               # row 30 = right/top edge

    acc = jnp.ones((1, bt), f32)
    for f in range(PRED_FEATS):                                    # unrolled short fixed loop
        base = f * BIN_PAD
        xin = xT[f:f + 1, :]                                       # (1, BT), inputs in [0, 1]
        cw_raw = cw_all[base:base + BIN_PAD, :]                    # (32, BT); rows 30,31 = total
        ch_raw = ch_all[base:base + BIN_PAD, :]
        u_d = params[DOFF + base:DOFF + base + BIN_PAD, :]         # (32, BT); row 31 pad = 0

        # exact (1, BT) reciprocals for the totals: they feed (x - cw_lo)/bw which amplifies error
        inv_tw = 1.0 / cw_raw[nb:nb + 1, :]
        inv_th = 1.0 / ch_raw[nb:nb + 1, :]
        cumw = edge_w + scale_w * cw_raw * inv_tw
        cumw = jnp.where(last, 1.0, cumw)                          # right edge = 1
        cumw_s = jnp.where(last, 1.0 + 1e-6, cumw)                 # nflows searchsorted bump
        cumh = edge_h + scale_h * ch_raw * inv_th
        cumh = jnp.where(last, 1.0, cumh)                          # top edge = 1

        # searchsorted: bin_idx = sum(x >= cum) - 1  (in [0, nb-1] for x in [0, 1])
        bin_idx = jnp.sum((xin >= cumw_s).astype(f32), axis=0,
                          keepdims=True).astype(jnp.int32) - 1     # (1, BT)
        oh0 = (sub == bin_idx).astype(f32)                         # one-hot gathers
        oh1 = (sub == bin_idx + 1).astype(f32)

        cw_lo = jnp.sum(oh0 * cumw, axis=0, keepdims=True)
        cw_hi = jnp.sum(oh1 * cumw, axis=0, keepdims=True)
        ch_lo = jnp.sum(oh0 * cumh, axis=0, keepdims=True)
        ch_hi = jnp.sum(oh1 * cumh, axis=0, keepdims=True)
        ud_lo = jnp.sum(oh0 * u_d, axis=0, keepdims=True)
        ud_hi = jnp.sum(oh1 * u_d, axis=0, keepdims=True)
        # softplus deferred to the two gathered rows (2 x (1, BT) instead of (31, BT))
        d_lo = MIN_DERIVATIVE + _softplus(ud_lo)
        d_hi = MIN_DERIVATIVE + _softplus(ud_hi)

        bw = cw_hi - cw_lo
        bh = ch_hi - ch_lo
        inv_bw = pl.reciprocal(bw, approx=True)                    # benign: error scaled back by bh
        delta = bh * inv_bw
        theta = (xin - cw_lo) * inv_bw
        ttm = theta * (1.0 - theta)
        numer = bh * (delta * theta * theta + d_lo * ttm)
        denom = delta + (d_lo + d_hi - 2.0 * delta) * ttm
        cdf_f = ch_lo + numer * pl.reciprocal(denom, approx=True)  # spline output (the CDF)

        cdf_f = jnp.where(xin == 1.0, 1.0, cdf_f)                  # torch.where(pred == 1.0, 1.0, cdf)
        acc = acc * cdf_f                                          # torch.prod(..., dim=-1)

    out_ref[...] = acc[None, :, :]                                 # (1, 1, BT) lane-dense store


# ----------------------- wrapper: layout plumbing + pallas_call -----------------------
def _prepare_params(p):
    """Pack/transpose weights: fused input layer, packed hidden/final layers, csum matrix."""
    f32 = jnp.float32
    F_, H, nb = PRED_FEATS, HID, NUM_BINS

    # Fused initial + context-projection layer operating on [x^T ; ctx^T] (F+H rows):
    #   rows [0,H)        -> h0     = wi^T x^T + wc^T ctx^T + (bi+bc)^T
    #   rows [(k+1)H,...) -> gate_k = wcb_k^T ctx^T + bcb_k^T
    zeros_xf = jnp.zeros((H, F_), f32)
    w_in_rows = [jnp.concatenate([p["wi"].astype(f32).T, p["wc"].astype(f32).T], axis=1)]
    b_in_rows = [(p["bi"].astype(f32) + p["bc"].astype(f32)).T]
    for k in range(NUM_BLOCKS):
        w_in_rows.append(jnp.concatenate([zeros_xf, p["wcb"][k].astype(f32).T], axis=1))
        b_in_rows.append(p["bcb"][k].astype(f32).T)
    w_in = jnp.concatenate(w_in_rows, axis=0)       # (4H, F+H) = (128, 40)
    b_in = jnp.concatenate(b_in_rows, axis=0)       # (128, 1)

    # Residual-block linears (W^T), interleaved [wb0_k ; wb1_k] per block.
    blk_w, blk_b = [], []
    for k in range(NUM_BLOCKS):
        blk_w += [p["wb0"][k].astype(f32).T, p["wb1"][k].astype(f32).T]
        blk_b += [p["bb0"][k].astype(f32).T, p["bb1"][k].astype(f32).T]

    # Final masked layer in per-feature 32-row slots: [widths | heights | derivs],
    # 1/sqrt(H) folded into width/height rows, pad rows zeroed.
    wf3 = p["wf"].astype(f32).reshape(H, F_, MULT)
    bf3 = p["bf"].astype(f32).reshape(1, F_, MULT)

    def blockify(a, lo, hi, scale):
        b = jnp.transpose(a[:, :, lo:hi], (1, 2, 0)) * scale       # (F, hi-lo, rows)
        return jnp.pad(b, ((0, 0), (0, BIN_PAD - (hi - lo)), (0, 0)))

    wfT = jnp.concatenate([blockify(wf3, 0, nb, INV_SQRT_H),
                           blockify(wf3, nb, 2 * nb, INV_SQRT_H),
                           blockify(wf3, 2 * nb, MULT, 1.0)],
                          axis=0).reshape(3 * F_ * BIN_PAD, H)     # (768, 32)
    bfT = jnp.concatenate([blockify(bf3, 0, nb, INV_SQRT_H),
                           blockify(bf3, nb, 2 * nb, INV_SQRT_H),
                           blockify(bf3, 2 * nb, MULT, 1.0)],
                          axis=0).reshape(3 * F_ * BIN_PAD, 1)     # (768, 1)

    w_hid = jnp.concatenate(blk_w + [wfT], axis=0)  # (6H + 768, H) = (960, 32)
    b_hid = jnp.concatenate(blk_b + [bfT], axis=0)  # (960, 1)

    # Block-diagonal masked cumulative-sum matrix: within a 32-row slot, output row i
    # sums input columns j < min(i, nb), so pad columns never leak into partials/totals.
    ii = jnp.arange(BIN_PAD)[:, None]
    jj = jnp.arange(BIN_PAD)[None, :]
    blk = ((jj < ii) & (jj < nb)).astype(f32)                      # (32, 32)
    csum_bd = jnp.kron(jnp.eye(F_, dtype=f32), blk)                # (256, 256)

    return w_in, b_in, w_hid, b_hid, csum_bd


def _pick_batch_tile(B):
    # >=128 fills the lane axis; <=512 caps VMEM/vreg pressure; B//2 keeps G >= 2 so the
    # single "parallel" grid axis occupies both v7x TensorCores whenever B allows it.
    bt = (B // 2) // 128 * 128
    return int(max(128, min(512, bt)))


def autoregressive_cdf_forward(predicates, contexts, p, batch_tile=None):
    B, feats = predicates.shape
    assert feats == PRED_FEATS and contexts.shape == (B, HID)
    BT = _pick_batch_tile(B) if batch_tile is None else int(batch_tile)
    G = pl.cdiv(B, BT)
    Bp = G * BT

    x = predicates.astype(jnp.float32)
    c = contexts.astype(jnp.float32)
    if Bp != B:
        # pad with predicates == 1.0 -> padded rows give a finite product of exactly 1.0 (trimmed below)
        x = jnp.pad(x, ((0, Bp - B), (0, 0)), constant_values=1.0)
        c = jnp.pad(c, ((0, Bp - B), (0, 0)))
    xcT = jnp.concatenate([x, c], axis=1).T                        # (F+H, Bp) batch on lanes

    w_in, b_in, w_hid, b_hid, csum_bd = _prepare_params(p)

    def full(shape):
        return pl.BlockSpec(shape, lambda i, n=len(shape): (0,) * n)

    out = pl.pallas_call(
        _autoregressive_cdf_kernel,
        out_shape=jax.ShapeDtypeStruct((G, 1, BT), jnp.float32),
        grid=(G,),
        in_specs=[
            pl.BlockSpec((XDIM, BT), lambda i: (0, i)),            # [x^T ; ctx^T]
            full(w_in.shape), full(b_in.shape),                    # fused initial+context layer
            full(w_hid.shape), full(b_hid.shape),                  # block + final layers (packed)
            full(csum_bd.shape),                                   # block-diag masked cumsum
        ],
        out_specs=pl.BlockSpec((1, 1, BT), lambda i: (i, 0, 0)),
        compiler_params=pltpu.CompilerParams(dimension_semantics=("parallel",)),
    )(xcT, w_in, b_in, w_hid, b_hid, csum_bd)
    return out.reshape(Bp)[:B]


# ----------------------- deterministic synthetic parameters -----------------------
def init_params(key):
    F_, H, NB, FM = PRED_FEATS, HID, NUM_BLOCKS, PRED_FEATS * MULT

    # MADE degrees & masks (nflows conventions), stored as [in, out]
    in_deg = jnp.arange(1, F_ + 1)
    max_, min_ = max(1, F_ - 1), min(1, F_ - 1)
    hid_deg = jnp.arange(H) % max_ + min_
    out_deg = jnp.repeat(jnp.arange(1, F_ + 1), MULT)           # feature-major param layout
    mask_in = (hid_deg[None, :] >= in_deg[:, None]).astype(jnp.float32)    # (F, H)
    mask_hid = (hid_deg[None, :] >= hid_deg[:, None]).astype(jnp.float32)  # (H, H)
    mask_out = (out_deg[None, :] > hid_deg[:, None]).astype(jnp.float32)   # (H, FM)

    ks = jax.random.split(key, 12)
    rn = lambda k, shape, s: jax.random.normal(k, shape, jnp.float32) * s
    return dict(
        wi=rn(ks[0], (F_, H), 1.0 / math.sqrt(F_)) * mask_in,
        bi=rn(ks[1], (1, H), 0.1),
        wc=rn(ks[2], (H, H), 1.0 / math.sqrt(H)),
        bc=rn(ks[3], (1, H), 0.1),
        wb0=rn(ks[4], (NB, H, H), 1.0 / math.sqrt(H)) * mask_hid[None],
        bb0=rn(ks[5], (NB, 1, H), 0.1),
        wb1=rn(ks[6], (NB, H, H), 1.0 / math.sqrt(H)) * mask_hid[None],
        bb1=rn(ks[7], (NB, 1, H), 0.1),
        wcb=rn(ks[8], (NB, H, H), 1.0 / math.sqrt(H)),
        bcb=rn(ks[9], (NB, 1, H), 0.1),
        wf=rn(ks[10], (H, FM), 1.0 / math.sqrt(H)) * mask_out,
        bf=rn(ks[11], (1, FM), 0.1),
    )


# ----------------------- pure-JAX reference (same semantics) -----------------------
def reference_forward(x, ctx, p):
    h = x @ p["wi"] + p["bi"] + ctx @ p["wc"] + p["bc"]
    for k in range(NUM_BLOCKS):
        t = jnp.maximum(h, 0.0)
        t = t @ p["wb0"][k] + p["bb0"][k]
        t = jnp.maximum(t, 0.0)
        t = t @ p["wb1"][k] + p["bb1"][k]
        gate = ctx @ p["wcb"][k] + p["bcb"][k]
        t = t * jax.nn.sigmoid(gate)
        h = h + t
    params = (h @ p["wf"] + p["bf"]).reshape(x.shape[0], PRED_FEATS, MULT)
    uw = params[..., :NUM_BINS] * INV_SQRT_H
    uh = params[..., NUM_BINS:2 * NUM_BINS] * INV_SQRT_H
    ud = params[..., 2 * NUM_BINS:]
    w = MIN_BIN_WIDTH + (1.0 - MIN_BIN_WIDTH * NUM_BINS) * jax.nn.softmax(uw, axis=-1)
    hh = MIN_BIN_HEIGHT + (1.0 - MIN_BIN_HEIGHT * NUM_BINS) * jax.nn.softmax(uh, axis=-1)
    z = jnp.zeros(w.shape[:-1] + (1,), w.dtype)
    cumw = jnp.concatenate([z, jnp.cumsum(w, -1)], -1).at[..., -1].set(1.0)
    cumh = jnp.concatenate([z, jnp.cumsum(hh, -1)], -1).at[..., -1].set(1.0)
    deriv = MIN_DERIVATIVE + jax.nn.softplus(ud)
    cumw_s = cumw.at[..., -1].add(1e-6)
    bin_idx = jnp.sum((x[..., None] >= cumw_s).astype(jnp.int32), -1) - 1
    g = lambda a, i: jnp.take_along_axis(a, i[..., None], -1)[..., 0]
    cw_lo, cw_hi = g(cumw, bin_idx), g(cumw, bin_idx + 1)
    ch_lo, ch_hi = g(cumh, bin_idx), g(cumh, bin_idx + 1)
    d_lo, d_hi = g(deriv, bin_idx), g(deriv, bin_idx + 1)
    bw, bh = cw_hi - cw_lo, ch_hi - ch_lo
    delta = bh / bw
    theta = (x - cw_lo) / bw
    ttm = theta * (1.0 - theta)
    cdfs = ch_lo + bh * (delta * theta * theta + d_lo * ttm) / (
        delta + (d_lo + d_hi - 2.0 * delta) * ttm)
    cdfs = jnp.where(x == 1.0, 1.0, cdfs)
    return jnp.prod(cdfs, axis=-1)


if __name__ == "__main__":
    key = jax.random.PRNGKey(0)
    kp, kx, kc = jax.random.split(key, 3)

    params = init_params(kp)

    B = 256   # auto BT=128 -> 2 grid steps (keeps both v7x TensorCores busy)
    predicates = jax.random.uniform(kx, (B, PRED_FEATS), jnp.float32, 0.0, 1.0)
    # exercise the `predicates == 1.0` branch exactly
    predicates = predicates.at[:, -1].set(1.0)
    predicates = predicates.at[0, 2].set(1.0)
    contexts = jax.random.normal(kc, (B, HID), jnp.float32)

    out = jax.block_until_ready(autoregressive_cdf_forward(predicates, contexts, params))
    ref = jax.block_until_ready(reference_forward(predicates, contexts, params))

    assert out.shape == (B,)
    assert bool(jnp.all(jnp.isfinite(out)))
    assert bool(jnp.allclose(out, ref, rtol=5e-2, atol=1e-4))

    # ragged batch exercises the padding path (pads to the same shape -> same compiled kernel)
    B2 = 200
    out2 = jax.block_until_ready(
        autoregressive_cdf_forward(predicates[:B2], contexts[:B2], params))
    ref2 = reference_forward(predicates[:B2], contexts[:B2], params)
    assert out2.shape == (B2,)
    assert bool(jnp.allclose(out2, ref2, rtol=5e-2, atol=1e-4))

    print("KERNEL_OK")
</pallas_src>

<mosaic_0001>
module attributes {stable_mosaic.version = 11 : i64} {
  func.func @_autoregressive_cdf_kernel(%arg0: i32, %arg1: memref<40x128xf32, #tpu.memory_space<vmem>>, %arg2: memref<128x40xf32, #tpu.memory_space<vmem>>, %arg3: memref<128x1xf32, #tpu.memory_space<vmem>>, %arg4: memref<960x32xf32, #tpu.memory_space<vmem>>, %arg5: memref<960x1xf32, #tpu.memory_space<vmem>>, %arg6: memref<256x256xf32, #tpu.memory_space<vmem>>, %arg7: memref<1x1x128xf32, #tpu.memory_space<vmem>>) attributes {dimension_semantics = [#tpu.dimension_semantics<parallel>], iteration_bounds = array<i64: 2>, scalar_prefetch = 0 : i64, scratch_operands = 0 : i64, tpu.core_type = #tpu.core_type<tc>, window_params = [{transform_indices = @transform_0, window_bounds = array<i64: 40, 128>}, {pipeline_mode = #tpu.pipeline_mode<synchronous>, transform_indices = @transform_1, window_bounds = array<i64: 128, 40>}, {pipeline_mode = #tpu.pipeline_mode<synchronous>, transform_indices = @transform_2, window_bounds = array<i64: 128, 1>}, {pipeline_mode = #tpu.pipeline_mode<synchronous>, transform_indices = @transform_3, window_bounds = array<i64: 960, 32>}, {pipeline_mode = #tpu.pipeline_mode<synchronous>, transform_indices = @transform_4, window_bounds = array<i64: 960, 1>}, {pipeline_mode = #tpu.pipeline_mode<synchronous>, transform_indices = @transform_5, window_bounds = array<i64: 256, 256>}, {transform_indices = @transform_6, window_bounds = array<i64: 1, 1, 128>}]} {
    %c0 = arith.constant 0 : index
    %c0_0 = arith.constant 0 : index
    %0 = vector.load %arg1[%c0, %c0_0] : memref<40x128xf32, #tpu.memory_space<vmem>>, vector<40x128xf32>
    %1 = vector.extract_strided_slice %0 {offsets = [0, 0], sizes = [8, 128], strides = [1, 1]} : vector<40x128xf32> to vector<8x128xf32>
    %c0_1 = arith.constant 0 : index
    %c0_2 = arith.constant 0 : index
    %2 = vector.load %arg2[%c0_1, %c0_2] : memref<128x40xf32, #tpu.memory_space<vmem>>, vector<128x40xf32>
    %cst = arith.constant dense<0.000000e+00> : vector<128x128xf32>
    %3 = tpu.matmul %2, %0, %cst {dimension_numbers = #tpu.dot_dimension_numbers<[1], [0], [0], [1], [0, 0, 1, 1], [], []>} : vector<128x40xf32>, vector<40x128xf32>, vector<128x128xf32> -> vector<128x128xf32>
    %c0_3 = arith.constant 0 : index
    %c0_4 = arith.constant 0 : index
    %4 = vector.load %arg3[%c0_3, %c0_4] : memref<128x1xf32, #tpu.memory_space<vmem>>, vector<128x1xf32>
    %5 = vector.broadcast %4 : vector<128x1xf32> to vector<128x128xf32>
    %6 = arith.addf %3, %5 : vector<128x128xf32>
    %7 = vector.extract_strided_slice %6 {offsets = [0, 0], sizes = [32, 128], strides = [1, 1]} : vector<128x128xf32> to vector<32x128xf32>
    %cst_5 = arith.constant 0.000000e+00 : f32
    %8 = vector.broadcast %cst_5 : f32 to vector<32x128xf32>
    %9 = arith.maximumf %7, %8 : vector<32x128xf32>
    %c0_6 = arith.constant 0 : index
    %c0_7 = arith.constant 0 : index
    %10 = vector.load %arg4[%c0_6, %c0_7] : memref<960x32xf32, #tpu.memory_space<vmem>>, vector<32x32xf32>
    %cst_8 = arith.constant dense<0.000000e+00> : vector<32x128xf32>
    %11 = tpu.matmul %10, %9, %cst_8 {dimension_numbers = #tpu.dot_dimension_numbers<[1], [0], [0], [1], [0, 0, 1, 1], [], []>} : vector<32x32xf32>, vector<32x128xf32>, vector<32x128xf32> -> vector<32x128xf32>
    %c0_9 = arith.constant 0 : index
    %c0_10 = arith.constant 0 : index
    %12 = vector.load %arg5[%c0_9, %c0_10] : memref<960x1xf32, #tpu.memory_space<vmem>>, vector<32x1xf32>
    %13 = vector.broadcast %12 : vector<32x1xf32> to vector<32x128xf32>
    %14 = arith.addf %11, %13 : vector<32x128xf32>
    %cst_11 = arith.constant 0.000000e+00 : f32
    %15 = vector.broadcast %cst_11 : f32 to vector<32x128xf32>
    %16 = arith.maximumf %14, %15 : vector<32x128xf32>
    %c32 = arith.constant 32 : index
    %c0_12 = arith.constant 0 : index
    %17 = vector.load %arg4[%c32, %c0_12] : memref<960x32xf32, #tpu.memory_space<vmem>>, vector<32x32xf32>
    %cst_13 = arith.constant dense<0.000000e+00> : vector<32x128xf32>
    %18 = tpu.matmul %17, %16, %cst_13 {dimension_numbers = #tpu.dot_dimension_numbers<[1], [0], [0], [1], [0, 0, 1, 1], [], []>} : vector<32x32xf32>, vector<32x128xf32>, vector<32x128xf32> -> vector<32x128xf32>
    %c32_14 = arith.constant 32 : index
    %c0_15 = arith.constant 0 : index
    %19 = vector.load %arg5[%c32_14, %c0_15] : memref<960x1xf32, #tpu.memory_space<vmem>>, vector<32x1xf32>
    %20 = vector.broadcast %19 : vector<32x1xf32> to vector<32x128xf32>
    %21 = arith.addf %18, %20 : vector<32x128xf32>
    %22 = vector.extract_strided_slice %6 {offsets = [32, 0], sizes = [32, 128], strides = [1, 1]} : vector<128x128xf32> to vector<32x128xf32>
    %cst_16 = arith.constant 0.000000e+00 : f32
    %23 = vector.broadcast %cst_16 : f32 to vector<32x128xf32>
    %24 = arith.subf %23, %22 : vector<32x128xf32>
    %25 = math.exp %24 : vector<32x128xf32>
    %cst_17 = arith.constant 1.000000e+00 : f32
    %26 = vector.broadcast %cst_17 : f32 to vector<32x128xf32>
    %27 = arith.addf %26, %25 : vector<32x128xf32>
    %cst_18 = arith.constant 1.000000e+00 : f32
    %28 = vector.broadcast %cst_18 : f32 to vector<32x128xf32>
    %29 = arith.divf %28, %27 : vector<32x128xf32>
    %30 = arith.mulf %21, %29 : vector<32x128xf32>
    %31 = arith.addf %7, %30 : vector<32x128xf32>
    %cst_19 = arith.constant 0.000000e+00 : f32
    %32 = vector.broadcast %cst_19 : f32 to vector<32x128xf32>
    %33 = arith.maximumf %31, %32 : vector<32x128xf32>
    %c64 = arith.constant 64 : index
    %c0_20 = arith.constant 0 : index
    %34 = vector.load %arg4[%c64, %c0_20] : memref<960x32xf32, #tpu.memory_space<vmem>>, vector<32x32xf32>
    %cst_21 = arith.constant dense<0.000000e+00> : vector<32x128xf32>
    %35 = tpu.matmul %34, %33, %cst_21 {dimension_numbers = #tpu.dot_dimension_numbers<[1], [0], [0], [1], [0, 0, 1, 1], [], []>} : vector<32x32xf32>, vector<32x128xf32>, vector<32x128xf32> -> vector<32x128xf32>
    %c64_22 = arith.constant 64 : index
    %c0_23 = arith.constant 0 : index
    %36 = vector.load %arg5[%c64_22, %c0_23] : memref<960x1xf32, #tpu.memory_space<vmem>>, vector<32x1xf32>
    %37 = vector.broadcast %36 : vector<32x1xf32> to vector<32x128xf32>
    %38 = arith.addf %35, %37 : vector<32x128xf32>
    %cst_24 = arith.constant 0.000000e+00 : f32
    %39 = vector.broadcast %cst_24 : f32 to vector<32x128xf32>
    %40 = arith.maximumf %38, %39 : vector<32x128xf32>
    %c96 = arith.constant 96 : index
    %c0_25 = arith.constant 0 : index
    %41 = vector.load %arg4[%c96, %c0_25] : memref<960x32xf32, #tpu.memory_space<vmem>>, vector<32x32xf32>
    %cst_26 = arith.constant dense<0.000000e+00> : vector<32x128xf32>
    %42 = tpu.matmul %41, %40, %cst_26 {dimension_numbers = #tpu.dot_dimension_numbers<[1], [0], [0], [1], [0, 0, 1, 1], [], []>} : vector<32x32xf32>, vector<32x128xf32>, vector<32x128xf32> -> vector<32x128xf32>
    %c96_27 = arith.constant 96 : index
    %c0_28 = arith.constant 0 : index
    %43 = vector.load %arg5[%c96_27, %c0_28] : memref<960x1xf32, #tpu.memory_space<vmem>>, vector<32x1xf32>
    %44 = vector.broadcast %43 : vector<32x1xf32> to vector<32x128xf32>
    %45 = arith.addf %42, %44 : vector<32x128xf32>
    %46 = vector.extract_strided_slice %6 {offsets = [64, 0], sizes = [32, 128], strides = [1, 1]} : vector<128x128xf32> to vector<32x128xf32>
    %cst_29 = arith.constant 0.000000e+00 : f32
    %47 = vector.broadcast %cst_29 : f32 to vector<32x128xf32>
    %48 = arith.subf %47, %46 : vector<32x128xf32>
    %49 = math.exp %48 : vector<32x128xf32>
    %cst_30 = arith.constant 1.000000e+00 : f32
    %50 = vector.broadcast %cst_30 : f32 to vector<32x128xf32>
    %51 = arith.addf %50, %49 : vector<32x128xf32>
    %cst_31 = arith.constant 1.000000e+00 : f32
    %52 = vector.broadcast %cst_31 : f32 to vector<32x128xf32>
    %53 = arith.divf %52, %51 : vector<32x128xf32>
    %54 = arith.mulf %45, %53 : vector<32x128xf32>
    %55 = arith.addf %31, %54 : vector<32x128xf32>
    %cst_32 = arith.constant 0.000000e+00 : f32
    %56 = vector.broadcast %cst_32 : f32 to vector<32x128xf32>
    %57 = arith.maximumf %55, %56 : vector<32x128xf32>
    %c128 = arith.constant 128 : index
    %c0_33 = arith.constant 0 : index
    %58 = vector.load %arg4[%c128, %c0_33] : memref<960x32xf32, #tpu.memory_space<vmem>>, vector<32x32xf32>
    %cst_34 = arith.constant dense<0.000000e+00> : vector<32x128xf32>
    %59 = tpu.matmul %58, %57, %cst_34 {dimension_numbers = #tpu.dot_dimension_numbers<[1], [0], [0], [1], [0, 0, 1, 1], [], []>} : vector<32x32xf32>, vector<32x128xf32>, vector<32x128xf32> -> vector<32x128xf32>
    %c128_35 = arith.constant 128 : index
    %c0_36 = arith.constant 0 : index
    %60 = vector.load %arg5[%c128_35, %c0_36] : memref<960x1xf32, #tpu.memory_space<vmem>>, vector<32x1xf32>
    %61 = vector.broadcast %60 : vector<32x1xf32> to vector<32x128xf32>
    %62 = arith.addf %59, %61 : vector<32x128xf32>
    %cst_37 = arith.constant 0.000000e+00 : f32
    %63 = vector.broadcast %cst_37 : f32 to vector<32x128xf32>
    %64 = arith.maximumf %62, %63 : vector<32x128xf32>
    %c160 = arith.constant 160 : index
    %c0_38 = arith.constant 0 : index
    %65 = vector.load %arg4[%c160, %c0_38] : memref<960x32xf32, #tpu.memory_space<vmem>>, vector<32x32xf32>
    %cst_39 = arith.constant dense<0.000000e+00> : vector<32x128xf32>
    %66 = tpu.matmul %65, %64, %cst_39 {dimension_numbers = #tpu.dot_dimension_numbers<[1], [0], [0], [1], [0, 0, 1, 1], [], []>} : vector<32x32xf32>, vector<32x128xf32>, vector<32x128xf32> -> vector<32x128xf32>
    %c160_40 = arith.constant 160 : index
    %c0_41 = arith.constant 0 : index
    %67 = vector.load %arg5[%c160_40, %c0_41] : memref<960x1xf32, #tpu.memory_space<vmem>>, vector<32x1xf32>
    %68 = vector.broadcast %67 : vector<32x1xf32> to vector<32x128xf32>
    %69 = arith.addf %66, %68 : vector<32x128xf32>
    %70 = vector.extract_strided_slice %6 {offsets = [96, 0], sizes = [32, 128], strides = [1, 1]} : vector<128x128xf32> to vector<32x128xf32>
    %cst_42 = arith.constant 0.000000e+00 : f32
    %71 = vector.broadcast %cst_42 : f32 to vector<32x128xf32>
    %72 = arith.subf %71, %70 : vector<32x128xf32>
    %73 = math.exp %72 : vector<32x128xf32>
    %cst_43 = arith.constant 1.000000e+00 : f32
    %74 = vector.broadcast %cst_43 : f32 to vector<32x128xf32>
    %75 = arith.addf %74, %73 : vector<32x128xf32>
    %cst_44 = arith.constant 1.000000e+00 : f32
    %76 = vector.broadcast %cst_44 : f32 to vector<32x128xf32>
    %77 = arith.divf %76, %75 : vector<32x128xf32>
    %78 = arith.mulf %69, %77 : vector<32x128xf32>
    %79 = arith.addf %55, %78 : vector<32x128xf32>
    %c192 = arith.constant 192 : index
    %c0_45 = arith.constant 0 : index
    %80 = vector.load %arg4[%c192, %c0_45] : memref<960x32xf32, #tpu.memory_space<vmem>>, vector<768x32xf32>
    %cst_46 = arith.constant dense<0.000000e+00> : vector<768x128xf32>
    %81 = tpu.matmul %80, %79, %cst_46 {dimension_numbers = #tpu.dot_dimension_numbers<[1], [0], [0], [1], [0, 0, 1, 1], [], []>} : vector<768x32xf32>, vector<32x128xf32>, vector<768x128xf32> -> vector<768x128xf32>
    %c192_47 = arith.constant 192 : index
    %c0_48 = arith.constant 0 : index
    %82 = vector.load %arg5[%c192_47, %c0_48] : memref<960x1xf32, #tpu.memory_space<vmem>>, vector<768x1xf32>
    %83 = vector.broadcast %82 : vector<768x1xf32> to vector<768x128xf32>
    %84 = arith.addf %81, %83 : vector<768x128xf32>
    %85 = vector.extract_strided_slice %84 {offsets = [0, 0], sizes = [512, 128], strides = [1, 1]} : vector<768x128xf32> to vector<512x128xf32>
    %cst_49 = arith.constant dense<0xFF800000> : vector<128xf32>
    %86 = vector.multi_reduction <maximumf>, %85, %cst_49 [0] : vector<512x128xf32> to vector<128xf32>
    %87 = vector.shape_cast %86 : vector<128xf32> to vector<1x128xf32>
    %88 = vector.broadcast %87 : vector<1x128xf32> to vector<512x128xf32>
    %89 = arith.subf %85, %88 : vector<512x128xf32>
    %cst_50 = arith.constant -8.000000e+01 : f32
    %90 = vector.broadcast %cst_50 : f32 to vector<512x128xf32>
    %91 = arith.maximumf %89, %90 : vector<512x128xf32>
    %92 = math.exp %91 : vector<512x128xf32>
    %c0_51 = arith.constant 0 : index
    %c0_52 = arith.constant 0 : index
    %93 = vector.load %arg6[%c0_51, %c0_52] : memref<256x256xf32, #tpu.memory_space<vmem>>, vector<256x256xf32>
    %94 = vector.extract_strided_slice %92 {offsets = [0, 0], sizes = [256, 128], strides = [1, 1]} : vector<512x128xf32> to vector<256x128xf32>
    %cst_53 = arith.constant dense<0.000000e+00> : vector<256x128xf32>
    %95 = tpu.matmul %93, %94, %cst_53 {dimension_numbers = #tpu.dot_dimension_numbers<[1], [0], [0], [1], [0, 0, 1, 1], [], []>} : vector<256x256xf32>, vector<256x128xf32>, vector<256x128xf32> -> vector<256x128xf32>
    %c0_54 = arith.constant 0 : index
    %c0_55 = arith.constant 0 : index
    %96 = vector.load %arg6[%c0_54, %c0_55] : memref<256x256xf32, #tpu.memory_space<vmem>>, vector<256x256xf32>
    %97 = vector.extract_strided_slice %92 {offsets = [256, 0], sizes = [256, 128], strides = [1, 1]} : vector<512x128xf32> to vector<256x128xf32>
    %cst_56 = arith.constant dense<0.000000e+00> : vector<256x128xf32>
    %98 = tpu.matmul %96, %97, %cst_56 {dimension_numbers = #tpu.dot_dimension_numbers<[1], [0], [0], [1], [0, 0, 1, 1], [], []>} : vector<256x256xf32>, vector<256x128xf32>, vector<256x128xf32> -> vector<256x128xf32>
    %99 = tpu.iota {dimensions = array<i32: 0>} : vector<32x128xi32>
    %100 = arith.sitofp %99 : vector<32x128xi32> to vector<32x128xf32>
    %cst_57 = arith.constant 1.000000e-03 : f32
    %101 = vector.broadcast %cst_57 : f32 to vector<32x128xf32>
    %102 = arith.mulf %101, %100 : vector<32x128xf32>
    %cst_58 = arith.constant 1.000000e-03 : f32
    %103 = vector.broadcast %cst_58 : f32 to vector<32x128xf32>
    %104 = arith.mulf %103, %100 : vector<32x128xf32>
    %c30_i32 = arith.constant 30 : i32
    %105 = vector.broadcast %c30_i32 : i32 to vector<32x128xi32>
    %106 = arith.cmpi eq, %99, %105 : vector<32x128xi32>
    %cst_59 = arith.constant 1.000000e+00 : f32
    %107 = vector.broadcast %cst_59 : f32 to vector<1x128xf32>
    %108 = vector.extract_strided_slice %1 {offsets = [0, 0], sizes = [1, 128], strides = [1, 1]} : vector<8x128xf32> to vector<1x128xf32>
    %109 = vector.extract_strided_slice %95 {offsets = [0, 0], sizes = [32, 128], strides = [1, 1]} : vector<256x128xf32> to vector<32x128xf32>
    %110 = vector.extract_strided_slice %98 {offsets = [0, 0], sizes = [32, 128], strides = [1, 1]} : vector<256x128xf32> to vector<32x128xf32>
    %111 = vector.extract_strided_slice %84 {offsets = [512, 0], sizes = [32, 128], strides = [1, 1]} : vector<768x128xf32> to vector<32x128xf32>
    %112 = vector.extract_strided_slice %109 {offsets = [30, 0], sizes = [1, 128], strides = [1, 1]} : vector<32x128xf32> to vector<1x128xf32>
    %cst_60 = arith.constant 1.000000e+00 : f32
    %113 = vector.broadcast %cst_60 : f32 to vector<1x128xf32>
    %114 = arith.divf %113, %112 : vector<1x128xf32>
    %115 = vector.extract_strided_slice %110 {offsets = [30, 0], sizes = [1, 128], strides = [1, 1]} : vector<32x128xf32> to vector<1x128xf32>
    %cst_61 = arith.constant 1.000000e+00 : f32
    %116 = vector.broadcast %cst_61 : f32 to vector<1x128xf32>
    %117 = arith.divf %116, %115 : vector<1x128xf32>
    %cst_62 = arith.constant 9.700000e-01 : f32
    %118 = vector.broadcast %cst_62 : f32 to vector<32x128xf32>
    %119 = arith.mulf %118, %109 : vector<32x128xf32>
    %120 = vector.broadcast %114 : vector<1x128xf32> to vector<32x128xf32>
    %121 = arith.mulf %119, %120 : vector<32x128xf32>
    %122 = arith.addf %102, %121 : vector<32x128xf32>
    %cst_63 = arith.constant 1.000000e+00 : f32
    %123 = vector.broadcast %cst_63 : f32 to vector<32x128xf32>
    %124 = arith.select %106, %123, %122 : vector<32x128xi1>, vector<32x128xf32>
    %cst_64 = arith.constant 1.00000095 : f32
    %125 = vector.broadcast %cst_64 : f32 to vector<32x128xf32>
    %126 = arith.select %106, %125, %124 : vector<32x128xi1>, vector<32x128xf32>
    %cst_65 = arith.constant 9.700000e-01 : f32
    %127 = vector.broadcast %cst_65 : f32 to vector<32x128xf32>
    %128 = arith.mulf %127, %110 : vector<32x128xf32>
    %129 = vector.broadcast %117 : vector<1x128xf32> to vector<32x128xf32>
    %130 = arith.mulf %128, %129 : vector<32x128xf32>
    %131 = arith.addf %104, %130 : vector<32x128xf32>
    %cst_66 = arith.constant 1.000000e+00 : f32
    %132 = vector.broadcast %cst_66 : f32 to vector<32x128xf32>
    %133 = arith.select %106, %132, %131 : vector<32x128xi1>, vector<32x128xf32>
    %134 = vector.broadcast %108 : vector<1x128xf32> to vector<32x128xf32>
    %135 = arith.cmpf oge, %134, %126 : vector<32x128xf32>
    %136 = arith.extui %135 : vector<32x128xi1> to vector<32x128xi32>
    %137 = arith.sitofp %136 : vector<32x128xi32> to vector<32x128xf32>
    %cst_67 = arith.constant dense<0.000000e+00> : vector<128xf32>
    %138 = vector.multi_reduction <add>, %137, %cst_67 [0] : vector<32x128xf32> to vector<128xf32>
    %139 = vector.shape_cast %138 : vector<128xf32> to vector<1x128xf32>
    %140 = arith.fptosi %139 : vector<1x128xf32> to vector<1x128xi32>
    %c1_i32 = arith.constant 1 : i32
    %141 = vector.broadcast %c1_i32 : i32 to vector<1x128xi32>
    %142 = arith.subi %140, %141 : vector<1x128xi32>
    %143 = vector.broadcast %142 : vector<1x128xi32> to vector<32x128xi32>
    %144 = arith.cmpi eq, %99, %143 : vector<32x128xi32>
    %145 = arith.extui %144 : vector<32x128xi1> to vector<32x128xi32>
    %146 = arith.sitofp %145 : vector<32x128xi32> to vector<32x128xf32>
    %c1_i32_68 = arith.constant 1 : i32
    %147 = vector.broadcast %c1_i32_68 : i32 to vector<1x128xi32>
    %148 = arith.addi %142, %147 : vector<1x128xi32>
    %149 = vector.broadcast %148 : vector<1x128xi32> to vector<32x128xi32>
    %150 = arith.cmpi eq, %99, %149 : vector<32x128xi32>
    %151 = arith.extui %150 : vector<32x128xi1> to vector<32x128xi32>
    %152 = arith.sitofp %151 : vector<32x128xi32> to vector<32x128xf32>
    %153 = arith.mulf %146, %124 : vector<32x128xf32>
    %cst_69 = arith.constant dense<0.000000e+00> : vector<128xf32>
    %154 = vector.multi_reduction <add>, %153, %cst_69 [0] : vector<32x128xf32> to vector<128xf32>
    %155 = vector.shape_cast %154 : vector<128xf32> to vector<1x128xf32>
    %156 = arith.mulf %152, %124 : vector<32x128xf32>
    %cst_70 = arith.constant dense<0.000000e+00> : vector<128xf32>
    %157 = vector.multi_reduction <add>, %156, %cst_70 [0] : vector<32x128xf32> to vector<128xf32>
    %158 = vector.shape_cast %157 : vector<128xf32> to vector<1x128xf32>
    %159 = arith.mulf %146, %133 : vector<32x128xf32>
    %cst_71 = arith.constant dense<0.000000e+00> : vector<128xf32>
    %160 = vector.multi_reduction <add>, %159, %cst_71 [0] : vector<32x128xf32> to vector<128xf32>
    %161 = vector.shape_cast %160 : vector<128xf32> to vector<1x128xf32>
    %162 = arith.mulf %152, %133 : vector<32x128xf32>
    %cst_72 = arith.constant dense<0.000000e+00> : vector<128xf32>
    %163 = vector.multi_reduction <add>, %162, %cst_72 [0] : vector<32x128xf32> to vector<128xf32>
    %164 = vector.shape_cast %163 : vector<128xf32> to vector<1x128xf32>
    %165 = arith.mulf %146, %111 : vector<32x128xf32>
    %cst_73 = arith.constant dense<0.000000e+00> : vector<128xf32>
    %166 = vector.multi_reduction <add>, %165, %cst_73 [0] : vector<32x128xf32> to vector<128xf32>
    %167 = vector.shape_cast %166 : vector<128xf32> to vector<1x128xf32>
    %168 = arith.mulf %152, %111 : vector<32x128xf32>
    %cst_74 = arith.constant dense<0.000000e+00> : vector<128xf32>
    %169 = vector.multi_reduction <add>, %168, %cst_74 [0] : vector<32x128xf32> to vector<128xf32>
    %170 = vector.shape_cast %169 : vector<128xf32> to vector<1x128xf32>
    %cst_75 = arith.constant 0.000000e+00 : f32
    %171 = vector.broadcast %cst_75 : f32 to vector<1x128xf32>
    %172 = arith.maximumf %167, %171 : vector<1x128xf32>
    %173 = math.absf %167 : vector<1x128xf32>
    %cst_76 = arith.constant 0.000000e+00 : f32
    %174 = vector.broadcast %cst_76 : f32 to vector<1x128xf32>
    %175 = arith.subf %174, %173 : vector<1x128xf32>
    %176 = math.exp %175 : vector<1x128xf32>
    %cst_77 = arith.constant 1.000000e+00 : f32
    %177 = vector.broadcast %cst_77 : f32 to vector<1x128xf32>
    %178 = arith.addf %177, %176 : vector<1x128xf32>
    %179 = math.log %178 : vector<1x128xf32>
    %180 = arith.addf %172, %179 : vector<1x128xf32>
    %cst_78 = arith.constant 1.000000e-03 : f32
    %181 = vector.broadcast %cst_78 : f32 to vector<1x128xf32>
    %182 = arith.addf %181, %180 : vector<1x128xf32>
    %cst_79 = arith.constant 0.000000e+00 : f32
    %183 = vector.broadcast %cst_79 : f32 to vector<1x128xf32>
    %184 = arith.maximumf %170, %183 : vector<1x128xf32>
    %185 = math.absf %170 : vector<1x128xf32>
    %cst_80 = arith.constant 0.000000e+00 : f32
    %186 = vector.broadcast %cst_80 : f32 to vector<1x128xf32>
    %187 = arith.subf %186, %185 : vector<1x128xf32>
    %188 = math.exp %187 : vector<1x128xf32>
    %cst_81 = arith.constant 1.000000e+00 : f32
    %189 = vector.broadcast %cst_81 : f32 to vector<1x128xf32>
    %190 = arith.addf %189, %188 : vector<1x128xf32>
    %191 = math.log %190 : vector<1x128xf32>
    %192 = arith.addf %184, %191 : vector<1x128xf32>
    %cst_82 = arith.constant 1.000000e-03 : f32
    %193 = vector.broadcast %cst_82 : f32 to vector<1x128xf32>
    %194 = arith.addf %193, %192 : vector<1x128xf32>
    %195 = arith.subf %158, %155 : vector<1x128xf32>
    %196 = arith.subf %164, %161 : vector<1x128xf32>
    %197 = tpu.reciprocal %195 {approx = true} : vector<1x128xf32> -> vector<1x128xf32>
    %198 = arith.mulf %196, %197 : vector<1x128xf32>
    %199 = arith.subf %108, %155 : vector<1x128xf32>
    %200 = arith.mulf %199, %197 : vector<1x128xf32>
    %cst_83 = arith.constant 1.000000e+00 : f32
    %201 = vector.broadcast %cst_83 : f32 to vector<1x128xf32>
    %202 = arith.subf %201, %200 : vector<1x128xf32>
    %203 = arith.mulf %200, %202 : vector<1x128xf32>
    %204 = arith.mulf %198, %200 : vector<1x128xf32>
    %205 = arith.mulf %204, %200 : vector<1x128xf32>
    %206 = arith.mulf %182, %203 : vector<1x128xf32>
    %207 = arith.addf %205, %206 : vector<1x128xf32>
    %208 = arith.mulf %196, %207 : vector<1x128xf32>
    %209 = arith.addf %182, %194 : vector<1x128xf32>
    %cst_84 = arith.constant 2.000000e+00 : f32
    %210 = vector.broadcast %cst_84 : f32 to vector<1x128xf32>
    %211 = arith.mulf %210, %198 : vector<1x128xf32>
    %212 = arith.subf %209, %211 : vector<1x128xf32>
    %213 = arith.mulf %212, %203 : vector<1x128xf32>
    %214 = arith.addf %198, %213 : vector<1x128xf32>
    %215 = tpu.reciprocal %214 {approx = true} : vector<1x128xf32> -> vector<1x128xf32>
    %216 = arith.mulf %208, %215 : vector<1x128xf32>
    %217 = arith.addf %161, %216 : vector<1x128xf32>
    %cst_85 = arith.constant 1.000000e+00 : f32
    %218 = vector.broadcast %cst_85 : f32 to vector<1x128xf32>
    %219 = arith.cmpf oeq, %108, %218 : vector<1x128xf32>
    %cst_86 = arith.constant 1.000000e+00 : f32
    %220 = vector.broadcast %cst_86 : f32 to vector<1x128xf32>
    %221 = arith.select %219, %220, %217 : vector<1x128xi1>, vector<1x128xf32>
    %222 = arith.mulf %107, %221 : vector<1x128xf32>
    %223 = vector.extract_strided_slice %1 {offsets = [1, 0], sizes = [1, 128], strides = [1, 1]} : vector<8x128xf32> to vector<1x128xf32>
    %224 = vector.extract_strided_slice %95 {offsets = [32, 0], sizes = [32, 128], strides = [1, 1]} : vector<256x128xf32> to vector<32x128xf32>
    %225 = vector.extract_strided_slice %98 {offsets = [32, 0], sizes = [32, 128], strides = [1, 1]} : vector<256x128xf32> to vector<32x128xf32>
    %226 = vector.extract_strided_slice %84 {offsets = [544, 0], sizes = [32, 128], strides = [1, 1]} : vector<768x128xf32> to vector<32x128xf32>
    %227 = vector.extract_strided_slice %224 {offsets = [30, 0], sizes = [1, 128], strides = [1, 1]} : vector<32x128xf32> to vector<1x128xf32>
    %cst_87 = arith.constant 1.000000e+00 : f32
    %228 = vector.broadcast %cst_87 : f32 to vector<1x128xf32>
    %229 = arith.divf %228, %227 : vector<1x128xf32>
    %230 = vector.extract_strided_slice %225 {offsets = [30, 0], sizes = [1, 128], strides = [1, 1]} : vector<32x128xf32> to vector<1x128xf32>
    %cst_88 = arith.constant 1.000000e+00 : f32
    %231 = vector.broadcast %cst_88 : f32 to vector<1x128xf32>
    %232 = arith.divf %231, %230 : vector<1x128xf32>
    %cst_89 = arith.constant 9.700000e-01 : f32
    %233 = vector.broadcast %cst_89 : f32 to vector<32x128xf32>
    %234 = arith.mulf %233, %224 : vector<32x128xf32>
    %235 = vector.broadcast %229 : vector<1x128xf32> to vector<32x128xf32>
    %236 = arith.mulf %234, %235 : vector<32x128xf32>
    %237 = arith.addf %102, %236 : vector<32x128xf32>
    %cst_90 = arith.constant 1.000000e+00 : f32
    %238 = vector.broadcast %cst_90 : f32 to vector<32x128xf32>
    %239 = arith.select %106, %238, %237 : vector<32x128xi1>, vector<32x128xf32>
    %cst_91 = arith.constant 1.00000095 : f32
    %240 = vector.broadcast %cst_91 : f32 to vector<32x128xf32>
    %241 = arith.select %106, %240, %239 : vector<32x128xi1>, vector<32x128xf32>
    %cst_92 = arith.constant 9.700000e-01 : f32
    %242 = vector.broadcast %cst_92 : f32 to vector<32x128xf32>
    %243 = arith.mulf %242, %225 : vector<32x128xf32>
    %244 = vector.broadcast %232 : vector<1x128xf32> to vector<32x128xf32>
    %245 = arith.mulf %243, %244 : vector<32x128xf32>
    %246 = arith.addf %104, %245 : vector<32x128xf32>
    %cst_93 = arith.constant 1.000000e+00 : f32
    %247 = vector.broadcast %cst_93 : f32 to vector<32x128xf32>
    %248 = arith.select %106, %247, %246 : vector<32x128xi1>, vector<32x128xf32>
    %249 = vector.broadcast %223 : vector<1x128xf32> to vector<32x128xf32>
    %250 = arith.cmpf oge, %249, %241 : vector<32x128xf32>
    %251 = arith.extui %250 : vector<32x128xi1> to vector<32x128xi32>
    %252 = arith.sitofp %251 : vector<32x128xi32> to vector<32x128xf32>
    %cst_94 = arith.constant dense<0.000000e+00> : vector<128xf32>
    %253 = vector.multi_reduction <add>, %252, %cst_94 [0] : vector<32x128xf32> to vector<128xf32>
    %254 = vector.shape_cast %253 : vector<128xf32> to vector<1x128xf32>
    %255 = arith.fptosi %254 : vector<1x128xf32> to vector<1x128xi32>
    %c1_i32_95 = arith.constant 1 : i32
    %256 = vector.broadcast %c1_i32_95 : i32 to vector<1x128xi32>
    %257 = arith.subi %255, %256 : vector<1x128xi32>
    %258 = vector.broadcast %257 : vector<1x128xi32> to vector<32x128xi32>
    %259 = arith.cmpi eq, %99, %258 : vector<32x128xi32>
    %260 = arith.extui %259 : vector<32x128xi1> to vector<32x128xi32>
    %261 = arith.sitofp %260 : vector<32x128xi32> to vector<32x128xf32>
    %c1_i32_96 = arith.constant 1 : i32
    %262 = vector.broadcast %c1_i32_96 : i32 to vector<1x128xi32>
    %263 = arith.addi %257, %262 : vector<1x128xi32>
    %264 = vector.broadcast %263 : vector<1x128xi32> to vector<32x128xi32>
    %265 = arith.cmpi eq, %99, %264 : vector<32x128xi32>
    %266 = arith.extui %265 : vector<32x128xi1> to vector<32x128xi32>
    %267 = arith.sitofp %266 : vector<32x128xi32> to vector<32x128xf32>
    %268 = arith.mulf %261, %239 : vector<32x128xf32>
    %cst_97 = arith.constant dense<0.000000e+00> : vector<128xf32>
    %269 = vector.multi_reduction <add>, %268, %cst_97 [0] : vector<32x128xf32> to vector<128xf32>
    %270 = vector.shape_cast %269 : vector<128xf32> to vector<1x128xf32>
    %271 = arith.mulf %267, %239 : vector<32x128xf32>
    %cst_98 = arith.constant dense<0.000000e+00> : vector<128xf32>
    %272 = vector.multi_reduction <add>, %271, %cst_98 [0] : vector<32x128xf32> to vector<128xf32>
    %273 = vector.shape_cast %272 : vector<128xf32> to vector<1x128xf32>
    %274 = arith.mulf %261, %248 : vector<32x128xf32>
    %cst_99 = arith.constant dense<0.000000e+00> : vector<128xf32>
    %275 = vector.multi_reduction <add>, %274, %cst_99 [0] : vector<32x128xf32> to vector<128xf32>
    %276 = vector.shape_cast %275 : vector<128xf32> to vector<1x128xf32>
    %277 = arith.mulf %267, %248 : vector<32x128xf32>
    %cst_100 = arith.constant dense<0.000000e+00> : vector<128xf32>
    %278 = vector.multi_reduction <add>, %277, %cst_100 [0] : vector<32x128xf32> to vector<128xf32>
    %279 = vector.shape_cast %278 : vector<128xf32> to vector<1x128xf32>
    %280 = arith.mulf %261, %226 : vector<32x128xf32>
    %cst_101 = arith.constant dense<0.000000e+00> : vector<128xf32>
    %281 = vector.multi_reduction <add>, %280, %cst_101 [0] : vector<32x128xf32> to vector<128xf32>
    %282 = vector.shape_cast %281 : vector<128xf32> to vector<1x128xf32>
    %283 = arith.mulf %267, %226 : vector<32x128xf32>
    %cst_102 = arith.constant dense<0.000000e+00> : vector<128xf32>
    %284 = vector.multi_reduction <add>, %283, %cst_102 [0] : vector<32x128xf32> to vector<128xf32>
    %285 = vector.shape_cast %284 : vector<128xf32> to vector<1x128xf32>
    %cst_103 = arith.constant 0.000000e+00 : f32
    %286 = vector.broadcast %cst_103 : f32 to vector<1x128xf32>
    %287 = arith.maximumf %282, %286 : vector<1x128xf32>
    %288 = math.absf %282 : vector<1x128xf32>
    %cst_104 = arith.constant 0.000000e+00 : f32
    %289 = vector.broadcast %cst_104 : f32 to vector<1x128xf32>
    %290 = arith.subf %289, %288 : vector<1x128xf32>
    %291 = math.exp %290 : vector<1x128xf32>
    %cst_105 = arith.constant 1.000000e+00 : f32
    %292 = vector.broadcast %cst_105 : f32 to vector<1x128xf32>
    %293 = arith.addf %292, %291 : vector<1x128xf32>
    %294 = math.log %293 : vector<1x128xf32>
    %295 = arith.addf %287, %294 : vector<1x128xf32>
    %cst_106 = arith.constant 1.000000e-03 : f32
    %296 = vector.broadcast %cst_106 : f32 to vector<1x128xf32>
    %297 = arith.addf %296, %295 : vector<1x128xf32>
    %cst_107 = arith.constant 0.000000e+00 : f32
    %298 = vector.broadcast %cst_107 : f32 to vector<1x128xf32>
    %299 = arith.maximumf %285, %298 : vector<1x128xf32>
    %300 = math.absf %285 : vector<1x128xf32>
    %cst_108 = arith.constant 0.000000e+00 : f32
    %301 = vector.broadcast %cst_108 : f32 to vector<1x128xf32>
    %302 = arith.subf %301, %300 : vector<1x128xf32>
    %303 = math.exp %302 : vector<1x128xf32>
    %cst_109 = arith.constant 1.000000e+00 : f32
    %304 = vector.broadcast %cst_109 : f32 to vector<1x128xf32>
    %305 = arith.addf %304, %303 : vector<1x128xf32>
    %306 = math.log %305 : vector<1x128xf32>
    %307 = arith.addf %299, %306 : vector<1x128xf32>
    %cst_110 = arith.constant 1.000000e-03 : f32
    %308 = vector.broadcast %cst_110 : f32 to vector<1x128xf32>
    %309 = arith.addf %308, %307 : vector<1x128xf32>
    %310 = arith.subf %273, %270 : vector<1x128xf32>
    %311 = arith.subf %279, %276 : vector<1x128xf32>
    %312 = tpu.reciprocal %310 {approx = true} : vector<1x128xf32> -> vector<1x128xf32>
    %313 = arith.mulf %311, %312 : vector<1x128xf32>
    %314 = arith.subf %223, %270 : vector<1x128xf32>
    %315 = arith.mulf %314, %312 : vector<1x128xf32>
    %cst_111 = arith.constant 1.000000e+00 : f32
    %316 = vector.broadcast %cst_111 : f32 to vector<1x128xf32>
    %317 = arith.subf %316, %315 : vector<1x128xf32>
    %318 = arith.mulf %315, %317 : vector<1x128xf32>
    %319 = arith.mulf %313, %315 : vector<1x128xf32>
    %320 = arith.mulf %319, %315 : vector<1x128xf32>
    %321 = arith.mulf %297, %318 : vector<1x128xf32>
    %322 = arith.addf %320, %321 : vector<1x128xf32>
    %323 = arith.mulf %311, %322 : vector<1x128xf32>
    %324 = arith.addf %297, %309 : vector<1x128xf32>
    %cst_112 = arith.constant 2.000000e+00 : f32
    %325 = vector.broadcast %cst_112 : f32 to vector<1x128xf32>
    %326 = arith.mulf %325, %313 : vector<1x128xf32>
    %327 = arith.subf %324, %326 : vector<1x128xf32>
    %328 = arith.mulf %327, %318 : vector<1x128xf32>
    %329 = arith.addf %313, %328 : vector<1x128xf32>
    %330 = tpu.reciprocal %329 {approx = true} : vector<1x128xf32> -> vector<1x128xf32>
    %331 = arith.mulf %323, %330 : vector<1x128xf32>
    %332 = arith.addf %276, %331 : vector<1x128xf32>
    %cst_113 = arith.constant 1.000000e+00 : f32
    %333 = vector.broadcast %cst_113 : f32 to vector<1x128xf32>
    %334 = arith.cmpf oeq, %223, %333 : vector<1x128xf32>
    %cst_114 = arith.constant 1.000000e+00 : f32
    %335 = vector.broadcast %cst_114 : f32 to vector<1x128xf32>
    %336 = arith.select %334, %335, %332 : vector<1x128xi1>, vector<1x128xf32>
    %337 = arith.mulf %222, %336 : vector<1x128xf32>
    %338 = vector.extract_strided_slice %1 {offsets = [2, 0], sizes = [1, 128], strides = [1, 1]} : vector<8x128xf32> to vector<1x128xf32>
    %339 = vector.extract_strided_slice %95 {offsets = [64, 0], sizes = [32, 128], strides = [1, 1]} : vector<256x128xf32> to vector<32x128xf32>
    %340 = vector.extract_strided_slice %98 {offsets = [64, 0], sizes = [32, 128], strides = [1, 1]} : vector<256x128xf32> to vector<32x128xf32>
    %341 = vector.extract_strided_slice %84 {offsets = [576, 0], sizes = [32, 128], strides = [1, 1]} : vector<768x128xf32> to vector<32x128xf32>
    %342 = vector.extract_strided_slice %339 {offsets = [30, 0], sizes = [1, 128], strides = [1, 1]} : vector<32x128xf32> to vector<1x128xf32>
    %cst_115 = arith.constant 1.000000e+00 : f32
    %343 = vector.broadcast %cst_115 : f32 to vector<1x128xf32>
    %344 = arith.divf %343, %342 : vector<1x128xf32>
    %345 = vector.extract_strided_slice %340 {offsets = [30, 0], sizes = [1, 128], strides = [1, 1]} : vector<32x128xf32> to vector<1x128xf32>
    %cst_116 = arith.constant 1.000000e+00 : f32
    %346 = vector.broadcast %cst_116 : f32 to vector<1x128xf32>
    %347 = arith.divf %346, %345 : vector<1x128xf32>
    %cst_117 = arith.constant 9.700000e-01 : f32
    %348 = vector.broadcast %cst_117 : f32 to vector<32x128xf32>
    %349 = arith.mulf %348, %339 : vector<32x128xf32>
    %350 = vector.broadcast %344 : vector<1x128xf32> to vector<32x128xf32>
    %351 = arith.mulf %349, %350 : vector<32x128xf32>
    %352 = arith.addf %102, %351 : vector<32x128xf32>
    %cst_118 = arith.constant 1.000000e+00 : f32
    %353 = vector.broadcast %cst_118 : f32 to vector<32x128xf32>
    %354 = arith.select %106, %353, %352 : vector<32x128xi1>, vector<32x128xf32>
    %cst_119 = arith.constant 1.00000095 : f32
    %355 = vector.broadcast %cst_119 : f32 to vector<32x128xf32>
    %356 = arith.select %106, %355, %354 : vector<32x128xi1>, vector<32x128xf32>
    %cst_120 = arith.constant 9.700000e-01 : f32
    %357 = vector.broadcast %cst_120 : f32 to vector<32x128xf32>
    %358 = arith.mulf %357, %340 : vector<32x128xf32>
    %359 = vector.broadcast %347 : vector<1x128xf32> to vector<32x128xf32>
    %360 = arith.mulf %358, %359 : vector<32x128xf32>
    %361 = arith.addf %104, %360 : vector<32x128xf32>
    %cst_121 = arith.constant 1.000000e+00 : f32
    %362 = vector.broadcast %cst_121 : f32 to vector<32x128xf32>
    %363 = arith.select %106, %362, %361 : vector<32x128xi1>, vector<32x128xf32>
    %364 = vector.broadcast %338 : vector<1x128xf32> to vector<32x128xf32>
    %365 = arith.cmpf oge, %364, %356 : vector<32x128xf32>
    %366 = arith.extui %365 : vector<32x128xi1> to vector<32x128xi32>
    %367 = arith.sitofp %366 : vector<32x128xi32> to vector<32x128xf32>
    %cst_122 = arith.constant dense<0.000000e+00> : vector<128xf32>
    %368 = vector.multi_reduction <add>, %367, %cst_122 [0] : vector<32x128xf32> to vector<128xf32>
    %369 = vector.shape_cast %368 : vector<128xf32> to vector<1x128xf32>
    %370 = arith.fptosi %369 : vector<1x128xf32> to vector<1x128xi32>
    %c1_i32_123 = arith.constant 1 : i32
    %371 = vector.broadcast %c1_i32_123 : i32 to vector<1x128xi32>
    %372 = arith.subi %370, %371 : vector<1x128xi32>
    %373 = vector.broadcast %372 : vector<1x128xi32> to vector<32x128xi32>
    %374 = arith.cmpi eq, %99, %373 : vector<32x128xi32>
    %375 = arith.extui %374 : vector<32x128xi1> to vector<32x128xi32>
    %376 = arith.sitofp %375 : vector<32x128xi32> to vector<32x128xf32>
    %c1_i32_124 = arith.constant 1 : i32
    %377 = vector.broadcast %c1_i32_124 : i32 to vector<1x128xi32>
    %378 = arith.addi %372, %377 : vector<1x128xi32>
    %379 = vector.broadcast %378 : vector<1x128xi32> to vector<32x128xi32>
    %380 = arith.cmpi eq, %99, %379 : vector<32x128xi32>
    %381 = arith.extui %380 : vector<32x128xi1> to vector<32x128xi32>
    %382 = arith.sitofp %381 : vector<32x128xi32> to vector<32x128xf32>
    %383 = arith.mulf %376, %354 : vector<32x128xf32>
    %cst_125 = arith.constant dense<0.000000e+00> : vector<128xf32>
    %384 = vector.multi_reduction <add>, %383, %cst_125 [0] : vector<32x128xf32> to vector<128xf32>
    %385 = vector.shape_cast %384 : vector<128xf32> to vector<1x128xf32>
    %386 = arith.mulf %382, %354 : vector<32x128xf32>
    %cst_126 = arith.constant dense<0.000000e+00> : vector<128xf32>
    %387 = vector.multi_reduction <add>, %386, %cst_126 [0] : vector<32x128xf32> to vector<128xf32>
    %388 = vector.shape_cast %387 : vector<128xf32> to vector<1x128xf32>
    %389 = arith.mulf %376, %363 : vector<32x128xf32>
    %cst_127 = arith.constant dense<0.000000e+00> : vector<128xf32>
    %390 = vector.multi_reduction <add>, %389, %cst_127 [0] : vector<32x128xf32> to vector<128xf32>
    %391 = vector.shape_cast %390 : vector<128xf32> to vector<1x128xf32>
    %392 = arith.mulf %382, %363 : vector<32x128xf32>
    %cst_128 = arith.constant dense<0.000000e+00> : vector<128xf32>
    %393 = vector.multi_reduction <add>, %392, %cst_128 [0] : vector<32x128xf32> to vector<128xf32>
    %394 = vector.shape_cast %393 : vector<128xf32> to vector<1x128xf32>
    %395 = arith.mulf %376, %341 : vector<32x128xf32>
    %cst_129 = arith.constant dense<0.000000e+00> : vector<128xf32>
    %396 = vector.multi_reduction <add>, %395, %cst_129 [0] : vector<32x128xf32> to vector<128xf32>
    %397 = vector.shape_cast %396 : vector<128xf32> to vector<1x128xf32>
    %398 = arith.mulf %382, %341 : vector<32x128xf32>
    %cst_130 = arith.constant dense<0.000000e+00> : vector<128xf32>
    %399 = vector.multi_reduction <add>, %398, %cst_130 [0] : vector<32x128xf32> to vector<128xf32>
    %400 = vector.shape_cast %399 : vector<128xf32> to vector<1x128xf32>
    %cst_131 = arith.constant 0.000000e+00 : f32
    %401 = vector.broadcast %cst_131 : f32 to vector<1x128xf32>
    %402 = arith.maximumf %397, %401 : vector<1x128xf32>
    %403 = math.absf %397 : vector<1x128xf32>
    %cst_132 = arith.constant 0.000000e+00 : f32
    %404 = vector.broadcast %cst_132 : f32 to vector<1x128xf32>
    %405 = arith.subf %404, %403 : vector<1x128xf32>
    %406 = math.exp %405 : vector<1x128xf32>
    %cst_133 = arith.constant 1.000000e+00 : f32
    %407 = vector.broadcast %cst_133 : f32 to vector<1x128xf32>
    %408 = arith.addf %407, %406 : vector<1x128xf32>
    %409 = math.log %408 : vector<1x128xf32>
    %410 = arith.addf %402, %409 : vector<1x128xf32>
    %cst_134 = arith.constant 1.000000e-03 : f32
    %411 = vector.broadcast %cst_134 : f32 to vector<1x128xf32>
    %412 = arith.addf %411, %410 : vector<1x128xf32>
    %cst_135 = arith.constant 0.000000e+00 : f32
    %413 = vector.broadcast %cst_135 : f32 to vector<1x128xf32>
    %414 = arith.maximumf %400, %413 : vector<1x128xf32>
    %415 = math.absf %400 : vector<1x128xf32>
    %cst_136 = arith.constant 0.000000e+00 : f32
    %416 = vector.broadcast %cst_136 : f32 to vector<1x128xf32>
    %417 = arith.subf %416, %415 : vector<1x128xf32>
    %418 = math.exp %417 : vector<1x128xf32>
    %cst_137 = arith.constant 1.000000e+00 : f32
    %419 = vector.broadcast %cst_137 : f32 to vector<1x128xf32>
    %420 = arith.addf %419, %418 : vector<1x128xf32>
    %421 = math.log %420 : vector<1x128xf32>
    %422 = arith.addf %414, %421 : vector<1x128xf32>
    %cst_138 = arith.constant 1.000000e-03 : f32
    %423 = vector.broadcast %cst_138 : f32 to vector<1x128xf32>
    %424 = arith.addf %423, %422 : vector<1x128xf32>
    %425 = arith.subf %388, %385 : vector<1x128xf32>
    %426 = arith.subf %394, %391 : vector<1x128xf32>
    %427 = tpu.reciprocal %425 {approx = true} : vector<1x128xf32> -> vector<1x128xf32>
    %428 = arith.mulf %426, %427 : vector<1x128xf32>
    %429 = arith.subf %338, %385 : vector<1x128xf32>
    %430 = arith.mulf %429, %427 : vector<1x128xf32>
    %cst_139 = arith.constant 1.000000e+00 : f32
    %431 = vector.broadcast %cst_139 : f32 to vector<1x128xf32>
    %432 = arith.subf %431, %430 : vector<1x128xf32>
    %433 = arith.mulf %430, %432 : vector<1x128xf32>
    %434 = arith.mulf %428, %430 : vector<1x128xf32>
    %435 = arith.mulf %434, %430 : vector<1x128xf32>
    %436 = arith.mulf %412, %433 : vector<1x128xf32>
    %437 = arith.addf %435, %436 : vector<1x128xf32>
    %438 = arith.mulf %426, %437 : vector<1x128xf32>
    %439 = arith.addf %412, %424 : vector<1x128xf32>
    %cst_140 = arith.constant 2.000000e+00 : f32
    %440 = vector.broadcast %cst_140 : f32 to vector<1x128xf32>
    %441 = arith.mulf %440, %428 : vector<1x128xf32>
    %442 = arith.subf %439, %441 : vector<1x128xf32>
    %443 = arith.mulf %442, %433 : vector<1x128xf32>
    %444 = arith.addf %428, %443 : vector<1x128xf32>
    %445 = tpu.reciprocal %444 {approx = true} : vector<1x128xf32> -> vector<1x128xf32>
    %446 = arith.mulf %438, %445 : vector<1x128xf32>
    %447 = arith.addf %391, %446 : vector<1x128xf32>
    %cst_141 = arith.constant 1.000000e+00 : f32
    %448 = vector.broadcast %cst_141 : f32 to vector<1x128xf32>
    %449 = arith.cmpf oeq, %338, %448 : vector<1x128xf32>
    %cst_142 = arith.constant 1.000000e+00 : f32
    %450 = vector.broadcast %cst_142 : f32 to vector<1x128xf32>
    %451 = arith.select %449, %450, %447 : vector<1x128xi1>, vector<1x128xf32>
    %452 = arith.mulf %337, %451 : vector<1x128xf32>
    %453 = vector.extract_strided_slice %1 {offsets = [3, 0], sizes = [1, 128], strides = [1, 1]} : vector<8x128xf32> to vector<1x128xf32>
    %454 = vector.extract_strided_slice %95 {offsets = [96, 0], sizes = [32, 128], strides = [1, 1]} : vector<256x128xf32> to vector<32x128xf32>
    %455 = vector.extract_strided_slice %98 {offsets = [96, 0], sizes = [32, 128], strides = [1, 1]} : vector<256x128xf32> to vector<32x128xf32>
    %456 = vector.extract_strided_slice %84 {offsets = [608, 0], sizes = [32, 128], strides = [1, 1]} : vector<768x128xf32> to vector<32x128xf32>
    %457 = vector.extract_strided_slice %454 {offsets = [30, 0], sizes = [1, 128], strides = [1, 1]} : vector<32x128xf32> to vector<1x128xf32>
    %cst_143 = arith.constant 1.000000e+00 : f32
    %458 = vector.broadcast %cst_143 : f32 to vector<1x128xf32>
    %459 = arith.divf %458, %457 : vector<1x128xf32>
    %460 = vector.extract_strided_slice %455 {offsets = [30, 0], sizes = [1, 128], strides = [1, 1]} : vector<32x128xf32> to vector<1x128xf32>
    %cst_144 = arith.constant 1.000000e+00 : f32
    %461 = vector.broadcast %cst_144 : f32 to vector<1x128xf32>
    %462 = arith.divf %461, %460 : vector<1x128xf32>
    %cst_145 = arith.constant 9.700000e-01 : f32
    %463 = vector.broadcast %cst_145 : f32 to vector<32x128xf32>
    %464 = arith.mulf %463, %454 : vector<32x128xf32>
    %465 = vector.broadcast %459 : vector<1x128xf32> to vector<32x128xf32>
    %466 = arith.mulf %464, %465 : vector<32x128xf32>
    %467 = arith.addf %102, %466 : vector<32x128xf32>
    %cst_146 = arith.constant 1.000000e+00 : f32
    %468 = vector.broadcast %cst_146 : f32 to vector<32x128xf32>
    %469 = arith.select %106, %468, %467 : vector<32x128xi1>, vector<32x128xf32>
    %cst_147 = arith.constant 1.00000095 : f32
    %470 = vector.broadcast %cst_147 : f32 to vector<32x128xf32>
    %471 = arith.select %106, %470, %469 : vector<32x128xi1>, vector<32x128xf32>
    %cst_148 = arith.constant 9.700000e-01 : f32
    %472 = vector.broadcast %cst_148 : f32 to vector<32x128xf32>
    %473 = arith.mulf %472, %455 : vector<32x128xf32>
    %474 = vector.broadcast %462 : vector<1x128xf32> to vector<32x128xf32>
    %475 = arith.mulf %473, %474 : vector<32x128xf32>
    %476 = arith.addf %104, %475 : vector<32x128xf32>
    %cst_149 = arith.constant 1.000000e+00 : f32
    %477 = vector.broadcast %cst_149 : f32 to vector<32x128xf32>
    %478 = arith.select %106, %477, %476 : vector<32x128xi1>, vector<32x128xf32>
    %479 = vector.broadcast %453 : vector<1x128xf32> to vector<32x128xf32>
    %480 = arith.cmpf oge, %479, %471 : vector<32x128xf32>
    %481 = arith.extui %480 : vector<32x128xi1> to vector<32x128xi32>
    %482 = arith.sitofp %481 : vector<32x128xi32> to vector<32x128xf32>
    %cst_150 = arith.constant dense<0.000000e+00> : vector<128xf32>
    %483 = vector.multi_reduction <add>, %482, %cst_150 [0] : vector<32x128xf32> to vector<128xf32>
    %484 = vector.shape_cast %483 : vector<128xf32> to vector<1x128xf32>
    %485 = arith.fptosi %484 : vector<1x128xf32> to vector<1x128xi32>
    %c1_i32_151 = arith.constant 1 : i32
    %486 = vector.broadcast %c1_i32_151 : i32 to vector<1x128xi32>
    %487 = arith.subi %485, %486 : vector<1x128xi32>
    %488 = vector.broadcast %487 : vector<1x128xi32> to vector<32x128xi32>
    %489 = arith.cmpi eq, %99, %488 : vector<32x128xi32>
    %490 = arith.extui %489 : vector<32x128xi1> to vector<32x128xi32>
    %491 = arith.sitofp %490 : vector<32x128xi32> to vector<32x128xf32>
    %c1_i32_152 = arith.constant 1 : i32
    %492 = vector.broadcast %c1_i32_152 : i32 to vector<1x128xi32>
    %493 = arith.addi %487, %492 : vector<1x128xi32>
    %494 = vector.broadcast %493 : vector<1x128xi32> to vector<32x128xi32>
    %495 = arith.cmpi eq, %99, %494 : vector<32x128xi32>
    %496 = arith.extui %495 : vector<32x128xi1> to vector<32x128xi32>
    %497 = arith.sitofp %496 : vector<32x128xi32> to vector<32x128xf32>
    %498 = arith.mulf %491, %469 : vector<32x128xf32>
    %cst_153 = arith.constant dense<0.000000e+00> : vector<128xf32>
    %499 = vector.multi_reduction <add>, %498, %cst_153 [0] : vector<32x128xf32> to vector<128xf32>
    %500 = vector.shape_cast %499 : vector<128xf32> to vector<1x128xf32>
    %501 = arith.mulf %497, %469 : vector<32x128xf32>
    %cst_154 = arith.constant dense<0.000000e+00> : vector<128xf32>
    %502 = vector.multi_reduction <add>, %501, %cst_154 [0] : vector<32x128xf32> to vector<128xf32>
    %503 = vector.shape_cast %502 : vector<128xf32> to vector<1x128xf32>
    %504 = arith.mulf %491, %478 : vector<32x128xf32>
    %cst_155 = arith.constant dense<0.000000e+00> : vector<128xf32>
    %505 = vector.multi_reduction <add>, %504, %cst_155 [0] : vector<32x128xf32> to vector<128xf32>
    %506 = vector.shape_cast %505 : vector<128xf32> to vector<1x128xf32>
    %507 = arith.mulf %497, %478 : vector<32x128xf32>
    %cst_156 = arith.constant dense<0.000000e+00> : vector<128xf32>
    %508 = vector.multi_reduction <add>, %507, %cst_156 [0] : vector<32x128xf32> to vector<128xf32>
    %509 = vector.shape_cast %508 : vector<128xf32> to vector<1x128xf32>
    %510 = arith.mulf %491, %456 : vector<32x128xf32>
    %cst_157 = arith.constant dense<0.000000e+00> : vector<128xf32>
    %511 = vector.multi_reduction <add>, %510, %cst_157 [0] : vector<32x128xf32> to vector<128xf32>
    %512 = vector.shape_cast %511 : vector<128xf32> to vector<1x128xf32>
    %513 = arith.mulf %497, %456 : vector<32x128xf32>
    %cst_158 = arith.constant dense<0.000000e+00> : vector<128xf32>
    %514 = vector.multi_reduction <add>, %513, %cst_158 [0] : vector<32x128xf32> to vector<128xf32>
    %515 = vector.shape_cast %514 : vector<128xf32> to vector<1x128xf32>
    %cst_159 = arith.constant 0.000000e+00 : f32
    %516 = vector.broadcast %cst_159 : f32 to vector<1x128xf32>
    %517 = arith.maximumf %512, %516 : vector<1x128xf32>
    %518 = math.absf %512 : vector<1x128xf32>
    %cst_160 = arith.constant 0.000000e+00 : f32
    %519 = vector.broadcast %cst_160 : f32 to vector<1x128xf32>
    %520 = arith.subf %519, %518 : vector<1x128xf32>
    %521 = math.exp %520 : vector<1x128xf32>
    %cst_161 = arith.constant 1.000000e+00 : f32
    %522 = vector.broadcast %cst_161 : f32 to vector<1x128xf32>
    %523 = arith.addf %522, %521 : vector<1x128xf32>
    %524 = math.log %523 : vector<1x128xf32>
    %525 = arith.addf %517, %524 : vector<1x128xf32>
    %cst_162 = arith.constant 1.000000e-03 : f32
    %526 = vector.broadcast %cst_162 : f32 to vector<1x128xf32>
    %527 = arith.addf %526, %525 : vector<1x128xf32>
    %cst_163 = arith.constant 0.000000e+00 : f32
    %528 = vector.broadcast %cst_163 : f32 to vector<1x128xf32>
    %529 = arith.maximumf %515, %528 : vector<1x128xf32>
    %530 = math.absf %515 : vector<1x128xf32>
    %cst_164 = arith.constant 0.000000e+00 : f32
    %531 = vector.broadcast %cst_164 : f32 to vector<1x128xf32>
    %532 = arith.subf %531, %530 : vector<1x128xf32>
    %533 = math.exp %532 : vector<1x128xf32>
    %cst_165 = arith.constant 1.000000e+00 : f32
    %534 = vector.broadcast %cst_165 : f32 to vector<1x128xf32>
    %535 = arith.addf %534, %533 : vector<1x128xf32>
    %536 = math.log %535 : vector<1x128xf32>
    %537 = arith.addf %529, %536 : vector<1x128xf32>
    %cst_166 = arith.constant 1.000000e-03 : f32
    %538 = vector.broadcast %cst_166 : f32 to vector<1x128xf32>
    %539 = arith.addf %538, %537 : vector<1x128xf32>
    %540 = arith.subf %503, %500 : vector<1x128xf32>
    %541 = arith.subf %509, %506 : vector<1x128xf32>
    %542 = tpu.reciprocal %540 {approx = true} : vector<1x128xf32> -> vector<1x128xf32>
    %543 = arith.mulf %541, %542 : vector<1x128xf32>
    %544 = arith.subf %453, %500 : vector<1x128xf32>
    %545 = arith.mulf %544, %542 : vector<1x128xf32>
    %cst_167 = arith.constant 1.000000e+00 : f32
    %546 = vector.broadcast %cst_167 : f32 to vector<1x128xf32>
    %547 = arith.subf %546, %545 : vector<1x128xf32>
    %548 = arith.mulf %545, %547 : vector<1x128xf32>
    %549 = arith.mulf %543, %545 : vector<1x128xf32>
    %550 = arith.mulf %549, %545 : vector<1x128xf32>
    %551 = arith.mulf %527, %548 : vector<1x128xf32>
    %552 = arith.addf %550, %551 : vector<1x128xf32>
    %553 = arith.mulf %541, %552 : vector<1x128xf32>
    %554 = arith.addf %527, %539 : vector<1x128xf32>
    %cst_168 = arith.constant 2.000000e+00 : f32
    %555 = vector.broadcast %cst_168 : f32 to vector<1x128xf32>
    %556 = arith.mulf %555, %543 : vector<1x128xf32>
    %557 = arith.subf %554, %556 : vector<1x128xf32>
    %558 = arith.mulf %557, %548 : vector<1x128xf32>
    %559 = arith.addf %543, %558 : vector<1x128xf32>
    %560 = tpu.reciprocal %559 {approx = true} : vector<1x128xf32> -> vector<1x128xf32>
    %561 = arith.mulf %553, %560 : vector<1x128xf32>
    %562 = arith.addf %506, %561 : vector<1x128xf32>
    %cst_169 = arith.constant 1.000000e+00 : f32
    %563 = vector.broadcast %cst_169 : f32 to vector<1x128xf32>
    %564 = arith.cmpf oeq, %453, %563 : vector<1x128xf32>
    %cst_170 = arith.constant 1.000000e+00 : f32
    %565 = vector.broadcast %cst_170 : f32 to vector<1x128xf32>
    %566 = arith.select %564, %565, %562 : vector<1x128xi1>, vector<1x128xf32>
    %567 = arith.mulf %452, %566 : vector<1x128xf32>
    %568 = vector.extract_strided_slice %1 {offsets = [4, 0], sizes = [1, 128], strides = [1, 1]} : vector<8x128xf32> to vector<1x128xf32>
    %569 = vector.extract_strided_slice %95 {offsets = [128, 0], sizes = [32, 128], strides = [1, 1]} : vector<256x128xf32> to vector<32x128xf32>
    %570 = vector.extract_strided_slice %98 {offsets = [128, 0], sizes = [32, 128], strides = [1, 1]} : vector<256x128xf32> to vector<32x128xf32>
    %571 = vector.extract_strided_slice %84 {offsets = [640, 0], sizes = [32, 128], strides = [1, 1]} : vector<768x128xf32> to vector<32x128xf32>
    %572 = vector.extract_strided_slice %569 {offsets = [30, 0], sizes = [1, 128], strides = [1, 1]} : vector<32x128xf32> to vector<1x128xf32>
    %cst_171 = arith.constant 1.000000e+00 : f32
    %573 = vector.broadcast %cst_171 : f32 to vector<1x128xf32>
    %574 = arith.divf %573, %572 : vector<1x128xf32>
    %575 = vector.extract_strided_slice %570 {offsets = [30, 0], sizes = [1, 128], strides = [1, 1]} : vector<32x128xf32> to vector<1x128xf32>
    %cst_172 = arith.constant 1.000000e+00 : f32
    %576 = vector.broadcast %cst_172 : f32 to vector<1x128xf32>
    %577 = arith.divf %576, %575 : vector<1x128xf32>
    %cst_173 = arith.constant 9.700000e-01 : f32
    %578 = vector.broadcast %cst_173 : f32 to vector<32x128xf32>
    %579 = arith.mulf %578, %569 : vector<32x128xf32>
    %580 = vector.broadcast %574 : vector<1x128xf32> to vector<32x128xf32>
    %581 = arith.mulf %579, %580 : vector<32x128xf32>
    %582 = arith.addf %102, %581 : vector<32x128xf32>
    %cst_174 = arith.constant 1.000000e+00 : f32
    %583 = vector.broadcast %cst_174 : f32 to vector<32x128xf32>
    %584 = arith.select %106, %583, %582 : vector<32x128xi1>, vector<32x128xf32>
    %cst_175 = arith.constant 1.00000095 : f32
    %585 = vector.broadcast %cst_175 : f32 to vector<32x128xf32>
    %586 = arith.select %106, %585, %584 : vector<32x128xi1>, vector<32x128xf32>
    %cst_176 = arith.constant 9.700000e-01 : f32
    %587 = vector.broadcast %cst_176 : f32 to vector<32x128xf32>
    %588 = arith.mulf %587, %570 : vector<32x128xf32>
    %589 = vector.broadcast %577 : vector<1x128xf32> to vector<32x128xf32>
    %590 = arith.mulf %588, %589 : vector<32x128xf32>
    %591 = arith.addf %104, %590 : vector<32x128xf32>
    %cst_177 = arith.constant 1.000000e+00 : f32
    %592 = vector.broadcast %cst_177 : f32 to vector<32x128xf32>
    %593 = arith.select %106, %592, %591 : vector<32x128xi1>, vector<32x128xf32>
    %594 = vector.broadcast %568 : vector<1x128xf32> to vector<32x128xf32>
    %595 = arith.cmpf oge, %594, %586 : vector<32x128xf32>
    %596 = arith.extui %595 : vector<32x128xi1> to vector<32x128xi32>
    %597 = arith.sitofp %596 : vector<32x128xi32> to vector<32x128xf32>
    %cst_178 = arith.constant dense<0.000000e+00> : vector<128xf32>
    %598 = vector.multi_reduction <add>, %597, %cst_178 [0] : vector<32x128xf32> to vector<128xf32>
    %599 = vector.shape_cast %598 : vector<128xf32> to vector<1x128xf32>
    %600 = arith.fptosi %599 : vector<1x128xf32> to vector<1x128xi32>
    %c1_i32_179 = arith.constant 1 : i32
    %601 = vector.broadcast %c1_i32_179 : i32 to vector<1x128xi32>
    %602 = arith.subi %600, %601 : vector<1x128xi32>
    %603 = vector.broadcast %602 : vector<1x128xi32> to vector<32x128xi32>
    %604 = arith.cmpi eq, %99, %603 : vector<32x128xi32>
    %605 = arith.extui %604 : vector<32x128xi1> to vector<32x128xi32>
    %606 = arith.sitofp %605 : vector<32x128xi32> to vector<32x128xf32>
    %c1_i32_180 = arith.constant 1 : i32
    %607 = vector.broadcast %c1_i32_180 : i32 to vector<1x128xi32>
    %608 = arith.addi %602, %607 : vector<1x128xi32>
    %609 = vector.broadcast %608 : vector<1x128xi32> to vector<32x128xi32>
    %610 = arith.cmpi eq, %99, %609 : vector<32x128xi32>
    %611 = arith.extui %610 : vector<32x128xi1> to vector<32x128xi32>
    %612 = arith.sitofp %611 : vector<32x128xi32> to vector<32x128xf32>
    %613 = arith.mulf %606, %584 : vector<32x128xf32>
    %cst_181 = arith.constant dense<0.000000e+00> : vector<128xf32>
    %614 = vector.multi_reduction <add>, %613, %cst_181 [0] : vector<32x128xf32> to vector<128xf32>
    %615 = vector.shape_cast %614 : vector<128xf32> to vector<1x128xf32>
    %616 = arith.mulf %612, %584 : vector<32x128xf32>
    %cst_182 = arith.constant dense<0.000000e+00> : vector<128xf32>
    %617 = vector.multi_reduction <add>, %616, %cst_182 [0] : vector<32x128xf32> to vector<128xf32>
    %618 = vector.shape_cast %617 : vector<128xf32> to vector<1x128xf32>
    %619 = arith.mulf %606, %593 : vector<32x128xf32>
    %cst_183 = arith.constant dense<0.000000e+00> : vector<128xf32>
    %620 = vector.multi_reduction <add>, %619, %cst_183 [0] : vector<32x128xf32> to vector<128xf32>
    %621 = vector.shape_cast %620 : vector<128xf32> to vector<1x128xf32>
    %622 = arith.mulf %612, %593 : vector<32x128xf32>
    %cst_184 = arith.constant dense<0.000000e+00> : vector<128xf32>
    %623 = vector.multi_reduction <add>, %622, %cst_184 [0] : vector<32x128xf32> to vector<128xf32>
    %624 = vector.shape_cast %623 : vector<128xf32> to vector<1x128xf32>
    %625 = arith.mulf %606, %571 : vector<32x128xf32>
    %cst_185 = arith.constant dense<0.000000e+00> : vector<128xf32>
    %626 = vector.multi_reduction <add>, %625, %cst_185 [0] : vector<32x128xf32> to vector<128xf32>
    %627 = vector.shape_cast %626 : vector<128xf32> to vector<1x128xf32>
    %628 = arith.mulf %612, %571 : vector<32x128xf32>
    %cst_186 = arith.constant dense<0.000000e+00> : vector<128xf32>
    %629 = vector.multi_reduction <add>, %628, %cst_186 [0] : vector<32x128xf32> to vector<128xf32>
    %630 = vector.shape_cast %629 : vector<128xf32> to vector<1x128xf32>
    %cst_187 = arith.constant 0.000000e+00 : f32
    %631 = vector.broadcast %cst_187 : f32 to vector<1x128xf32>
    %632 = arith.maximumf %627, %631 : vector<1x128xf32>
    %633 = math.absf %627 : vector<1x128xf32>
    %cst_188 = arith.constant 0.000000e+00 : f32
    %634 = vector.broadcast %cst_188 : f32 to vector<1x128xf32>
    %635 = arith.subf %634, %633 : vector<1x128xf32>
    %636 = math.exp %635 : vector<1x128xf32>
    %cst_189 = arith.constant 1.000000e+00 : f32
    %637 = vector.broadcast %cst_189 : f32 to vector<1x128xf32>
    %638 = arith.addf %637, %636 : vector<1x128xf32>
    %639 = math.log %638 : vector<1x128xf32>
    %640 = arith.addf %632, %639 : vector<1x128xf32>
    %cst_190 = arith.constant 1.000000e-03 : f32
    %641 = vector.broadcast %cst_190 : f32 to vector<1x128xf32>
    %642 = arith.addf %641, %640 : vector<1x128xf32>
    %cst_191 = arith.constant 0.000000e+00 : f32
    %643 = vector.broadcast %cst_191 : f32 to vector<1x128xf32>
    %644 = arith.maximumf %630, %643 : vector<1x128xf32>
    %645 = math.absf %630 : vector<1x128xf32>
    %cst_192 = arith.constant 0.000000e+00 : f32
    %646 = vector.broadcast %cst_192 : f32 to vector<1x128xf32>
    %647 = arith.subf %646, %645 : vector<1x128xf32>
    %648 = math.exp %647 : vector<1x128xf32>
    %cst_193 = arith.constant 1.000000e+00 : f32
    %649 = vector.broadcast %cst_193 : f32 to vector<1x128xf32>
    %650 = arith.addf %649, %648 : vector<1x128xf32>
    %651 = math.log %650 : vector<1x128xf32>
    %652 = arith.addf %644, %651 : vector<1x128xf32>
    %cst_194 = arith.constant 1.000000e-03 : f32
    %653 = vector.broadcast %cst_194 : f32 to vector<1x128xf32>
    %654 = arith.addf %653, %652 : vector<1x128xf32>
    %655 = arith.subf %618, %615 : vector<1x128xf32>
    %656 = arith.subf %624, %621 : vector<1x128xf32>
    %657 = tpu.reciprocal %655 {approx = true} : vector<1x128xf32> -> vector<1x128xf32>
    %658 = arith.mulf %656, %657 : vector<1x128xf32>
    %659 = arith.subf %568, %615 : vector<1x128xf32>
    %660 = arith.mulf %659, %657 : vector<1x128xf32>
    %cst_195 = arith.constant 1.000000e+00 : f32
    %661 = vector.broadcast %cst_195 : f32 to vector<1x128xf32>
    %662 = arith.subf %661, %660 : vector<1x128xf32>
    %663 = arith.mulf %660, %662 : vector<1x128xf32>
    %664 = arith.mulf %658, %660 : vector<1x128xf32>
    %665 = arith.mulf %664, %660 : vector<1x128xf32>
    %666 = arith.mulf %642, %663 : vector<1x128xf32>
    %667 = arith.addf %665, %666 : vector<1x128xf32>
    %668 = arith.mulf %656, %667 : vector<1x128xf32>
    %669 = arith.addf %642, %654 : vector<1x128xf32>
    %cst_196 = arith.constant 2.000000e+00 : f32
    %670 = vector.broadcast %cst_196 : f32 to vector<1x128xf32>
    %671 = arith.mulf %670, %658 : vector<1x128xf32>
    %672 = arith.subf %669, %671 : vector<1x128xf32>
    %673 = arith.mulf %672, %663 : vector<1x128xf32>
    %674 = arith.addf %658, %673 : vector<1x128xf32>
    %675 = tpu.reciprocal %674 {approx = true} : vector<1x128xf32> -> vector<1x128xf32>
    %676 = arith.mulf %668, %675 : vector<1x128xf32>
    %677 = arith.addf %621, %676 : vector<1x128xf32>
    %cst_197 = arith.constant 1.000000e+00 : f32
    %678 = vector.broadcast %cst_197 : f32 to vector<1x128xf32>
    %679 = arith.cmpf oeq, %568, %678 : vector<1x128xf32>
    %cst_198 = arith.constant 1.000000e+00 : f32
    %680 = vector.broadcast %cst_198 : f32 to vector<1x128xf32>
    %681 = arith.select %679, %680, %677 : vector<1x128xi1>, vector<1x128xf32>
    %682 = arith.mulf %567, %681 : vector<1x128xf32>
    %683 = vector.extract_strided_slice %1 {offsets = [5, 0], sizes = [1, 128], strides = [1, 1]} : vector<8x128xf32> to vector<1x128xf32>
    %684 = vector.extract_strided_slice %95 {offsets = [160, 0], sizes = [32, 128], strides = [1, 1]} : vector<256x128xf32> to vector<32x128xf32>
    %685 = vector.extract_strided_slice %98 {offsets = [160, 0], sizes = [32, 128], strides = [1, 1]} : vector<256x128xf32> to vector<32x128xf32>
    %686 = vector.extract_strided_slice %84 {offsets = [672, 0], sizes = [32, 128], strides = [1, 1]} : vector<768x128xf32> to vector<32x128xf32>
    %687 = vector.extract_strided_slice %684 {offsets = [30, 0], sizes = [1, 128], strides = [1, 1]} : vector<32x128xf32> to vector<1x128xf32>
    %cst_199 = arith.constant 1.000000e+00 : f32
    %688 = vector.broadcast %cst_199 : f32 to vector<1x128xf32>
    %689 = arith.divf %688, %687 : vector<1x128xf32>
    %690 = vector.extract_strided_slice %685 {offsets = [30, 0], sizes = [1, 128], strides = [1, 1]} : vector<32x128xf32> to vector<1x128xf32>
    %cst_200 = arith.constant 1.000000e+00 : f32
    %691 = vector.broadcast %cst_200 : f32 to vector<1x128xf32>
    %692 = arith.divf %691, %690 : vector<1x128xf32>
    %cst_201 = arith.constant 9.700000e-01 : f32
    %693 = vector.broadcast %cst_201 : f32 to vector<32x128xf32>
    %694 = arith.mulf %693, %684 : vector<32x128xf32>
    %695 = vector.broadcast %689 : vector<1x128xf32> to vector<32x128xf32>
    %696 = arith.mulf %694, %695 : vector<32x128xf32>
    %697 = arith.addf %102, %696 : vector<32x128xf32>
    %cst_202 = arith.constant 1.000000e+00 : f32
    %698 = vector.broadcast %cst_202 : f32 to vector<32x128xf32>
    %699 = arith.select %106, %698, %697 : vector<32x128xi1>, vector<32x128xf32>
    %cst_203 = arith.constant 1.00000095 : f32
    %700 = vector.broadcast %cst_203 : f32 to vector<32x128xf32>
    %701 = arith.select %106, %700, %699 : vector<32x128xi1>, vector<32x128xf32>
    %cst_204 = arith.constant 9.700000e-01 : f32
    %702 = vector.broadcast %cst_204 : f32 to vector<32x128xf32>
    %703 = arith.mulf %702, %685 : vector<32x128xf32>
    %704 = vector.broadcast %692 : vector<1x128xf32> to vector<32x128xf32>
    %705 = arith.mulf %703, %704 : vector<32x128xf32>
    %706 = arith.addf %104, %705 : vector<32x128xf32>
    %cst_205 = arith.constant 1.000000e+00 : f32
    %707 = vector.broadcast %cst_205 : f32 to vector<32x128xf32>
    %708 = arith.select %106, %707, %706 : vector<32x128xi1>, vector<32x128xf32>
    %709 = vector.broadcast %683 : vector<1x128xf32> to vector<32x128xf32>
    %710 = arith.cmpf oge, %709, %701 : vector<32x128xf32>
    %711 = arith.extui %710 : vector<32x128xi1> to vector<32x128xi32>
    %712 = arith.sitofp %711 : vector<32x128xi32> to vector<32x128xf32>
    %cst_206 = arith.constant dense<0.000000e+00> : vector<128xf32>
    %713 = vector.multi_reduction <add>, %712, %cst_206 [0] : vector<32x128xf32> to vector<128xf32>
    %714 = vector.shape_cast %713 : vector<128xf32> to vector<1x128xf32>
    %715 = arith.fptosi %714 : vector<1x128xf32> to vector<1x128xi32>
    %c1_i32_207 = arith.constant 1 : i32
    %716 = vector.broadcast %c1_i32_207 : i32 to vector<1x128xi32>
    %717 = arith.subi %715, %716 : vector<1x128xi32>
    %718 = vector.broadcast %717 : vector<1x128xi32> to vector<32x128xi32>
    %719 = arith.cmpi eq, %99, %718 : vector<32x128xi32>
    %720 = arith.extui %719 : vector<32x128xi1> to vector<32x128xi32>
    %721 = arith.sitofp %720 : vector<32x128xi32> to vector<32x128xf32>
    %c1_i32_208 = arith.constant 1 : i32
    %722 = vector.broadcast %c1_i32_208 : i32 to vector<1x128xi32>
    %723 = arith.addi %717, %722 : vector<1x128xi32>
    %724 = vector.broadcast %723 : vector<1x128xi32> to vector<32x128xi32>
    %725 = arith.cmpi eq, %99, %724 : vector<32x128xi32>
    %726 = arith.extui %725 : vector<32x128xi1> to vector<32x128xi32>
    %727 = arith.sitofp %726 : vector<32x128xi32> to vector<32x128xf32>
    %728 = arith.mulf %721, %699 : vector<32x128xf32>
    %cst_209 = arith.constant dense<0.000000e+00> : vector<128xf32>
    %729 = vector.multi_reduction <add>, %728, %cst_209 [0] : vector<32x128xf32> to vector<128xf32>
    %730 = vector.shape_cast %729 : vector<128xf32> to vector<1x128xf32>
    %731 = arith.mulf %727, %699 : vector<32x128xf32>
    %cst_210 = arith.constant dense<0.000000e+00> : vector<128xf32>
    %732 = vector.multi_reduction <add>, %731, %cst_210 [0] : vector<32x128xf32> to vector<128xf32>
    %733 = vector.shape_cast %732 : vector<128xf32> to vector<1x128xf32>
    %734 = arith.mulf %721, %708 : vector<32x128xf32>
    %cst_211 = arith.constant dense<0.000000e+00> : vector<128xf32>
    %735 = vector.multi_reduction <add>, %734, %cst_211 [0] : vector<32x128xf32> to vector<128xf32>
    %736 = vector.shape_cast %735 : vector<128xf32> to vector<1x128xf32>
    %737 = arith.mulf %727, %708 : vector<32x128xf32>
    %cst_212 = arith.constant dense<0.000000e+00> : vector<128xf32>
    %738 = vector.multi_reduction <add>, %737, %cst_212 [0] : vector<32x128xf32> to vector<128xf32>
    %739 = vector.shape_cast %738 : vector<128xf32> to vector<1x128xf32>
    %740 = arith.mulf %721, %686 : vector<32x128xf32>
    %cst_213 = arith.constant dense<0.000000e+00> : vector<128xf32>
    %741 = vector.multi_reduction <add>, %740, %cst_213 [0] : vector<32x128xf32> to vector<128xf32>
    %742 = vector.shape_cast %741 : vector<128xf32> to vector<1x128xf32>
    %743 = arith.mulf %727, %686 : vector<32x128xf32>
    %cst_214 = arith.constant dense<0.000000e+00> : vector<128xf32>
    %744 = vector.multi_reduction <add>, %743, %cst_214 [0] : vector<32x128xf32> to vector<128xf32>
    %745 = vector.shape_cast %744 : vector<128xf32> to vector<1x128xf32>
    %cst_215 = arith.constant 0.000000e+00 : f32
    %746 = vector.broadcast %cst_215 : f32 to vector<1x128xf32>
    %747 = arith.maximumf %742, %746 : vector<1x128xf32>
    %748 = math.absf %742 : vector<1x128xf32>
    %cst_216 = arith.constant 0.000000e+00 : f32
    %749 = vector.broadcast %cst_216 : f32 to vector<1x128xf32>
    %750 = arith.subf %749, %748 : vector<1x128xf32>
    %751 = math.exp %750 : vector<1x128xf32>
    %cst_217 = arith.constant 1.000000e+00 : f32
    %752 = vector.broadcast %cst_217 : f32 to vector<1x128xf32>
    %753 = arith.addf %752, %751 : vector<1x128xf32>
    %754 = math.log %753 : vector<1x128xf32>
    %755 = arith.addf %747, %754 : vector<1x128xf32>
    %cst_218 = arith.constant 1.000000e-03 : f32
    %756 = vector.broadcast %cst_218 : f32 to vector<1x128xf32>
    %757 = arith.addf %756, %755 : vector<1x128xf32>
    %cst_219 = arith.constant 0.000000e+00 : f32
    %758 = vector.broadcast %cst_219 : f32 to vector<1x128xf32>
    %759 = arith.maximumf %745, %758 : vector<1x128xf32>
    %760 = math.absf %745 : vector<1x128xf32>
    %cst_220 = arith.constant 0.000000e+00 : f32
    %761 = vector.broadcast %cst_220 : f32 to vector<1x128xf32>
    %762 = arith.subf %761, %760 : vector<1x128xf32>
    %763 = math.exp %762 : vector<1x128xf32>
    %cst_221 = arith.constant 1.000000e+00 : f32
    %764 = vector.broadcast %cst_221 : f32 to vector<1x128xf32>
    %765 = arith.addf %764, %763 : vector<1x128xf32>
    %766 = math.log %765 : vector<1x128xf32>
    %767 = arith.addf %759, %766 : vector<1x128xf32>
    %cst_222 = arith.constant 1.000000e-03 : f32
    %768 = vector.broadcast %cst_222 : f32 to vector<1x128xf32>
    %769 = arith.addf %768, %767 : vector<1x128xf32>
    %770 = arith.subf %733, %730 : vector<1x128xf32>
    %771 = arith.subf %739, %736 : vector<1x128xf32>
    %772 = tpu.reciprocal %770 {approx = true} : vector<1x128xf32> -> vector<1x128xf32>
    %773 = arith.mulf %771, %772 : vector<1x128xf32>
    %774 = arith.subf %683, %730 : vector<1x128xf32>
    %775 = arith.mulf %774, %772 : vector<1x128xf32>
    %cst_223 = arith.constant 1.000000e+00 : f32
    %776 = vector.broadcast %cst_223 : f32 to vector<1x128xf32>
    %777 = arith.subf %776, %775 : vector<1x128xf32>
    %778 = arith.mulf %775, %777 : vector<1x128xf32>
    %779 = arith.mulf %773, %775 : vector<1x128xf32>
    %780 = arith.mulf %779, %775 : vector<1x128xf32>
    %781 = arith.mulf %757, %778 : vector<1x128xf32>
    %782 = arith.addf %780, %781 : vector<1x128xf32>
    %783 = arith.mulf %771, %782 : vector<1x128xf32>
    %784 = arith.addf %757, %769 : vector<1x128xf32>
    %cst_224 = arith.constant 2.000000e+00 : f32
    %785 = vector.broadcast %cst_224 : f32 to vector<1x128xf32>
    %786 = arith.mulf %785, %773 : vector<1x128xf32>
    %787 = arith.subf %784, %786 : vector<1x128xf32>
    %788 = arith.mulf %787, %778 : vector<1x128xf32>
    %789 = arith.addf %773, %788 : vector<1x128xf32>
    %790 = tpu.reciprocal %789 {approx = true} : vector<1x128xf32> -> vector<1x128xf32>
    %791 = arith.mulf %783, %790 : vector<1x128xf32>
    %792 = arith.addf %736, %791 : vector<1x128xf32>
    %cst_225 = arith.constant 1.000000e+00 : f32
    %793 = vector.broadcast %cst_225 : f32 to vector<1x128xf32>
    %794 = arith.cmpf oeq, %683, %793 : vector<1x128xf32>
    %cst_226 = arith.constant 1.000000e+00 : f32
    %795 = vector.broadcast %cst_226 : f32 to vector<1x128xf32>
    %796 = arith.select %794, %795, %792 : vector<1x128xi1>, vector<1x128xf32>
    %797 = arith.mulf %682, %796 : vector<1x128xf32>
    %798 = vector.extract_strided_slice %1 {offsets = [6, 0], sizes = [1, 128], strides = [1, 1]} : vector<8x128xf32> to vector<1x128xf32>
    %799 = vector.extract_strided_slice %95 {offsets = [192, 0], sizes = [32, 128], strides = [1, 1]} : vector<256x128xf32> to vector<32x128xf32>
    %800 = vector.extract_strided_slice %98 {offsets = [192, 0], sizes = [32, 128], strides = [1, 1]} : vector<256x128xf32> to vector<32x128xf32>
    %801 = vector.extract_strided_slice %84 {offsets = [704, 0], sizes = [32, 128], strides = [1, 1]} : vector<768x128xf32> to vector<32x128xf32>
    %802 = vector.extract_strided_slice %799 {offsets = [30, 0], sizes = [1, 128], strides = [1, 1]} : vector<32x128xf32> to vector<1x128xf32>
    %cst_227 = arith.constant 1.000000e+00 : f32
    %803 = vector.broadcast %cst_227 : f32 to vector<1x128xf32>
    %804 = arith.divf %803, %802 : vector<1x128xf32>
    %805 = vector.extract_strided_slice %800 {offsets = [30, 0], sizes = [1, 128], strides = [1, 1]} : vector<32x128xf32> to vector<1x128xf32>
    %cst_228 = arith.constant 1.000000e+00 : f32
    %806 = vector.broadcast %cst_228 : f32 to vector<1x128xf32>
    %807 = arith.divf %806, %805 : vector<1x128xf32>
    %cst_229 = arith.constant 9.700000e-01 : f32
    %808 = vector.broadcast %cst_229 : f32 to vector<32x128xf32>
    %809 = arith.mulf %808, %799 : vector<32x128xf32>
    %810 = vector.broadcast %804 : vector<1x128xf32> to vector<32x128xf32>
    %811 = arith.mulf %809, %810 : vector<32x128xf32>
    %812 = arith.addf %102, %811 : vector<32x128xf32>
    %cst_230 = arith.constant 1.000000e+00 : f32
    %813 = vector.broadcast %cst_230 : f32 to vector<32x128xf32>
    %814 = arith.select %106, %813, %812 : vector<32x128xi1>, vector<32x128xf32>
    %cst_231 = arith.constant 1.00000095 : f32
    %815 = vector.broadcast %cst_231 : f32 to vector<32x128xf32>
    %816 = arith.select %106, %815, %814 : vector<32x128xi1>, vector<32x128xf32>
    %cst_232 = arith.constant 9.700000e-01 : f32
    %817 = vector.broadcast %cst_232 : f32 to vector<32x128xf32>
    %818 = arith.mulf %817, %800 : vector<32x128xf32>
    %819 = vector.broadcast %807 : vector<1x128xf32> to vector<32x128xf32>
    %820 = arith.mulf %818, %819 : vector<32x128xf32>
    %821 = arith.addf %104, %820 : vector<32x128xf32>
    %cst_233 = arith.constant 1.000000e+00 : f32
    %822 = vector.broadcast %cst_233 : f32 to vector<32x128xf32>
    %823 = arith.select %106, %822, %821 : vector<32x128xi1>, vector<32x128xf32>
    %824 = vector.broadcast %798 : vector<1x128xf32> to vector<32x128xf32>
    %825 = arith.cmpf oge, %824, %816 : vector<32x128xf32>
    %826 = arith.extui %825 : vector<32x128xi1> to vector<32x128xi32>
    %827 = arith.sitofp %826 : vector<32x128xi32> to vector<32x128xf32>
    %cst_234 = arith.constant dense<0.000000e+00> : vector<128xf32>
    %828 = vector.multi_reduction <add>, %827, %cst_234 [0] : vector<32x128xf32> to vector<128xf32>
    %829 = vector.shape_cast %828 : vector<128xf32> to vector<1x128xf32>
    %830 = arith.fptosi %829 : vector<1x128xf32> to vector<1x128xi32>
    %c1_i32_235 = arith.constant 1 : i32
    %831 = vector.broadcast %c1_i32_235 : i32 to vector<1x128xi32>
    %832 = arith.subi %830, %831 : vector<1x128xi32>
    %833 = vector.broadcast %832 : vector<1x128xi32> to vector<32x128xi32>
    %834 = arith.cmpi eq, %99, %833 : vector<32x128xi32>
    %835 = arith.extui %834 : vector<32x128xi1> to vector<32x128xi32>
    %836 = arith.sitofp %835 : vector<32x128xi32> to vector<32x128xf32>
    %c1_i32_236 = arith.constant 1 : i32
    %837 = vector.broadcast %c1_i32_236 : i32 to vector<1x128xi32>
    %838 = arith.addi %832, %837 : vector<1x128xi32>
    %839 = vector.broadcast %838 : vector<1x128xi32> to vector<32x128xi32>
    %840 = arith.cmpi eq, %99, %839 : vector<32x128xi32>
    %841 = arith.extui %840 : vector<32x128xi1> to vector<32x128xi32>
    %842 = arith.sitofp %841 : vector<32x128xi32> to vector<32x128xf32>
    %843 = arith.mulf %836, %814 : vector<32x128xf32>
    %cst_237 = arith.constant dense<0.000000e+00> : vector<128xf32>
    %844 = vector.multi_reduction <add>, %843, %cst_237 [0] : vector<32x128xf32> to vector<128xf32>
    %845 = vector.shape_cast %844 : vector<128xf32> to vector<1x128xf32>
    %846 = arith.mulf %842, %814 : vector<32x128xf32>
    %cst_238 = arith.constant dense<0.000000e+00> : vector<128xf32>
    %847 = vector.multi_reduction <add>, %846, %cst_238 [0] : vector<32x128xf32> to vector<128xf32>
    %848 = vector.shape_cast %847 : vector<128xf32> to vector<1x128xf32>
    %849 = arith.mulf %836, %823 : vector<32x128xf32>
    %cst_239 = arith.constant dense<0.000000e+00> : vector<128xf32>
    %850 = vector.multi_reduction <add>, %849, %cst_239 [0] : vector<32x128xf32> to vector<128xf32>
    %851 = vector.shape_cast %850 : vector<128xf32> to vector<1x128xf32>
    %852 = arith.mulf %842, %823 : vector<32x128xf32>
    %cst_240 = arith.constant dense<0.000000e+00> : vector<128xf32>
    %853 = vector.multi_reduction <add>, %852, %cst_240 [0] : vector<32x128xf32> to vector<128xf32>
    %854 = vector.shape_cast %853 : vector<128xf32> to vector<1x128xf32>
    %855 = arith.mulf %836, %801 : vector<32x128xf32>
    %cst_241 = arith.constant dense<0.000000e+00> : vector<128xf32>
    %856 = vector.multi_reduction <add>, %855, %cst_241 [0] : vector<32x128xf32> to vector<128xf32>
    %857 = vector.shape_cast %856 : vector<128xf32> to vector<1x128xf32>
    %858 = arith.mulf %842, %801 : vector<32x128xf32>
    %cst_242 = arith.constant dense<0.000000e+00> : vector<128xf32>
    %859 = vector.multi_reduction <add>, %858, %cst_242 [0] : vector<32x128xf32> to vector<128xf32>
    %860 = vector.shape_cast %859 : vector<128xf32> to vector<1x128xf32>
    %cst_243 = arith.constant 0.000000e+00 : f32
    %861 = vector.broadcast %cst_243 : f32 to vector<1x128xf32>
    %862 = arith.maximumf %857, %861 : vector<1x128xf32>
    %863 = math.absf %857 : vector<1x128xf32>
    %cst_244 = arith.constant 0.000000e+00 : f32
    %864 = vector.broadcast %cst_244 : f32 to vector<1x128xf32>
    %865 = arith.subf %864, %863 : vector<1x128xf32>
    %866 = math.exp %865 : vector<1x128xf32>
    %cst_245 = arith.constant 1.000000e+00 : f32
    %867 = vector.broadcast %cst_245 : f32 to vector<1x128xf32>
    %868 = arith.addf %867, %866 : vector<1x128xf32>
    %869 = math.log %868 : vector<1x128xf32>
    %870 = arith.addf %862, %869 : vector<1x128xf32>
    %cst_246 = arith.constant 1.000000e-03 : f32
    %871 = vector.broadcast %cst_246 : f32 to vector<1x128xf32>
    %872 = arith.addf %871, %870 : vector<1x128xf32>
    %cst_247 = arith.constant 0.000000e+00 : f32
    %873 = vector.broadcast %cst_247 : f32 to vector<1x128xf32>
    %874 = arith.maximumf %860, %873 : vector<1x128xf32>
    %875 = math.absf %860 : vector<1x128xf32>
    %cst_248 = arith.constant 0.000000e+00 : f32
    %876 = vector.broadcast %cst_248 : f32 to vector<1x128xf32>
    %877 = arith.subf %876, %875 : vector<1x128xf32>
    %878 = math.exp %877 : vector<1x128xf32>
    %cst_249 = arith.constant 1.000000e+00 : f32
    %879 = vector.broadcast %cst_249 : f32 to vector<1x128xf32>
    %880 = arith.addf %879, %878 : vector<1x128xf32>
    %881 = math.log %880 : vector<1x128xf32>
    %882 = arith.addf %874, %881 : vector<1x128xf32>
    %cst_250 = arith.constant 1.000000e-03 : f32
    %883 = vector.broadcast %cst_250 : f32 to vector<1x128xf32>
    %884 = arith.addf %883, %882 : vector<1x128xf32>
    %885 = arith.subf %848, %845 : vector<1x128xf32>
    %886 = arith.subf %854, %851 : vector<1x128xf32>
    %887 = tpu.reciprocal %885 {approx = true} : vector<1x128xf32> -> vector<1x128xf32>
    %888 = arith.mulf %886, %887 : vector<1x128xf32>
    %889 = arith.subf %798, %845 : vector<1x128xf32>
    %890 = arith.mulf %889, %887 : vector<1x128xf32>
    %cst_251 = arith.constant 1.000000e+00 : f32
    %891 = vector.broadcast %cst_251 : f32 to vector<1x128xf32>
    %892 = arith.subf %891, %890 : vector<1x128xf32>
    %893 = arith.mulf %890, %892 : vector<1x128xf32>
    %894 = arith.mulf %888, %890 : vector<1x128xf32>
    %895 = arith.mulf %894, %890 : vector<1x128xf32>
    %896 = arith.mulf %872, %893 : vector<1x128xf32>
    %897 = arith.addf %895, %896 : vector<1x128xf32>
    %898 = arith.mulf %886, %897 : vector<1x128xf32>
    %899 = arith.addf %872, %884 : vector<1x128xf32>
    %cst_252 = arith.constant 2.000000e+00 : f32
    %900 = vector.broadcast %cst_252 : f32 to vector<1x128xf32>
    %901 = arith.mulf %900, %888 : vector<1x128xf32>
    %902 = arith.subf %899, %901 : vector<1x128xf32>
    %903 = arith.mulf %902, %893 : vector<1x128xf32>
    %904 = arith.addf %888, %903 : vector<1x128xf32>
    %905 = tpu.reciprocal %904 {approx = true} : vector<1x128xf32> -> vector<1x128xf32>
    %906 = arith.mulf %898, %905 : vector<1x128xf32>
    %907 = arith.addf %851, %906 : vector<1x128xf32>
    %cst_253 = arith.constant 1.000000e+00 : f32
    %908 = vector.broadcast %cst_253 : f32 to vector<1x128xf32>
    %909 = arith.cmpf oeq, %798, %908 : vector<1x128xf32>
    %cst_254 = arith.constant 1.000000e+00 : f32
    %910 = vector.broadcast %cst_254 : f32 to vector<1x128xf32>
    %911 = arith.select %909, %910, %907 : vector<1x128xi1>, vector<1x128xf32>
    %912 = arith.mulf %797, %911 : vector<1x128xf32>
    %913 = vector.extract_strided_slice %1 {offsets = [7, 0], sizes = [1, 128], strides = [1, 1]} : vector<8x128xf32> to vector<1x128xf32>
    %914 = vector.extract_strided_slice %95 {offsets = [224, 0], sizes = [32, 128], strides = [1, 1]} : vector<256x128xf32> to vector<32x128xf32>
    %915 = vector.extract_strided_slice %98 {offsets = [224, 0], sizes = [32, 128], strides = [1, 1]} : vector<256x128xf32> to vector<32x128xf32>
    %916 = vector.extract_strided_slice %84 {offsets = [736, 0], sizes = [32, 128], strides = [1, 1]} : vector<768x128xf32> to vector<32x128xf32>
    %917 = vector.extract_strided_slice %914 {offsets = [30, 0], sizes = [1, 128], strides = [1, 1]} : vector<32x128xf32> to vector<1x128xf32>
    %cst_255 = arith.constant 1.000000e+00 : f32
    %918 = vector.broadcast %cst_255 : f32 to vector<1x128xf32>
    %919 = arith.divf %918, %917 : vector<1x128xf32>
    %920 = vector.extract_strided_slice %915 {offsets = [30, 0], sizes = [1, 128], strides = [1, 1]} : vector<32x128xf32> to vector<1x128xf32>
    %cst_256 = arith.constant 1.000000e+00 : f32
    %921 = vector.broadcast %cst_256 : f32 to vector<1x128xf32>
    %922 = arith.divf %921, %920 : vector<1x128xf32>
    %cst_257 = arith.constant 9.700000e-01 : f32
    %923 = vector.broadcast %cst_257 : f32 to vector<32x128xf32>
    %924 = arith.mulf %923, %914 : vector<32x128xf32>
    %925 = vector.broadcast %919 : vector<1x128xf32> to vector<32x128xf32>
    %926 = arith.mulf %924, %925 : vector<32x128xf32>
    %927 = arith.addf %102, %926 : vector<32x128xf32>
    %cst_258 = arith.constant 1.000000e+00 : f32
    %928 = vector.broadcast %cst_258 : f32 to vector<32x128xf32>
    %929 = arith.select %106, %928, %927 : vector<32x128xi1>, vector<32x128xf32>
    %cst_259 = arith.constant 1.00000095 : f32
    %930 = vector.broadcast %cst_259 : f32 to vector<32x128xf32>
    %931 = arith.select %106, %930, %929 : vector<32x128xi1>, vector<32x128xf32>
    %cst_260 = arith.constant 9.700000e-01 : f32
    %932 = vector.broadcast %cst_260 : f32 to vector<32x128xf32>
    %933 = arith.mulf %932, %915 : vector<32x128xf32>
    %934 = vector.broadcast %922 : vector<1x128xf32> to vector<32x128xf32>
    %935 = arith.mulf %933, %934 : vector<32x128xf32>
    %936 = arith.addf %104, %935 : vector<32x128xf32>
    %cst_261 = arith.constant 1.000000e+00 : f32
    %937 = vector.broadcast %cst_261 : f32 to vector<32x128xf32>
    %938 = arith.select %106, %937, %936 : vector<32x128xi1>, vector<32x128xf32>
    %939 = vector.broadcast %913 : vector<1x128xf32> to vector<32x128xf32>
    %940 = arith.cmpf oge, %939, %931 : vector<32x128xf32>
    %941 = arith.extui %940 : vector<32x128xi1> to vector<32x128xi32>
    %942 = arith.sitofp %941 : vector<32x128xi32> to vector<32x128xf32>
    %cst_262 = arith.constant dense<0.000000e+00> : vector<128xf32>
    %943 = vector.multi_reduction <add>, %942, %cst_262 [0] : vector<32x128xf32> to vector<128xf32>
    %944 = vector.shape_cast %943 : vector<128xf32> to vector<1x128xf32>
    %945 = arith.fptosi %944 : vector<1x128xf32> to vector<1x128xi32>
    %c1_i32_263 = arith.constant 1 : i32
    %946 = vector.broadcast %c1_i32_263 : i32 to vector<1x128xi32>
    %947 = arith.subi %945, %946 : vector<1x128xi32>
    %948 = vector.broadcast %947 : vector<1x128xi32> to vector<32x128xi32>
    %949 = arith.cmpi eq, %99, %948 : vector<32x128xi32>
    %950 = arith.extui %949 : vector<32x128xi1> to vector<32x128xi32>
    %951 = arith.sitofp %950 : vector<32x128xi32> to vector<32x128xf32>
    %c1_i32_264 = arith.constant 1 : i32
    %952 = vector.broadcast %c1_i32_264 : i32 to vector<1x128xi32>
    %953 = arith.addi %947, %952 : vector<1x128xi32>
    %954 = vector.broadcast %953 : vector<1x128xi32> to vector<32x128xi32>
    %955 = arith.cmpi eq, %99, %954 : vector<32x128xi32>
    %956 = arith.extui %955 : vector<32x128xi1> to vector<32x128xi32>
    %957 = arith.sitofp %956 : vector<32x128xi32> to vector<32x128xf32>
    %958 = arith.mulf %951, %929 : vector<32x128xf32>
    %cst_265 = arith.constant dense<0.000000e+00> : vector<128xf32>
    %959 = vector.multi_reduction <add>, %958, %cst_265 [0] : vector<32x128xf32> to vector<128xf32>
    %960 = vector.shape_cast %959 : vector<128xf32> to vector<1x128xf32>
    %961 = arith.mulf %957, %929 : vector<32x128xf32>
    %cst_266 = arith.constant dense<0.000000e+00> : vector<128xf32>
    %962 = vector.multi_reduction <add>, %961, %cst_266 [0] : vector<32x128xf32> to vector<128xf32>
    %963 = vector.shape_cast %962 : vector<128xf32> to vector<1x128xf32>
    %964 = arith.mulf %951, %938 : vector<32x128xf32>
    %cst_267 = arith.constant dense<0.000000e+00> : vector<128xf32>
    %965 = vector.multi_reduction <add>, %964, %cst_267 [0] : vector<32x128xf32> to vector<128xf32>
    %966 = vector.shape_cast %965 : vector<128xf32> to vector<1x128xf32>
    %967 = arith.mulf %957, %938 : vector<32x128xf32>
    %cst_268 = arith.constant dense<0.000000e+00> : vector<128xf32>
    %968 = vector.multi_reduction <add>, %967, %cst_268 [0] : vector<32x128xf32> to vector<128xf32>
    %969 = vector.shape_cast %968 : vector<128xf32> to vector<1x128xf32>
    %970 = arith.mulf %951, %916 : vector<32x128xf32>
    %cst_269 = arith.constant dense<0.000000e+00> : vector<128xf32>
    %971 = vector.multi_reduction <add>, %970, %cst_269 [0] : vector<32x128xf32> to vector<128xf32>
    %972 = vector.shape_cast %971 : vector<128xf32> to vector<1x128xf32>
    %973 = arith.mulf %957, %916 : vector<32x128xf32>
    %cst_270 = arith.constant dense<0.000000e+00> : vector<128xf32>
    %974 = vector.multi_reduction <add>, %973, %cst_270 [0] : vector<32x128xf32> to vector<128xf32>
    %975 = vector.shape_cast %974 : vector<128xf32> to vector<1x128xf32>
    %cst_271 = arith.constant 0.000000e+00 : f32
    %976 = vector.broadcast %cst_271 : f32 to vector<1x128xf32>
    %977 = arith.maximumf %972, %976 : vector<1x128xf32>
    %978 = math.absf %972 : vector<1x128xf32>
    %cst_272 = arith.constant 0.000000e+00 : f32
    %979 = vector.broadcast %cst_272 : f32 to vector<1x128xf32>
    %980 = arith.subf %979, %978 : vector<1x128xf32>
    %981 = math.exp %980 : vector<1x128xf32>
    %cst_273 = arith.constant 1.000000e+00 : f32
    %982 = vector.broadcast %cst_273 : f32 to vector<1x128xf32>
    %983 = arith.addf %982, %981 : vector<1x128xf32>
    %984 = math.log %983 : vector<1x128xf32>
    %985 = arith.addf %977, %984 : vector<1x128xf32>
    %cst_274 = arith.constant 1.000000e-03 : f32
    %986 = vector.broadcast %cst_274 : f32 to vector<1x128xf32>
    %987 = arith.addf %986, %985 : vector<1x128xf32>
    %cst_275 = arith.constant 0.000000e+00 : f32
    %988 = vector.broadcast %cst_275 : f32 to vector<1x128xf32>
    %989 = arith.maximumf %975, %988 : vector<1x128xf32>
    %990 = math.absf %975 : vector<1x128xf32>
    %cst_276 = arith.constant 0.000000e+00 : f32
    %991 = vector.broadcast %cst_276 : f32 to vector<1x128xf32>
    %992 = arith.subf %991, %990 : vector<1x128xf32>
    %993 = math.exp %992 : vector<1x128xf32>
    %cst_277 = arith.constant 1.000000e+00 : f32
    %994 = vector.broadcast %cst_277 : f32 to vector<1x128xf32>
    %995 = arith.addf %994, %993 : vector<1x128xf32>
    %996 = math.log %995 : vector<1x128xf32>
    %997 = arith.addf %989, %996 : vector<1x128xf32>
    %cst_278 = arith.constant 1.000000e-03 : f32
    %998 = vector.broadcast %cst_278 : f32 to vector<1x128xf32>
    %999 = arith.addf %998, %997 : vector<1x128xf32>
    %1000 = arith.subf %963, %960 : vector<1x128xf32>
    %1001 = arith.subf %969, %966 : vector<1x128xf32>
    %1002 = tpu.reciprocal %1000 {approx = true} : vector<1x128xf32> -> vector<1x128xf32>
    %1003 = arith.mulf %1001, %1002 : vector<1x128xf32>
    %1004 = arith.subf %913, %960 : vector<1x128xf32>
    %1005 = arith.mulf %1004, %1002 : vector<1x128xf32>
    %cst_279 = arith.constant 1.000000e+00 : f32
    %1006 = vector.broadcast %cst_279 : f32 to vector<1x128xf32>
    %1007 = arith.subf %1006, %1005 : vector<1x128xf32>
    %1008 = arith.mulf %1005, %1007 : vector<1x128xf32>
    %1009 = arith.mulf %1003, %1005 : vector<1x128xf32>
    %1010 = arith.mulf %1009, %1005 : vector<1x128xf32>
    %1011 = arith.mulf %987, %1008 : vector<1x128xf32>
    %1012 = arith.addf %1010, %1011 : vector<1x128xf32>
    %1013 = arith.mulf %1001, %1012 : vector<1x128xf32>
    %1014 = arith.addf %987, %999 : vector<1x128xf32>
    %cst_280 = arith.constant 2.000000e+00 : f32
    %1015 = vector.broadcast %cst_280 : f32 to vector<1x128xf32>
    %1016 = arith.mulf %1015, %1003 : vector<1x128xf32>
    %1017 = arith.subf %1014, %1016 : vector<1x128xf32>
    %1018 = arith.mulf %1017, %1008 : vector<1x128xf32>
    %1019 = arith.addf %1003, %1018 : vector<1x128xf32>
    %1020 = tpu.reciprocal %1019 {approx = true} : vector<1x128xf32> -> vector<1x128xf32>
    %1021 = arith.mulf %1013, %1020 : vector<1x128xf32>
    %1022 = arith.addf %966, %1021 : vector<1x128xf32>
    %cst_281 = arith.constant 1.000000e+00 : f32
    %1023 = vector.broadcast %cst_281 : f32 to vector<1x128xf32>
    %1024 = arith.cmpf oeq, %913, %1023 : vector<1x128xf32>
    %cst_282 = arith.constant 1.000000e+00 : f32
    %1025 = vector.broadcast %cst_282 : f32 to vector<1x128xf32>
    %1026 = arith.select %1024, %1025, %1022 : vector<1x128xi1>, vector<1x128xf32>
    %1027 = arith.mulf %912, %1026 : vector<1x128xf32>
    %1028 = vector.shape_cast %1027 : vector<1x128xf32> to vector<1x1x128xf32>
    %c0_283 = arith.constant 0 : index
    %c0_284 = arith.constant 0 : index
    %c0_285 = arith.constant 0 : index
    %1029 = vector.load %arg7[%c0_283, %c0_284, %c0_285] : memref<1x1x128xf32, #tpu.memory_space<vmem>>, vector<1x1x128xf32>
    tpu.vector_store %arg7[%c0_283, %c0_284, %c0_285], %1028 {strides = array<i32>} : memref<1x1x128xf32, #tpu.memory_space<vmem>>, vector<1x1x128xf32>,
    return
  }
  func.func @transform_0(%arg0: i32) -> (i32, i32) {
    %c0_i32 = arith.constant 0 : i32
    %c0_i32_0 = arith.constant 0 : i32
    return %c0_i32, %arg0 : i32, i32
  }
  func.func @transform_1(%arg0: i32) -> (i32, i32) {
    %c0_i32 = arith.constant 0 : i32
    %c0_i32_0 = arith.constant 0 : i32
    %c0_i32_1 = arith.constant 0 : i32
    return %c0_i32, %c0_i32_0 : i32, i32
  }
  func.func @transform_2(%arg0: i32) -> (i32, i32) {
    %c0_i32 = arith.constant 0 : i32
    %c0_i32_0 = arith.constant 0 : i32
    %c0_i32_1 = arith.constant 0 : i32
    return %c0_i32, %c0_i32_0 : i32, i32
  }
  func.func @transform_3(%arg0: i32) -> (i32, i32) {
    %c0_i32 = arith.constant 0 : i32
    %c0_i32_0 = arith.constant 0 : i32
    %c0_i32_1 = arith.constant 0 : i32
    return %c0_i32, %c0_i32_0 : i32, i32
  }
  func.func @transform_4(%arg0: i32) -> (i32, i32) {
    %c0_i32 = arith.constant 0 : i32
    %c0_i32_0 = arith.constant 0 : i32
    %c0_i32_1 = arith.constant 0 : i32
    return %c0_i32, %c0_i32_0 : i32, i32
  }
  func.func @transform_5(%arg0: i32) -> (i32, i32) {
    %c0_i32 = arith.constant 0 : i32
    %c0_i32_0 = arith.constant 0 : i32
    %c0_i32_1 = arith.constant 0 : i32
    return %c0_i32, %c0_i32_0 : i32, i32
  }
  func.func @transform_6(%arg0: i32) -> (i32, i32, i32) {
    %c0_i32 = arith.constant 0 : i32
    %c0_i32_0 = arith.constant 0 : i32
    %c0_i32_1 = arith.constant 0 : i32
    return %arg0, %c0_i32, %c0_i32_0 : i32, i32, i32
  }
}

</mosaic_0001>

<bundles_post_ra>
// kernel: tpu_custom_call.1
= control target key start
LH: loop header
LB: loop body
LE: loop exit
PB: predicated region body
PF: predicated region fallthrough
CT: control target
= control target key end

     0   :  { %11 = vsyncpa [#allocation4], 0  ;;  %s10671_s0 = inlined_call_operand.vmem [shape: f32[40,256], index: 0, kind: input, shape index: {}]   ;;  %s10672_s1 = inlined_call_operand.vmem [shape: f32[128,40], index: 1, kind: input, shape index: {}]   ;;  %s10673_s2 = inlined_call_operand.vmem [shape: f32[128,1], index: 2, kind: input, shape index: {}]   ;;  %s10674_s3 = inlined_call_operand.vmem [shape: f32[960,32], index: 3, kind: input, shape index: {}]   ;;  %s10675_s4 = inlined_call_operand.vmem [shape: f32[960,1], index: 4, kind: input, shape index: {}]   ;;  %s10676_s5 = inlined_call_operand.vmem [shape: f32[256,256], index: 5, kind: input, shape index: {}]   ;;  %s10677_s6 = inlined_call_operand.hbm [shape: f32[2,1,128], index: 6, kind: output, shape index: {}]  }
   0x1   :  { %13 = vsyncpa [#allocation4 + $0x1], 0  ;;  %s6132_s21 = smov 0   ;;  %s6134_s22 = smov 0  }
   0x2   :  { %s6136_s23 = smov 0   ;;  %s6138_s24 = smov 0  }
   0x3 LB: > { %s5336_s25 = sadd.s32 4294967295, %s6093_s24   ;;  %s5337_s26 = sadd.s32 4294967294, %s6093_s24   ;;  %s6093_s24 = sphi %s6138_s24, %s11404_s24   ;;  %s6089_s23 = sphi %s6136_s23, %s11403_s23   ;;  %s6085_s22 = sphi %s6134_s22, %s11402_s22   ;;  %s6081_s21 = sphi %s6132_s21, %s11401_s21  }
   0x4   : > { %s6155_s27 = sadd.s32 1, %s6093_s24   ;;  %s26_s28 = sadd.s32 1, %s6089_s23 }
   0x5   : > { %s23_s29 = ssub.s32 %s6093_s24, %s6155_s27  ;;  %p33_p0 = scmp.ne.s32.totalorder %s6089_s23, %s6085_s22 }
   0x6   : > { %p24_p1 = scmp.eq.s32.totalorder %s23_s29, 0  ;;  %p34_p2 = scmp.eq.s32.totalorder %s6093_s24, 0 }
   0x7   : > { %p168_p3 = scmp.eq.s32.totalorder %s5336_s25, 1  ;;  %p173_p4 = scmp.ne.s32.totalorder %s6085_s22, %s6081_s21 }
   0x8   : > { %s6168_s30 = scalar_select %p24_p1, %s6089_s23, %s26_s28  }
   0x9   : > { %p35_p5 = por %p34_p2, %p33_p0  ;;  %p6170_p6 = por %p168_p3, %p33_p0 }
   0xa   : > { %p174_p7 = scmp.eq.s32.totalorder %s5337_s26, 1  ;;  %p5339_p9 = scmp.ge.s32.totalorder %s6093_s24, 2 }
   0xc   : > { %p6174_p8 = por %p174_p7, %p173_p4  ;;  %205 = sbr.rel (%p5339_p9) target bundleno = 26 (0x1a), region = 36 }
  0x11   : > { %208 = sbr.rel (!%p35_p5) target bundleno = 26 (0x1a), region = 40  ;;  %s210_s9 = sand.u32 (%p35_p5), 1, %s6089_s23  }
  0x12   : > { %s5340_s10 = sshll.u32 (%p35_p5), %s6093_s24, 3  ;;  %s5608_s11 = smul.u32 (%p35_p5), 40, %s210_s9 }
  0x13   : > { %s214_s14 = scalar_lea.vmem (%p35_p5), %s10671_s0, %s5340_s10 }
  0x14   : > { %v251_v0 = vld [vmem:[%s214_s14] sm:$0xff] (%p35_p5)  ;;  %v253_v1 = vld [vmem:[%s214_s14 + $0x10] sm:$0xff] (%p35_p5)  ;;  %s212_s15 = scalar_lea.vmem (%p35_p5), [#allocation2], %s5608_s11 }
  0x15   : > { %v255_v2 = vld [vmem:[%s214_s14 + $0x20] sm:$0xff] (%p35_p5)  ;;  %252 = vst [vmem:[%s212_s15] sm:$0xff] (%p35_p5), %v251_v0  ;;  %v257_v3 = vld [vmem:[%s214_s14 + $0x30] sm:$0xff] (%p35_p5) }
  0x16   : > { %254 = vst [vmem:[%s212_s15 + $0x8] sm:$0xff] %v253_v1  ;;  %v259_v4 = vld [vmem:[%s214_s14 + $0x40] sm:$0xff] }
  0x17   : > { %256 = vst [vmem:[%s212_s15 + $0x10] sm:$0xff] %v255_v2 }
  0x18   : > { %258 = vst [vmem:[%s212_s15 + $0x18] sm:$0xff] %v257_v3 }
  0x19   : > { %260 = vst [vmem:[%s212_s15 + $0x20] sm:$0xff] %v259_v4 }
  0x1a PF: > { %p5341_p10 = scmp.ge.s32.totalorder %s6093_s24, 1  ;;  %p265_p11 = scmp.lt.s32.totalorder %s6093_s24, 3 }
  0x1c   : > { %p266_p12 = pnand %p5341_p10, %p265_p11 }
  0x1e   : > { %269 = sbr.rel (%p266_p12) target bundleno = 2534 (0x9e6), region = 78 }
  0x23   : > { %v542_v5 = vld [vmem:[%s10675_s4 + $0x18] sm:$0xff]  ;;  %v322_v7 = vld [vmem:[%s10673_s2 + $0x8] sm:$0xff]  ;;  %s6198_s28 = sand.u32 1, %s6085_s22   ;;  %v6095_v8 = vmov 0   ;;  %v541_v12 = vld [vmem:[%s10675_s4 + $0x10] sm:$0xff]  ;;  %vm417_vm0 = vcmask 326656   ;;  %s5272_s20 = scalar_lea.hbm %s10677_s6, %s5336_s25 }
  0x24   : > { %v324_v6 = vld [vmem:[%s10673_s2 + $0x18] sm:$0xff]  ;;  %5693 = vset.pattern.permute.xlu2 %v6095_v8  ;;  %5692 = vset.pattern.permute.xlu1 %v6095_v8  ;;  %s5609_s29 = smul.u32 40, %s6198_s28  ;;  %v323_v13 = vld [vmem:[%s10673_s2 + $0x10] sm:$0xff]  ;;  %v321_v14 = vld [vmem:[%s10673_s2] sm:$0xff]  ;;  %vm563_vm1 = vcmask 261120   ;;  %s299_s26 = scalar_lea.vmem [#allocation3], %s6198_s28 }
  0x25   : > { %5691 = vset.pattern.permute.xlu0 %v6095_v8  ;;  %560 = vperm.xlu2 %5693, %v542_v5   ;;  %v305_v17 = vld [vmem:[%s10672_s1] sm:$0xff]  ;;  %v328_v18 = vld [vmem:[%s10673_s2 + $0x38] sm:$0xff]  ;;  %v540_v19 = vld [vmem:[%s10675_s4 + $0x8] sm:$0xff]  ;;  %s5276_s10 = sshll.u32 %s5272_s20, 4  ;;  %s5264_s11 = scalar_lea.sflag [#allocation4], %s6198_s28  ;;  %s5277_s10 = int_to_ptr.hbm [resolvable:$true] %s5276_s10 }
  0x26   : > { %354 = vperm.xlu0 %5691, %v324_v6   ;;  %344 = vperm.xlu1 %5692, %v322_v7   ;;  %s6201_s9 = scalar_lea.vmem [#allocation2], %s5609_s29  ;;  %v539_v20 = vld [vmem:[%s10675_s4] sm:$0xff]  ;;  %v306_v21 = vld [vmem:[%s10672_s1 + $0x8] sm:$0xff]  ;;  %v327_v23 = vld [vmem:[%s10673_s2 + $0x30] sm:$0xff]  ;;  %s5274_s29 = sshll.u32 %s299_s26, 4  ;;  %s5275_s29 = int_to_ptr.vmem [resolvable:$true] %s5274_s29 }
  0x27   : > { %v304_v9 = vld [vmem:[%s6201_s9 + $0x20] sm:$0xff]  ;;  %v303_v10 = vld [vmem:[%s6201_s9 + $0x18] sm:$0xff]  ;;  %v302_v11 = vld [vmem:[%s6201_s9 + $0x10] sm:$0xff]  ;;  %s6045_s12 = sshra.s32 %s5277_s10, 4  ;;  %s6051_s15 = scalar_lea.hbm %s10677_s6, 2  ;;  %s6046_s12 = int_to_ptr.hbm [resolvable:$true] %s6045_s12 }
  0x28   : > { %477 = vmatpush.msra.mxu0 %v304_v9  ;;  %v301_v15 = vld [vmem:[%s6201_s9 + $0x8] sm:$0xff]  ;;  %v300_v16 = vld [vmem:[%s6201_s9] sm:$0xff]  ;;  %v616_v27 = vld [vmem:[%s10675_s4 + $0x38] sm:$0xff]  ;;  %s6047_s13 = scalar_lea.hbm %s6046_s12, 1  ;;  %p6052_p2 = scmp.lt.s32.totalorder %s6046_s12, %s10677_s6 }
  0x29   : > { %v325_v22 = vld [vmem:[%s10673_s2 + $0x20] sm:$0xff]  ;;  %v326_v24 = vld [vmem:[%s10673_s2 + $0x28] sm:$0xff]  ;;  %v307_v25 = vld [vmem:[%s10672_s1 + $0x10] sm:$0xff]  ;;  %p6048_p13 = scmp.ne.s32.totalorder %s6046_s12, %s6047_s13  ;;  %p6053_p3 = scmp.lt.s32.totalorder %s6051_s15, %s6047_s13 }
  0x2a   : > { %478 = vmatpush.msra.mxu0 %v303_v10  ;;  %v614_v26 = vld [vmem:[%s10675_s4 + $0x28] sm:$0xff]  ;;  %v615_v28 = vld [vmem:[%s10675_s4 + $0x30] sm:$0xff]  ;;  %v308_v29 = vld [vmem:[%s10672_s1 + $0x18] sm:$0xff] }
  0x2b   : > { %v772_v30 = vld [vmem:[%s10675_s4 + $0x50] sm:$0xff]  ;;  %v613_v31 = vld [vmem:[%s10675_s4 + $0x20] sm:$0xff]  ;;  %v773_v32 = vld [vmem:[%s10675_s4 + $0x58] sm:$0xff]  ;;  %p6049_p0 = pnand %p6048_p13, %p6170_p6  ;;  %p6054_p4 = por %p6053_p3, %p6052_p2 }
  0x2c   : > { %479 = vmatpush.msra.mxu0 %v302_v11  ;;  %v309_v33 = vld [vmem:[%s10672_s1 + $0x20] sm:$0xff]  ;;  %v332_v34 = vld [vmem:[%s10673_s2 + $0x58] sm:$0xff]  ;;  %v771_v35 = vld [vmem:[%s10675_s4 + $0x48] sm:$0xff] }
  0x2d   : > { %555 = vperm.xlu2 %5693, %v541_v12   ;;  %v770_v36 = vld [vmem:[%s10675_s4 + $0x40] sm:$0xff]  ;;  %v310_v37 = vld [vmem:[%s10672_s1 + $0x28] sm:$0xff]  ;;  %v331_v39 = vld [vmem:[%s10673_s2 + $0x50] sm:$0xff]  ;;  %p6050_p1 = pneg %p6049_p0 }
  0x2e   : > { %349 = vperm.xlu0 %5691, %v323_v13   ;;  %339 = vperm.xlu1 %5692, %v321_v14   ;;  %v329_v38 = vld [vmem:[%s10673_s2 + $0x40] sm:$0xff]  ;;  %v330_v40 = vld [vmem:[%s10673_s2 + $0x48] sm:$0xff]  ;;  %v311_v41 = vld [vmem:[%s10672_s1 + $0x30] sm:$0xff] }
  0x2f   : > { %480 = vmatpush.msra.mxu0 %v301_v15  ;;  %v844_v42 = vld [vmem:[%s10675_s4 + $0x68] sm:$0xff]  ;;  %v846_v43 = vld [vmem:[%s10675_s4 + $0x78] sm:$0xff]  ;;  %v845_v44 = vld [vmem:[%s10675_s4 + $0x70] sm:$0xff]  ;;  %p6055_p5 = pnand %p6054_p4, %p6050_p1 }
  0x30   : > { %v312_v45 = vld [vmem:[%s10672_s1 + $0x38] sm:$0xff]  ;;  %v1002_v46 = vld [vmem:[%s10675_s4 + $0x90] sm:$0xff]  ;;  %v843_v47 = vld [vmem:[%s10675_s4 + $0x60] sm:$0xff] }
  0x31   : > { %481 = vmatpush.msra.mxu0 %v300_v16  ;;  %v1003_v48 = vld [vmem:[%s10675_s4 + $0x98] sm:$0xff]  ;;  %v313_v49 = vld [vmem:[%s10672_s1 + $0x40] sm:$0xff]  ;;  %v1001_v51 = vld [vmem:[%s10675_s4 + $0x88] sm:$0xff] }
  0x32   : > { %5342 = vmatmul.msk.f32.vlgmr.msra.gmra.mxu0 %vm417_vm0, %v305_v17  ;;  %v336_v50 = vld [vmem:[%s10673_s2 + $0x78] sm:$0xff]  ;;  %v1000_v52 = vld [vmem:[%s10675_s4 + $0x80] sm:$0xff]  ;;  %v314_v53 = vld [vmem:[%s10672_s1 + $0x48] sm:$0xff] }
  0x33   : > { %v333_v54 = vld [vmem:[%s10673_s2 + $0x60] sm:$0xff]  ;;  %v335_v55 = vld [vmem:[%s10673_s2 + $0x70] sm:$0xff]  ;;  %v334_v56 = vld [vmem:[%s10673_s2 + $0x68] sm:$0xff] }
  0x34   : > { %v315_v57 = vld [vmem:[%s10672_s1 + $0x50] sm:$0xff]  ;;  %v1074_v58 = vld [vmem:[%s10675_s4 + $0xa8] sm:$0xff]  ;;  %v1076_v59 = vld [vmem:[%s10675_s4 + $0xb8] sm:$0xff] }
  0x35   : > { %374 = vperm.xlu2 %5693, %v328_v18   ;;  %v1075_v60 = vld [vmem:[%s10675_s4 + $0xb0] sm:$0xff]  ;;  %v316_v61 = vld [vmem:[%s10672_s1 + $0x58] sm:$0xff]  ;;  %v1319_v62 = vld [vmem:[%s10675_s4 + $0xc8] sm:$0xff] }
  0x36   : > { %550 = vperm.xlu0 %5691, %v540_v19   ;;  %545 = vperm.xlu1 %5692, %v539_v20   ;;  %v1073_v63 = vld [vmem:[%s10675_s4 + $0xa0] sm:$0xff]  ;;  %v1320_v3 = vld [vmem:[%s10675_s4 + $0xd0] sm:$0xff]  ;;  %v1321_v4 = vld [vmem:[%s10675_s4 + $0xd8] sm:$0xff] }
  0x37   : > { %v1318_v0 = vld [vmem:[%s10675_s4 + $0xc0] sm:$0xff]  ;;  %v318_v5 = vld [vmem:[%s10672_s1 + $0x68] sm:$0xff]  ;;  %v1325_v6 = vld [vmem:[%s10675_s4 + $0xf8] sm:$0xff] }
  0x38   : > { %v317_v1 = vld [vmem:[%s10672_s1 + $0x60] sm:$0xff]  ;;  %v1323_v7 = vld [vmem:[%s10675_s4 + $0xe8] sm:$0xff]  ;;  %v1324_v8 = vld [vmem:[%s10675_s4 + $0xf0] sm:$0xff] }
  0x39   : > { %v1322_v2 = vld [vmem:[%s10675_s4 + $0xe0] sm:$0xff]  ;;  %v319_v9 = vld [vmem:[%s10672_s1 + $0x70] sm:$0xff]  ;;  %v1327_v12 = vld [vmem:[%s10675_s4 + $0x108] sm:$0xff] }
  0x3a   : > { %5343 = vmatmul.msk.f32.gmra.mxu0 %vm417_vm0, %v306_v21  ;;  %v1328_v10 = vld [vmem:[%s10675_s4 + $0x110] sm:$0xff]  ;;  %v1326_v11 = vld [vmem:[%s10675_s4 + $0x100] sm:$0xff]  ;;  %v1331_v13 = vld [vmem:[%s10675_s4 + $0x128] sm:$0xff] }
  0x3b   : > { %v1329_v14 = vld [vmem:[%s10675_s4 + $0x118] sm:$0xff]  ;;  %v1330_v15 = vld [vmem:[%s10675_s4 + $0x120] sm:$0xff]  ;;  %v1332_v18 = vld [vmem:[%s10675_s4 + $0x130] sm:$0xff] }
  0x3c   : > { %v1334_v17 = vld [vmem:[%s10675_s4 + $0x140] sm:$0xff]  ;;  %v1333_v19 = vld [vmem:[%s10675_s4 + $0x138] sm:$0xff] }
  0x3d   : > { %359 = vperm.xlu2 %5693, %v325_v22   ;;  %v320_v21 = vld [vmem:[%s10672_s1 + $0x78] sm:$0xff] }
  0x3e   : > { %369 = vperm.xlu0 %5691, %v327_v23   ;;  %364 = vperm.xlu1 %5692, %v326_v24   ;;  %v1337_v22 = vld [vmem:[%s10675_s4 + $0x158] sm:$0xff]  ;;  %v1335_v23 = vld [vmem:[%s10675_s4 + $0x148] sm:$0xff]  ;;  %v1336_v24 = vld [vmem:[%s10675_s4 + $0x150] sm:$0xff] }
  0x42   : > { %5344 = vmatmul.msk.f32.gmra.mxu0 %vm417_vm0, %v307_v25 }
  0x45   : > { %624 = vperm.xlu2 %5693, %v614_v26  }
  0x46   : > { %634 = vperm.xlu0 %5691, %v616_v27   ;;  %629 = vperm.xlu1 %5692, %v615_v28   ;;  %v1340_v28 = vld [vmem:[%s10675_s4 + $0x170] sm:$0xff] }
  0x4a   : > { %5345 = vmatmul.msk.f32.gmra.mxu0 %vm417_vm0, %v308_v29  ;;  %v1338_v29 = vld [vmem:[%s10675_s4 + $0x160] sm:$0xff] }
  0x4d   : > { %786 = vperm.xlu2 %5693, %v772_v30   ;;  %v1339_v30 = vld [vmem:[%s10675_s4 + $0x168] sm:$0xff] }
  0x4e   : > { %619 = vperm.xlu0 %5691, %v613_v31   ;;  %791 = vperm.xlu1 %5692, %v773_v32  }
  0x52   : > { %5346 = vmatmul.msk.f32.gmra.mxu0 %vm417_vm0, %v309_v33 }
  0x55   : > { %394 = vperm.xlu2 %5693, %v332_v34  }
  0x56   : > { %781 = vperm.xlu0 %5691, %v771_v35   ;;  %776 = vperm.xlu1 %5692, %v770_v36   ;;  %v1343_v36 = vld [vmem:[%s10675_s4 + $0x188] sm:$0xff] }
  0x5a   : > { %5347 = vmatmul.msk.f32.gmra.mxu0 %vm417_vm0, %v310_v37 }
  0x5d   : > { %379 = vperm.xlu2 %5693, %v329_v38   ;;  %v1341_v38 = vld [vmem:[%s10675_s4 + $0x178] sm:$0xff] }
  0x5e   : > { %389 = vperm.xlu0 %5691, %v331_v39   ;;  %384 = vperm.xlu1 %5692, %v330_v40   ;;  %v1342_v39 = vld [vmem:[%s10675_s4 + $0x180] sm:$0xff] }
  0x62   : > { %5348 = vmatmul.msk.f32.gmra.mxu0 %vm417_vm0, %v311_v41 }
  0x65   : > { %854 = vperm.xlu2 %5693, %v844_v42  }
  0x66   : > { %864 = vperm.xlu0 %5691, %v846_v43   ;;  %859 = vperm.xlu1 %5692, %v845_v44  }
  0x6a   : > { %5349 = vmatmul.msk.f32.gmra.mxu0 %vm417_vm0, %v312_v45  ;;  %v535_v45 = vld [vmem:[%s10674_s3] sm:$0xff] }
  0x6d   : > { %1016 = vperm.xlu2 %5693, %v1002_v46   ;;  %v1346_v46 = vld [vmem:[%s10675_s4 + $0x1a0] sm:$0xff] }
  0x6e   : > { %849 = vperm.xlu0 %5691, %v843_v47   ;;  %1021 = vperm.xlu1 %5692, %v1003_v48   ;;  %v1344_v47 = vld [vmem:[%s10675_s4 + $0x190] sm:$0xff]  ;;  %v1345_v48 = vld [vmem:[%s10675_s4 + $0x198] sm:$0xff] }
  0x72   : > { %5350 = vmatmul.msk.f32.gmra.mxu0 %vm417_vm0, %v313_v49  ;;  %v536_v49 = vld [vmem:[%s10674_s3 + $0x8] sm:$0xff] }
  0x75   : > { %414 = vperm.xlu2 %5693, %v336_v50   ;;  %v1349_v50 = vld [vmem:[%s10675_s4 + $0x1b8] sm:$0xff] }
  0x76   : > { %1011 = vperm.xlu0 %5691, %v1001_v51   ;;  %1006 = vperm.xlu1 %5692, %v1000_v52   ;;  %v1347_v51 = vld [vmem:[%s10675_s4 + $0x1a8] sm:$0xff]  ;;  %v1348_v52 = vld [vmem:[%s10675_s4 + $0x1b0] sm:$0xff] }
  0x7a   : > { %5351 = vmatmul.msk.f32.gmra.mxu0 %vm417_vm0, %v314_v53  ;;  %v537_v53 = vld [vmem:[%s10674_s3 + $0x10] sm:$0xff] }
  0x7d   : > { %399 = vperm.xlu2 %5693, %v333_v54   ;;  %v1352_v54 = vld [vmem:[%s10675_s4 + $0x1d0] sm:$0xff] }
  0x7e   : > { %409 = vperm.xlu0 %5691, %v335_v55   ;;  %404 = vperm.xlu1 %5692, %v334_v56   ;;  %v1350_v55 = vld [vmem:[%s10675_s4 + $0x1c0] sm:$0xff]  ;;  %v1351_v56 = vld [vmem:[%s10675_s4 + $0x1c8] sm:$0xff] }
  0x82   : > { %5352 = vmatmul.msk.f32.gmra.mxu0 %vm417_vm0, %v315_v57  ;;  %v538_v57 = vld [vmem:[%s10674_s3 + $0x18] sm:$0xff] }
  0x85   : > { %1084 = vperm.xlu2 %5693, %v1074_v58   ;;  %v1355_v58 = vld [vmem:[%s10675_s4 + $0x1e8] sm:$0xff] }
  0x86   : > { %1094 = vperm.xlu0 %5691, %v1076_v59   ;;  %1089 = vperm.xlu1 %5692, %v1075_v60   ;;  %v1353_v59 = vld [vmem:[%s10675_s4 + $0x1d8] sm:$0xff]  ;;  %v1354_v60 = vld [vmem:[%s10675_s4 + $0x1e0] sm:$0xff] }
  0x8a   : > { %5353 = vmatmul.msk.f32.gmra.mxu0 %vm417_vm0, %v316_v61  ;;  %v1358_v61 = vld [vmem:[%s10675_s4 + $0x200] sm:$0xff] }
  0x8d   : > { %1421 = vperm.xlu2 %5693, %v1319_v62   ;;  %v1356_v62 = vld [vmem:[%s10675_s4 + $0x1f0] sm:$0xff] }
  0x8e   : > { %1079 = vperm.xlu0 %5691, %v1073_v63   ;;  %1416 = vperm.xlu1 %5692, %v1318_v0   ;;  %v1357_v63 = vld [vmem:[%s10675_s4 + $0x1f8] sm:$0xff] }
  0x8f   : > { %v1361_v0 = vld [vmem:[%s10675_s4 + $0x218] sm:$0xff] }
  0x92   : > { %5354 = vmatmul.msk.f32.gmra.mxu0 %vm417_vm0, %v317_v1  ;;  %v1359_v1 = vld [vmem:[%s10675_s4 + $0x208] sm:$0xff] }
  0x95   : > { %1436 = vperm.xlu2 %5693, %v1322_v2   ;;  %v1360_v2 = vld [vmem:[%s10675_s4 + $0x210] sm:$0xff] }
  0x96   : > { %1426 = vperm.xlu0 %5691, %v1320_v3   ;;  %1431 = vperm.xlu1 %5692, %v1321_v4   ;;  %v1364_v3 = vld [vmem:[%s10675_s4 + $0x230] sm:$0xff]  ;;  %v1362_v4 = vld [vmem:[%s10675_s4 + $0x220] sm:$0xff] }
  0x98   : > { %v355_v25 = vpop.permute.xlu0 %354  ;;  %v345_v27 = vpop.permute.xlu1 %344 }
  0x9a   : > { %5355 = vmatmul.msk.f32.gmra.mxu0 %vm417_vm0, %v318_v5  ;;  %v1363_v5 = vld [vmem:[%s10675_s4 + $0x228] sm:$0xff] }
  0x9d   : > { %1451 = vperm.xlu2 %5693, %v1325_v6   ;;  %v1367_v6 = vld [vmem:[%s10675_s4 + $0x248] sm:$0xff] }
  0x9e   : > { %1441 = vperm.xlu0 %5691, %v1323_v7   ;;  %1446 = vperm.xlu1 %5692, %v1324_v8   ;;  %v1365_v7 = vld [vmem:[%s10675_s4 + $0x238] sm:$0xff]  ;;  %v1366_v8 = vld [vmem:[%s10675_s4 + $0x240] sm:$0xff] }
  0xa0   : > { %v350_v32 = vpop.permute.xlu0 %349  ;;  %v340_v40 = vpop.permute.xlu1 %339 }
  0xa2   : > { %5356 = vmatmul.msk.f32.gmra.mxu0 %vm417_vm0, %v319_v9  ;;  %v1370_v9 = vld [vmem:[%s10675_s4 + $0x260] sm:$0xff] }
  0xa5   : > { %1466 = vperm.xlu2 %5693, %v1328_v10   ;;  %v1368_v10 = vld [vmem:[%s10675_s4 + $0x250] sm:$0xff] }
  0xa6   : > { %1456 = vperm.xlu0 %5691, %v1326_v11   ;;  %1461 = vperm.xlu1 %5692, %v1327_v12   ;;  %v1369_v11 = vld [vmem:[%s10675_s4 + $0x258] sm:$0xff] }
  0xa7   : > { %v1373_v12 = vld [vmem:[%s10675_s4 + $0x278] sm:$0xff] }
  0xaa   : > { %5357 = vmatmul.msk.f32.gmra.mxu0 %vm417_vm0, %v320_v21  ;;  %v1382_v21 = vld [vmem:[%s10675_s4 + $0x2c0] sm:$0xff] }
  0xad   : > { %1481 = vperm.xlu2 %5693, %v1331_v13   ;;  %v1371_v13 = vld [vmem:[%s10675_s4 + $0x268] sm:$0xff] }
  0xae   : > { %1471 = vperm.xlu0 %5691, %v1329_v14   ;;  %1476 = vperm.xlu1 %5692, %v1330_v15   ;;  %v1372_v14 = vld [vmem:[%s10675_s4 + $0x270] sm:$0xff] }
  0xaf   : > { %v483_v16 = vpop.f32.mrf.mxu0  ;;  %v1376_v15 = vld [vmem:[%s10675_s4 + $0x290] sm:$0xff] }
  0xb0   : > { %v6468_v41 = vadd.f32 %v483_v16, %v340_v40  ;;  %v1374_v16 = vld [vmem:[%s10675_s4 + $0x280] sm:$0xff] }
  0xb2   : > { %v531_v44 = vmax.f32 %v6468_v41, 0.0 }
  0xb5   : > { %1496 = vperm.xlu2 %5693, %v1334_v17   ;;  %v1375_v17 = vld [vmem:[%s10675_s4 + $0x288] sm:$0xff] }
  0xb6   : > { %1486 = vperm.xlu0 %5691, %v1332_v18   ;;  %1491 = vperm.xlu1 %5692, %v1333_v19   ;;  %v1379_v18 = vld [vmem:[%s10675_s4 + $0x2a8] sm:$0xff]  ;;  %v1377_v19 = vld [vmem:[%s10675_s4 + $0x298] sm:$0xff] }
  0xb7   : > { %v486_v20 = vpop.f32.mrf.mxu0 }
  0xb8   : > { %v6460_v37 = vadd.f32 %v486_v20, %v345_v27  ;;  %v1378_v20 = vld [vmem:[%s10675_s4 + $0x2a0] sm:$0xff]  ;;  %v1388_v27 = vld [vmem:[%s10675_s4 + $0x2f0] sm:$0xff] }
  0xba   : > { %v532_v43 = vmax.f32 %v6460_v37, 0.0 }
  0xbd   : > { %1511 = vperm.xlu2 %5693, %v1337_v22   ;;  %v1380_v22 = vld [vmem:[%s10675_s4 + $0x2b0] sm:$0xff] }
  0xbe   : > { %1501 = vperm.xlu0 %5691, %v1335_v23   ;;  %1506 = vperm.xlu1 %5692, %v1336_v24   ;;  %v1381_v23 = vld [vmem:[%s10675_s4 + $0x2b8] sm:$0xff] }
  0xbf   : > { %v489_v26 = vpop.f32.mrf.mxu0  ;;  %v1385_v24 = vld [vmem:[%s10675_s4 + $0x2d8] sm:$0xff] }
  0xc0   : > { %v6454_v34 = vadd.f32 %v489_v26, %v350_v32  ;;  %v1384_v26 = vld [vmem:[%s10675_s4 + $0x2d0] sm:$0xff]  ;;  %v1390_v32 = vld [vmem:[%s10675_s4 + $0x300] sm:$0xff] }
  0xc2   : > { %v533_v42 = vmax.f32 %v6454_v34, 0.0 }
  0xc5   : > { %1526 = vperm.xlu2 %5693, %v1340_v28   ;;  %v1386_v28 = vld [vmem:[%s10675_s4 + $0x2e0] sm:$0xff] }
  0xc6   : > { %1516 = vperm.xlu0 %5691, %v1338_v29   ;;  %1521 = vperm.xlu1 %5692, %v1339_v30   ;;  %v1387_v29 = vld [vmem:[%s10675_s4 + $0x2e8] sm:$0xff] }
  0xc7   : > { %v492_v31 = vpop.f32.mrf.mxu0  ;;  %v1391_v30 = vld [vmem:[%s10675_s4 + $0x308] sm:$0xff] }
  0xc8   : > { %v6452_v33 = vadd.f32 %v492_v31, %v355_v25  ;;  %v1383_v25 = vld [vmem:[%s10675_s4 + $0x2c8] sm:$0xff]  ;;  %v1389_v31 = vld [vmem:[%s10675_s4 + $0x2f8] sm:$0xff] }
  0xca   : > { %v534_v35 = vmax.f32 %v6452_v33, 0.0 }
  0xcc   : > { %588 = vmatpush.msra.mxu1 %v534_v35 }
  0xcd   : > { %1541 = vperm.xlu2 %5693, %v1343_v36   ;;  %v1394_v36 = vld [vmem:[%s10675_s4 + $0x320] sm:$0xff] }
  0xce   : > { %1531 = vperm.xlu0 %5691, %v1341_v38   ;;  %1536 = vperm.xlu1 %5692, %v1342_v39   ;;  %v1392_v38 = vld [vmem:[%s10675_s4 + $0x310] sm:$0xff]  ;;  %v1393_v39 = vld [vmem:[%s10675_s4 + $0x318] sm:$0xff] }
  0xcf   : > { %589 = vmatpush.msra.mxu1 %v533_v42  ;;  %v1398_v42 = vld [vmem:[%s10675_s4 + $0x340] sm:$0xff] }
  0xd1   : > { %590 = vmatpush.msra.mxu1 %v532_v43  ;;  %v1395_v43 = vld [vmem:[%s10675_s4 + $0x328] sm:$0xff] }
  0xd3   : > { %591 = vmatpush.msra.mxu1 %v531_v44  ;;  %v1396_v44 = vld [vmem:[%s10675_s4 + $0x330] sm:$0xff] }
  0xd4   : > { %5358 = vmatmul.msk.f32.vlgmr.msra.gmra.mxu1 %vm563_vm1, %v535_v45  ;;  %v561_v45 = vpop.permute.xlu2 %560 }
  0xd5   : > { %1556 = vperm.xlu2 %5693, %v1346_v46  }
  0xd6   : > { %1546 = vperm.xlu0 %5691, %v1344_v47   ;;  %1551 = vperm.xlu1 %5692, %v1345_v48   ;;  %v1400_v47 = vld [vmem:[%s10675_s4 + $0x350] sm:$0xff]  ;;  %v1399_v48 = vld [vmem:[%s10675_s4 + $0x348] sm:$0xff] }
  0xdc   : > { %5359 = vmatmul.msk.f32.gmra.mxu1 %vm563_vm1, %v536_v49  ;;  %v1397_v49 = vld [vmem:[%s10675_s4 + $0x338] sm:$0xff] }
  0xdd   : > { %1571 = vperm.xlu2 %5693, %v1349_v50   ;;  %v556_v50 = vpop.permute.xlu2 %555 }
  0xde   : > { %1561 = vperm.xlu0 %5691, %v1347_v51   ;;  %1566 = vperm.xlu1 %5692, %v1348_v52  }
  0xe4   : > { %5360 = vmatmul.msk.f32.gmra.mxu1 %vm563_vm1, %v537_v53 }
  0xe5   : > { %1586 = vperm.xlu2 %5693, %v1352_v54   ;;  %v1401_v54 = vld [vmem:[%s10675_s4 + $0x358] sm:$0xff] }
  0xe6   : > { %1576 = vperm.xlu0 %5691, %v1350_v55   ;;  %1581 = vperm.xlu1 %5692, %v1351_v56   ;;  %v551_v55 = vpop.permute.xlu0 %550  ;;  %v1402_v56 = vld [vmem:[%s10675_s4 + $0x360] sm:$0xff] }
  0xec   : > { %5361 = vmatmul.msk.f32.gmra.mxu1 %vm563_vm1, %v538_v57 }
  0xed   : > { %1601 = vperm.xlu2 %5693, %v1355_v58  }
  0xee   : > { %1591 = vperm.xlu0 %5691, %v1353_v59   ;;  %1596 = vperm.xlu1 %5692, %v1354_v60   ;;  %v1403_v59 = vld [vmem:[%s10675_s4 + $0x368] sm:$0xff]  ;;  %v546_v60 = vpop.permute.xlu1 %545 }
  0xf5   : > { %1616 = vperm.xlu2 %5693, %v1358_v61  }
  0xf6   : > { %1606 = vperm.xlu0 %5691, %v1356_v62   ;;  %1611 = vperm.xlu1 %5692, %v1357_v63  }
  0xfd   : > { %1631 = vperm.xlu2 %5693, %v1361_v0  }
  0xfe   : > { %1621 = vperm.xlu0 %5691, %v1359_v1   ;;  %1626 = vperm.xlu1 %5692, %v1360_v2   ;;  %v609_v1 = vld [vmem:[%s10674_s3 + $0x20] sm:$0xff]  ;;  %v1407_v2 = vld [vmem:[%s10675_s4 + $0x388] sm:$0xff] }
 0x105   : > { %1646 = vperm.xlu2 %5693, %v1364_v3   ;;  %v1404_v3 = vld [vmem:[%s10675_s4 + $0x370] sm:$0xff] }
 0x106   : > { %1636 = vperm.xlu0 %5691, %v1362_v4   ;;  %1641 = vperm.xlu1 %5692, %v1363_v5   ;;  %v1406_v4 = vld [vmem:[%s10675_s4 + $0x380] sm:$0xff]  ;;  %v610_v5 = vld [vmem:[%s10674_s3 + $0x28] sm:$0xff] }
 0x10d   : > { %1661 = vperm.xlu2 %5693, %v1367_v6   ;;  %v1410_v6 = vld [vmem:[%s10675_s4 + $0x3a0] sm:$0xff] }
 0x10e   : > { %1651 = vperm.xlu0 %5691, %v1365_v7   ;;  %1656 = vperm.xlu1 %5692, %v1366_v8   ;;  %v1405_v7 = vld [vmem:[%s10675_s4 + $0x378] sm:$0xff]  ;;  %v1408_v8 = vld [vmem:[%s10675_s4 + $0x390] sm:$0xff] }
 0x115   : > { %1676 = vperm.xlu2 %5693, %v1370_v9   ;;  %v611_v9 = vld [vmem:[%s10674_s3 + $0x30] sm:$0xff] }
 0x116   : > { %1666 = vperm.xlu0 %5691, %v1368_v10   ;;  %1671 = vperm.xlu1 %5692, %v1369_v11   ;;  %v1412_v10 = vld [vmem:[%s10675_s4 + $0x3b0] sm:$0xff]  ;;  %v1411_v11 = vld [vmem:[%s10675_s4 + $0x3a8] sm:$0xff] }
 0x11d   : > { %1691 = vperm.xlu2 %5693, %v1373_v12   ;;  %v1409_v12 = vld [vmem:[%s10675_s4 + $0x398] sm:$0xff] }
 0x11e   : > { %1681 = vperm.xlu0 %5691, %v1371_v13   ;;  %1686 = vperm.xlu1 %5692, %v1372_v14   ;;  %v612_v13 = vld [vmem:[%s10674_s3 + $0x38] sm:$0xff] }
 0x11f   : > { %v1413_v14 = vld [vmem:[%s10675_s4 + $0x3b8] sm:$0xff] }
 0x125   : > { %1706 = vperm.xlu2 %5693, %v1376_v15   ;;  %v495_v15 = vpop.f32.mrf.mxu0 }
 0x126   : > { %1696 = vperm.xlu0 %5691, %v1374_v16   ;;  %1701 = vperm.xlu1 %5692, %v1375_v17  }
 0x12d   : > { %1721 = vperm.xlu2 %5693, %v1379_v18   ;;  %v498_v16 = vpop.f32.mrf.mxu0  ;;  %v375_v18 = vpop.permute.xlu2 %374 }
 0x12e   : > { %1711 = vperm.xlu0 %5691, %v1377_v19   ;;  %1716 = vperm.xlu1 %5692, %v1378_v20   ;;  %v370_v19 = vpop.permute.xlu0 %369  ;;  %v365_v20 = vpop.permute.xlu1 %364 }
 0x135   : > { %1736 = vperm.xlu2 %5693, %v1382_v21   ;;  %v501_v17 = vpop.f32.mrf.mxu0 }
 0x136   : > { %1726 = vperm.xlu0 %5691, %v1380_v22   ;;  %1731 = vperm.xlu1 %5692, %v1381_v23   ;;  %v502_v21 = vadd.f32 %v501_v17, %v370_v19  ;;  %v499_v22 = vadd.f32 %v498_v16, %v365_v20 }
 0x13d   : > { %1751 = vperm.xlu2 %5693, %v1385_v24   ;;  %v504_v23 = vpop.f32.mrf.mxu0  ;;  %v360_v24 = vpop.permute.xlu2 %359 }
 0x13e   : > { %1741 = vperm.xlu0 %5691, %v1383_v25   ;;  %1746 = vperm.xlu1 %5692, %v1384_v26   ;;  %v505_v25 = vadd.f32 %v504_v23, %v375_v18  ;;  %v496_v26 = vadd.f32 %v495_v15, %v360_v24 }
 0x145   : > { %1766 = vperm.xlu2 %5693, %v1388_v27   ;;  %v680_v27 = vsub.f32 0.0, %v502_v21  ;;  %v625_v21 = vpop.permute.xlu2 %624 }
 0x146   : > { %1756 = vperm.xlu0 %5691, %v1386_v28   ;;  %1761 = vperm.xlu1 %5692, %v1387_v29   ;;  %v679_v28 = vsub.f32 0.0, %v499_v22  ;;  %v681_v29 = vsub.f32 0.0, %v505_v25 }
 0x14d   : > { %1781 = vperm.xlu2 %5693, %v1391_v30   ;;  %v678_v30 = vsub.f32 0.0, %v496_v26 }
 0x14e   : > { %1771 = vperm.xlu0 %5691, %v1389_v31   ;;  %1776 = vperm.xlu1 %5692, %v1390_v32   ;;  %v686_v31 = vmul.f32 1.442695, %v680_v27  ;;  %v684_v32 = vmul.f32 1.442695, %v679_v28 }
 0x150   : > { %5694 = vpow2.f32 %v686_v31 }
 0x151   : > { %v593_v35 = vpop.f32.mrf.mxu1  ;;  %5696 = vpow2.f32 %v684_v32 }
 0x152   : > { %v594_v61 = vadd.f32 %v593_v35, %v546_v60  ;;  %v688_v35 = vmul.f32 1.442695, %v681_v29 }
 0x154   : > { %v605_v0 = vmax.f32 %v594_v61, 0.0  ;;  %5698 = vpow2.f32 %v688_v35 }
 0x155   : > { %1796 = vperm.xlu2 %5693, %v1394_v36   ;;  %v682_v36 = vmul.f32 1.442695, %v678_v30 }
 0x156   : > { %1786 = vperm.xlu0 %5691, %v1392_v38   ;;  %1791 = vperm.xlu1 %5692, %v1393_v39   ;;  %v5695_v38 = vpop.eup %5694 }
 0x157   : > { %5700 = vpow2.f32 %v682_v36  ;;  %v5697_v39 = vpop.eup %5696 }
 0x159   : > { %v596_v40 = vpop.f32.mrf.mxu1 }
 0x15a   : > { %v597_v57 = vadd.f32 %v596_v40, %v551_v55  ;;  %v5699_v40 = vpop.eup %5698 }
 0x15c   : > { %v606_v63 = vmax.f32 %v597_v57, 0.0 }
 0x15d   : > { %1816 = vperm.xlu2 %5693, %v1398_v42   ;;  %v5701_v42 = vpop.eup %5700 }
 0x15e   : > { %1801 = vperm.xlu0 %5691, %v1395_v43   ;;  %1806 = vperm.xlu1 %5692, %v1396_v44   ;;  %v692_v43 = vadd.f32 1.0, %v5695_v38  ;;  %v6715_v44 = vadd.f32 1.0, %v5697_v39 }
 0x160   : > { %5702 = vrcp.f32 %v692_v43  ;;  %vm729_vm2 = vweird.f32 %v692_v43  ;;  %v720_v15 = vand.u32 2147483648, %v6715_v44  ;;  %vm714_vm12 = vweird.f32 %v6715_v44 }
 0x161   : > { %v599_v46 = vpop.f32.mrf.mxu1  ;;  %5704 = vrcp.f32 %v6715_v44 }
 0x162   : > { %v600_v52 = vadd.f32 %v599_v46, %v556_v50  ;;  %v6717_v46 = vadd.f32 1.0, %v5701_v42  ;;  %v721_v32 = vor.u32 1.1754944e-38, %v720_v15 }
 0x164   : > { %v607_v62 = vmax.f32 %v600_v52, 0.0  ;;  %vm699_vm6 = vweird.f32 %v6717_v46  ;;  %v703_v18 = vand.u32 2147483647, %v6717_v46 }
 0x165   : > { %1826 = vperm.xlu2 %5693, %v1400_v47  }
 0x166   : > { %1821 = vperm.xlu0 %5691, %v1399_v48   ;;  %1811 = vperm.xlu1 %5692, %v1397_v49   ;;  %v5703_v48 = vpop.eup %5702 }
 0x167   : > { %v6721_v49 = vpop.eup %5704  ;;  %v725_v52 = vmul.f32 %v5703_v48, %v692_v43  ;;  %vm730_vm3 = vweird.f32 %v5703_v48 }
 0x168   : > { %vm715_vm8 = vweird.f32 %v6721_v49  ;;  %vm6741_vm9 = vmor %vm729_vm2, %vm730_vm3  ;;  %vm704_vm2 = vcmp.eq.f32.partialorder %v703_v18, 8.507059e+37 }
 0x169   : > { %v602_v51 = vpop.f32.mrf.mxu1  ;;  %v726_v57 = vsub.f32 1.0, %v725_v52  ;;  %vm6764_vm13 = vmor %vm714_vm12, %vm715_vm8 }
 0x16a   : > { %v603_v53 = vadd.f32 %v602_v51, %v561_v45  ;;  %v693_v45 = vadd.f32 1.0, %v5699_v40 }
 0x16b   : > { %v727_v61 = vmul.f32 %v5703_v48, %v726_v57 }
 0x16c   : > { %v608_v58 = vmax.f32 %v603_v53, 0.0  ;;  %5706 = vrcp.f32 %v693_v45  ;;  %v710_v53 = vmul.f32 %v6721_v49, %v6715_v44  ;;  %vm744_vm4 = vweird.f32 %v693_v45 }
 0x16d   : > { %1831 = vperm.xlu2 %5693, %v1401_v54   ;;  %5708 = vrcp.f32 %v6717_v46 }
 0x16e   : > { %661 = vmatpush.msra.mxu2 %v608_v58  ;;  %1836 = vperm.xlu0 %5691, %v1402_v56   ;;  %v711_v58 = vsub.f32 1.0, %v710_v53 }
 0x16f   : > { %1841 = vperm.xlu1 %5692, %v1403_v59  }
 0x170   : > { %662 = vmatpush.msra.mxu2 %v607_v62  ;;  %v635_v62 = vpop.permute.xlu0 %634 }
 0x172   : > { %663 = vmatpush.msra.mxu2 %v606_v63  ;;  %v6723_v50 = vpop.eup %5706  ;;  %v712_v63 = vmul.f32 %v6721_v49, %v711_v58 }
 0x173   : > { %v6725_v51 = vpop.eup %5708  ;;  %v740_v54 = vmul.f32 %v6723_v50, %v693_v45  ;;  %vm745_vm5 = vweird.f32 %v6723_v50 }
 0x174   : > { %664 = vmatpush.msra.mxu2 %v605_v0  ;;  %v695_v55 = vmul.f32 %v6725_v51, %v6717_v46  ;;  %vm700_vm7 = vweird.f32 %v6725_v51  ;;  %vm6750_vm10 = vmor %vm744_vm4, %vm745_vm5 }
 0x175   : > { %5362 = vmatmul.msk.f32.vlgmr.msra.gmra.mxu2 %vm563_vm1, %v609_v1  ;;  %1861 = vperm.xlu2 %5693, %v1407_v2   ;;  %v741_v59 = vsub.f32 1.0, %v740_v54  ;;  %v718_v2 = vand.u32 2147483647, %v6715_v44  ;;  %vm6754_vm11 = vmor %vm699_vm6, %vm700_vm7 }
 0x176   : > { %1846 = vperm.xlu0 %5691, %v1404_v3   ;;  %v696_v60 = vsub.f32 1.0, %v695_v55  ;;  %v769_v55 = vld [vmem:[%s10674_s3 + $0x58] sm:$0xff] }
 0x177   : > { %1856 = vperm.xlu1 %5692, %v1406_v4   ;;  %v742_v0 = vmul.f32 %v6723_v50, %v741_v59  ;;  %v728_v4 = vadd.f32 %v5703_v48, %v727_v61  ;;  %vm6768_vm14 = vcmp.eq.f32.partialorder %v718_v2, 8.507059e+37 }
 0x178   : > { %v697_v1 = vmul.f32 %v6725_v51, %v696_v60  ;;  %v620_v29 = vpop.permute.xlu0 %619  ;;  %v787_v60 = vpop.permute.xlu2 %786 }
 0x179   : > { %v732_v20 = vsel %vm6741_vm9, %v5703_v48, %v728_v4 }
 0x17d   : > { %5363 = vmatmul.msk.f32.gmra.mxu2 %vm563_vm1, %v610_v5  ;;  %1876 = vperm.xlu2 %5693, %v1410_v6   ;;  %v733_v5 = vand.u32 2147483647, %v692_v43  ;;  %v735_v6 = vand.u32 2147483648, %v692_v43 }
 0x17e   : > { %1851 = vperm.xlu0 %5691, %v1405_v7   ;;  %v750_v7 = vand.u32 2147483648, %v693_v45 }
 0x17f   : > { %1866 = vperm.xlu1 %5692, %v1408_v8   ;;  %v713_v8 = vadd.f32 %v6721_v49, %v712_v63  ;;  %vm734_vm15 = vcmp.eq.f32.partialorder %v733_v5, 8.507059e+37  ;;  %v736_v24 = vor.u32 1.1754944e-38, %v735_v6 }
 0x180   : > { %v751_v25 = vor.u32 1.1754944e-38, %v750_v7  ;;  %v395_v15 = vpop.permute.xlu2 %394 }
 0x181   : > { %v717_v27 = vsel %vm6764_vm13, %v6721_v49, %v713_v8  ;;  %v737_v35 = vsel %vm734_vm15, %v736_v24, %v732_v20  ;;  %v839_v8 = vld [vmem:[%s10674_s3 + $0x60] sm:$0xff] }
 0x182   : > { %v722_v42 = vsel %vm6768_vm14, %v721_v32, %v717_v27 }
 0x185   : > { %5364 = vmatmul.msk.f32.gmra.mxu2 %vm563_vm1, %v611_v9  ;;  %1886 = vperm.xlu2 %5693, %v1412_v10   ;;  %v743_v10 = vadd.f32 %v6723_v50, %v742_v0  ;;  %v782_v0 = vpop.permute.xlu0 %781  ;;  %v840_v9 = vld [vmem:[%s10674_s3 + $0x68] sm:$0xff] }
 0x186   : > { %1881 = vperm.xlu0 %5691, %v1411_v11   ;;  %v748_v11 = vand.u32 2147483647, %v693_v45 }
 0x187   : > { %1871 = vperm.xlu1 %5692, %v1409_v12   ;;  %v630_v12 = vpop.permute.xlu1 %629  ;;  %v747_v28 = vsel %vm6750_vm10, %v6723_v50, %v743_v10  ;;  %v841_v10 = vld [vmem:[%s10674_s3 + $0x70] sm:$0xff] }
 0x188   : > { %vm749_vm0 = vcmp.eq.f32.partialorder %v748_v11, 8.507059e+37  ;;  %v842_v11 = vld [vmem:[%s10674_s3 + $0x78] sm:$0xff] }
 0x189   : > { %v752_v43 = vsel %vm749_vm0, %v751_v25, %v747_v28 }
 0x18d   : > { %5365 = vmatmul.msk.f32.gmra.mxu2 %vm563_vm1, %v612_v13  ;;  %v698_v13 = vadd.f32 %v6725_v51, %v697_v1  ;;  %v390_v16 = vpop.permute.xlu0 %389 }
 0x18e   : > { %1891 = vperm.xlu0 %5691, %v1413_v14   ;;  %v705_v14 = vand.u32 2147483648, %v6717_v46 }
 0x18f   : > { %v702_v30 = vsel %vm6754_vm11, %v6725_v51, %v698_v13  ;;  %v792_v59 = vpop.permute.xlu1 %791 }
 0x190   : > { %v706_v31 = vor.u32 1.1754944e-38, %v705_v14 }
 0x192   : > { %v707_v46 = vsel %vm704_vm2, %v706_v31, %v702_v30 }
 0x1f8   : > { %v666_v47 = vpop.f32.mrf.mxu2 }
 0x1f9   : > { %v667_v38 = vadd.f32 %v666_v47, %v620_v29 }
 0x1fb   : > { %v754_v48 = vmul.f32 %v707_v46, %v667_v38 }
 0x1fd   : > { %v6795_v53 = vadd.f32 %v754_v48, %v6468_v41  ;;  %v768_v41 = vld [vmem:[%s10674_s3 + $0x50] sm:$0xff] }
 0x200   : > { %v669_v56 = vpop.f32.mrf.mxu2 }
 0x201   : > { %v670_v26 = vadd.f32 %v669_v56, %v625_v21  ;;  %v380_v21 = vpop.permute.xlu2 %379 }
 0x203   : > { %v755_v44 = vmul.f32 %v722_v42, %v670_v26 }
 0x205   : > { %v6791_v47 = vadd.f32 %v755_v44, %v6460_v37  ;;  %v767_v37 = vld [vmem:[%s10674_s3 + $0x48] sm:$0xff] }
 0x207   : > { %v763_v54 = vmax.f32 %v6791_v47, 0.0 }
 0x208   : > { %v672_v3 = vpop.f32.mrf.mxu2 }
 0x209   : > { %v673_v19 = vadd.f32 %v672_v3, %v630_v12  ;;  %v777_v3 = vpop.permute.xlu1 %776  ;;  %v507_v12 = vpop.f32.mrf.mxu0 }
 0x20a   : > { %v508_v23 = vadd.f32 %v507_v12, %v380_v21 }
 0x20b   : > { %v756_v39 = vmul.f32 %v737_v35, %v673_v19 }
 0x20c   : > { %v908_v27 = vsub.f32 0.0, %v508_v23 }
 0x20d   : > { %v6787_v50 = vadd.f32 %v756_v39, %v6454_v34  ;;  %v766_v34 = vld [vmem:[%s10674_s3 + $0x40] sm:$0xff] }
 0x20e   : > { %v912_v31 = vmul.f32 1.442695, %v908_v27 }
 0x20f   : > { %v764_v52 = vmax.f32 %v6787_v50, 0.0 }
 0x210   : > { %v675_v36 = vpop.f32.mrf.mxu2 }
 0x211   : > { %v676_v40 = vadd.f32 %v675_v36, %v635_v62  ;;  %v510_v13 = vpop.f32.mrf.mxu0  ;;  %v385_v17 = vpop.permute.xlu1 %384 }
 0x212   : > { %v511_v19 = vadd.f32 %v510_v13, %v385_v17 }
 0x213   : > { %v757_v45 = vmul.f32 %v752_v43, %v676_v40 }
 0x214   : > { %v909_v25 = vsub.f32 0.0, %v511_v19 }
 0x215   : > { %v6784_v49 = vadd.f32 %v757_v45, %v6452_v33  ;;  %v762_v33 = vmax.f32 %v6795_v53, 0.0 }
 0x216   : > { %v914_v29 = vmul.f32 1.442695, %v909_v25 }
 0x217   : > { %v765_v51 = vmax.f32 %v6784_v49, 0.0 }
 0x219   : > { %818 = vmatpush.msra.mxu3 %v765_v51  ;;  %v513_v14 = vpop.f32.mrf.mxu0 }
 0x21a   : > { %v514_v18 = vadd.f32 %v513_v14, %v390_v16 }
 0x21b   : > { %819 = vmatpush.msra.mxu3 %v764_v52 }
 0x21c   : > { %v910_v24 = vsub.f32 0.0, %v514_v18  ;;  %v855_v18 = vpop.permute.xlu2 %854 }
 0x21d   : > { %820 = vmatpush.msra.mxu3 %v763_v54 }
 0x21e   : > { %v916_v28 = vmul.f32 1.442695, %v910_v24 }
 0x21f   : > { %821 = vmatpush.msra.mxu3 %v762_v33 }
 0x220   : > { %5366 = vmatmul.msk.f32.vlgmr.msra.gmra.mxu3 %vm563_vm1, %v766_v34  ;;  %5710 = vpow2.f32 %v916_v28 }
 0x221   : > { %v516_v20 = vpop.f32.mrf.mxu0  ;;  %5712 = vpow2.f32 %v914_v29 }
 0x222   : > { %v517_v22 = vadd.f32 %v516_v20, %v395_v15 }
 0x224   : > { %v911_v26 = vsub.f32 0.0, %v517_v22 }
 0x226   : > { %v918_v30 = vmul.f32 1.442695, %v911_v26  ;;  %v5711_v32 = vpop.eup %5710 }
 0x227   : > { %v5713_v35 = vpop.eup %5712  ;;  %v922_v39 = vadd.f32 1.0, %v5711_v32 }
 0x228   : > { %5367 = vmatmul.msk.f32.gmra.mxu3 %vm563_vm1, %v767_v37  ;;  %5714 = vpow2.f32 %v918_v30  ;;  %v6831_v40 = vadd.f32 1.0, %v5713_v35 }
 0x229   : > { %5716 = vpow2.f32 %v912_v31  ;;  %vm959_vm3 = vweird.f32 %v922_v39 }
 0x22a   : > { %5718 = vrcp.f32 %v922_v39  ;;  %v950_v12 = vand.u32 2147483648, %v6831_v40  ;;  %vm944_vm13 = vweird.f32 %v6831_v40 }
 0x22b   : > { %5720 = vrcp.f32 %v6831_v40 }
 0x22c   : > { %v951_v29 = vor.u32 1.1754944e-38, %v950_v12 }
 0x22e   : > { %v5715_v36 = vpop.eup %5714 }
 0x22f   : > { %v5717_v38 = vpop.eup %5716  ;;  %v923_v42 = vadd.f32 1.0, %v5715_v36 }
 0x230   : > { %5368 = vmatmul.msk.f32.gmra.mxu3 %vm563_vm1, %v768_v41  ;;  %v6833_v43 = vadd.f32 1.0, %v5717_v38  ;;  %v5719_v45 = vpop.eup %5718 }
 0x231   : > { %5722 = vrcp.f32 %v923_v42  ;;  %v6837_v46 = vpop.eup %5720  ;;  %v955_v52 = vmul.f32 %v5719_v45, %v922_v39  ;;  %vm960_vm4 = vweird.f32 %v5719_v45  ;;  %vm974_vm5 = vweird.f32 %v923_v42 }
 0x232   : > { %5724 = vrcp.f32 %v6833_v43  ;;  %v940_v54 = vmul.f32 %v6837_v46, %v6831_v40  ;;  %vm929_vm7 = vweird.f32 %v6833_v43  ;;  %vm945_vm9 = vweird.f32 %v6837_v46  ;;  %vm6857_vm10 = vmor %vm959_vm3, %vm960_vm4 }
 0x233   : > { %v956_v41 = vsub.f32 1.0, %v955_v52  ;;  %v933_v15 = vand.u32 2147483647, %v6833_v43  ;;  %vm6880_vm14 = vmor %vm944_vm13, %vm945_vm9 }
 0x235   : > { %vm934_vm3 = vcmp.eq.f32.partialorder %v933_v15, 8.507059e+37 }
 0x237   : > { %v6839_v48 = vpop.eup %5722 }
 0x238   : > { %5369 = vmatmul.msk.f32.gmra.mxu3 %vm563_vm1, %v769_v55  ;;  %v6841_v51 = vpop.eup %5724  ;;  %v970_v33 = vmul.f32 %v6839_v48, %v923_v42  ;;  %v941_v55 = vsub.f32 1.0, %v940_v54  ;;  %vm975_vm6 = vweird.f32 %v6839_v48 }
 0x239   : > { %v925_v34 = vmul.f32 %v6841_v51, %v6833_v43  ;;  %vm930_vm8 = vweird.f32 %v6841_v51  ;;  %vm6866_vm11 = vmor %vm974_vm5, %vm975_vm6 }
 0x23a   : > { %vm6870_vm12 = vmor %vm929_vm7, %vm930_vm8 }
 0x2a3   : > { %v823_v56 = vpop.f32.mrf.mxu3 }
 0x2a4   : > { %v824_v4 = vadd.f32 %v823_v56, %v777_v3  ;;  %v971_v56 = vsub.f32 1.0, %v970_v33  ;;  %v965_v3 = vand.u32 2147483648, %v922_v39 }
 0x2a6   : > { %v835_v7 = vmax.f32 %v824_v4, 0.0  ;;  %v980_v4 = vand.u32 2147483648, %v923_v42  ;;  %v966_v21 = vor.u32 1.1754944e-38, %v965_v3 }
 0x2a8   : > { %v981_v22 = vor.u32 1.1754944e-38, %v980_v4 }
 0x2ab   : > { %v826_v57 = vpop.f32.mrf.mxu3 }
 0x2ac   : > { %v827_v1 = vadd.f32 %v826_v57, %v782_v0  ;;  %v926_v57 = vsub.f32 1.0, %v925_v34  ;;  %v999_v34 = vld [vmem:[%s10674_s3 + $0x98] sm:$0xff] }
 0x2ae   : > { %v836_v6 = vmax.f32 %v827_v1, 0.0 }
 0x2b3   : > { %v829_v58 = vpop.f32.mrf.mxu3 }
 0x2b4   : > { %v830_v62 = vadd.f32 %v829_v58, %v787_v60  ;;  %v957_v58 = vmul.f32 %v5719_v45, %v956_v41  ;;  %v942_v60 = vmul.f32 %v6837_v46, %v941_v55 }
 0x2b6   : > { %v837_v5 = vmax.f32 %v830_v62, 0.0  ;;  %v927_v62 = vmul.f32 %v6841_v51, %v926_v57  ;;  %v958_v1 = vadd.f32 %v5719_v45, %v957_v58  ;;  %v1017_v57 = vpop.permute.xlu2 %1016 }
 0x2b8   : > { %v962_v17 = vsel %vm6857_vm10, %v5719_v45, %v958_v1 }
 0x2bb   : > { %v832_v61 = vpop.f32.mrf.mxu3 }
 0x2bc   : > { %v833_v63 = vadd.f32 %v832_v61, %v792_v59  ;;  %v865_v59 = vpop.permute.xlu0 %864  ;;  %v972_v61 = vmul.f32 %v6839_v48, %v971_v56 }
 0x2be   : > { %v838_v2 = vmax.f32 %v833_v63, 0.0  ;;  %v948_v63 = vand.u32 2147483647, %v6831_v40  ;;  %v415_v12 = vpop.permute.xlu2 %414 }
 0x2c0   : > { %891 = vmatpush.msrb.mxu1 %v838_v2  ;;  %v963_v2 = vand.u32 2147483647, %v922_v39  ;;  %vm6884_vm15 = vcmp.eq.f32.partialorder %v948_v63, 8.507059e+37 }
 0x2c2   : > { %892 = vmatpush.msrb.mxu1 %v837_v5  ;;  %v943_v5 = vadd.f32 %v6837_v46, %v942_v60  ;;  %vm964_vm0 = vcmp.eq.f32.partialorder %v963_v2, 8.507059e+37 }
 0x2c3   : > { %v967_v30 = vsel %vm964_vm0, %v966_v21, %v962_v17 }
 0x2c4   : > { %893 = vmatpush.msrb.mxu1 %v836_v6  ;;  %v947_v24 = vsel %vm6880_vm14, %v6837_v46, %v943_v5  ;;  %v850_v26 = vpop.permute.xlu0 %849  ;;  %v1069_v5 = vld [vmem:[%s10674_s3 + $0xa0] sm:$0xff]  ;;  %v1070_v6 = vld [vmem:[%s10674_s3 + $0xa8] sm:$0xff] }
 0x2c5   : > { %v952_v38 = vsel %vm6884_vm15, %v951_v29, %v947_v24 }
 0x2c6   : > { %894 = vmatpush.msrb.mxu1 %v835_v7  ;;  %v973_v7 = vadd.f32 %v6839_v48, %v972_v61 }
 0x2c7   : > { %5370 = vmatmul.msk.f32.vlgmr.msrb.gmra.mxu1 %vm563_vm1, %v839_v8  ;;  %v978_v8 = vand.u32 2147483647, %v923_v42 }
 0x2c8   : > { %v977_v25 = vsel %vm6866_vm11, %v6839_v48, %v973_v7  ;;  %v1071_v7 = vld [vmem:[%s10674_s3 + $0xb0] sm:$0xff] }
 0x2c9   : > { %vm979_vm2 = vcmp.eq.f32.partialorder %v978_v8, 8.507059e+37  ;;  %v1072_v8 = vld [vmem:[%s10674_s3 + $0xb8] sm:$0xff] }
 0x2ca   : > { %v982_v39 = vsel %vm979_vm2, %v981_v22, %v977_v25 }
 0x2cc   : > { %v1012_v61 = vpop.permute.xlu0 %1011 }
 0x2cf   : > { %5371 = vmatmul.msk.f32.gmra.mxu1 %vm563_vm1, %v840_v9  ;;  %v860_v9 = vpop.permute.xlu1 %859 }
 0x2d4   : > { %v410_v14 = vpop.permute.xlu0 %409 }
 0x2d7   : > { %5372 = vmatmul.msk.f32.gmra.mxu1 %vm563_vm1, %v841_v10  ;;  %v928_v10 = vadd.f32 %v6841_v51, %v927_v62  ;;  %v1022_v56 = vpop.permute.xlu1 %1021 }
 0x2d9   : > { %v932_v27 = vsel %vm6870_vm12, %v6841_v51, %v928_v10 }
 0x2df   : > { %5373 = vmatmul.msk.f32.gmra.mxu1 %vm563_vm1, %v842_v11  ;;  %v935_v11 = vand.u32 2147483648, %v6833_v43 }
 0x2e1   : > { %v936_v28 = vor.u32 1.1754944e-38, %v935_v11 }
 0x2e3   : > { %v937_v43 = vsel %vm934_vm3, %v936_v28, %v932_v27 }
 0x344   : > { %v896_v44 = vpop.f32.mrf.mxu1 }
 0x345   : > { %v897_v32 = vadd.f32 %v896_v44, %v850_v26 }
 0x347   : > { %v984_v45 = vmul.f32 %v937_v43, %v897_v32 }
 0x349   : > { %v6911_v54 = vadd.f32 %v984_v45, %v6795_v53  ;;  %v998_v53 = vld [vmem:[%s10674_s3 + $0x90] sm:$0xff] }
 0x34c   : > { %v899_v37 = vpop.f32.mrf.mxu1 }
 0x34d   : > { %v900_v23 = vadd.f32 %v899_v37, %v855_v18  ;;  %v400_v18 = vpop.permute.xlu2 %399 }
 0x34f   : > { %v985_v40 = vmul.f32 %v952_v38, %v900_v23 }
 0x351   : > { %v6907_v44 = vadd.f32 %v985_v40, %v6791_v47  ;;  %v997_v47 = vld [vmem:[%s10674_s3 + $0x88] sm:$0xff] }
 0x353   : > { %v993_v33 = vmax.f32 %v6907_v44, 0.0 }
 0x354   : > { %v902_v0 = vpop.f32.mrf.mxu1 }
 0x355   : > { %v903_v16 = vadd.f32 %v902_v0, %v860_v9  ;;  %v1007_v0 = vpop.permute.xlu1 %1006  ;;  %v519_v9 = vpop.f32.mrf.mxu0 }
 0x356   : > { %v520_v20 = vadd.f32 %v519_v9, %v400_v18  ;;  %v1248_v18 = vld [vmem:[%s10674_s3 + $0x190] sm:$0xff] }
 0x357   : > { %v986_v35 = vmul.f32 %v967_v30, %v903_v16 }
 0x358   : > { %v1138_v24 = vsub.f32 0.0, %v520_v20 }
 0x359   : > { %v6903_v48 = vadd.f32 %v986_v35, %v6787_v50  ;;  %v996_v50 = vld [vmem:[%s10674_s3 + $0x80] sm:$0xff] }
 0x35a   : > { %v1142_v28 = vmul.f32 1.442695, %v1138_v24 }
 0x35b   : > { %v994_v52 = vmax.f32 %v6903_v48, 0.0 }
 0x35c   : > { %v905_v31 = vpop.f32.mrf.mxu1 }
 0x35d   : > { %v906_v36 = vadd.f32 %v905_v31, %v865_v59  ;;  %v522_v10 = vpop.f32.mrf.mxu0  ;;  %v405_v17 = vpop.permute.xlu1 %404 }
 0x35e   : > { %v523_v19 = vadd.f32 %v522_v10, %v405_v17  ;;  %v1085_v17 = vpop.permute.xlu2 %1084 }
 0x35f   : > { %v987_v42 = vmul.f32 %v982_v39, %v906_v36 }
 0x360   : > { %v1139_v23 = vsub.f32 0.0, %v523_v19  ;;  %v1306_v19 = vld [vmem:[%s10674_s3 + $0x360] sm:$0xff] }
 0x361   : > { %v6900_v46 = vadd.f32 %v987_v42, %v6784_v49  ;;  %v992_v49 = vmax.f32 %v6911_v54, 0.0 }
 0x362   : > { %v1144_v27 = vmul.f32 1.442695, %v1139_v23 }
 0x363   : > { %v995_v51 = vmax.f32 %v6900_v46, 0.0 }
 0x365   : > { %1048 = vmatpush.msrb.mxu2 %v995_v51  ;;  %v525_v11 = vpop.f32.mrf.mxu0 }
 0x366   : > { %v526_v15 = vadd.f32 %v525_v11, %v410_v14 }
 0x367   : > { %1049 = vmatpush.msrb.mxu2 %v994_v52 }
 0x368   : > { %v1140_v21 = vsub.f32 0.0, %v526_v15 }
 0x369   : > { %1050 = vmatpush.msrb.mxu2 %v993_v33 }
 0x36a   : > { %v1146_v25 = vmul.f32 1.442695, %v1140_v21 }
 0x36b   : > { %1051 = vmatpush.msrb.mxu2 %v992_v49 }
 0x36c   : > { %5374 = vmatmul.msk.f32.vlgmr.msrb.gmra.mxu2 %vm563_vm1, %v996_v50  ;;  %5726 = vpow2.f32 %v1146_v25 }
 0x36d   : > { %v528_v13 = vpop.f32.mrf.mxu0 }
 0x36e   : > { %v529_v16 = vadd.f32 %v528_v13, %v415_v12  ;;  %v1303_v13 = vld [vmem:[%s10674_s3 + $0x348] sm:$0xff] }
 0x370   : > { %v1141_v22 = vsub.f32 0.0, %v529_v16 }
 0x372   : > { %v1148_v26 = vmul.f32 1.442695, %v1141_v22  ;;  %v5727_v29 = vpop.eup %5726 }
 0x373   : > { %v6947_v32 = vadd.f32 1.0, %v5727_v29 }
 0x374   : > { %5375 = vmatmul.msk.f32.gmra.mxu2 %vm563_vm1, %v997_v47  ;;  %5728 = vpow2.f32 %v1148_v26 }
 0x375   : > { %5730 = vpow2.f32 %v1144_v27  ;;  %vm1189_vm9 = vweird.f32 %v6947_v32 }
 0x376   : > { %5732 = vpow2.f32 %v1142_v28 }
 0x377   : > { %5734 = vrcp.f32 %v6947_v32 }
 0x37a   : > { %v5729_v30 = vpop.eup %5728 }
 0x37b   : > { %v5731_v31 = vpop.eup %5730  ;;  %v1153_v36 = vadd.f32 1.0, %v5729_v30 }
 0x37c   : > { %5376 = vmatmul.msk.f32.gmra.mxu2 %vm563_vm1, %v998_v53  ;;  %v5733_v35 = vpop.eup %5732  ;;  %v1151_v38 = vadd.f32 1.0, %v5731_v31 }
 0x37d   : > { %v6949_v39 = vadd.f32 1.0, %v5733_v35  ;;  %5736 = vrcp.f32 %v1153_v36  ;;  %v6955_v42 = vpop.eup %5734  ;;  %vm1204_vm4 = vweird.f32 %v1153_v36 }
 0x37e   : > { %5738 = vrcp.f32 %v1151_v38  ;;  %v1185_v51 = vmul.f32 %v6955_v42, %v6947_v32  ;;  %vm1190_vm6 = vweird.f32 %v6955_v42  ;;  %vm1174_vm11 = vweird.f32 %v1151_v38 }
 0x37f   : > { %5740 = vrcp.f32 %v6949_v39  ;;  %vm1159_vm7 = vweird.f32 %v6949_v39  ;;  %vm6987_vm13 = vmor %vm1189_vm9, %vm1190_vm6  ;;  %v1165_v10 = vand.u32 2147483648, %v6949_v39  ;;  %v1163_v14 = vand.u32 2147483647, %v6949_v39 }
 0x380   : > { %v1186_v53 = vsub.f32 1.0, %v1185_v51 }
 0x381   : > { %v1166_v28 = vor.u32 1.1754944e-38, %v1165_v10  ;;  %v1302_v10 = vld [vmem:[%s10674_s3 + $0x340] sm:$0xff] }
 0x383   : > { %v6957_v43 = vpop.eup %5736 }
 0x384   : > { %5377 = vmatmul.msk.f32.gmra.mxu2 %vm563_vm1, %v999_v34  ;;  %v6959_v45 = vpop.eup %5738  ;;  %v1200_v33 = vmul.f32 %v6957_v43, %v1153_v36  ;;  %vm1205_vm5 = vweird.f32 %v6957_v43 }
 0x385   : > { %v6963_v52 = vpop.eup %5740  ;;  %v1170_v50 = vmul.f32 %v6959_v45, %v1151_v38  ;;  %vm6981_vm10 = vmor %vm1204_vm4, %vm1205_vm5  ;;  %vm1175_vm12 = vweird.f32 %v6959_v45  ;;  %vm1164_vm4 = vcmp.eq.f32.partialorder %v1163_v14, 8.507059e+37  ;;  %v1246_v14 = vld [vmem:[%s10674_s3 + $0x180] sm:$0xff] }
 0x386   : > { %v1155_v47 = vmul.f32 %v6963_v52, %v6949_v39  ;;  %v1201_v34 = vsub.f32 1.0, %v1200_v33  ;;  %vm1160_vm8 = vweird.f32 %v6963_v52  ;;  %vm7008_vm0 = vmor %vm1174_vm11, %vm1175_vm12  ;;  %v1293_v33 = vld [vmem:[%s10674_s3 + $0x2f8] sm:$0xff] }
 0x387   : > { %vm6999_vm14 = vmor %vm1159_vm7, %vm1160_vm8 }
 0x3ef   : > { %v1053_v37 = vpop.f32.mrf.mxu2 }
 0x3f0   : > { %v1054_v1 = vadd.f32 %v1053_v37, %v1007_v0  ;;  %v1171_v37 = vsub.f32 1.0, %v1170_v50  ;;  %v1180_v0 = vand.u32 2147483648, %v1151_v38  ;;  %v1236_v50 = vld [vmem:[%s10674_s3 + $0x130] sm:$0xff] }
 0x3f2   : > { %v1065_v4 = vmax.f32 %v1054_v1, 0.0  ;;  %v1181_v20 = vor.u32 1.1754944e-38, %v1180_v0  ;;  %v1241_v0 = vld [vmem:[%s10674_s3 + $0x158] sm:$0xff] }
 0x3f7   : > { %v1056_v41 = vpop.f32.mrf.mxu2 }
 0x3f8   : > { %v1057_v62 = vadd.f32 %v1056_v41, %v1012_v61  ;;  %v1156_v41 = vsub.f32 1.0, %v1155_v47  ;;  %v1294_v47 = vld [vmem:[%s10674_s3 + $0x300] sm:$0xff] }
 0x3fa   : > { %v1066_v3 = vmax.f32 %v1057_v62, 0.0  ;;  %v1210_v62 = vand.u32 2147483648, %v1153_v36 }
 0x3fc   : > { %v1211_v12 = vor.u32 1.1754944e-38, %v1210_v62  ;;  %v1298_v62 = vld [vmem:[%s10674_s3 + $0x320] sm:$0xff] }
 0x3ff   : > { %v1059_v55 = vpop.f32.mrf.mxu2 }
 0x400   : > { %v1060_v59 = vadd.f32 %v1059_v55, %v1017_v57  ;;  %v1187_v55 = vmul.f32 %v6955_v42, %v1186_v53  ;;  %v1095_v57 = vpop.permute.xlu0 %1094  ;;  %v1225_v53 = vld [vmem:[%s10674_s3 + $0xd8] sm:$0xff] }
 0x402   : > { %v1067_v2 = vmax.f32 %v1060_v59, 0.0  ;;  %v1172_v59 = vmul.f32 %v6959_v45, %v1171_v37  ;;  %v1188_v61 = vadd.f32 %v6955_v42, %v1187_v55  ;;  %v1295_v37 = vld [vmem:[%s10674_s3 + $0x308] sm:$0xff]  ;;  %v1238_v55 = vld [vmem:[%s10674_s3 + $0x140] sm:$0xff] }
 0x404   : > { %v1192_v11 = vsel %vm6987_vm13, %v6955_v42, %v1188_v61  ;;  %v1240_v61 = vld [vmem:[%s10674_s3 + $0x150] sm:$0xff] }
 0x407   : > { %v1062_v58 = vpop.f32.mrf.mxu2 }
 0x408   : > { %v1063_v60 = vadd.f32 %v1062_v58, %v1022_v56  ;;  %v1202_v56 = vmul.f32 %v6957_v43, %v1201_v34  ;;  %v1080_v26 = vpop.permute.xlu0 %1079  ;;  %v1237_v34 = vld [vmem:[%s10674_s3 + $0x138] sm:$0xff] }
 0x40a   : > { %v1068_v63 = vmax.f32 %v1063_v60, 0.0  ;;  %v1157_v60 = vmul.f32 %v6963_v52, %v1156_v41  ;;  %v1203_v1 = vadd.f32 %v6957_v43, %v1202_v56  ;;  %v1226_v41 = vld [vmem:[%s10674_s3 + $0xe0] sm:$0xff]  ;;  %v1296_v56 = vld [vmem:[%s10674_s3 + $0x310] sm:$0xff] }
 0x40c   : > { %1121 = vmatpush.msrb.mxu3 %v1068_v63  ;;  %v1178_v63 = vand.u32 2147483647, %v1151_v38  ;;  %v1158_v9 = vadd.f32 %v6963_v52, %v1157_v60  ;;  %v1207_v16 = vsel %vm6981_vm10, %v6957_v43, %v1203_v1  ;;  %v1228_v60 = vld [vmem:[%s10674_s3 + $0xf0] sm:$0xff]  ;;  %v1299_v1 = vld [vmem:[%s10674_s3 + $0x328] sm:$0xff] }
 0x40e   : > { %1122 = vmatpush.msrb.mxu3 %v1067_v2  ;;  %v1208_v2 = vand.u32 2147483647, %v1153_v36  ;;  %vm7012_vm2 = vcmp.eq.f32.partialorder %v1178_v63, 8.507059e+37  ;;  %v1162_v27 = vsel %vm6999_vm14, %v6963_v52, %v1158_v9  ;;  %v1234_v52 = vld [vmem:[%s10674_s3 + $0x120] sm:$0xff]  ;;  %v1229_v63 = vld [vmem:[%s10674_s3 + $0xf8] sm:$0xff]  ;;  %v1244_v9 = vld [vmem:[%s10674_s3 + $0x170] sm:$0xff] }
 0x40f   : > { %v1167_v42 = vsel %vm1164_vm4, %v1166_v28, %v1162_v27  ;;  %v1309_v27 = vld [vmem:[%s10674_s3 + $0x378] sm:$0xff] }
 0x410   : > { %1123 = vmatpush.msrb.mxu3 %v1066_v3  ;;  %v1195_v3 = vand.u32 2147483648, %v6947_v32  ;;  %vm1209_vm15 = vcmp.eq.f32.partialorder %v1208_v2, 8.507059e+37  ;;  %v1230_v2 = vld [vmem:[%s10674_s3 + $0x100] sm:$0xff] }
 0x411   : > { %v1212_v30 = vsel %vm1209_vm15, %v1211_v12, %v1207_v16  ;;  %v1245_v12 = vld [vmem:[%s10674_s3 + $0x178] sm:$0xff]  ;;  %v1247_v16 = vld [vmem:[%s10674_s3 + $0x188] sm:$0xff] }
 0x412   : > { %1124 = vmatpush.msrb.mxu3 %v1065_v4  ;;  %v1196_v21 = vor.u32 1.1754944e-38, %v1195_v3  ;;  %v1242_v3 = vld [vmem:[%s10674_s3 + $0x160] sm:$0xff]  ;;  %v1300_v4 = vld [vmem:[%s10674_s3 + $0x330] sm:$0xff] }
 0x413   : > { %5378 = vmatmul.msk.f32.vlgmr.msrb.gmra.mxu3 %vm563_vm1, %v1069_v5  ;;  %v1173_v5 = vadd.f32 %v6959_v45, %v1172_v59  ;;  %v1297_v59 = vld [vmem:[%s10674_s3 + $0x318] sm:$0xff] }
 0x415   : > { %v1177_v24 = vsel %vm7008_vm0, %v6959_v45, %v1173_v5  ;;  %v1231_v5 = vld [vmem:[%s10674_s3 + $0x108] sm:$0xff] }
 0x416   : > { %v1182_v36 = vsel %vm7012_vm2, %v1181_v20, %v1177_v24  ;;  %v1249_v20 = vld [vmem:[%s10674_s3 + $0x198] sm:$0xff]  ;;  %v1308_v24 = vld [vmem:[%s10674_s3 + $0x370] sm:$0xff] }
 0x41b   : > { %5379 = vmatmul.msk.f32.gmra.mxu3 %vm563_vm1, %v1070_v6  ;;  %v1243_v6 = vld [vmem:[%s10674_s3 + $0x168] sm:$0xff] }
 0x423   : > { %5380 = vmatmul.msk.f32.gmra.mxu3 %vm563_vm1, %v1071_v7  ;;  %v1193_v7 = vand.u32 2147483647, %v6947_v32 }
 0x425   : > { %vm1194_vm3 = vcmp.eq.f32.partialorder %v1193_v7, 8.507059e+37  ;;  %v1301_v7 = vld [vmem:[%s10674_s3 + $0x338] sm:$0xff] }
 0x426   : > { %v1197_v29 = vsel %vm1194_vm3, %v1196_v21, %v1192_v11  ;;  %v1233_v11 = vld [vmem:[%s10674_s3 + $0x118] sm:$0xff]  ;;  %v1307_v21 = vld [vmem:[%s10674_s3 + $0x368] sm:$0xff] }
 0x42b   : > { %5381 = vmatmul.msk.f32.gmra.mxu3 %vm563_vm1, %v1072_v8  ;;  %v1090_v8 = vpop.permute.xlu1 %1089 }
 0x496   : > { %v6952_v40 = vpop.f32.mrf.mxu3 }
 0x497   : > { %v1127_v31 = vadd.f32 %v6952_v40, %v1080_v26  ;;  %v1251_v26 = vld [vmem:[%s10674_s3 + $0x1a8] sm:$0xff] }
 0x499   : > { %v1214_v43 = vmul.f32 %v1167_v42, %v1127_v31 }
 0x49b   : > { %v1218_v51 = vadd.f32 %v1214_v43, %v6911_v54  ;;  %v1235_v54 = vld [vmem:[%s10674_s3 + $0x128] sm:$0xff] }
 0x49c   : > { %v1255_v43 = vld [vmem:[%s10674_s3 + $0x1c8] sm:$0xff] }
 0x49e   : > { %v1129_v49 = vpop.f32.mrf.mxu3 }
 0x49f   : > { %v1130_v23 = vadd.f32 %v1129_v49, %v1085_v17  ;;  %v1224_v49 = vld [vmem:[%s10674_s3 + $0xd0] sm:$0xff]  ;;  %v1305_v17 = vld [vmem:[%s10674_s3 + $0x358] sm:$0xff] }
 0x4a1   : > { %v1215_v38 = vmul.f32 %v1182_v36, %v1130_v23  ;;  %v1250_v23 = vld [vmem:[%s10674_s3 + $0x1a0] sm:$0xff] }
 0x4a3   : > { %v1219_v40 = vadd.f32 %v1215_v38, %v6907_v44  ;;  %v1223_v44 = vld [vmem:[%s10674_s3 + $0xc8] sm:$0xff]  ;;  %v1254_v38 = vld [vmem:[%s10674_s3 + $0x1c0] sm:$0xff] }
 0x4a6   : > { %v1132_v58 = vpop.f32.mrf.mxu3 }
 0x4a7   : > { %v1133_v15 = vadd.f32 %v1132_v58, %v1090_v8  ;;  %v1239_v58 = vld [vmem:[%s10674_s3 + $0x148] sm:$0xff]  ;;  %v1232_v8 = vld [vmem:[%s10674_s3 + $0x110] sm:$0xff] }
 0x4a9   : > { %v1216_v32 = vmul.f32 %v1197_v29, %v1133_v15  ;;  %v1304_v15 = vld [vmem:[%s10674_s3 + $0x350] sm:$0xff] }
 0x4aa   : > { %v1252_v29 = vld [vmem:[%s10674_s3 + $0x1b0] sm:$0xff] }
 0x4ab   : > { %v1220_v45 = vadd.f32 %v1216_v32, %v6903_v48  ;;  %v1292_v48 = vld [vmem:[%s10674_s3 + $0x2f0] sm:$0xff]  ;;  %v1253_v32 = vld [vmem:[%s10674_s3 + $0x1b8] sm:$0xff] }
 0x4ae   : > { %v1135_v22 = vpop.f32.mrf.mxu3 }
 0x4af   : > { %v1136_v25 = vadd.f32 %v1135_v22, %v1095_v57  ;;  %v1227_v57 = vld [vmem:[%s10674_s3 + $0xe8] sm:$0xff] }
 0x4b1   : > { %v1217_v35 = vmul.f32 %v1212_v30, %v1136_v25  ;;  %v1310_v30 = vld [vmem:[%s10674_s3 + $0x380] sm:$0xff] }
 0x4b3   : > { %v1221_v39 = vadd.f32 %v1217_v35, %v6900_v46  ;;  %v1222_v46 = vld [vmem:[%s10674_s3 + $0xc0] sm:$0xff]  ;;  %v1311_v35 = vld [vmem:[%s10674_s3 + $0x388] sm:$0xff] }
 0x4b5   : > { %2194 = vmatpush.msrb.mxu0 %v1221_v39  ;;  %5584 = vmatpush.msra.mxu1 %v1221_v39 }
 0x4b6   : > { %5585 = vmatpush.msra.mxu3 %v1221_v39  ;;  %v1312_v39 = vld [vmem:[%s10674_s3 + $0x390] sm:$0xff] }
 0x4b7   : > { %2195 = vmatpush.msrb.mxu0 %v1220_v45  ;;  %5586 = vmatpush.msra.mxu1 %v1220_v45 }
 0x4b8   : > { %5587 = vmatpush.msra.mxu3 %v1220_v45  ;;  %v1313_v45 = vld [vmem:[%s10674_s3 + $0x398] sm:$0xff] }
 0x4b9   : > { %2196 = vmatpush.msrb.mxu0 %v1219_v40  ;;  %5588 = vmatpush.msra.mxu1 %v1219_v40 }
 0x4ba   : > { %5589 = vmatpush.msra.mxu3 %v1219_v40 }
 0x4bb   : > { %2197 = vmatpush.msrb.mxu0 %v1218_v51  ;;  %5590 = vmatpush.msra.mxu1 %v1218_v51 }
 0x4bc   : > { %5591 = vmatpush.msra.mxu3 %v1218_v51  ;;  %5382 = vmatmul.msk.f32.vlgmr.msrb.gmra.mxu0 %vm563_vm1, %v1222_v46  ;;  %v1256_v51 = vld [vmem:[%s10674_s3 + $0x1d0] sm:$0xff]  ;;  %v1314_v46 = vld [vmem:[%s10674_s3 + $0x3a0] sm:$0xff] }
 0x4bd   : > { %5394 = vmatmul.msk.f32.vlgmr.msra.gmra.mxu1 %vm563_vm1, %v1234_v52  ;;  %5452 = vmatmul.msk.f32.vlgmr.msra.gmra.mxu3 %vm563_vm1, %v1292_v48  ;;  %v1257_v48 = vld [vmem:[%s10674_s3 + $0x1d8] sm:$0xff] }
 0x4c4   : > { %5383 = vmatmul.msk.f32.gmra.mxu0 %vm563_vm1, %v1223_v44  ;;  %v1315_v44 = vld [vmem:[%s10674_s3 + $0x3a8] sm:$0xff] }
 0x4c5   : > { %5395 = vmatmul.msk.f32.gmra.mxu1 %vm563_vm1, %v1235_v54  ;;  %5453 = vmatmul.msk.f32.gmra.mxu3 %vm563_vm1, %v1293_v33  ;;  %v1258_v33 = vld [vmem:[%s10674_s3 + $0x1e0] sm:$0xff] }
 0x4cc   : > { %5384 = vmatmul.msk.f32.gmra.mxu0 %vm563_vm1, %v1224_v49  ;;  %v1316_v49 = vld [vmem:[%s10674_s3 + $0x3b0] sm:$0xff] }
 0x4cd   : > { %5396 = vmatmul.msk.f32.gmra.mxu1 %vm563_vm1, %v1236_v50  ;;  %5454 = vmatmul.msk.f32.gmra.mxu3 %vm563_vm1, %v1294_v47 }
 0x4d4   : > { %5385 = vmatmul.msk.f32.gmra.mxu0 %vm563_vm1, %v1225_v53  ;;  %v1259_v53 = vld [vmem:[%s10674_s3 + $0x1e8] sm:$0xff] }
 0x4d5   : > { %5397 = vmatmul.msk.f32.gmra.mxu1 %vm563_vm1, %v1237_v34  ;;  %5455 = vmatmul.msk.f32.gmra.mxu3 %vm563_vm1, %v1295_v37  ;;  %v1317_v34 = vld [vmem:[%s10674_s3 + $0x3b8] sm:$0xff] }
 0x4dc   : > { %5386 = vmatmul.msk.f32.gmra.mxu0 %vm563_vm1, %v1226_v41 }
 0x4dd   : > { %5398 = vmatmul.msk.f32.gmra.mxu1 %vm563_vm1, %v1238_v55  ;;  %5456 = vmatmul.msk.f32.gmra.mxu3 %vm563_vm1, %v1296_v56  ;;  %v1260_v55 = vld [vmem:[%s10674_s3 + $0x1f0] sm:$0xff] }
 0x4e4   : > { %5387 = vmatmul.msk.f32.gmra.mxu0 %vm563_vm1, %v1227_v57  ;;  %v1261_v57 = vld [vmem:[%s10674_s3 + $0x1f8] sm:$0xff] }
 0x4e5   : > { %5399 = vmatmul.msk.f32.gmra.mxu1 %vm563_vm1, %v1239_v58  ;;  %5457 = vmatmul.msk.f32.gmra.mxu3 %vm563_vm1, %v1297_v59  ;;  %v1262_v59 = vld [vmem:[%s10674_s3 + $0x200] sm:$0xff] }
 0x4ec   : > { %5388 = vmatmul.msk.f32.gmra.mxu0 %vm563_vm1, %v1228_v60 }
 0x4ed   : > { %5400 = vmatmul.msk.f32.gmra.mxu1 %vm563_vm1, %v1240_v61  ;;  %5458 = vmatmul.msk.f32.gmra.mxu3 %vm563_vm1, %v1298_v62  ;;  %v1263_v61 = vld [vmem:[%s10674_s3 + $0x208] sm:$0xff] }
 0x4f4   : > { %5389 = vmatmul.msk.f32.gmra.mxu0 %vm563_vm1, %v1229_v63  ;;  %v1264_v63 = vld [vmem:[%s10674_s3 + $0x210] sm:$0xff] }
 0x4f5   : > { %5401 = vmatmul.msk.f32.gmra.mxu1 %vm563_vm1, %v1241_v0  ;;  %5459 = vmatmul.msk.f32.gmra.mxu3 %vm563_vm1, %v1299_v1  ;;  %v1265_v1 = vld [vmem:[%s10674_s3 + $0x218] sm:$0xff] }
 0x4fc   : > { %5390 = vmatmul.msk.f32.gmra.mxu0 %vm563_vm1, %v1230_v2 }
 0x4fd   : > { %5402 = vmatmul.msk.f32.gmra.mxu1 %vm563_vm1, %v1242_v3  ;;  %5460 = vmatmul.msk.f32.gmra.mxu3 %vm563_vm1, %v1300_v4  ;;  %v1266_v3 = vld [vmem:[%s10674_s3 + $0x220] sm:$0xff]  ;;  %v7350_v4 = vpop.permute.xlu0 %1426 }
 0x504   : > { %5391 = vmatmul.msk.f32.gmra.mxu0 %vm563_vm1, %v1231_v5  ;;  %v7353_v5 = vpop.permute.xlu2 %1421 }
 0x505   : > { %5403 = vmatmul.msk.f32.gmra.mxu1 %vm563_vm1, %v1243_v6  ;;  %5461 = vmatmul.msk.f32.gmra.mxu3 %vm563_vm1, %v1301_v7  ;;  %v1267_v7 = vld [vmem:[%s10674_s3 + $0x228] sm:$0xff] }
 0x50c   : > { %5392 = vmatmul.msk.f32.gmra.mxu0 %vm563_vm1, %v1232_v8  ;;  %v7361_v8 = vpop.permute.xlu0 %1441 }
 0x50d   : > { %5404 = vmatmul.msk.f32.gmra.mxu1 %vm563_vm1, %v1244_v9  ;;  %5462 = vmatmul.msk.f32.gmra.mxu3 %vm563_vm1, %v1302_v10  ;;  %v7365_v10 = vpop.permute.xlu1 %1416 }
 0x514   : > { %5393 = vmatmul.msk.f32.gmra.mxu0 %vm563_vm1, %v1233_v11 }
 0x515   : > { %5405 = vmatmul.msk.f32.gmra.mxu1 %vm563_vm1, %v1245_v12  ;;  %5463 = vmatmul.msk.f32.gmra.mxu3 %vm563_vm1, %v1303_v13  ;;  %v1268_v12 = vld [vmem:[%s10674_s3 + $0x230] sm:$0xff]  ;;  %v7372_v13 = vpop.permute.xlu2 %1436 }
 0x51d   : > { %5406 = vmatmul.msk.f32.gmra.mxu1 %vm563_vm1, %v1246_v14  ;;  %5464 = vmatmul.msk.f32.gmra.mxu3 %vm563_vm1, %v1304_v15  ;;  %v7375_v14 = vpop.permute.xlu0 %1456 }
 0x525   : > { %5407 = vmatmul.msk.f32.gmra.mxu1 %vm563_vm1, %v1247_v16  ;;  %5465 = vmatmul.msk.f32.gmra.mxu3 %vm563_vm1, %v1305_v17  ;;  %v1269_v17 = vld [vmem:[%s10674_s3 + $0x238] sm:$0xff] }
 0x52d   : > { %5408 = vmatmul.msk.f32.gmra.mxu1 %vm563_vm1, %v1248_v18  ;;  %5466 = vmatmul.msk.f32.gmra.mxu3 %vm563_vm1, %v1306_v19  ;;  %v7384_v18 = vpop.permute.xlu1 %1431  ;;  %v7387_v19 = vpop.permute.xlu2 %1451 }
 0x535   : > { %5409 = vmatmul.msk.f32.gmra.mxu1 %vm563_vm1, %v1249_v20  ;;  %5467 = vmatmul.msk.f32.gmra.mxu3 %vm563_vm1, %v1307_v21  ;;  %v7389_v20 = vpop.permute.xlu0 %1471 }
 0x539   : > { %v7363_v9 = vpop.f32.mrf.mxu0 }
 0x53a   : > { %v7205_v22 = vpop.f32.mrf.mxu1 }
 0x53d   : > { %5410 = vmatmul.msk.f32.gmra.mxu1 %vm563_vm1, %v1250_v23  ;;  %5468 = vmatmul.msk.f32.gmra.mxu3 %vm563_vm1, %v1308_v24  ;;  %v1270_v23 = vld [vmem:[%s10674_s3 + $0x240] sm:$0xff] }
 0x540   : > { %v7293_v50 = vpop.f32.mrf.mxu3 }
 0x541   : > { %10897 = vst [vmem:[#allocation6_spill] sm:$0xff] %v7293_v50  ;;  %v7377_v15 = vpop.f32.mrf.mxu0  ;;  %v1277_v50 = vld [vmem:[%s10674_s3 + $0x278] sm:$0xff] }
 0x542   : > { %v7215_v25 = vpop.f32.mrf.mxu1 }
 0x545   : > { %5411 = vmatmul.msk.f32.gmra.mxu1 %vm563_vm1, %v1251_v26  ;;  %5469 = vmatmul.msk.f32.gmra.mxu3 %vm563_vm1, %v1309_v27  ;;  %v7399_v26 = vpop.permute.xlu1 %1446  ;;  %v7401_v27 = vpop.permute.xlu2 %1466 }
 0x548   : > { %v7305_v37 = vpop.f32.mrf.mxu3 }
 0x549   : > { %10898 = vst [vmem:[#allocation7_spill] sm:$0xff] %v7305_v37  ;;  %v7396_v24 = vpop.f32.mrf.mxu0 }
 0x54a   : > { %v7225_v28 = vpop.f32.mrf.mxu1 }
 0x54d   : > { %5412 = vmatmul.msk.f32.gmra.mxu1 %vm563_vm1, %v1252_v29  ;;  %5470 = vmatmul.msk.f32.gmra.mxu3 %vm563_vm1, %v1310_v30  ;;  %v1271_v30 = vld [vmem:[%s10674_s3 + $0x248] sm:$0xff] }
 0x552   : > { %v7235_v31 = vpop.f32.mrf.mxu1 }
 0x555   : > { %5413 = vmatmul.msk.f32.gmra.mxu1 %vm563_vm1, %v1253_v32  ;;  %5471 = vmatmul.msk.f32.gmra.mxu3 %vm563_vm1, %v1311_v35  ;;  %v7408_v32 = vpop.permute.xlu0 %1486  ;;  %v7411_v35 = vpop.f32.mrf.mxu0 }
 0x55a   : > { %v7245_v36 = vpop.f32.mrf.mxu1 }
 0x55d   : > { %5414 = vmatmul.msk.f32.gmra.mxu1 %vm563_vm1, %v1254_v38  ;;  %5472 = vmatmul.msk.f32.gmra.mxu3 %vm563_vm1, %v1312_v39  ;;  %v7413_v38 = vpop.permute.xlu1 %1461  ;;  %v7415_v39 = vpop.permute.xlu2 %1481 }
 0x562   : > { %v7255_v42 = vpop.f32.mrf.mxu1 }
 0x565   : > { %5415 = vmatmul.msk.f32.gmra.mxu1 %vm563_vm1, %v1255_v43  ;;  %5473 = vmatmul.msk.f32.gmra.mxu3 %vm563_vm1, %v1313_v45  ;;  %v1272_v45 = vld [vmem:[%s10674_s3 + $0x250] sm:$0xff] }
 0x56a   : > { %v7265_v40 = vpop.f32.mrf.mxu1 }
 0x56d   : > { %5416 = vmatmul.msk.f32.gmra.mxu1 %vm563_vm1, %v1256_v51  ;;  %5474 = vmatmul.msk.f32.gmra.mxu3 %vm563_vm1, %v1314_v46  ;;  %v7423_v51 = vpop.permute.xlu0 %1501  ;;  %v7425_v46 = vpop.f32.mrf.mxu0 }
 0x572   : > { %v7275_v52 = vpop.f32.mrf.mxu1 }
 0x575   : > { %5417 = vmatmul.msk.f32.gmra.mxu1 %vm563_vm1, %v1257_v48  ;;  %5475 = vmatmul.msk.f32.gmra.mxu3 %vm563_vm1, %v1315_v44  ;;  %v7427_v48 = vpop.permute.xlu1 %1476 }
 0x57a   : > { %v7285_v54 = vpop.f32.mrf.mxu1 }
 0x57d   : > { %5418 = vmatmul.msk.f32.gmra.mxu1 %vm563_vm1, %v1258_v33  ;;  %5476 = vmatmul.msk.f32.gmra.mxu3 %vm563_vm1, %v1316_v49  ;;  %v1273_v33 = vld [vmem:[%s10674_s3 + $0x258] sm:$0xff]  ;;  %v7434_v49 = vpop.permute.xlu2 %1496 }
 0x582   : > { %v7297_v47 = vpop.f32.mrf.mxu1 }
 0x585   : > { %5419 = vmatmul.msk.f32.gmra.mxu1 %vm563_vm1, %v1259_v53  ;;  %5477 = vmatmul.msk.f32.gmra.mxu3 %vm563_vm1, %v1317_v34  ;;  %v7437_v53 = vpop.permute.xlu0 %1516  ;;  %v7439_v34 = vpop.f32.mrf.mxu0 }
 0x58a   : > { %v7309_v41 = vpop.f32.mrf.mxu1 }
 0x58b   : > { %10899 = vst [vmem:[#allocation8_spill] sm:$0xff] %v7309_v41 }
 0x58d   : > { %5420 = vmatmul.msk.f32.gmra.mxu1 %vm563_vm1, %v1260_v55 }
 0x592   : > { %v7315_v56 = vpop.f32.mrf.mxu1 }
 0x595   : > { %5421 = vmatmul.msk.f32.gmra.mxu1 %vm563_vm1, %v1261_v57  ;;  %v1274_v57 = vld [vmem:[%s10674_s3 + $0x260] sm:$0xff] }
 0x59a   : > { %v7321_v58 = vpop.f32.mrf.mxu1 }
 0x59d   : > { %5422 = vmatmul.msk.f32.gmra.mxu1 %vm563_vm1, %v1262_v59  ;;  %v1492_v59 = vpop.permute.xlu1 %1491 }
 0x5a2   : > { %v7327_v60 = vpop.f32.mrf.mxu1 }
 0x5a3   : > { %10900 = vst [vmem:[#allocation9_spill] sm:$0xff] %v7327_v60 }
 0x5a5   : > { %5423 = vmatmul.msk.f32.gmra.mxu1 %vm563_vm1, %v1263_v61  ;;  %v1512_v61 = vpop.permute.xlu2 %1511 }
 0x5aa   : > { %v7333_v62 = vpop.f32.mrf.mxu1 }
 0x5ab   : > { %10901 = vst [vmem:[#allocation10_spill] sm:$0xff] %v7333_v62 }
 0x5ad   : > { %5424 = vmatmul.msk.f32.gmra.mxu1 %vm563_vm1, %v1264_v63  ;;  %v7447_v63 = vpop.permute.xlu0 %1531 }
 0x5b2   : > { %v7339_v0 = vpop.f32.mrf.mxu1 }
 0x5b5   : > { %5425 = vmatmul.msk.f32.gmra.mxu1 %vm563_vm1, %v1265_v1 }
 0x5ba   : > { %v7345_v2 = vpop.f32.mrf.mxu1 }
 0x5bb   : > { %10902 = vst [vmem:[#allocation11_spill] sm:$0xff] %v7345_v2 }
 0x5bd   : > { %5426 = vmatmul.msk.f32.gmra.mxu1 %vm563_vm1, %v1266_v3  ;;  %v1275_v3 = vld [vmem:[%s10674_s3 + $0x268] sm:$0xff] }
 0x5c2   : > { %v7355_v6 = vpop.f32.mrf.mxu1 }
 0x5c3   : > { %10903 = vst [vmem:[#allocation12_spill] sm:$0xff] %v7355_v6  ;;  %v1279_v6 = vld [vmem:[%s10674_s3 + $0x288] sm:$0xff] }
 0x5c5   : > { %5427 = vmatmul.msk.f32.gmra.mxu1 %vm563_vm1, %v1267_v7  ;;  %v7454_v7 = vpop.f32.mrf.mxu0 }
 0x5ca   : > { %v7367_v11 = vpop.f32.mrf.mxu1 }
 0x5cb   : > { %10904 = vst [vmem:[#allocation13_spill] sm:$0xff] %v7367_v11 }
 0x5cd   : > { %5428 = vmatmul.msk.f32.gmra.mxu1 %vm563_vm1, %v1268_v12  ;;  %v7457_v12 = vpop.permute.xlu1 %1506 }
 0x5d2   : > { %v7379_v16 = vpop.f32.mrf.mxu1 }
 0x5d5   : > { %5429 = vmatmul.msk.f32.gmra.mxu1 %vm563_vm1, %v1269_v17  ;;  %v7459_v17 = vpop.permute.xlu2 %1526 }
 0x5d6   : > { %10910 = vst [vmem:[#allocation19_spill] sm:$0xff] %v7459_v17 }
 0x5da   : > { %v7391_v21 = vpop.f32.mrf.mxu1 }
 0x5db   : > { %10905 = vst [vmem:[#allocation14_spill] sm:$0xff] %v7391_v21 }
 0x5dd   : > { %5430 = vmatmul.msk.f32.gmra.mxu1 %vm563_vm1, %v1270_v23  ;;  %v7471_v37 = vpop.permute.xlu2 %1541 }
 0x5de   : > { %10913 = vst [vmem:[#allocation22_spill] sm:$0xff] %v7471_v37 }
 0x5e2   : > { %v7403_v29 = vpop.f32.mrf.mxu1 }
 0x5e3   : > { %10906 = vst [vmem:[#allocation15_spill] sm:$0xff] %v7403_v29 }
 0x5e5   : > { %5431 = vmatmul.msk.f32.gmra.mxu1 %vm563_vm1, %v1271_v30  ;;  %v1276_v30 = vld [vmem:[%s10674_s3 + $0x270] sm:$0xff]  ;;  %v7488_v29 = vpop.permute.xlu2 %1556 }
 0x5e6   : > { %10916 = vst [vmem:[#allocation25_spill] sm:$0xff] %v7488_v29 }
 0x5ea   : > { %v7417_v43 = vpop.f32.mrf.mxu1 }
 0x5eb   : > { %10907 = vst [vmem:[#allocation16_spill] sm:$0xff] %v7417_v43 }
 0x5ed   : > { %5432 = vmatmul.msk.f32.gmra.mxu1 %vm563_vm1, %v1272_v45  ;;  %v7466_v45 = vpop.permute.xlu0 %1546 }
 0x5ee   : > { %10912 = vst [vmem:[#allocation21_spill] sm:$0xff] %v7466_v45 }
 0x5f2   : > { %v7429_v44 = vpop.f32.mrf.mxu1 }
 0x5f5   : > { %5433 = vmatmul.msk.f32.gmra.mxu1 %vm563_vm1, %v1273_v33  ;;  %v2220_v33 = vpop.f32.mrf.mxu0 }
 0x5f6   : > { %v7520_v17 = vadd.f32 %v2220_v33, %v7387_v19 }
 0x5f8   : > { %10923 = vst [vmem:[#allocation32_spill] sm:$0xff] %v7520_v17 }
 0x5fa   : > { %v7441_v55 = vpop.f32.mrf.mxu1 }
 0x5fb   : > { %10908 = vst [vmem:[#allocation17_spill] sm:$0xff] %v7441_v55 }
 0x5fd   : > { %5434 = vmatmul.msk.f32.gmra.mxu1 %vm563_vm1, %v1274_v57  ;;  %v7469_v57 = vpop.permute.xlu1 %1521 }
 0x602   : > { %v7449_v1 = vpop.f32.mrf.mxu1 }
 0x603   : > { %10909 = vst [vmem:[#allocation18_spill] sm:$0xff] %v7449_v1  ;;  %v7479_v1 = vpop.f32.mrf.mxu0 }
 0x605   : > { %5435 = vmatmul.msk.f32.gmra.mxu1 %vm563_vm1, %v1275_v3  ;;  %v7481_v55 = vpop.permute.xlu1 %1536 }
 0x60a   : > { %v7461_v23 = vpop.f32.mrf.mxu1 }
 0x60b   : > { %10911 = vst [vmem:[#allocation20_spill] sm:$0xff] %v7461_v23  ;;  %v7477_v23 = vpop.permute.xlu0 %1561  ;;  %v7493_v11 = vpop.f32.mrf.mxu0 }
 0x60c   : > { %10914 = vst [vmem:[#allocation23_spill] sm:$0xff] %v7477_v23 }
 0x60d   : > { %5436 = vmatmul.msk.f32.gmra.mxu1 %vm563_vm1, %v1276_v30  ;;  %v1278_v30 = vld [vmem:[%s10674_s3 + $0x280] sm:$0xff]  ;;  %v1552_v23 = vpop.permute.xlu1 %1551 }
 0x612   : > { %v2316_v3 = vpop.f32.mrf.mxu1 }
 0x613   : > { %v7491_v21 = vpop.permute.xlu0 %1576 }
 0x614   : > { %10917 = vst [vmem:[#allocation26_spill] sm:$0xff] %v7491_v21  ;;  %v7506_v21 = vpop.f32.mrf.mxu0 }
 0x615   : > { %5437 = vmatmul.msk.f32.gmra.mxu1 %vm563_vm1, %v1277_v50 }
 0x61a   : > { %v7483_v43 = vpop.f32.mrf.mxu1 }
 0x61b   : > { %10915 = vst [vmem:[#allocation24_spill] sm:$0xff] %v7483_v43  ;;  %v1572_v43 = vpop.permute.xlu2 %1571  ;;  %v1592_v2 = vpop.permute.xlu0 %1591 }
 0x61d   : > { %5438 = vmatmul.msk.f32.gmra.mxu1 %vm563_vm1, %v1278_v30  ;;  %v1280_v30 = vld [vmem:[%s10674_s3 + $0x290] sm:$0xff] }
 0x622   : > { %v7495_v50 = vpop.f32.mrf.mxu1 }
 0x623   : > { %10918 = vst [vmem:[#allocation27_spill] sm:$0xff] %v7495_v50  ;;  %v7509_v50 = vpop.permute.xlu1 %1566  ;;  %v7511_v29 = vpop.permute.xlu2 %1586 }
 0x624   : > { %10920 = vst [vmem:[#allocation29_spill] sm:$0xff] %v7509_v50  ;;  %v7516_v41 = vpop.permute.xlu0 %1606 }
 0x625   : > { %5439 = vmatmul.msk.f32.gmra.mxu1 %vm563_vm1, %v1279_v6  ;;  %10921 = vst [vmem:[#allocation30_spill] sm:$0xff] %v7511_v29  ;;  %v1281_v6 = vld [vmem:[%s10674_s3 + $0x298] sm:$0xff] }
 0x626   : > { %10922 = vst [vmem:[#allocation31_spill] sm:$0xff] %v7516_v41  ;;  %v1283_v41 = vld [vmem:[%s10674_s3 + $0x2a8] sm:$0xff] }
 0x62a   : > { %v7501_v62 = vpop.f32.mrf.mxu1 }
 0x62b   : > { %10919 = vst [vmem:[#allocation28_spill] sm:$0xff] %v7501_v62  ;;  %v2232_v62 = vpop.f32.mrf.mxu0  ;;  %v7522_v60 = vpop.permute.xlu1 %1581 }
 0x62c   : > { %v7529_v29 = vadd.f32 %v2232_v62, %v7389_v20  ;;  %v7531_v50 = vpop.permute.xlu2 %1601  ;;  %v7545_v62 = vadd.f32 %v7235_v31, %v1492_v59  ;;  %v7564_v31 = vadd.f32 %v7315_v56, %v7447_v63  ;;  %v7567_v59 = vadd.f32 %v7339_v0, %v1552_v23 }
 0x62d   : > { %5440 = vmatmul.msk.f32.gmra.mxu1 %vm563_vm1, %v1280_v30  ;;  %v7526_v30 = vadd.f32 %v7411_v35, %v7384_v18  ;;  %v7542_v18 = vpop.permute.xlu0 %1621  ;;  %v7582_v56 = vadd.f32 %v7429_v44, %v1592_v2  ;;  %v1285_v2 = vld [vmem:[%s10674_s3 + $0x2b8] sm:$0xff] }
 0x62e   : > { %10925 = vst [vmem:[#allocation34_spill] sm:$0xff] %v7529_v29 }
 0x62f   : > { %10924 = vst [vmem:[#allocation33_spill] sm:$0xff] %v7526_v30  ;;  %v2490_v19 = vmax.f32 %v7526_v30, %v7520_v17  ;;  %v7556_v30 = vadd.f32 %v7275_v52, %v1512_v61  ;;  %v7573_v52 = vadd.f32 %v7379_v16, %v1572_v43 }
 0x630   : > { %10927 = vst [vmem:[#allocation36_spill] sm:$0xff] %v7545_v62 }
 0x631   : > { %v2494_v33 = vmax.f32 %v2490_v19, %v7529_v29  ;;  %10928 = vst [vmem:[#allocation37_spill] sm:$0xff] %v7556_v30 }
 0x632   : > { %v2328_v45 = vpop.f32.mrf.mxu1  ;;  %10929 = vst [vmem:[#allocation38_spill] sm:$0xff] %v7564_v31 }
 0x633   : > { %v2498_v20 = vmax.f32 %v2494_v33, %v7545_v62  ;;  %v7548_v35 = vpop.permute.xlu1 %1596  ;;  %10930 = vst [vmem:[#allocation39_spill] sm:$0xff] %v7567_v59 }
 0x634   : > { %v7558_v19 = vpop.permute.xlu2 %1616  ;;  %10931 = vst [vmem:[#allocation40_spill] sm:$0xff] %v7573_v52 }
 0x635   : > { %5441 = vmatmul.msk.f32.gmra.mxu1 %vm563_vm1, %v1281_v6  ;;  %v1282_v6 = vld [vmem:[%s10674_s3 + $0x2a0] sm:$0xff]  ;;  %v7569_v33 = vpop.permute.xlu0 %1636  ;;  %10932 = vst [vmem:[#allocation41_spill] sm:$0xff] %v7582_v56 }
 0x63a   : > { %v7533_v37 = vpop.f32.mrf.mxu1 }
 0x63b   : > { %10926 = vst [vmem:[#allocation35_spill] sm:$0xff] %v7533_v37  ;;  %v1612_v0 = vpop.permute.xlu1 %1611 }
 0x63c   : > { %v7585_v23 = vadd.f32 %v2316_v3, %v1612_v0  ;;  %v1632_v16 = vpop.permute.xlu2 %1631 }
 0x63d   : > { %5442 = vmatmul.msk.f32.gmra.mxu1 %vm563_vm1, %v1282_v6  ;;  %v2502_v6 = vmax.f32 %v2498_v20, %v7556_v30 }
 0x63e   : > { %10933 = vst [vmem:[#allocation42_spill] sm:$0xff] %v7585_v23 }
 0x63f   : > { %v2506_v17 = vmax.f32 %v2502_v6, %v7564_v31  ;;  %v7589_v6 = vadd.f32 %v2328_v45, %v1632_v16  ;;  %v1652_v31 = vpop.permute.xlu0 %1651 }
 0x641   : > { %v2510_v20 = vmax.f32 %v2506_v17, %v7567_v59  ;;  %10934 = vst [vmem:[#allocation43_spill] sm:$0xff] %v7589_v6 }
 0x642   : > { %v7550_v37 = vpop.f32.mrf.mxu1 }
 0x643   : > { %v2514_v63 = vmax.f32 %v2510_v20, %v7573_v52 }
 0x645   : > { %5443 = vmatmul.msk.f32.gmra.mxu1 %vm563_vm1, %v1283_v41  ;;  %v1284_v41 = vld [vmem:[%s10674_s3 + $0x2b0] sm:$0xff]  ;;  %v2518_v43 = vmax.f32 %v2514_v63, %v7582_v56  ;;  %v1289_v63 = vld [vmem:[%s10674_s3 + $0x2d8] sm:$0xff] }
 0x647   : > { %v2522_v30 = vmax.f32 %v2518_v43, %v7585_v23  ;;  %v1290_v43 = vld [vmem:[%s10674_s3 + $0x2e0] sm:$0xff]  ;;  %v7649_v23 = vpop.permute.xlu2 %1646  ;;  %v7657_v62 = vpop.permute.xlu0 %1666 }
 0x649   : > { %v7596_v44 = vmax.f32 %v2522_v30, %v7589_v6 }
 0x64a   : > { %v7575_v61 = vpop.f32.mrf.mxu1 }
 0x64b   : > { %10935 = vst [vmem:[#allocation44_spill] sm:$0xff] %v7596_v44  ;;  %v7673_v44 = vadd.f32 %v7454_v7, %v7399_v26  ;;  %v7695_v26 = vadd.f32 %v7396_v24, %v7350_v4 }
 0x64d   : > { %5444 = vmatmul.msk.f32.gmra.mxu1 %vm563_vm1, %v1284_v41  ;;  %v1286_v41 = vld [vmem:[%s10674_s3 + $0x2c0] sm:$0xff]  ;;  %10942 = vst [vmem:[#allocation51_spill] sm:$0xff] %v7695_v26 }
 0x64f   : > { %v7655_v59 = vpop.permute.xlu2 %1661 }
 0x652   : > { %v2340_v29 = vpop.f32.mrf.mxu1 }
 0x653   : > { %v7598_v17 = vadd.f32 %v2340_v29, %v1652_v31  ;;  %v1287_v29 = vld [vmem:[%s10674_s3 + $0x2c8] sm:$0xff]  ;;  %v1288_v31 = vld [vmem:[%s10674_s3 + $0x2d0] sm:$0xff] }
 0x655   : > { %10936 = vst [vmem:[#allocation45_spill] sm:$0xff] %v7598_v17  ;;  %5445 = vmatmul.msk.f32.gmra.mxu1 %vm563_vm1, %v1285_v2  ;;  %v7665_v17 = vadd.f32 %v7425_v46, %v7372_v13  ;;  %v7685_v13 = vadd.f32 %v7479_v1, %v7375_v14  ;;  %v7705_v14 = vpop.permute.xlu0 %1681  ;;  %v7726_v1 = vadd.f32 %v7225_v28, %v7408_v32 }
 0x656   : > { %v7743_v28 = vadd.f32 %v7265_v40, %v7457_v12  ;;  %v7762_v40 = vadd.f32 %v7321_v58, %v7481_v55  ;;  %v10950_v12 = vld [vmem:[#allocation9_spill] sm:$0xff]  ;;  %v10958_v58 = vld [vmem:[#allocation11_spill] sm:$0xff] }
 0x657   : > { %v7691_v46 = vpop.permute.xlu2 %1676 }
 0x658   : > { %10945 = vst [vmem:[#allocation54_spill] sm:$0xff] %v7743_v28 }
 0x659   : > { %10948 = vst [vmem:[#allocation57_spill] sm:$0xff] %v7762_v40 }
 0x65a   : > { %v7603_v45 = vpop.f32.mrf.mxu1 }
 0x65d   : > { %5446 = vmatmul.msk.f32.gmra.mxu1 %vm563_vm1, %v1286_v41  ;;  %v1291_v41 = vld [vmem:[%s10674_s3 + $0x2e8] sm:$0xff] }
 0x662   : > { %v7609_v20 = vpop.f32.mrf.mxu1 }
 0x665   : > { %5447 = vmatmul.msk.f32.gmra.mxu1 %vm563_vm1, %v1287_v29 }
 0x66a   : > { %v7615_v30 = vpop.f32.mrf.mxu1 }
 0x66d   : > { %5448 = vmatmul.msk.f32.gmra.mxu1 %vm563_vm1, %v1288_v31  ;;  %v7641_v31 = vpop.permute.xlu1 %1626 }
 0x672   : > { %v7621_v0 = vpop.f32.mrf.mxu1 }
 0x675   : > { %5449 = vmatmul.msk.f32.gmra.mxu1 %vm563_vm1, %v1289_v63  ;;  %v7645_v3 = vpop.permute.xlu1 %1641 }
 0x67a   : > { %v7627_v16 = vpop.f32.mrf.mxu1 }
 0x67d   : > { %5450 = vmatmul.msk.f32.gmra.mxu1 %vm563_vm1, %v1290_v43  ;;  %v7651_v43 = vpop.permute.xlu1 %1656 }
 0x682   : > { %v7633_v2 = vpop.f32.mrf.mxu1 }
 0x685   : > { %5451 = vmatmul.msk.f32.gmra.mxu1 %vm563_vm1, %v1291_v41  ;;  %v7659_v41 = vpop.permute.xlu1 %1671 }
 0x68a   : > { %v7639_v29 = vpop.f32.mrf.mxu1 }
 0x692   : > { %v7643_v63 = vpop.f32.mrf.mxu1 }
 0x693   : > { %10937 = vst [vmem:[#allocation46_spill] sm:$0xff] %v7643_v63  ;;  %v7681_v63 = vadd.f32 %v7377_v15, %v7353_v5 }
 0x695   : > { %10941 = vst [vmem:[#allocation50_spill] sm:$0xff] %v7681_v63 }
 0x69a   : > { %v7647_v56 = vpop.f32.mrf.mxu1 }
 0x69b   : > { %10938 = vst [vmem:[#allocation47_spill] sm:$0xff] %v7647_v56  ;;  %v7669_v56 = vadd.f32 %v7439_v34, %v7361_v8  ;;  %v7689_v8 = vadd.f32 %v7493_v11, %v7413_v38  ;;  %v2489_v11 = vmax.f32 %v7695_v26, %v7673_v44  ;;  %v7713_v38 = vpop.permute.xlu1 %1686  ;;  %v7722_v34 = vadd.f32 %v7215_v25, %v7415_v39  ;;  %v7739_v25 = vpop.permute.xlu2 %1691 }
 0x6a2   : > { %v7653_v6 = vpop.f32.mrf.mxu1 }
 0x6a3   : > { %10939 = vst [vmem:[#allocation48_spill] sm:$0xff] %v7653_v6  ;;  %v7677_v6 = vadd.f32 %v7363_v9, %v7365_v10  ;;  %v7699_v9 = vadd.f32 %v7506_v21, %v7401_v27  ;;  %v2488_v10 = vmax.f32 %v7681_v63, %v7669_v56  ;;  %v7718_v27 = vadd.f32 %v7205_v22, %v7427_v48 }
 0x6a4   : > { %v7737_v22 = vadd.f32 %v7255_v42, %v7423_v51  ;;  %v7754_v42 = vadd.f32 %v7285_v54, %v7437_v53  ;;  %v7758_v51 = vadd.f32 %v7297_v47, %v7469_v57  ;;  %v10955_v54 = vld [vmem:[#allocation10_spill] sm:$0xff] }
 0x6a5   : > { %10940 = vst [vmem:[#allocation49_spill] sm:$0xff] %v7677_v6  ;;  %v2487_v5 = vmax.f32 %v7677_v6, %v7665_v17  ;;  %v2492_v24 = vmax.f32 %v2488_v10, %v7689_v8  ;;  %v2493_v21 = vmax.f32 %v2489_v11, %v7699_v9  ;;  %v7733_v11 = vadd.f32 %v7245_v36, %v7434_v49  ;;  %v10949_v49 = vld [vmem:[#allocation22_spill] sm:$0xff] }
 0x6a6   : > { %10944 = vst [vmem:[#allocation53_spill] sm:$0xff] %v7737_v22 }
 0x6a7   : > { %v2491_v4 = vmax.f32 %v2487_v5, %v7685_v13  ;;  %v2496_v5 = vmax.f32 %v2492_v24, %v7722_v34  ;;  %v2497_v10 = vmax.f32 %v2493_v21, %v7726_v1  ;;  %10943 = vst [vmem:[#allocation52_spill] sm:$0xff] %v7733_v11  ;;  %v7766_v24 = vadd.f32 %v10950_v12, %v10949_v49  ;;  %v1702_v21 = vpop.permute.xlu1 %1701  ;;  %v10960_v49 = vld [vmem:[#allocation12_spill] sm:$0xff] }
 0x6a8   : > { %10946 = vst [vmem:[#allocation55_spill] sm:$0xff] %v7754_v42 }
 0x6a9   : > { %v2495_v7 = vmax.f32 %v2491_v4, %v7718_v27  ;;  %v2500_v48 = vmax.f32 %v2496_v5, %v7737_v22  ;;  %v7749_v4 = vpop.permute.xlu0 %1696  ;;  %v2501_v36 = vmax.f32 %v2497_v10, %v7743_v28  ;;  %10947 = vst [vmem:[#allocation56_spill] sm:$0xff] %v7758_v51  ;;  %v10952_v5 = vld [vmem:[#allocation8_spill] sm:$0xff]  ;;  %v10957_v22 = vld [vmem:[#allocation25_spill] sm:$0xff]  ;;  %v10959_v28 = vld [vmem:[#allocation23_spill] sm:$0xff] }
 0x6aa   : > { %v7661_v52 = vpop.f32.mrf.mxu1  ;;  %v7780_v55 = vadd.f32 %v10958_v58, %v10957_v22  ;;  %v7784_v12 = vadd.f32 %v10960_v49, %v10959_v28  ;;  %v10965_v22 = vld [vmem:[#allocation15_spill] sm:$0xff]  ;;  %v10966_v49 = vld [vmem:[#allocation30_spill] sm:$0xff] }
 0x6ab   : > { %v2499_v39 = vmax.f32 %v2495_v7, %v7733_v11  ;;  %v10951_v7 = vld [vmem:[#allocation19_spill] sm:$0xff]  ;;  %v10954_v11 = vld [vmem:[#allocation21_spill] sm:$0xff]  ;;  %v2504_v57 = vmax.f32 %v2500_v48, %v7758_v51  ;;  %v10964_v48 = vld [vmem:[#allocation14_spill] sm:$0xff]  ;;  %v7799_v58 = vadd.f32 %v10965_v22, %v7522_v60  ;;  %v1707_v60 = vpop.permute.xlu2 %1706 }
 0x6ac   : > { %v7770_v10 = vadd.f32 %v10952_v5, %v10951_v7  ;;  %v7774_v53 = vadd.f32 %v10955_v54, %v10954_v11  ;;  %v10961_v7 = vld [vmem:[#allocation29_spill] sm:$0xff]  ;;  %v10963_v54 = vld [vmem:[#allocation26_spill] sm:$0xff]  ;;  %v10970_v22 = vld [vmem:[#allocation31_spill] sm:$0xff] }
 0x6ad   : > { %v2503_v47 = vmax.f32 %v2499_v39, %v7754_v42  ;;  %v10962_v5 = vld [vmem:[#allocation13_spill] sm:$0xff]  ;;  %v2508_v39 = vmax.f32 %v2504_v57, %v7766_v24  ;;  %v7795_v42 = vadd.f32 %v10964_v48, %v10963_v54  ;;  %v10969_v54 = vld [vmem:[#allocation18_spill] sm:$0xff] }
 0x6ae   : > { %10953 = vst [vmem:[#allocation22_spill] sm:$0xff] %v7770_v10  ;;  %v2505_v6 = vmax.f32 %v2501_v36, %v7770_v10  ;;  %v7789_v63 = vadd.f32 %v10962_v5, %v10961_v7  ;;  %v10967_v36 = vld [vmem:[#allocation16_spill] sm:$0xff]  ;;  %v10968_v57 = vld [vmem:[#allocation17_spill] sm:$0xff]  ;;  %v7814_v48 = vadd.f32 %v10969_v54, %v7531_v50 }
 0x6af   : > { %10956 = vst [vmem:[#allocation9_spill] sm:$0xff] %v7774_v53  ;;  %v2507_v11 = vmax.f32 %v2503_v47, %v7762_v40  ;;  %v7804_v51 = vadd.f32 %v10967_v36, %v10966_v49  ;;  %v2512_v47 = vmax.f32 %v2508_v39, %v7784_v12  ;;  %v7810_v10 = vadd.f32 %v10968_v57, %v7548_v35  ;;  %v10971_v40 = vld [vmem:[#allocation20_spill] sm:$0xff]  ;;  %v10973_v35 = vld [vmem:[#allocation27_spill] sm:$0xff] }
 0x6b0   : > { %v2509_v28 = vmax.f32 %v2505_v6, %v7774_v53  ;;  %v7819_v49 = vadd.f32 %v10971_v40, %v10970_v22  ;;  %v10972_v39 = vld [vmem:[#allocation24_spill] sm:$0xff]  ;;  %v7829_v57 = vadd.f32 %v10973_v35, %v7542_v18  ;;  %v10975_v18 = vld [vmem:[#allocation35_spill] sm:$0xff] }
 0x6b1   : > { %v2511_v5 = vmax.f32 %v2507_v11, %v7780_v55  ;;  %v2516_v11 = vmax.f32 %v2512_v47, %v7799_v58  ;;  %v7825_v53 = vadd.f32 %v10972_v39, %v7558_v19  ;;  %v1712_v50 = vpop.permute.xlu0 %1711  ;;  %v7840_v47 = vadd.f32 %v7550_v37, %v7645_v3  ;;  %v1717_v19 = vpop.permute.xlu1 %1716 }
 0x6b2   : > { %v7709_v15 = vpop.f32.mrf.mxu1  ;;  %v2513_v6 = vmax.f32 %v2509_v28, %v7789_v63  ;;  %v10974_v28 = vld [vmem:[#allocation28_spill] sm:$0xff]  ;;  %v7845_v39 = vadd.f32 %v10975_v18, %v7569_v33  ;;  %v7860_v3 = vadd.f32 %v7603_v45, %v7651_v43  ;;  %v7864_v33 = vadd.f32 %v7615_v30, %v7657_v62 }
 0x6b3   : > { %v2515_v36 = vmax.f32 %v2511_v5, %v7795_v42  ;;  %v7834_v26 = vadd.f32 %v10974_v28, %v7641_v31  ;;  %v2520_v5 = vmax.f32 %v2516_v11, %v7814_v48  ;;  %v7855_v11 = vadd.f32 %v7609_v20, %v7655_v59 }
 0x6b4   : > { %v2517_v54 = vmax.f32 %v2513_v6, %v7804_v51  ;;  %v7849_v6 = vadd.f32 %v7575_v61, %v7649_v23  ;;  %v7868_v61 = vadd.f32 %v7621_v0, %v7659_v41  ;;  %v7873_v59 = vadd.f32 %v7633_v2, %v7705_v14  ;;  %v10976_v0 = vld [vmem:[#allocation46_spill] sm:$0xff]  ;;  %v10977_v2 = vld [vmem:[#allocation48_spill] sm:$0xff] }
 0x6b5   : > { %v2519_v40 = vmax.f32 %v2515_v36, %v7810_v10  ;;  %v2524_v36 = vmax.f32 %v2520_v5, %v7829_v57  ;;  %v7879_v43 = vadd.f32 %v7627_v16, %v7691_v46  ;;  %v7883_v62 = vadd.f32 %v7639_v29, %v7713_v38  ;;  %v10978_v16 = vld [vmem:[#allocation44_spill] sm:$0xff]  ;;  %v10979_v46 = vld [vmem:[#allocation45_spill] sm:$0xff]  ;;  %v10981_v38 = vld [vmem:[#allocation47_spill] sm:$0xff] }
 0x6b6   : > { %v2521_v22 = vmax.f32 %v2517_v54, %v7819_v49  ;;  %v7888_v41 = vadd.f32 %v10976_v0, %v7739_v25  ;;  %v7891_v14 = vadd.f32 %v10977_v2, %v1702_v21  ;;  %v1722_v54 = vpop.permute.xlu2 %1721  ;;  %v10980_v5 = vmax.f32 %v10978_v16, %v10979_v46 }
 0x6b7   : > { %v2523_v31 = vmax.f32 %v2519_v40, %v7825_v53  ;;  %v2528_v35 = vmax.f32 %v2524_v36, %v7840_v47  ;;  %v7905_v18 = vadd.f32 %v7661_v52, %v1707_v60  ;;  %v7908_v21 = vadd.f32 %v7709_v15, %v1712_v50 }
 0x6b8   : > { %v2525_v37 = vmax.f32 %v2521_v22, %v7834_v26  ;;  %v2534_v29 = vmax.f32 %v10980_v5, %v7868_v61  ;;  %v7901_v22 = vadd.f32 %v10981_v38, %v7749_v4 }
 0x6b9   : > { %v2527_v20 = vmax.f32 %v2523_v31, %v7845_v39  ;;  %v2532_v30 = vmax.f32 %v2528_v35, %v7855_v11  ;;  %v1727_v36 = vpop.permute.xlu0 %1726  ;;  %v1732_v52 = vpop.permute.xlu1 %1731 }
 0x6ba   : > { %v7745_v32 = vpop.f32.mrf.mxu1  ;;  %v2529_v45 = vmax.f32 %v2525_v37, %v7849_v6 }
 0x6bb   : > { %v2531_v28 = vmax.f32 %v2527_v20, %v7860_v3  ;;  %v2536_v25 = vmax.f32 %v2532_v30, %v7873_v59  ;;  %v2538_v20 = vmax.f32 %v2534_v29, %v7888_v41 }
 0x6bc   : > { %v2533_v40 = vmax.f32 %v2529_v45, %v7864_v33  ;;  %v7917_v45 = vadd.f32 %v7745_v32, %v1717_v19 }
 0x6bd   : > { %v2535_v37 = vmax.f32 %v2531_v28, %v7879_v43  ;;  %v2540_v4 = vmax.f32 %v2536_v25, %v7891_v14  ;;  %v2542_v50 = vmax.f32 %v2538_v20, %v7908_v21  ;;  %v7930_v25 = vpop.f32.mrf.mxu3 }
 0x6be   : > { %v2537_v35 = vmax.f32 %v2533_v40, %v7883_v62  ;;  %10982 = vst [vmem:[#allocation19_spill] sm:$0xff] %v7930_v25 }
 0x6bf   : > { %v2539_v15 = vmax.f32 %v2535_v37, %v7901_v22 }
 0x6c2   : > { %v2382_v7 = vpop.f32.mrf.mxu1 }
 0x6c3   : > { %v7910_v31 = vadd.f32 %v2382_v7, %v1722_v54  ;;  %v2541_v7 = vmax.f32 %v2537_v35, %v7905_v18  ;;  %v2543_v54 = vmax.f32 %v2539_v15, %v7917_v45 }
 0x6c5   : > { %v2544_v0 = vmax.f32 %v2540_v4, %v7910_v31  ;;  %v7936_v20 = vpop.f32.mrf.mxu3 }
 0x6c6   : > { %10983 = vst [vmem:[#allocation8_spill] sm:$0xff] %v7936_v20 }
 0x6c7   : > { %v2547_v19 = vmax.f32 %v2543_v54, %v2544_v0 }
 0x6ca   : > { %v2385_v23 = vpop.f32.mrf.mxu1 }
 0x6cb   : > { %v7919_v30 = vadd.f32 %v2385_v23, %v1727_v36 }
 0x6cd   : > { %v2545_v28 = vmax.f32 %v2541_v7, %v7919_v30  ;;  %v7948_v0 = vpop.f32.mrf.mxu3 }
 0x6ce   : > { %10985 = vst [vmem:[#allocation21_spill] sm:$0xff] %v7948_v0  ;;  %v1747_v0 = vpop.permute.xlu1 %1746 }
 0x6d2   : > { %v2388_v60 = vpop.f32.mrf.mxu1 }
 0x6d3   : > { %v7925_v2 = vadd.f32 %v2388_v60, %v1732_v52  ;;  %v10984_v52 = vld [vmem:[#allocation40_spill] sm:$0xff] }
 0x6d5   : > { %v2546_v32 = vmax.f32 %v2542_v50, %v7925_v2 }
 0x6d7   : > { %v2548_v23 = vmax.f32 %v2545_v28, %v2546_v32  ;;  %v7956_v32 = vpop.f32.mrf.mxu3 }
 0x6d8   : > { %10986 = vst [vmem:[#allocation10_spill] sm:$0xff] %v7956_v32 }
 0x6d9   : > { %v2549_v40 = vmax.f32 %v2547_v19, %v2548_v23  ;;  %v10988_v23 = vld [vmem:[#allocation36_spill] sm:$0xff] }
 0x6db   : > { %v2550_v16 = vrot.slane %v2549_v40, 4 }
 0x6dd   : > { %v2551_v5 = vmax.f32 %v2549_v40, %v2550_v16 }
 0x6df   : > { %v2552_v29 = vrot.slane %v2551_v5, 2  ;;  %v7958_v19 = vpop.f32.mrf.mxu3 }
 0x6e0   : > { %10987 = vst [vmem:[#allocation25_spill] sm:$0xff] %v7958_v19 }
 0x6e1   : > { %v2553_v38 = vmax.f32 %v2551_v5, %v2552_v29 }
 0x6e3   : > { %v2554_v36 = vrot.slane %v2553_v38, 1 }
 0x6e5   : > { %v7932_v37 = vmax.f32 %v2553_v38, %v2554_v36 }
 0x6e7   : > { %v2562_v35 = vsub.f32 %v7673_v44, %v7932_v37  ;;  %v2587_v15 = vsub.f32 %v10984_v52, %v7932_v37  ;;  %v2571_v40 = vsub.f32 %v10988_v23, %v7932_v37  ;;  %v2570_v16 = vsub.f32 %v7726_v1, %v7932_v37  ;;  %v10989_v52 = vld [vmem:[#allocation34_spill] sm:$0xff]  ;;  %v7970_v60 = vpop.f32.mrf.mxu3 }
 0x6e8   : > { %v2569_v5 = vsub.f32 %v7722_v34, %v7932_v37  ;;  %v2568_v38 = vsub.f32 %v7718_v27, %v7932_v37  ;;  %v2567_v44 = vsub.f32 %v10989_v52, %v7932_v37  ;;  %10990 = vst [vmem:[#allocation11_spill] sm:$0xff] %v7970_v60  ;;  %v2566_v23 = vsub.f32 %v7699_v9, %v7932_v37 }
 0x6e9   : > { %v2635_v29 = vmax.f32 %v2571_v40, -80.0  ;;  %v2634_v36 = vmax.f32 %v2570_v16, -80.0  ;;  %v2565_v34 = vsub.f32 %v7689_v8, %v7932_v37  ;;  %v2564_v27 = vsub.f32 %v7685_v13, %v7932_v37 }
 0x6ea   : > { %v2633_v54 = vmax.f32 %v2569_v5, -80.0  ;;  %v2632_v7 = vmax.f32 %v2568_v38, -80.0  ;;  %v2631_v40 = vmax.f32 %v2567_v44, -80.0  ;;  %v2630_v16 = vmax.f32 %v2566_v23, -80.0  ;;  %v10991_v5 = vld [vmem:[#allocation32_spill] sm:$0xff] }
 0x6eb   : > { %v2714_v28 = vmul.f32 1.442695, %v2635_v29  ;;  %v2712_v1 = vmul.f32 1.442695, %v2634_v36  ;;  %v2563_v29 = vsub.f32 %v10991_v5, %v7932_v37  ;;  %v2629_v4 = vmax.f32 %v2565_v34, -80.0 }
 0x6ec   : > { %v2710_v50 = vmul.f32 1.442695, %v2633_v54  ;;  %v2708_v52 = vmul.f32 1.442695, %v2632_v7  ;;  %v2706_v60 = vmul.f32 1.442695, %v2631_v40  ;;  %v2586_v38 = vsub.f32 %v7789_v63, %v7932_v37 }
 0x6ed   : > { %5742 = vpow2.f32 %v2714_v28  ;;  %v2628_v8 = vmax.f32 %v2564_v27, -80.0  ;;  %v2704_v44 = vmul.f32 1.442695, %v2630_v16  ;;  %v2561_v13 = vsub.f32 %v7669_v56, %v7932_v37  ;;  %v10993_v16 = vld [vmem:[#allocation33_spill] sm:$0xff] }
 0x6ee   : > { %5744 = vpow2.f32 %v2712_v1  ;;  %v2627_v7 = vmax.f32 %v2563_v29, -80.0  ;;  %v2585_v36 = vsub.f32 %v7784_v12, %v7932_v37  ;;  %v2702_v23 = vmul.f32 1.442695, %v2629_v4  ;;  %v10995_v29 = vld [vmem:[#allocation51_spill] sm:$0xff] }
 0x6ef   : > { %5746 = vpow2.f32 %v2710_v50  ;;  %v7982_v54 = vpop.f32.mrf.mxu3  ;;  %v2651_v50 = vmax.f32 %v2587_v15, -80.0  ;;  %v2560_v63 = vsub.f32 %v7665_v17, %v7932_v37  ;;  %v2626_v1 = vmax.f32 %v2562_v35, -80.0  ;;  %v10994_v17 = vld [vmem:[#allocation39_spill] sm:$0xff] }
 0x6f0   : > { %5748 = vpow2.f32 %v2708_v52  ;;  %10992 = vst [vmem:[#allocation23_spill] sm:$0xff] %v7982_v54  ;;  %v2584_v56 = vsub.f32 %v7780_v55, %v7932_v37  ;;  %v2650_v40 = vmax.f32 %v2586_v38, -80.0  ;;  %v2700_v27 = vmul.f32 1.442695, %v2628_v8  ;;  %v1742_v54 = vpop.permute.xlu0 %1741 }
 0x6f1   : > { %5750 = vpow2.f32 %v2706_v60  ;;  %v2559_v52 = vsub.f32 %v10993_v16, %v7932_v37  ;;  %v2625_v12 = vmax.f32 %v2561_v13, -80.0  ;;  %v2698_v15 = vmul.f32 1.442695, %v2627_v7 }
 0x6f2   : > { %5752 = vpow2.f32 %v2704_v44  ;;  %v2583_v35 = vsub.f32 %v10994_v17, %v7932_v37  ;;  %v2649_v60 = vmax.f32 %v2585_v36, -80.0  ;;  %v2746_v5 = vmul.f32 1.442695, %v2651_v50  ;;  %v10996_v44 = vld [vmem:[#allocation9_spill] sm:$0xff] }
 0x6f3   : > { %v5743_v9 = vpop.eup %5742  ;;  %5754 = vpow2.f32 %v2702_v23  ;;  %v2558_v55 = vsub.f32 %v10995_v29, %v7932_v37  ;;  %v2696_v38 = vmul.f32 1.442695, %v2626_v1  ;;  %v2582_v13 = vsub.f32 %v10996_v44, %v7932_v37  ;;  %v10999_v17 = vld [vmem:[#allocation49_spill] sm:$0xff] }
 0x6f4   : > { %2876 = vmatpush.msra.mxu0 %v5743_v9  ;;  %5592 = vmatpush.msra.mxu2 %v5743_v9  ;;  %v5745_v28 = vpop.eup %5744  ;;  %v2624_v9 = vmax.f32 %v2560_v63, -80.0  ;;  %v2648_v7 = vmax.f32 %v2584_v56, -80.0  ;;  %5756 = vpow2.f32 %v2700_v27  ;;  %v2623_v36 = vmax.f32 %v2559_v52, -80.0  ;;  %v11000_v52 = vld [vmem:[#allocation57_spill] sm:$0xff] }
 0x6f5   : > { %v5747_v34 = vpop.eup %5746  ;;  %v2694_v50 = vmul.f32 1.442695, %v2625_v12  ;;  %5758 = vpow2.f32 %v2698_v15  ;;  %v2647_v63 = vmax.f32 %v2583_v35, -80.0  ;;  %v2742_v1 = vmul.f32 1.442695, %v2649_v60 }
 0x6f6   : > { %2877 = vmatpush.msra.mxu0 %v5745_v28  ;;  %5593 = vmatpush.msra.mxu2 %v5745_v28  ;;  %v5749_v4 = vpop.eup %5748  ;;  %v2744_v28 = vmul.f32 1.442695, %v2650_v40  ;;  %5760 = vpow2.f32 %v2746_v5  ;;  %v2556_v29 = vsub.f32 %v10999_v17, %v7932_v37  ;;  %v2622_v56 = vmax.f32 %v2558_v55, -80.0 }
 0x6f7   : > { %v5751_v8 = vpop.eup %5750  ;;  %v2692_v40 = vmul.f32 1.442695, %v2624_v9  ;;  %5762 = vpow2.f32 %v2696_v38  ;;  %v2580_v12 = vsub.f32 %v11000_v52, %v7932_v37  ;;  %v2646_v15 = vmax.f32 %v2582_v13, -80.0  ;;  %v11001_v9 = vld [vmem:[#allocation38_spill] sm:$0xff] }
 0x6f8   : > { %2878 = vmatpush.msra.mxu0 %v5747_v34  ;;  %5594 = vmatpush.msra.mxu2 %v5747_v34  ;;  %v10997_v34 = vld [vmem:[#allocation50_spill] sm:$0xff]  ;;  %v5753_v23 = vpop.eup %5752  ;;  %5764 = vpow2.f32 %v2744_v28  ;;  %v2619_v35 = vsub.f32 %v7925_v2, %v7932_v37  ;;  %v2690_v5 = vmul.f32 1.442695, %v2623_v36  ;;  %v2579_v38 = vsub.f32 %v11001_v9, %v7932_v37 }
 0x6f9   : > { %v2557_v16 = vsub.f32 %v10997_v34, %v7932_v37  ;;  %v5755_v27 = vpop.eup %5754  ;;  %5766 = vpow2.f32 %v2694_v50  ;;  %v11002_v44 = vsub.f32 %v7766_v24, %v7932_v37  ;;  %v2688_v28 = vmul.f32 1.442695, %v2622_v56 }
 0x6fa   : > { %2879 = vmatpush.msra.mxu0 %v5749_v4  ;;  %5595 = vmatpush.msra.mxu2 %v5749_v4  ;;  %v8002_v4 = vpop.f32.mrf.mxu3  ;;  %v5757_v55 = vpop.eup %5756  ;;  %5768 = vpow2.f32 %v2742_v1  ;;  %v2644_v50 = vmax.f32 %v2580_v12, -80.0  ;;  %v2736_v17 = vmul.f32 1.442695, %v2646_v15  ;;  %v2683_v52 = vmax.f32 %v2619_v35, -80.0 }
 0x6fb   : > { %10998 = vst [vmem:[#allocation12_spill] sm:$0xff] %v8002_v4  ;;  %v2621_v60 = vmax.f32 %v2557_v16, -80.0  ;;  %v2645_v34 = vmax.f32 %v11002_v44, -80.0  ;;  %v5759_v13 = vpop.eup %5758  ;;  %5770 = vpow2.f32 %v2692_v40  ;;  %v11003_v16 = vld [vmem:[#allocation22_spill] sm:$0xff]  ;;  %v11005_v12 = vsub.f32 %v10979_v46, %v7932_v37 }
 0x6fc   : > { %2880 = vmatpush.msra.mxu0 %v5751_v8  ;;  %5596 = vmatpush.msra.mxu2 %v5751_v8  ;;  %v2740_v8 = vmul.f32 1.442695, %v2648_v7  ;;  %v2620_v7 = vmax.f32 %v2556_v29, -80.0  ;;  %v5761_v2 = vpop.eup %5760  ;;  %v2578_v36 = vsub.f32 %v11003_v16, %v7932_v37  ;;  %v2643_v29 = vmax.f32 %v2579_v38, -80.0 }
 0x6fd   : > { %v2686_v9 = vmul.f32 1.442695, %v2621_v60  ;;  %2989 = vmatpush.msrb.mxu3 %v5761_v2  ;;  %v2734_v56 = vmul.f32 1.442695, %v2645_v34  ;;  %v2667_v15 = vmax.f32 %v11005_v12, -80.0  ;;  %v11006_v60 = vld [vmem:[#allocation55_spill] sm:$0xff]  ;;  %v2600_v46 = vsub.f32 %v7845_v39, %v7932_v37 }
 0x6fe   : > { %2881 = vmatpush.msra.mxu0 %v5753_v23  ;;  %5597 = vmatpush.msra.mxu2 %v5753_v23  ;;  %v2738_v23 = vmul.f32 1.442695, %v2647_v63  ;;  %5772 = vpow2.f32 %v2740_v8  ;;  %v11004_v63 = vld [vmem:[#allocation56_spill] sm:$0xff]  ;;  %v2684_v8 = vmul.f32 1.442695, %v2620_v7  ;;  %v11009_v2 = vld [vmem:[#allocation37_spill] sm:$0xff]  ;;  %v11011_v39 = vsub.f32 %v7840_v47, %v7932_v37 }
 0x6ff   : > { %5774 = vpow2.f32 %v2690_v5  ;;  %v2577_v1 = vsub.f32 %v11004_v63, %v7932_v37  ;;  %v2576_v5 = vsub.f32 %v11006_v60, %v7932_v37  ;;  %v2732_v44 = vmul.f32 1.442695, %v2644_v50  ;;  %v11012_v63 = vld [vmem:[#allocation54_spill] sm:$0xff] }
 0x700   : > { %2882 = vmatpush.msra.mxu0 %v5755_v27  ;;  %5598 = vmatpush.msra.mxu2 %v5755_v27  ;;  %v5763_v27 = vpop.eup %5762  ;;  %5776 = vpow2.f32 %v2738_v23  ;;  %v2810_v23 = vmul.f32 1.442695, %v2683_v52  ;;  %v2575_v16 = vsub.f32 %v11009_v2, %v7932_v37  ;;  %v2730_v50 = vmul.f32 1.442695, %v2643_v29 }
 0x701   : > { %v5765_v24 = vpop.eup %5764  ;;  %5778 = vpow2.f32 %v2688_v28  ;;  %v2574_v12 = vsub.f32 %v11012_v63, %v7932_v37 }
 0x702   : > { %2883 = vmatpush.msra.mxu0 %v5757_v55  ;;  %5599 = vmatpush.msra.mxu2 %v5757_v55  ;;  %v5767_v40 = vpop.eup %5766  ;;  %v2642_v55 = vmax.f32 %v2578_v36, -80.0  ;;  %5780 = vpow2.f32 %v2736_v17  ;;  %v8024_v34 = vpop.f32.mrf.mxu3  ;;  %v2641_v36 = vmax.f32 %v2577_v1, -80.0  ;;  %v2640_v1 = vmax.f32 %v2576_v5, -80.0 }
 0x703   : > { %2990 = vmatpush.msrb.mxu3 %v5765_v24  ;;  %v5769_v35 = vpop.eup %5768  ;;  %11007 = vst [vmem:[#allocation29_spill] sm:$0xff] %v8024_v34  ;;  %5782 = vpow2.f32 %v2686_v9  ;;  %v2778_v24 = vmul.f32 1.442695, %v2667_v15 }
 0x704   : > { %2884 = vmatpush.msra.mxu0 %v5759_v13  ;;  %5600 = vmatpush.msra.mxu2 %v5759_v13  ;;  %v5771_v38 = vpop.eup %5770  ;;  %v11008_v13 = vsub.f32 %v7849_v6, %v7932_v37  ;;  %5784 = vpow2.f32 %v2734_v56  ;;  %v2665_v6 = vmax.f32 %v11011_v39, -80.0  ;;  %v2728_v29 = vmul.f32 1.442695, %v2642_v55 }
 0x705   : > { %2991 = vmatpush.msrb.mxu3 %v5769_v35  ;;  %v5773_v28 = vpop.eup %5772  ;;  %5786 = vpow2.f32 %v2684_v8  ;;  %v2664_v35 = vmax.f32 %v2600_v46, -80.0  ;;  %v11013_v8 = vld [vmem:[#allocation53_spill] sm:$0xff]  ;;  %v2597_v55 = vsub.f32 %v7829_v57, %v7932_v37  ;;  %v2724_v2 = vmul.f32 1.442695, %v2640_v1  ;;  %v8051_v57 = vld [vmem:[%s10676_s5] sm:$0xff] }
 0x706   : > { %2885 = vmatpush.msra.mxu0 %v5763_v27  ;;  %5601 = vmatpush.msra.mxu2 %v5763_v27  ;;  %v2666_v7 = vmax.f32 %v11008_v13, -80.0  ;;  %v5775_v17 = vpop.eup %5774  ;;  %v11010_v27 = vld [vmem:[#allocation43_spill] sm:$0xff]  ;;  %5788 = vpow2.f32 %v2732_v44  ;;  %v2573_v60 = vsub.f32 %v11013_v8, %v7932_v37  ;;  %v2639_v13 = vmax.f32 %v2575_v16, -80.0 }
 0x707   : > { %v2599_v52 = vsub.f32 %v11010_v27, %v7932_v37  ;;  %2992 = vmatpush.msrb.mxu3 %v5773_v28  ;;  %v5777_v9 = vpop.eup %5776  ;;  %5790 = vpow2.f32 %v2810_v23  ;;  %v2726_v28 = vmul.f32 1.442695, %v2641_v36  ;;  %v11014_v23 = vld [vmem:[#allocation52_spill] sm:$0xff]  ;;  %v2596_v27 = vsub.f32 %v7825_v53, %v7932_v37  ;;  %v11016_v53 = vld [vmem:[#allocation42_spill] sm:$0xff] }
 0x708   : > { %2886 = vmatpush.msra.mxu0 %v5767_v40  ;;  %5602 = vmatpush.msra.mxu2 %v5767_v40  ;;  %v5779_v56 = vpop.eup %5778  ;;  %v2598_v40 = vsub.f32 %v7834_v26, %v7932_v37  ;;  %v2776_v47 = vmul.f32 1.442695, %v2666_v7  ;;  %5792 = vpow2.f32 %v2730_v50  ;;  %v2572_v46 = vsub.f32 %v11014_v23, %v7932_v37 }
 0x709   : > { %2993 = vmatpush.msrb.mxu3 %v5777_v9  ;;  %v5781_v15 = vpop.eup %5780  ;;  %v2663_v44 = vmax.f32 %v2599_v52, -80.0  ;;  %5794 = vpow2.f32 %v2778_v24  ;;  %v2638_v7 = vmax.f32 %v2574_v12, -80.0  ;;  %v2772_v50 = vmul.f32 1.442695, %v2664_v35 }
 0x70a   : > { %2887 = vmatpush.msra.mxu0 %v5771_v38  ;;  %5603 = vmatpush.msra.mxu2 %v5771_v38  ;;  %v5783_v5 = vpop.eup %5782  ;;  %v2774_v38 = vmul.f32 1.442695, %v2665_v6  ;;  %5796 = vpow2.f32 %v2728_v29  ;;  %v2662_v36 = vmax.f32 %v2598_v40, -80.0  ;;  %v2637_v52 = vmax.f32 %v2573_v60, -80.0  ;;  %v8058_v6 = vld [vmem:[%s10676_s5 + $0x60] sm:$0xff]  ;;  %v8060_v9 = vpop.f32.mrf.mxu3 }
 0x70b   : > { %2994 = vmatpush.msrb.mxu3 %v5781_v15  ;;  %v5785_v26 = vpop.eup %5784  ;;  %5798 = vpow2.f32 %v2776_v47  ;;  %v2722_v39 = vmul.f32 1.442695, %v2639_v13  ;;  %11015 = vst [vmem:[#allocation13_spill] sm:$0xff] %v8060_v9  ;;  %v2661_v63 = vmax.f32 %v2597_v55, -80.0  ;;  %v2770_v12 = vmul.f32 1.442695, %v2663_v44 }
 0x70c   : > { %2888 = vmatpush.msra.mxu0 %v5775_v17  ;;  %5604 = vmatpush.msra.mxu2 %v5775_v17  ;;  %v5787_v16 = vpop.eup %5786  ;;  %5800 = vpow2.f32 %v2726_v28  ;;  %v2595_v29 = vsub.f32 %v11016_v53, %v7932_v37  ;;  %v2720_v40 = vmul.f32 1.442695, %v2638_v7  ;;  %v11017_v47 = vsub.f32 %v7919_v30, %v7932_v37 }
 0x70d   : > { %2995 = vmatpush.msrb.mxu3 %v5785_v26  ;;  %v5789_v17 = vpop.eup %5788  ;;  %5802 = vpow2.f32 %v2774_v38  ;;  %v2768_v8 = vmul.f32 1.442695, %v2662_v36  ;;  %v2594_v13 = vsub.f32 %v7819_v49, %v7932_v37  ;;  %v2660_v28 = vmax.f32 %v2596_v27, -80.0 }
 0x70e   : > { %2889 = vmatpush.msra.mxu0 %v5779_v56  ;;  %5605 = vmatpush.msra.mxu2 %v5779_v56  ;;  %v5791_v24 = vpop.eup %5790  ;;  %v2636_v56 = vmax.f32 %v2572_v46, -80.0  ;;  %5804 = vpow2.f32 %v2724_v2  ;;  %v2682_v15 = vmax.f32 %v11017_v47, -80.0  ;;  %v2615_v44 = vsub.f32 %v7908_v21, %v7932_v37 }
 0x70f   : > { %2996 = vmatpush.msrb.mxu3 %v5789_v17  ;;  %v5793_v1 = vpop.eup %5792  ;;  %5806 = vpow2.f32 %v2772_v50  ;;  %v11018_v30 = vsub.f32 %v7910_v31, %v7932_v37  ;;  %v2766_v26 = vmul.f32 1.442695, %v2661_v63  ;;  %v2593_v49 = vsub.f32 %v7814_v48, %v7932_v37 }
 0x710   : > { %2890 = vmatpush.msra.mxu0 %v5783_v5  ;;  %5606 = vmatpush.msra.mxu2 %v5783_v5  ;;  %v5795_v35 = vpop.eup %5794  ;;  %v2718_v5 = vmul.f32 1.442695, %v2637_v52  ;;  %5808 = vpow2.f32 %v2722_v39  ;;  %v2659_v46 = vmax.f32 %v2595_v29, -80.0  ;;  %v2716_v7 = vmul.f32 1.442695, %v2636_v56  ;;  %v8088_v52 = vld [vmem:[%s10676_s5 + $0x70] sm:$0xff] }
 0x711   : > { %2997 = vmatpush.msrb.mxu3 %v5793_v1  ;;  %v5797_v60 = vpop.eup %5796  ;;  %v2681_v38 = vmax.f32 %v11018_v30, -80.0  ;;  %5810 = vpow2.f32 %v2770_v12  ;;  %v11019_v21 = vsub.f32 %v7917_v45, %v7932_v37  ;;  %v2808_v36 = vmul.f32 1.442695, %v2682_v15  ;;  %v8097_v29 = vld [vmem:[%s10676_s5 + $0x10] sm:$0xff] }
 0x712   : > { %2891 = vmatpush.msra.mxu0 %v5787_v16  ;;  %5607 = vmatpush.msra.mxu2 %v5787_v16  ;;  %v5799_v55 = vpop.eup %5798  ;;  %5812 = vpow2.f32 %v2720_v40  ;;  %v2614_v16 = vsub.f32 %v7905_v18, %v7932_v37  ;;  %v2592_v17 = vsub.f32 %v7810_v10, %v7932_v37  ;;  %v2658_v48 = vmax.f32 %v2594_v13, -80.0  ;;  %v11020_v10 = vld [vmem:[#allocation41_spill] sm:$0xff]  ;;  %v8099_v40 = vpop.f32.mrf.mxu3 }
 0x713   : > { %2892 = vmatmul.f32.vlgmr.msra.gmra.mxu0 %v8051_v57  ;;  %2910 = vmatmul.f32.vlgmr.msra.gmra.mxu2 %v8058_v6  ;;  %v5801_v23 = vpop.eup %5800  ;;  %v2680_v31 = vmax.f32 %v11019_v21, -80.0  ;;  %5814 = vpow2.f32 %v2768_v8  ;;  %v2764_v27 = vmul.f32 1.442695, %v2660_v28  ;;  %v2613_v45 = vsub.f32 %v7891_v14, %v7932_v37  ;;  %11021 = vst [vmem:[#allocation26_spill] sm:$0xff] %v8099_v40 }
 0x714   : > { %3102 = vmatpush.msrb.mxu0 %v5795_v35  ;;  %3215 = vmatpush.msrb.mxu2 %v5791_v24  ;;  %v5803_v2 = vpop.eup %5802  ;;  %5816 = vpow2.f32 %v2718_v5  ;;  %v2679_v39 = vmax.f32 %v2615_v44, -80.0  ;;  %v2806_v24 = vmul.f32 1.442695, %v2681_v38  ;;  %v2591_v12 = vsub.f32 %v11020_v10, %v7932_v37 }
 0x715   : > { %2998 = vmatpush.msrb.mxu3 %v5797_v60  ;;  %v5805_v50 = vpop.eup %5804  ;;  %5818 = vpow2.f32 %v2766_v26  ;;  %v2657_v1 = vmax.f32 %v2593_v49, -80.0  ;;  %v2762_v53 = vmul.f32 1.442695, %v2659_v46  ;;  %v2612_v14 = vsub.f32 %v7901_v22, %v7932_v37  ;;  %v8116_v46 = vld [vmem:[%s10676_s5 + $0x8] sm:$0xff] }
 0x716   : > { %3103 = vmatpush.msrb.mxu0 %v5799_v55  ;;  %v5807_v18 = vpop.eup %5806  ;;  %5820 = vpow2.f32 %v2716_v7  ;;  %v2678_v35 = vmax.f32 %v2614_v16, -80.0  ;;  %v2804_v47 = vmul.f32 1.442695, %v2680_v31  ;;  %v2590_v8 = vsub.f32 %v7804_v51, %v7932_v37 }
 0x717   : > { %2999 = vmatpush.msrb.mxu3 %v5801_v23  ;;  %v5809_v63 = vpop.eup %5808  ;;  %5822 = vpow2.f32 %v2808_v36  ;;  %v2656_v60 = vmax.f32 %v2592_v17, -80.0  ;;  %v2760_v13 = vmul.f32 1.442695, %v2658_v48  ;;  %v2611_v5 = vsub.f32 %v7888_v41, %v7932_v37 }
 0x718   : > { %3104 = vmatpush.msrb.mxu0 %v5803_v2  ;;  %v5811_v56 = vpop.eup %5810  ;;  %5824 = vpow2.f32 %v2764_v27  ;;  %v2677_v55 = vmax.f32 %v2613_v45, -80.0  ;;  %v2802_v22 = vmul.f32 1.442695, %v2679_v39  ;;  %v2589_v30 = vsub.f32 %v7799_v58, %v7932_v37 }
 0x719   : > { %3000 = vmatpush.msrb.mxu3 %v5805_v50  ;;  %v5813_v15 = vpop.eup %5812  ;;  %5826 = vpow2.f32 %v2806_v24  ;;  %v2655_v38 = vmax.f32 %v2591_v12, -80.0  ;;  %v2758_v51 = vmul.f32 1.442695, %v2657_v1  ;;  %v2610_v23 = vsub.f32 %v7883_v62, %v7932_v37  ;;  %v8123_v62 = vld [vmem:[%s10676_s5 + $0x80] sm:$0xff] }
 0x71a   : > { %3105 = vmatpush.msrb.mxu0 %v5807_v18  ;;  %v5815_v28 = vpop.eup %5814  ;;  %5828 = vpow2.f32 %v2762_v53  ;;  %v2676_v49 = vmax.f32 %v2612_v14, -80.0  ;;  %v2800_v41 = vmul.f32 1.442695, %v2678_v35  ;;  %v2588_v58 = vsub.f32 %v7795_v42, %v7932_v37  ;;  %v8136_v1 = vpop.f32.mrf.mxu3 }
 0x71b   : > { %3001 = vmatpush.msrb.mxu3 %v5809_v63  ;;  %2913 = vmatmul.f32.gmra.mxu2 %v8088_v52  ;;  %v5817_v44 = vpop.eup %5816  ;;  %5830 = vpow2.f32 %v2804_v47  ;;  %v2654_v2 = vmax.f32 %v2590_v8, -80.0  ;;  %v2756_v16 = vmul.f32 1.442695, %v2656_v60  ;;  %v2609_v31 = vsub.f32 %v7873_v59, %v7932_v37  ;;  %v8134_v59 = vld [vmem:[%s10676_s5 + $0x20] sm:$0xff]  ;;  %11022 = vst [vmem:[#allocation14_spill] sm:$0xff] %v8136_v1 }
 0x71c   : > { %3106 = vmatpush.msrb.mxu0 %v5811_v56  ;;  %v5819_v26 = vpop.eup %5818  ;;  %5832 = vpow2.f32 %v2760_v13  ;;  %v2675_v36 = vmax.f32 %v2611_v5, -80.0  ;;  %v2798_v50 = vmul.f32 1.442695, %v2677_v55  ;;  %v2653_v48 = vmax.f32 %v2589_v30, -80.0  ;;  %v8151_v5 = vld [vmem:[%s10676_s5 + $0x90] sm:$0xff] }
 0x71d   : > { %3002 = vmatpush.msrb.mxu3 %v5813_v15  ;;  %2895 = vmatmul.f32.gmra.mxu0 %v8097_v29  ;;  %v5821_v7 = vpop.eup %5820  ;;  %5834 = vpow2.f32 %v2802_v22  ;;  %v2754_v42 = vmul.f32 1.442695, %v2655_v38  ;;  %v2608_v18 = vsub.f32 %v7879_v43, %v7932_v37  ;;  %v2674_v45 = vmax.f32 %v2610_v23, -80.0 }
 0x71e   : > { %3107 = vmatpush.msrb.mxu0 %v5815_v28  ;;  %v5823_v21 = vpop.eup %5822  ;;  %5836 = vpow2.f32 %v2758_v51  ;;  %v2796_v39 = vmul.f32 1.442695, %v2676_v49  ;;  %v2652_v63 = vmax.f32 %v2588_v58, -80.0  ;;  %v2752_v10 = vmul.f32 1.442695, %v2654_v2 }
 0x71f   : > { %3003 = vmatpush.msrb.mxu3 %v5817_v44  ;;  %v5825_v17 = vpop.eup %5824  ;;  %3216 = vmatpush.msrb.mxu2 %v5823_v21  ;;  %5838 = vpow2.f32 %v2800_v41  ;;  %v2607_v43 = vsub.f32 %v7868_v61, %v7932_v37  ;;  %v2673_v53 = vmax.f32 %v2609_v31, -80.0  ;;  %v2794_v56 = vmul.f32 1.442695, %v2675_v36  ;;  %v8146_v61 = vld [vmem:[%s10676_s5 + $0x18] sm:$0xff]  ;;  %v8170_v31 = vld [vmem:[%s10676_s5 + $0x28] sm:$0xff] }
 0x720   : > { %3108 = vmatpush.msrb.mxu0 %v5819_v26  ;;  %v5827_v27 = vpop.eup %5826  ;;  %5840 = vpow2.f32 %v2756_v16  ;;  %v2750_v35 = vmul.f32 1.442695, %v2653_v48  ;;  %v2606_v15 = vsub.f32 %v7864_v33, %v7932_v37  ;;  %v2672_v8 = vmax.f32 %v2608_v18, -80.0 }
 0x721   : > { %3004 = vmatpush.msrb.mxu3 %v5821_v7  ;;  %v5829_v24 = vpop.eup %5828  ;;  %3217 = vmatpush.msrb.mxu2 %v5827_v27  ;;  %5842 = vpow2.f32 %v2798_v50  ;;  %v2792_v60 = vmul.f32 1.442695, %v2674_v45  ;;  %v2748_v28 = vmul.f32 1.442695, %v2652_v63  ;;  %v2605_v33 = vsub.f32 %v7855_v11, %v7932_v37  ;;  %v8162_v11 = vld [vmem:[%s10676_s5 + $0x30] sm:$0xff]  ;;  %v8175_v50 = vld [vmem:[%s10676_s5 + $0xa0] sm:$0xff] }
 0x722   : > { %3005 = vmatmul.f32.vlgmr.msrb.gmra.mxu3 %v8116_v46  ;;  %3109 = vmatpush.msrb.mxu0 %v5825_v17  ;;  %v5831_v12 = vpop.eup %5830  ;;  %5844 = vpow2.f32 %v2754_v42  ;;  %v2671_v22 = vmax.f32 %v2607_v43, -80.0  ;;  %v2790_v44 = vmul.f32 1.442695, %v2673_v53  ;;  %v2604_v51 = vsub.f32 %v7860_v3, %v7932_v37  ;;  %v8165_v2 = vpop.f32.mrf.mxu3  ;;  %v8187_v63 = vld [vmem:[%s10676_s5 + $0xb0] sm:$0xff] }
 0x723   : > { %2916 = vmatmul.f32.gmra.mxu2 %v8123_v62  ;;  %v5833_v14 = vpop.eup %5832  ;;  %5846 = vpow2.f32 %v2796_v39  ;;  %v2670_v26 = vmax.f32 %v2606_v15, -80.0  ;;  %v2788_v23 = vmul.f32 1.442695, %v2672_v8  ;;  %v2669_v7 = vmax.f32 %v2605_v33, -80.0  ;;  %11023 = vst [vmem:[#allocation15_spill] sm:$0xff] %v8165_v2  ;;  %v8213_v15 = vld [vmem:[%s10676_s5 + $0x58] sm:$0xff]  ;;  %v8423_v2 = vpop.f32.mrf.mxu1 }
 0x724   : > { %3110 = vmatpush.msrb.mxu0 %v5829_v24  ;;  %3218 = vmatpush.msrb.mxu2 %v5831_v12  ;;  %v5835_v47 = vpop.eup %5834  ;;  %5848 = vpow2.f32 %v2752_v10  ;;  %v2786_v58 = vmul.f32 1.442695, %v2671_v22  ;;  %v2668_v16 = vmax.f32 %v2604_v51, -80.0  ;;  %v8182_v24 = vld [vmem:[%s10676_s5 + $0x38] sm:$0xff]  ;;  %v8218_v8 = vld [vmem:[%s10676_s5 + $0xd0] sm:$0xff] }
 0x725   : > { %2898 = vmatmul.f32.gmra.mxu0 %v8134_v59  ;;  %v5837_v13 = vpop.eup %5836  ;;  %5850 = vpow2.f32 %v2794_v56  ;;  %v2784_v21 = vmul.f32 1.442695, %v2670_v26  ;;  %v2782_v48 = vmul.f32 1.442695, %v2669_v7  ;;  %v8196_v56 = vld [vmem:[%s10676_s5 + $0x48] sm:$0xff]  ;;  %v8245_v22 = vld [vmem:[%s10676_s5 + $0x78] sm:$0xff] }
 0x726   : > { %3111 = vmatpush.msrb.mxu0 %v5833_v14  ;;  %3219 = vmatpush.msrb.mxu2 %v5835_v47  ;;  %v5839_v55 = vpop.eup %5838  ;;  %5852 = vpow2.f32 %v2750_v35  ;;  %v2780_v18 = vmul.f32 1.442695, %v2668_v16  ;;  %v8201_v14 = vld [vmem:[%s10676_s5 + $0xc0] sm:$0xff]  ;;  %11029 = vst [vmem:[#allocation20_spill] sm:$0xff] %v8245_v22  ;;  %v8278_v51 = vld [vmem:[%s10676_s5 + $0x110] sm:$0xff] }
 0x727   : > { %v5841_v30 = vpop.eup %5840  ;;  %5854 = vpow2.f32 %v2792_v60  ;;  %v2820_v35 = vld [vmem:[%s10676_s5 + $0x40] sm:$0xff]  ;;  %v2822_v60 = vld [vmem:[%s10676_s5 + $0x50] sm:$0xff] }
 0x728   : > { %3112 = vmatpush.msrb.mxu0 %v5837_v13  ;;  %3220 = vmatpush.msrb.mxu2 %v5839_v55  ;;  %v5843_v38 = vpop.eup %5842  ;;  %5856 = vpow2.f32 %v2748_v28  ;;  %v8230_v28 = vld [vmem:[%s10676_s5 + $0x68] sm:$0xff]  ;;  %v8235_v55 = vld [vmem:[%s10676_s5 + $0xe0] sm:$0xff]  ;;  %v8326_v16 = vld [vmem:[%s10676_s5 + $0x150] sm:$0xff] }
 0x729   : > { %v5845_v49 = vpop.eup %5844  ;;  %5858 = vpow2.f32 %v2790_v44  ;;  %11027 = vst [vmem:[#allocation18_spill] sm:$0xff] %v8230_v28  ;;  %v8250_v44 = vld [vmem:[%s10676_s5 + $0xf0] sm:$0xff] }
 0x72a   : > { %3008 = vmatmul.f32.gmra.mxu3 %v8146_v61  ;;  %3113 = vmatpush.msrb.mxu0 %v5841_v30  ;;  %v5847_v41 = vpop.eup %5846  ;;  %5860 = vpow2.f32 %v2788_v23  ;;  %v8189_v12 = vpop.f32.mrf.mxu3  ;;  %v8263_v30 = vld [vmem:[%s10676_s5 + $0x100] sm:$0xff] }
 0x72b   : > { %2919 = vmatmul.f32.gmra.mxu2 %v8151_v5  ;;  %v5849_v3 = vpop.eup %5848  ;;  %5862 = vpow2.f32 %v2786_v58  ;;  %11024 = vst [vmem:[#allocation30_spill] sm:$0xff] %v8189_v12  ;;  %v8293_v23 = vld [vmem:[%s10676_s5 + $0x120] sm:$0xff]  ;;  %v2837_v58 = vld [vmem:[%s10676_s5 + $0xc8] sm:$0xff] }
 0x72c   : > { %3221 = vmatpush.msrb.mxu2 %v5843_v38  ;;  %3114 = vmatpush.msrb.mxu0 %v5845_v49  ;;  %v5851_v37 = vpop.eup %5850  ;;  %5864 = vpow2.f32 %v2784_v21 }
 0x72d   : > { %2901 = vmatmul.f32.gmra.mxu0 %v8162_v11  ;;  %v5853_v36 = vpop.eup %5852  ;;  %5866 = vpow2.f32 %v2782_v48  ;;  %v8350_v48 = vld [vmem:[%s10676_s5 + $0x170] sm:$0xff] }
 0x72e   : > { %3222 = vmatpush.msrb.mxu2 %v5847_v41  ;;  %3115 = vmatpush.msrb.mxu0 %v5849_v3  ;;  %v5855_v17 = vpop.eup %5854  ;;  %5868 = vpow2.f32 %v2780_v18  ;;  %v8305_v41 = vld [vmem:[%s10676_s5 + $0x130] sm:$0xff]  ;;  %v8316_v3 = vld [vmem:[%s10676_s5 + $0x140] sm:$0xff] }
 0x72f   : > { %v5857_v42 = vpop.eup %5856 }
 0x730   : > { %3223 = vmatpush.msrb.mxu2 %v5851_v37  ;;  %3116 = vmatpush.msrb.mxu0 %v5853_v36  ;;  %v5859_v27 = vpop.eup %5858  ;;  %v2839_v37 = vld [vmem:[%s10676_s5 + $0xd8] sm:$0xff]  ;;  %v8338_v36 = vld [vmem:[%s10676_s5 + $0x160] sm:$0xff] }
 0x731   : > { %v5861_v45 = vpop.eup %5860 }
 0x732   : > { %3011 = vmatmul.f32.gmra.mxu3 %v8170_v31  ;;  %3224 = vmatpush.msrb.mxu2 %v5855_v17  ;;  %v5863_v39 = vpop.eup %5862  ;;  %v8207_v47 = vpop.f32.mrf.mxu3 }
 0x733   : > { %3117 = vmatpush.msrb.mxu0 %v5857_v42  ;;  %2922 = vmatmul.f32.gmra.mxu2 %v8175_v50  ;;  %v5865_v10 = vpop.eup %5864  ;;  %11025 = vst [vmem:[#allocation16_spill] sm:$0xff] %v8207_v47 }
 0x734   : > { %3225 = vmatpush.msrb.mxu2 %v5859_v27  ;;  %v5867_v43 = vpop.eup %5866 }
 0x735   : > { %v5869_v53 = vpop.eup %5868  ;;  %2904 = vmatmul.f32.gmra.mxu0 %v2820_v35 }
 0x736   : > { %3226 = vmatpush.msrb.mxu2 %v5861_v45  ;;  %v2860_v45 = vld [vmem:[%s10676_s5 + $0x180] sm:$0xff] }
 0x738   : > { %3227 = vmatpush.msrb.mxu2 %v5863_v39 }
 0x73a   : > { %3014 = vmatmul.f32.gmra.mxu3 %v8182_v24  ;;  %3228 = vmatpush.msrb.mxu2 %v5865_v10  ;;  %v8225_v13 = vpop.f32.mrf.mxu3 }
 0x73b   : > { %2925 = vmatmul.f32.gmra.mxu2 %v8187_v63  ;;  %11026 = vst [vmem:[#allocation17_spill] sm:$0xff] %v8225_v13 }
 0x73c   : > { %3229 = vmatpush.msrb.mxu2 %v5867_v43 }
 0x73d   : > { %2907 = vmatmul.f32.gmra.mxu0 %v2822_v60 }
 0x73e   : > { %3230 = vmatpush.msrb.mxu2 %v5869_v53  ;;  %v2862_v53 = vld [vmem:[%s10676_s5 + $0x190] sm:$0xff] }
 0x742   : > { %3017 = vmatmul.f32.gmra.mxu3 %v8196_v56  ;;  %v8240_v33 = vpop.f32.mrf.mxu3 }
 0x743   : > { %2928 = vmatmul.f32.gmra.mxu2 %v8201_v14  ;;  %11028 = vst [vmem:[#allocation31_spill] sm:$0xff] %v8240_v33 }
 0x745   : > { %3118 = vmatmul.f32.vlgmr.msrb.gmra.mxu0 %v8051_v57  ;;  %v8258_v57 = vld [vmem:[%s10676_s5 + $0x88] sm:$0xff] }
 0x746   : > { %11030 = vst [vmem:[#allocation24_spill] sm:$0xff] %v8258_v57 }
 0x74a   : > { %3020 = vmatmul.f32.gmra.mxu3 %v8213_v15  ;;  %v8265_v38 = vpop.f32.mrf.mxu3 }
 0x74b   : > { %2931 = vmatmul.f32.gmra.mxu2 %v8218_v8  ;;  %11031 = vst [vmem:[#allocation27_spill] sm:$0xff] %v8265_v38 }
 0x74d   : > { %3121 = vmatmul.f32.gmra.mxu0 %v8097_v29  ;;  %v8273_v29 = vld [vmem:[%s10676_s5 + $0x98] sm:$0xff] }
 0x74e   : > { %11032 = vst [vmem:[#allocation28_spill] sm:$0xff] %v8273_v29 }
 0x752   : > { %3023 = vmatmul.f32.gmra.mxu3 %v8230_v28  ;;  %v8281_v26 = vpop.f32.mrf.mxu3 }
 0x753   : > { %2934 = vmatmul.f32.gmra.mxu2 %v8235_v55  ;;  %11033 = vst [vmem:[#allocation35_spill] sm:$0xff] %v8281_v26 }
 0x755   : > { %3124 = vmatmul.f32.gmra.mxu0 %v8134_v59  ;;  %v8288_v59 = vld [vmem:[%s10676_s5 + $0xa8] sm:$0xff] }
 0x756   : > { %11034 = vst [vmem:[#allocation46_spill] sm:$0xff] %v8288_v59 }
 0x75a   : > { %3026 = vmatmul.f32.gmra.mxu3 %v8245_v22  ;;  %v8297_v49 = vpop.f32.mrf.mxu3 }
 0x75b   : > { %2937 = vmatmul.f32.gmra.mxu2 %v8250_v44  ;;  %11035 = vst [vmem:[#allocation48_spill] sm:$0xff] %v8297_v49 }
 0x75d   : > { %3127 = vmatmul.f32.gmra.mxu0 %v8162_v11  ;;  %v2835_v11 = vld [vmem:[%s10676_s5 + $0xb8] sm:$0xff] }
 0x762   : > { %3029 = vmatmul.f32.gmra.mxu3 %v8258_v57  ;;  %v8308_v7 = vpop.f32.mrf.mxu3 }
 0x763   : > { %2940 = vmatmul.f32.gmra.mxu2 %v8263_v30  ;;  %11036 = vst [vmem:[#allocation44_spill] sm:$0xff] %v8308_v7 }
 0x765   : > { %3130 = vmatmul.f32.gmra.mxu0 %v2820_v35 }
 0x76a   : > { %3032 = vmatmul.f32.gmra.mxu3 %v8273_v29  ;;  %v8328_v21 = vpop.f32.mrf.mxu3 }
 0x76b   : > { %2943 = vmatmul.f32.gmra.mxu2 %v8278_v51  ;;  %11037 = vst [vmem:[#allocation45_spill] sm:$0xff] %v8328_v21 }
 0x76d   : > { %3133 = vmatmul.f32.gmra.mxu0 %v2822_v60 }
 0x772   : > { %3035 = vmatmul.f32.gmra.mxu3 %v8288_v59  ;;  %v8340_v17 = vpop.f32.mrf.mxu3 }
 0x773   : > { %2946 = vmatmul.f32.gmra.mxu2 %v8293_v23  ;;  %11038 = vst [vmem:[#allocation47_spill] sm:$0xff] %v8340_v17 }
 0x775   : > { %3136 = vmatmul.f32.gmra.mxu0 %v8058_v6  ;;  %v2841_v6 = vld [vmem:[%s10676_s5 + $0xe8] sm:$0xff] }
 0x77a   : > { %3038 = vmatmul.f32.gmra.mxu3 %v2835_v11  ;;  %v8356_v27 = vpop.f32.mrf.mxu3 }
 0x77b   : > { %2949 = vmatmul.f32.gmra.mxu2 %v8305_v41  ;;  %11039 = vst [vmem:[#allocation40_spill] sm:$0xff] %v8356_v27 }
 0x77d   : > { %3139 = vmatmul.f32.gmra.mxu0 %v8088_v52  ;;  %v2843_v52 = vld [vmem:[%s10676_s5 + $0xf8] sm:$0xff] }
 0x782   : > { %3041 = vmatmul.f32.gmra.mxu3 %v2837_v58 }
 0x783   : > { %2952 = vmatmul.f32.gmra.mxu2 %v8316_v3 }
 0x785   : > { %3142 = vmatmul.f32.gmra.mxu0 %v8123_v62  ;;  %v2845_v62 = vld [vmem:[%s10676_s5 + $0x108] sm:$0xff] }
 0x78a   : > { %3044 = vmatmul.f32.gmra.mxu3 %v2839_v37  ;;  %v2851_v37 = vld [vmem:[%s10676_s5 + $0x138] sm:$0xff] }
 0x78b   : > { %2955 = vmatmul.f32.gmra.mxu2 %v8326_v16 }
 0x78d   : > { %3145 = vmatmul.f32.gmra.mxu0 %v8151_v5  ;;  %v2847_v5 = vld [vmem:[%s10676_s5 + $0x118] sm:$0xff] }
 0x790   : > { %v2893_v18 = vpop.f32.mrf.mxu0 }
 0x792   : > { %3047 = vmatmul.f32.gmra.mxu3 %v2841_v6 }
 0x793   : > { %2958 = vmatmul.f32.gmra.mxu2 %v8338_v36 }
 0x795   : > { %3148 = vmatmul.f32.gmra.mxu0 %v8175_v50  ;;  %v2849_v50 = vld [vmem:[%s10676_s5 + $0x128] sm:$0xff] }
 0x796   : > { %v8354_v42 = vpop.f32.mrf.mxu2 }
 0x79a   : > { %3050 = vmatmul.f32.gmra.mxu3 %v2843_v52  ;;  %v2896_v43 = vpop.f32.mrf.mxu0 }
 0x79b   : > { %2961 = vmatmul.f32.gmra.mxu2 %v8350_v48 }
 0x79d   : > { %3151 = vmatmul.f32.gmra.mxu0 %v8187_v63 }
 0x79e   : > { %v8365_v10 = vpop.f32.mrf.mxu2 }
 0x7a2   : > { %3053 = vmatmul.f32.gmra.mxu3 %v2845_v62  ;;  %v2899_v11 = vpop.f32.mrf.mxu0 }
 0x7a3   : > { %2964 = vmatmul.f32.gmra.mxu2 %v2860_v45  ;;  %v3328_v45 = vlaneseq }
 0x7a5   : > { %v3006_v39 = vpop.f32.mrf.mxu3  ;;  %3154 = vmatmul.f32.gmra.mxu0 %v8201_v14  ;;  %v2853_v14 = vld [vmem:[%s10676_s5 + $0x148] sm:$0xff] }
 0x7a6   : > { %v8377_v60 = vpop.f32.mrf.mxu2  ;;  %v3007_v7 = vadd.f32 %v3006_v39, %v2893_v18 }
 0x7aa   : > { %3056 = vmatmul.f32.gmra.mxu3 %v2847_v5  ;;  %v2902_v63 = vpop.f32.mrf.mxu0  ;;  %v2864_v5 = vld [vmem:[%s10676_s5 + $0x1a0] sm:$0xff] }
 0x7ab   : > { %2967 = vmatmul.f32.gmra.mxu2 %v2862_v53  ;;  %v8393_v53 = vshrl.u32 %v3328_v45, 7  ;;  %v2855_v45 = vld [vmem:[%s10676_s5 + $0x158] sm:$0xff] }
 0x7ad   : > { %v3009_v35 = vpop.f32.mrf.mxu3  ;;  %3157 = vmatmul.f32.gmra.mxu0 %v8218_v8  ;;  %11040 = vst [vmem:[#allocation36_spill] sm:$0xff] %v8393_v53  ;;  %v8403_v27 = vadd.s32 16, %v8393_v53  ;;  %v8406_v17 = vadd.s32 24, %v8393_v53  ;;  %v3333_v33 = vcvt.s32.f32 %v8393_v53 }
 0x7ae   : > { %v8383_v6 = vpop.f32.mrf.mxu2  ;;  %v3010_v49 = vadd.f32 %v3009_v35, %v2896_v43  ;;  %v3375_v35 = vmul.f32 0.97, %v3007_v7 }
 0x7af   : > { %11042 = vst [vmem:[#allocation32_spill] sm:$0xff] %v8403_v27  ;;  %v3335_v18 = vcvt.s32.f32 %v8403_v27  ;;  %v3336_v39 = vcvt.s32.f32 %v8406_v17  ;;  %vm3344_vm8 = vcmp.eq.s32.totalorder %v8406_v17, 30 }
 0x7b1   : > { %v8441_v7 = vmul.f32 0.001, %v3335_v18 }
 0x7b2   : > { %3059 = vmatmul.f32.gmra.mxu3 %v2849_v50  ;;  %v2905_v4 = vpop.f32.mrf.mxu0 }
 0x7b3   : > { %2970 = vmatmul.f32.gmra.mxu2 %v2864_v5  ;;  %11047 = vst [vmem:[#allocation51_spill] sm:$0xff] %v8441_v7 }
 0x7b5   : > { %v3012_v58 = vpop.f32.mrf.mxu3  ;;  %3160 = vmatmul.f32.gmra.mxu0 %v8235_v55  ;;  %v2866_v55 = vld [vmem:[%s10676_s5 + $0x1b0] sm:$0xff] }
 0x7b6   : > { %v8395_v50 = vpop.f32.mrf.mxu2  ;;  %v3013_v26 = vadd.f32 %v3012_v58, %v2899_v11  ;;  %v3376_v11 = vmul.f32 0.97, %v3010_v49  ;;  %v8446_v49 = vld [vmem:[%s6201_s9] sm:$0xff] }
 0x7b8   : > { %v3377_v58 = vmul.f32 0.97, %v3013_v26  ;;  %v8443_v26 = vmul.f32 0.001, %v3336_v39 }
 0x7ba   : > { %3062 = vmatmul.f32.gmra.mxu3 %v2851_v37  ;;  %11048 = vst [vmem:[#allocation9_spill] sm:$0xff] %v8443_v26 }
 0x7bb   : > { %2973 = vmatmul.f32.gmra.mxu2 %v2866_v55 }
 0x7bd   : > { %v3015_v52 = vpop.f32.mrf.mxu3  ;;  %3163 = vmatmul.f32.gmra.mxu0 %v8250_v44 }
 0x7be   : > { %v3016_v62 = vadd.f32 %v3015_v52, %v2902_v63  ;;  %v8400_v52 = vadd.s32 8, %v8393_v53  ;;  %v8421_v12 = vpop.f32.mrf.mxu2 }
 0x7c0   : > { %5870 = vrcp.f32 %v3016_v62  ;;  %11041 = vst [vmem:[#allocation34_spill] sm:$0xff] %v8400_v52  ;;  %v3356_v5 = vand.u32 2147483648, %v3016_v62  ;;  %vm3350_vm1 = vweird.f32 %v3016_v62  ;;  %v3354_v21 = vand.u32 2147483647, %v3016_v62 }
 0x7c1   : > { %v3334_v13 = vcvt.s32.f32 %v8400_v52 }
 0x7c2   : > { %3065 = vmatmul.f32.gmra.mxu3 %v2853_v14  ;;  %vm3355_vm7 = vcmp.eq.f32.partialorder %v3354_v21, 8.507059e+37  ;;  %v2857_v21 = vld [vmem:[%s10676_s5 + $0x168] sm:$0xff] }
 0x7c5   : > { %v8397_v8 = vpop.f32.mrf.mxu3  ;;  %3166 = vmatmul.f32.gmra.mxu0 %v8263_v30 }
 0x7c6   : > { %v5871_v37 = vpop.eup %5870 }
 0x7c7   : > { %v3346_v63 = vmul.f32 %v5871_v37, %v3016_v62  ;;  %vm3351_vm5 = vweird.f32 %v5871_v37 }
 0x7c8   : > { %vm8417_vm6 = vmor %vm3350_vm1, %vm3351_vm5 }
 0x7c9   : > { %v3347_v14 = vsub.f32 1.0, %v3346_v63  ;;  %v3357_v63 = vor.u32 1.1754944e-38, %v3356_v5  ;;  %v3378_v5 = vmul.f32 0.97, %v3016_v62 }
 0x7ca   : > { %3068 = vmatmul.f32.gmra.mxu3 %v2855_v45  ;;  %v8431_v45 = vmul.f32 0.001, %v3333_v33 }
 0x7cb   : > { %v3348_v38 = vmul.f32 %v5871_v37, %v3347_v14  ;;  %v8433_v14 = vmul.f32 0.001, %v3334_v13  ;;  %v3413_v13 = vperm.slane %v8446_v49, 0 }
 0x7cc   : > { %11045 = vst [vmem:[#allocation33_spill] sm:$0xff] %v8431_v45 }
 0x7cd   : > { %v3349_v43 = vadd.f32 %v5871_v37, %v3348_v38  ;;  %v8427_v44 = vpop.f32.mrf.mxu3  ;;  %11046 = vst [vmem:[#allocation39_spill] sm:$0xff] %v8433_v14  ;;  %v2868_v38 = vld [vmem:[%s10676_s5 + $0x1c0] sm:$0xff]  ;;  %3169 = vmatmul.f32.gmra.mxu0 %v8278_v51 }
 0x7ce   : > { %2976 = vmatmul.f32.gmra.mxu2 %v2868_v38 }
 0x7cf   : > { %v3353_v55 = vsel %vm8417_vm6, %v5871_v37, %v3349_v43  ;;  %v8451_v43 = vpop.f32.mrf.mxu2 }
 0x7d0   : > { %v3358_v1 = vsel %vm3355_vm7, %v3357_v63, %v3353_v55  ;;  %v10703_v55 = vmov 0.0  }
 0x7d1   : > { %v3379_v47 = vperm.slane %v3358_v1, 6 }
 0x7d2   : > { %3071 = vmatmul.f32.gmra.mxu3 %v2857_v21  ;;  %v2870_v21 = vld [vmem:[%s10676_s5 + $0x1d0] sm:$0xff] }
 0x7d3   : > { %v3380_v33 = vmul.f32 %v3379_v47, %v3375_v35  ;;  %v3381_v62 = vmul.f32 %v3379_v47, %v3376_v11  ;;  %v3382_v37 = vmul.f32 %v3379_v47, %v3377_v58  ;;  %v3383_v63 = vmul.f32 %v3379_v47, %v3378_v5  ;;  %v2394_v58 = vpop.f32.mrf.mxu1  ;;  %v2859_v47 = vld [vmem:[%s10676_s5 + $0x178] sm:$0xff] }
 0x7d5   : > { %v8454_v18 = vadd.f32 %v3380_v33, %v8431_v45  ;;  %v8457_v1 = vadd.f32 %v3381_v62, %v8433_v14  ;;  %v8460_v39 = vadd.f32 %v3382_v37, %v8441_v7  ;;  %v8463_v35 = vadd.f32 %v3383_v63, %v8443_v26  ;;  %v3024_v11 = vpop.f32.mrf.mxu3  ;;  %3172 = vmatmul.f32.gmra.mxu0 %v8293_v23  ;;  %v2863_v23 = vld [vmem:[%s10676_s5 + $0x198] sm:$0xff] }
 0x7d6   : > { %2979 = vmatmul.f32.gmra.mxu2 %v2870_v21 }
 0x7d7   : > { %v3395_v30 = vsel %vm3344_vm8, 1.000001, %v8463_v35  ;;  %vm3414_vm9 = vcmp.ge.f32.partialorder %v3413_v13, %v8454_v18  ;;  %vm3415_vm10 = vcmp.ge.f32.partialorder %v3413_v13, %v8457_v1  ;;  %vm3416_vm11 = vcmp.ge.f32.partialorder %v3413_v13, %v8460_v39  ;;  %v8482_v63 = vpop.f32.mrf.mxu2 }
 0x7d8   : > { %vm3417_vm12 = vcmp.ge.f32.partialorder %v3413_v13, %v3395_v30  ;;  %v5478_v5 = vsel %vm3414_vm9, 1.0, %v10703_v55  ;;  %v5479_v38 = vsel %vm3415_vm10, 1.0, %v10703_v55  ;;  %v5480_v33 = vsel %vm3416_vm11, 1.0, %v10703_v55 }
 0x7d9   : > { %v3426_v62 = vadd.f32 %v5479_v38, %v5478_v5  ;;  %v5481_v37 = vsel %vm3417_vm12, 1.0, %v10703_v55  ;;  %v2872_v5 = vld [vmem:[%s10676_s5 + $0x1e0] sm:$0xff]  ;;  %v2861_v38 = vld [vmem:[%s10676_s5 + $0x188] sm:$0xff] }
 0x7da   : > { %3074 = vmatmul.f32.gmra.mxu3 %v2859_v47  ;;  %v1737_v47 = vpop.permute.xlu2 %1736 }
 0x7db   : > { %v3427_v13 = vadd.f32 %v5480_v33, %v3426_v62  ;;  %v2397_v21 = vpop.f32.mrf.mxu1 }
 0x7dd   : > { %v3428_v30 = vadd.f32 %v5481_v37, %v3427_v13  ;;  %v3027_v40 = vpop.f32.mrf.mxu3  ;;  %3175 = vmatmul.f32.gmra.mxu0 %v8305_v41  ;;  %v3391_v41 = vsel %vm3344_vm8, 1.0, %v8463_v35 }
 0x7de   : > { %v8485_v9 = vadd.f32 %v3027_v40, %v8365_v10  ;;  %2982 = vmatmul.f32.gmra.mxu2 %v2872_v5 }
 0x7df   : > { %v3429_v34 = vrot.slane %v3428_v30, 4  ;;  %v8495_v40 = vpop.f32.mrf.mxu2 }
 0x7e0   : > { %5872 = vrcp.f32 %v8485_v9  ;;  %vm3587_vm15 = vweird.f32 %v8485_v9 }
 0x7e1   : > { %v3430_v51 = vadd.f32 %v3429_v34, %v3428_v30  ;;  %v3019_v34 = vadd.f32 %v8397_v8, %v2905_v4  ;;  %v2874_v30 = vld [vmem:[%s10676_s5 + $0x1f0] sm:$0xff] }
 0x7e2   : > { %3077 = vmatmul.f32.gmra.mxu3 %v2861_v38 }
 0x7e3   : > { %v3431_v33 = vrot.slane %v3430_v51, 2  ;;  %v2400_v4 = vpop.f32.mrf.mxu1 }
 0x7e5   : > { %v3432_v10 = vadd.f32 %v3431_v33, %v3430_v51  ;;  %v8497_v62 = vpop.f32.mrf.mxu3  ;;  %v3025_v51 = vadd.f32 %v3024_v11, %v8354_v42  ;;  %v3593_v33 = vand.u32 2147483648, %v8485_v9  ;;  %v3591_v42 = vand.u32 2147483647, %v8485_v9  ;;  %3178 = vmatmul.f32.gmra.mxu0 %v8316_v3 }
 0x7e6   : > { %v8499_v37 = vpop.eup %5872  ;;  %2985 = vmatmul.f32.gmra.mxu2 %v2874_v30  ;;  %v2398_v30 = vadd.f32 %v2397_v21, %v1747_v0 }
 0x7e7   : > { %v3433_v13 = vrot.slane %v3432_v10, 1  ;;  %v3583_v55 = vmul.f32 %v8499_v37, %v8485_v9  ;;  %vm3588_vm13 = vweird.f32 %v8499_v37  ;;  %v8517_v11 = vpop.f32.mrf.mxu2  ;;  %vm8543_vm1 = vcmp.eq.f32.partialorder %v3591_v42, 8.507059e+37 }
 0x7e8   : > { %11049 = vst [vmem:[#allocation50_spill] sm:$0xff] %v8517_v11  ;;  %vm8526_vm0 = vmor %vm3587_vm15, %vm3588_vm13 }
 0x7e9   : > { %v3434_v5 = vadd.f32 %v3433_v13, %v3432_v10  ;;  %v3584_v38 = vsub.f32 1.0, %v3583_v55  ;;  %v2392_v55 = vadd.f32 %v8423_v2, %v1737_v47  ;;  %v2395_v10 = vadd.f32 %v2394_v58, %v1742_v54  ;;  %v1752_v13 = vpop.permute.xlu2 %1751 }
 0x7ea   : > { %3080 = vmatmul.f32.gmra.mxu3 %v2863_v23  ;;  %v2401_v25 = vadd.f32 %v2400_v4, %v1752_v13  ;;  %v3594_v2 = vor.u32 1.1754944e-38, %v3593_v33  ;;  %v8538_v58 = vmul.f32 0.97, %v3019_v34 }
 0x7eb   : > { %vm5610_vm14 = vcmp.lt.s32.totalorder %v3434_v5, 0  ;;  %v5611_v8 = vceil.f32 %v3434_v5  ;;  %v5612_v19 = vfloor.f32 %v3434_v5  ;;  %v3585_v32 = vmul.f32 %v8499_v37, %v3584_v38 }
 0x7ed   : > { %v5613_v23 = vsel %vm5610_vm14, %v5611_v8, %v5612_v19  ;;  %v3586_v20 = vadd.f32 %v8499_v37, %v3585_v32  ;;  %v3033_v5 = vpop.f32.mrf.mxu3  ;;  %v8533_v19 = vmul.f32 0.97, %v3025_v51  ;;  %3181 = vmatmul.f32.gmra.mxu0 %v8326_v16 }
 0x7ee   : > { %v5614_v38 = vcvt.f32.s32 %v5613_v23  ;;  %v8531_v0 = vadd.f32 %v3033_v5, %v8383_v6  ;;  %v2865_v6 = vld [vmem:[%s10676_s5 + $0x1a8] sm:$0xff]  ;;  %3231 = vmatmul.f32.vlgmr.msrb.gmra.mxu2 %v8116_v46  ;;  %v2908_v5 = vpop.f32.mrf.mxu0 }
 0x7ef   : > { %v3590_v32 = vsel %vm8526_vm0, %v8499_v37, %v3586_v20  ;;  %v11054_v20 = vmov 0.0  }
 0x7f0   : > { %v5482_v35 = vadd.s32 4294967295, %v5614_v38  ;;  %vm3449_vm2 = vcmp.eq.s32.totalorder %v8393_v53, %v5614_v38  ;;  %vm3450_vm3 = vcmp.eq.s32.totalorder %v8400_v52, %v5614_v38  ;;  %vm3451_vm4 = vcmp.eq.s32.totalorder %v8403_v27, %v5614_v38 }
 0x7f1   : > { %vm3452_vm5 = vcmp.eq.s32.totalorder %v8406_v17, %v5614_v38  ;;  %v8552_v47 = vsel %vm3449_vm2, 1.0, %v11054_v20  ;;  %v8555_v37 = vsel %vm3450_vm3, 1.0, %v11054_v20  ;;  %v8558_v34 = vsel %vm3451_vm4, 1.0, %v11054_v20  ;;  %v8587_v38 = vpop.f32.mrf.mxu2 }
 0x7f2   : > { %11055 = vst [vmem:[#allocation49_spill] sm:$0xff] %v8552_v47  ;;  %vm3437_vm6 = vcmp.eq.s32.totalorder %v8393_v53, %v5482_v35  ;;  %vm3438_vm7 = vcmp.eq.s32.totalorder %v8400_v52, %v5482_v35  ;;  %vm3439_vm9 = vcmp.eq.s32.totalorder %v8403_v27, %v5482_v35  ;;  %vm3440_vm10 = vcmp.eq.s32.totalorder %v8406_v17, %v5482_v35 }
 0x7f3   : > { %11056 = vst [vmem:[#allocation57_spill] sm:$0xff] %v8555_v37  ;;  %3083 = vmatmul.f32.gmra.mxu3 %v2865_v6  ;;  %v8566_v51 = vsel %vm3437_vm6, 1.0, %v11054_v20  ;;  %v8569_v33 = vsel %vm3438_vm7, 1.0, %v11054_v20  ;;  %v8572_v4 = vsel %vm3439_vm9, 1.0, %v11054_v20  ;;  %v8575_v46 = vsel %vm3440_vm10, 1.0, %v11054_v20 }
 0x7f4   : > { %11057 = vst [vmem:[#allocation38_spill] sm:$0xff] %v8558_v34  ;;  %v8579_v8 = vsel %vm3452_vm5, 1.0, %v11054_v20  ;;  %v3461_v42 = vmul.f32 %v8566_v51, %v8454_v18  ;;  %v3462_v13 = vmul.f32 %v8569_v33, %v8457_v1  ;;  %v3463_v23 = vmul.f32 %v8572_v4, %v8460_v39 }
 0x7f5   : > { %11058 = vst [vmem:[#allocation22_spill] sm:$0xff] %v8566_v51  ;;  %v3464_v54 = vmul.f32 %v8575_v46, %v3391_v41  ;;  %v3474_v3 = vmul.f32 %v8552_v47, %v8454_v18  ;;  %v3475_v35 = vmul.f32 %v8555_v37, %v8457_v1  ;;  %v3476_v6 = vmul.f32 %v8558_v34, %v8460_v39  ;;  %v3036_v59 = vpop.f32.mrf.mxu3 }
 0x7f6   : > { %11059 = vst [vmem:[#allocation56_spill] sm:$0xff] %v8569_v33  ;;  %v3465_v29 = vadd.f32 %v3462_v13, %v3461_v42  ;;  %v3477_v57 = vmul.f32 %v8579_v8, %v3391_v41  ;;  %v3513_v11 = vmul.f32 %v8566_v51, %v2392_v55  ;;  %v3514_v22 = vmul.f32 %v8569_v33, %v2395_v10  ;;  %v2867_v41 = vld [vmem:[%s10676_s5 + $0x1b8] sm:$0xff] }
 0x7f7   : > { %11060 = vst [vmem:[#allocation55_spill] sm:$0xff] %v8572_v4  ;;  %v3516_v28 = vmul.f32 %v8575_v46, %v2401_v25  ;;  %v3526_v27 = vmul.f32 %v8552_v47, %v2392_v55  ;;  %v3022_v18 = vadd.f32 %v8427_v44, %v2908_v5  ;;  %v3515_v1 = vmul.f32 %v8572_v4, %v2398_v30 }
 0x7f8   : > { %11061 = vst [vmem:[#allocation37_spill] sm:$0xff] %v8575_v46  ;;  %v3466_v52 = vadd.f32 %v3465_v29, %v3463_v23  ;;  %v3517_v53 = vadd.f32 %v3514_v22, %v3513_v11  ;;  %v3527_v39 = vmul.f32 %v8555_v37, %v2395_v10  ;;  %v3528_v13 = vmul.f32 %v8558_v34, %v2398_v30 }
 0x7f9   : > { %11062 = vst [vmem:[#allocation43_spill] sm:$0xff] %v8579_v8  ;;  %v3595_v55 = vsel %vm8543_vm1, %v3594_v2, %v3590_v32  ;;  %3234 = vmatmul.f32.gmra.mxu2 %v8146_v61  ;;  %v3615_v23 = vmul.f32 0.97, %v8485_v9  ;;  %v3613_v5 = vmul.f32 0.97, %v3022_v18  ;;  %v8618_v30 = vadd.f32 %v3036_v59, %v8395_v50  ;;  %3184 = vmatmul.f32.gmra.mxu0 %v8338_v36  ;;  %v2871_v36 = vld [vmem:[%s10676_s5 + $0x1d8] sm:$0xff] }
 0x7fa   : > { %11063 = vst [vmem:[#allocation54_spill] sm:$0xff] %v8587_v38  ;;  %v3478_v38 = vadd.f32 %v3475_v35, %v3474_v3  ;;  %v3529_v3 = vmul.f32 %v8579_v8, %v2401_v25  ;;  %v8612_v29 = vadd.f32 %v3466_v52, %v3464_v54  ;;  %v3518_v44 = vadd.f32 %v3517_v53, %v3515_v1 }
 0x7fb   : > { %v3530_v22 = vadd.f32 %v3527_v39, %v3526_v27  ;;  %v3616_v11 = vperm.slane %v3595_v55, 6  ;;  %3086 = vmatmul.f32.gmra.mxu3 %v2867_v41  ;;  %v3650_v53 = vperm.slane %v8446_v49, 1  ;;  %v8625_v27 = vpop.f32.mrf.mxu2 }
 0x7fc   : > { %v3479_v42 = vadd.f32 %v3478_v38, %v3476_v6  ;;  %v8621_v25 = vadd.f32 %v3518_v44, %v3516_v28 }
 0x7fd   : > { %v3531_v32 = vadd.f32 %v3530_v22, %v3528_v13  ;;  %v3617_v61 = vmul.f32 %v3616_v11, %v8538_v58  ;;  %v3620_v52 = vmul.f32 %v3616_v11, %v3615_v23  ;;  %v3618_v2 = vmul.f32 %v3616_v11, %v3613_v5  ;;  %v3039_v9 = vpop.f32.mrf.mxu3  ;;  %v1757_v22 = vpop.permute.xlu0 %1756 }
 0x7fe   : > { %v8614_v10 = vadd.f32 %v3479_v42, %v3477_v57  ;;  %v3619_v57 = vmul.f32 %v3616_v11, %v8533_v19  ;;  %v2869_v19 = vld [vmem:[%s10676_s5 + $0x1c8] sm:$0xff]  ;;  %v2403_v11 = vpop.f32.mrf.mxu1 }
 0x7ff   : > { %v8628_v21 = vadd.f32 %v3531_v32, %v3529_v3  ;;  %v8631_v59 = vadd.f32 %v3617_v61, %v8431_v45  ;;  %v8634_v28 = vadd.f32 %v3618_v2, %v8433_v14  ;;  %v8640_v50 = vadd.f32 %v3620_v52, %v8443_v26 }
 0x800   : > { %v8637_v16 = vadd.f32 %v3619_v57, %v8441_v7 }
 0x801   : > { %vm3651_vm11 = vcmp.ge.f32.partialorder %v3650_v53, %v8631_v59  ;;  %3237 = vmatmul.f32.gmra.mxu2 %v8170_v31  ;;  %v3632_v38 = vsel %vm3344_vm8, 1.000001, %v8640_v50  ;;  %vm3652_vm12 = vcmp.ge.f32.partialorder %v3650_v53, %v8634_v28  ;;  %v3040_v31 = vadd.f32 %v3039_v9, %v8421_v12  ;;  %3187 = vmatmul.f32.gmra.mxu0 %v8350_v48 }
 0x802   : > { %v5491_v58 = vsel %vm3651_vm11, 1.0, %v11054_v20  ;;  %vm3653_vm13 = vcmp.ge.f32.partialorder %v3650_v53, %v8637_v16  ;;  %v5492_v54 = vsel %vm3652_vm12, 1.0, %v11054_v20  ;;  %vm3654_vm14 = vcmp.ge.f32.partialorder %v3650_v53, %v3632_v38 }
 0x803   : > { %3089 = vmatmul.f32.gmra.mxu3 %v2869_v19  ;;  %v8655_v35 = vpop.f32.mrf.mxu2  ;;  %v3663_v6 = vadd.f32 %v5492_v54, %v5491_v58  ;;  %v5493_v1 = vsel %vm3653_vm13, 1.0, %v11054_v20  ;;  %5874 = vrcp.f32 %v3040_v31  ;;  %v5494_v42 = vsel %vm3654_vm14, 1.0, %v11054_v20 }
 0x804   : > { %v3833_v57 = vand.u32 2147483648, %v3040_v31  ;;  %v3031_v48 = vadd.f32 %v8497_v62, %v8377_v60  ;;  %v3831_v2 = vand.u32 2147483647, %v3040_v31  ;;  %vm3827_vm0 = vweird.f32 %v3040_v31 }
 0x805   : > { %v3042_v18 = vpop.f32.mrf.mxu3  ;;  %v3664_v41 = vadd.f32 %v5493_v1, %v3663_v6 }
 0x806   : > { %v8660_v39 = vadd.f32 %v3042_v18, %v8451_v43  ;;  %v3834_v58 = vor.u32 1.1754944e-38, %v3833_v57  ;;  %v3852_v54 = vmul.f32 0.97, %v3031_v48  ;;  %vm3832_vm3 = vcmp.eq.f32.partialorder %v3831_v2, 8.507059e+37  ;;  %v1762_v57 = vpop.permute.xlu1 %1761 }
 0x807   : > { %v3665_v13 = vadd.f32 %v5494_v42, %v3664_v41  ;;  %v1772_v42 = vpop.permute.xlu0 %1771 }
 0x809   : > { %3240 = vmatmul.f32.gmra.mxu2 %v8182_v24  ;;  %v3666_v3 = vrot.slane %v3665_v13, 4  ;;  %v5875_v12 = vpop.eup %5874  ;;  %v2873_v24 = vld [vmem:[%s10676_s5 + $0x1e8] sm:$0xff] }
 0x80a   : > { %v3823_v23 = vmul.f32 %v5875_v12, %v3040_v31  ;;  %vm3828_vm15 = vweird.f32 %v5875_v12 }
 0x80b   : > { %3092 = vmatmul.f32.gmra.mxu3 %v2871_v36  ;;  %v3667_v55 = vadd.f32 %v3666_v3, %v3665_v13  ;;  %v8668_v44 = vpop.f32.mrf.mxu2  ;;  %vm3829_vm2 = vmor %vm3827_vm0, %vm3828_vm15  ;;  %v11064_v36 = vld [vmem:[#allocation6_spill] sm:$0xff]  ;;  %v2406_v3 = vpop.f32.mrf.mxu1 }
 0x80c   : > { %v3824_v61 = vsub.f32 1.0, %v3823_v23  ;;  %v11065_v23 = vld [vmem:[#allocation7_spill] sm:$0xff] }
 0x80d   : > { %v3045_v43 = vpop.f32.mrf.mxu3  ;;  %v3668_v32 = vrot.slane %v3667_v55, 2 }
 0x80e   : > { %v8671_v5 = vadd.f32 %v3045_v43, %v8482_v63  ;;  %v3825_v52 = vmul.f32 %v5875_v12, %v3824_v61  ;;  %v3854_v43 = vmul.f32 0.97, %v8618_v30  ;;  %v2404_v61 = vadd.f32 %v2403_v11, %v1757_v22  ;;  %v11066_v11 = vld [vmem:[#allocation36_spill] sm:$0xff] }
 0x80f   : > { %v3669_v53 = vadd.f32 %v3668_v32, %v3667_v55  ;;  %v3853_v55 = vmul.f32 0.97, %v8531_v0  ;;  %v2413_v32 = vadd.f32 %v11065_v23, %v1772_v42  ;;  %v2407_v0 = vadd.f32 %v2406_v3, %v1762_v57 }
 0x810   : > { %v3826_v63 = vadd.f32 %v5875_v12, %v3825_v52  ;;  %v3628_v30 = vsel %vm3344_vm8, 1.0, %v8640_v50 }
 0x811   : > { %3243 = vmatmul.f32.gmra.mxu2 %v8196_v56  ;;  %v3670_v9 = vrot.slane %v3669_v53, 1  ;;  %v1767_v56 = vpop.permute.xlu2 %1766 }
 0x812   : > { %v3830_v6 = vsel %vm3829_vm2, %v5875_v12, %v3826_v63  ;;  %v2410_v13 = vadd.f32 %v11064_v36, %v1767_v56 }
 0x813   : > { %3095 = vmatmul.f32.gmra.mxu3 %v2873_v24  ;;  %v3671_v19 = vadd.f32 %v3670_v9, %v3669_v53  ;;  %v3835_v1 = vsel %vm3832_vm3, %v3834_v58, %v3830_v6  ;;  %v8682_v41 = vpop.f32.mrf.mxu2  ;;  %v3855_v53 = vmul.f32 0.97, %v3040_v31  ;;  %v11067_v31 = vld [vmem:[#allocation34_spill] sm:$0xff] }
 0x814   : > { %v3856_v12 = vperm.slane %v3835_v1, 6 }
 0x815   : > { %v3048_v38 = vpop.f32.mrf.mxu3  ;;  %vm5615_vm4 = vcmp.lt.s32.totalorder %v3671_v19, 0  ;;  %v5616_v60 = vceil.f32 %v3671_v19  ;;  %v5617_v62 = vfloor.f32 %v3671_v19  ;;  %v8696_v19 = vperm.slane %v8446_v49, 2 }
 0x816   : > { %v8680_v18 = vadd.f32 %v3048_v38, %v8495_v40  ;;  %v2875_v40 = vld [vmem:[%s10676_s5 + $0x1f8] sm:$0xff]  ;;  %v3857_v52 = vmul.f32 %v3856_v12, %v3852_v54  ;;  %v3858_v2 = vmul.f32 %v3856_v12, %v3853_v55  ;;  %v3859_v9 = vmul.f32 %v3856_v12, %v3854_v43 }
 0x817   : > { %v5618_v24 = vsel %vm5615_vm4, %v5616_v60, %v5617_v62  ;;  %v3860_v63 = vmul.f32 %v3856_v12, %v3855_v53 }
 0x818   : > { %v5619_v48 = vcvt.f32.s32 %v5618_v24  ;;  %v11077_v24 = vld [vmem:[#allocation18_spill] sm:$0xff] }
 0x819   : > { %3246 = vmatmul.f32.gmra.mxu2 %v8213_v15  ;;  %v11068_v15 = vld [vmem:[#allocation32_spill] sm:$0xff] }
 0x81a   : > { %v5495_v22 = vadd.s32 4294967295, %v5619_v48  ;;  %vm3686_vm1 = vcmp.eq.s32.totalorder %v11066_v11, %v5619_v48  ;;  %vm3687_vm5 = vcmp.eq.s32.totalorder %v11067_v31, %v5619_v48  ;;  %vm3688_vm6 = vcmp.eq.s32.totalorder %v11068_v15, %v5619_v48 }
 0x81b   : > { %3098 = vmatmul.f32.gmra.mxu3 %v2875_v40  ;;  %vm3689_vm7 = vcmp.eq.s32.totalorder %v8406_v17, %v5619_v48  ;;  %v8703_v58 = vsel %vm3686_vm1, 1.0, %v11054_v20  ;;  %v8706_v38 = vsel %vm3687_vm5, 1.0, %v11054_v20  ;;  %v8709_v50 = vsel %vm3688_vm6, 1.0, %v11054_v20  ;;  %v8743_v40 = vpop.f32.mrf.mxu2 }
 0x81c   : > { %11069 = vst [vmem:[#allocation53_spill] sm:$0xff] %v8703_v58  ;;  %vm3674_vm9 = vcmp.eq.s32.totalorder %v11066_v11, %v5495_v22  ;;  %vm3675_vm10 = vcmp.eq.s32.totalorder %v11067_v31, %v5495_v22  ;;  %vm3676_vm11 = vcmp.eq.s32.totalorder %v11068_v15, %v5495_v22  ;;  %vm3677_vm12 = vcmp.eq.s32.totalorder %v8406_v17, %v5495_v22 }
 0x81d   : > { %11070 = vst [vmem:[#allocation52_spill] sm:$0xff] %v8706_v38  ;;  %v8716_v54 = vsel %vm3674_vm9, 1.0, %v11054_v20  ;;  %v8719_v6 = vsel %vm3675_vm10, 1.0, %v11054_v20  ;;  %v8722_v56 = vsel %vm3676_vm11, 1.0, %v11054_v20  ;;  %v8725_v60 = vsel %vm3677_vm12, 1.0, %v11054_v20  ;;  %v3051_v23 = vpop.f32.mrf.mxu3 }
 0x81e   : > { %11071 = vst [vmem:[#allocation42_spill] sm:$0xff] %v8709_v50  ;;  %v8728_v62 = vsel %vm3689_vm7, 1.0, %v11054_v20  ;;  %v3698_v1 = vmul.f32 %v8716_v54, %v8631_v59  ;;  %v3699_v42 = vmul.f32 %v8719_v6, %v8634_v28  ;;  %v3700_v36 = vmul.f32 %v8722_v56, %v8637_v16 }
 0x81f   : > { %11072 = vst [vmem:[#allocation41_spill] sm:$0xff] %v8716_v54  ;;  %v3701_v3 = vmul.f32 %v8725_v60, %v3628_v30  ;;  %v3711_v55 = vmul.f32 %v8703_v58, %v8631_v59  ;;  %v3712_v43 = vmul.f32 %v8706_v38, %v8634_v28  ;;  %v3713_v12 = vmul.f32 %v8709_v50, %v8637_v16 }
 0x820   : > { %11073 = vst [vmem:[#allocation6_spill] sm:$0xff] %v8719_v6  ;;  %v3702_v53 = vadd.f32 %v3699_v42, %v3698_v1  ;;  %v3714_v57 = vmul.f32 %v8728_v62, %v3628_v30  ;;  %v3750_v48 = vmul.f32 %v8716_v54, %v2404_v61  ;;  %v3751_v22 = vmul.f32 %v8719_v6, %v2407_v0 }
 0x821   : > { %11074 = vst [vmem:[#allocation7_spill] sm:$0xff] %v8722_v56  ;;  %3249 = vmatmul.f32.gmra.mxu2 %v11077_v24  ;;  %v3715_v4 = vadd.f32 %v3712_v43, %v3711_v55  ;;  %v3752_v59 = vmul.f32 %v8722_v56, %v2410_v13  ;;  %v3753_v28 = vmul.f32 %v8725_v60, %v2413_v32 }
 0x822   : > { %11075 = vst [vmem:[#allocation58_spill] sm:$0xff] %v8725_v60  ;;  %v3763_v33 = vmul.f32 %v8703_v58, %v2404_v61  ;;  %v3703_v16 = vadd.f32 %v3702_v53, %v3700_v36  ;;  %v3754_v51 = vadd.f32 %v3751_v22, %v3750_v48  ;;  %v3764_v8 = vmul.f32 %v8706_v38, %v2407_v0  ;;  %v11079_v22 = vld [vmem:[#allocation50_spill] sm:$0xff] }
 0x823   : > { %11076 = vst [vmem:[#allocation59_spill] sm:$0xff] %v8728_v62  ;;  %v3765_v24 = vmul.f32 %v8709_v50, %v2410_v13  ;;  %v3716_v1 = vadd.f32 %v3715_v4, %v3713_v12  ;;  %v3766_v30 = vmul.f32 %v8728_v62, %v2413_v32  ;;  %v8756_v42 = vadd.f32 %v3857_v52, %v8431_v45  ;;  %v11086_v50 = vld [vmem:[#allocation46_spill] sm:$0xff] }
 0x824   : > { %v8759_v55 = vadd.f32 %v3858_v2, %v8433_v14  ;;  %v3704_v43 = vadd.f32 %v3703_v16, %v3701_v3  ;;  %v3755_v56 = vadd.f32 %v3754_v51, %v3752_v59  ;;  %v3767_v60 = vadd.f32 %v3764_v8, %v3763_v33  ;;  %v11078_v8 = vld [vmem:[#allocation20_spill] sm:$0xff] }
 0x825   : > { %v8762_v61 = vadd.f32 %v3859_v9, %v8441_v7  ;;  %v3717_v36 = vadd.f32 %v3716_v1, %v3714_v57  ;;  %v8765_v0 = vadd.f32 %v3860_v63, %v8443_v26  ;;  %vm3891_vm13 = vcmp.ge.f32.partialorder %v8696_v19, %v8756_v42  ;;  %v3054_v3 = vpop.f32.mrf.mxu3 }
 0x826   : > { %v3705_v4 = vrot.slane %v3704_v43, 4  ;;  %v3756_v13 = vadd.f32 %v3755_v56, %v3753_v28  ;;  %v3768_v32 = vadd.f32 %v3767_v60, %v3765_v24  ;;  %vm3892_vm14 = vcmp.ge.f32.partialorder %v8696_v19, %v8759_v55  ;;  %v8779_v60 = vpop.f32.mrf.mxu2  ;;  %v11080_v28 = vld [vmem:[#allocation54_spill] sm:$0xff] }
 0x827   : > { %v3718_v52 = vrot.slane %v3717_v36, 4  ;;  %v3872_v51 = vsel %vm3344_vm8, 1.000001, %v8765_v0  ;;  %v5504_v33 = vsel %vm3891_vm13, 1.0, %v11054_v20  ;;  %vm3893_vm15 = vcmp.ge.f32.partialorder %v8696_v19, %v8762_v61 }
 0x828   : > { %v3706_v2 = vadd.f32 %v3705_v4, %v3704_v43  ;;  %v3769_v9 = vadd.f32 %v3768_v32, %v3766_v30  ;;  %v5505_v56 = vsel %vm3892_vm14, 1.0, %v11054_v20  ;;  %vm3894_vm0 = vcmp.ge.f32.partialorder %v8696_v19, %v3872_v51  ;;  %v11081_v32 = vld [vmem:[#allocation24_spill] sm:$0xff] }
 0x829   : > { %3252 = vmatmul.f32.gmra.mxu2 %v11078_v8  ;;  %v3719_v63 = vadd.f32 %v3718_v52, %v3717_v36  ;;  %v3903_v53 = vadd.f32 %v5505_v56, %v5504_v33  ;;  %v5506_v48 = vsel %vm3893_vm15, 1.0, %v11054_v20  ;;  %v8784_v59 = vadd.f32 %v3051_v23, %v11079_v22 }
 0x82a   : > { %v3707_v12 = vrot.slane %v3706_v2, 2  ;;  %v8787_v16 = vadd.f32 %v3054_v3, %v11080_v28  ;;  %v5507_v43 = vsel %vm3894_vm0, 1.0, %v11054_v20  ;;  %v3757_v8 = vrot.slane %v3756_v13, 4 }
 0x82b   : > { %v3720_v57 = vrot.slane %v3719_v63, 2  ;;  %v3904_v1 = vadd.f32 %v5506_v48, %v3903_v53  ;;  %5876 = vrcp.f32 %v8784_v59  ;;  %vm4067_vm3 = vweird.f32 %v8784_v59 }
 0x82c   : > { %v3708_v24 = vadd.f32 %v3707_v12, %v3706_v2  ;;  %v3758_v22 = vadd.f32 %v3757_v8, %v3756_v13  ;;  %v4071_v13 = vand.u32 2147483647, %v8784_v59 }
 0x82d   : > { %v3721_v30 = vadd.f32 %v3720_v57, %v3719_v63  ;;  %v3905_v4 = vadd.f32 %v5507_v43, %v3904_v1  ;;  %v3057_v23 = vpop.f32.mrf.mxu3  ;;  %v3520_v57 = vrot.slane %v8621_v25, 4  ;;  %v3770_v1 = vrot.slane %v3769_v9, 4  ;;  %v11082_v43 = vld [vmem:[#allocation28_spill] sm:$0xff] }
 0x82e   : > { %v3709_v36 = vrot.slane %v3708_v24, 1  ;;  %v8792_v3 = vpop.f32.mrf.mxu2  ;;  %v8795_v63 = vadd.f32 %v3057_v23, %v8625_v27  ;;  %v3759_v23 = vrot.slane %v3758_v22, 2  ;;  %vm4072_vm5 = vcmp.eq.f32.partialorder %v4071_v13, 8.507059e+37 }
 0x82f   : > { %v3722_v19 = vrot.slane %v3721_v30, 1  ;;  %v3906_v51 = vrot.slane %v3905_v4, 4 }
 0x830   : > { %v3710_v52 = vadd.f32 %v3709_v36, %v3708_v24  ;;  %v3533_v24 = vrot.slane %v8628_v21, 4  ;;  %v3468_v36 = vrot.slane %v8612_v29, 4 }
 0x831   : > { %3255 = vmatmul.f32.gmra.mxu2 %v11081_v32  ;;  %v3723_v33 = vadd.f32 %v3722_v19, %v3721_v30  ;;  %v3907_v56 = vadd.f32 %v3906_v51, %v3905_v4  ;;  %v5877_v2 = vpop.eup %5876  ;;  %v3481_v4 = vrot.slane %v8614_v10, 4  ;;  %v4073_v19 = vand.u32 2147483648, %v8784_v59 }
 0x832   : > { %v4063_v48 = vmul.f32 %v5877_v2, %v8784_v59  ;;  %v3521_v32 = vadd.f32 %v3520_v57, %v8621_v25  ;;  %vm4068_vm2 = vweird.f32 %v5877_v2  ;;  %v3800_v8 = vsub.f32 %v8446_v49, %v3710_v52 }
 0x833   : > { %v3796_v12 = vsub.f32 %v3723_v33, %v3710_v52  ;;  %v3908_v53 = vrot.slane %v3907_v56, 2  ;;  %vm4069_vm1 = vmor %vm4067_vm3, %vm4068_vm2  ;;  %v4074_v52 = vor.u32 1.1754944e-38, %v4073_v19  ;;  %v3469_v19 = vadd.f32 %v3468_v36, %v8612_v29 }
 0x834   : > { %v4064_v30 = vsub.f32 1.0, %v4063_v48  ;;  %v8813_v48 = vadd.f32 %v3533_v24, %v8628_v21  ;;  %v3760_v21 = vadd.f32 %v3759_v23, %v3758_v22  ;;  %v4093_v24 = vmul.f32 0.97, %v8671_v5 }
 0x835   : > { %5878 = vrcp.f32 %v3796_v12  ;;  %v3909_v28 = vadd.f32 %v3908_v53, %v3907_v56  ;;  %v3060_v33 = vpop.f32.mrf.mxu3  ;;  %v3482_v38 = vadd.f32 %v3481_v4, %v8614_v10  ;;  %v3470_v54 = vrot.slane %v3469_v19, 2 }
 0x836   : > { %v4065_v51 = vmul.f32 %v5877_v2, %v4064_v30  ;;  %v8808_v12 = vadd.f32 %v3060_v33, %v8655_v35  ;;  %v3522_v35 = vrot.slane %v3521_v32, 2  ;;  %v3761_v23 = vrot.slane %v3760_v21, 1 }
 0x837   : > { %v3910_v27 = vrot.slane %v3909_v28, 1  ;;  %v3483_v37 = vrot.slane %v3482_v38, 2 }
 0x838   : > { %v4066_v62 = vadd.f32 %v5877_v2, %v4065_v51  ;;  %v8885_v47 = vadd.f32 %v3761_v23, %v3760_v21 }
 0x839   : > { %3258 = vmatmul.f32.gmra.mxu2 %v11082_v43  ;;  %v3911_v56 = vadd.f32 %v3910_v27, %v3909_v28  ;;  %v3771_v43 = vadd.f32 %v3770_v1, %v3769_v9  ;;  %v8820_v28 = vpop.f32.mrf.mxu2  ;;  %v4092_v9 = vmul.f32 0.97, %v8660_v39  ;;  %v3868_v39 = vsel %vm3344_vm8, 1.0, %v8765_v0 }
 0x83a   : > { %11085 = vst [vmem:[#allocation50_spill] sm:$0xff] %v8820_v28  ;;  %v4070_v27 = vsel %vm4069_vm1, %v5877_v2, %v4066_v62  ;;  %v3535_v62 = vrot.slane %v8813_v48, 2 }
 0x83b   : > { %v8810_v53 = vpop.eup %5878  ;;  %vm5620_vm4 = vcmp.lt.s32.totalorder %v3911_v56, 0  ;;  %v5621_v57 = vceil.f32 %v3911_v56  ;;  %v5622_v30 = vfloor.f32 %v3911_v56  ;;  %v4075_v1 = vsel %vm4072_vm5, %v4074_v52, %v4070_v27 }
 0x83c   : > { %11083 = vst [vmem:[#allocation18_spill] sm:$0xff] %v8810_v53  ;;  %v8817_v25 = vmul.f32 %v8810_v53, %v3800_v8  ;;  %v3772_v51 = vrot.slane %v3771_v43, 2  ;;  %v4094_v8 = vmul.f32 0.97, %v8680_v18  ;;  %v4096_v53 = vperm.slane %v4075_v1, 6  ;;  %v5999_v1 = vld [vmem:[%s10676_s5 + $0xb8] sm:$0xff] }
 0x83d   : > { %v5623_v33 = vsel %vm5620_vm4, %v5621_v57, %v5622_v30  ;;  %v3523_v18 = vadd.f32 %v3522_v35, %v3521_v32  ;;  %v3063_v35 = vpop.f32.mrf.mxu3  ;;  %v3536_v46 = vadd.f32 %v3535_v62, %v8813_v48 }
 0x83e   : > { %11084 = vst [vmem:[#allocation20_spill] sm:$0xff] %v8817_v25  ;;  %v5624_v2 = vcvt.f32.s32 %v5623_v33  ;;  %v4097_v5 = vmul.f32 %v4096_v53, %v4092_v9  ;;  %v4098_v22 = vmul.f32 %v4096_v53, %v4093_v24  ;;  %v4099_v13 = vmul.f32 %v4096_v53, %v4094_v8  ;;  %v9043_v25 = vld [vmem:[%s6201_s9] sm:$0xff] }
 0x83f   : > { %v3524_v58 = vrot.slane %v3523_v18, 1  ;;  %v3537_v21 = vrot.slane %v3536_v46, 1 }
 0x840   : > { %v5508_v56 = vadd.s32 4294967295, %v5624_v2  ;;  %vm3926_vm6 = vcmp.eq.s32.totalorder %v11066_v11, %v5624_v2  ;;  %vm3927_vm7 = vcmp.eq.s32.totalorder %v11067_v31, %v5624_v2  ;;  %vm3928_vm9 = vcmp.eq.s32.totalorder %v11068_v15, %v5624_v2 }
 0x841   : > { %3261 = vmatmul.f32.gmra.mxu2 %v11086_v50  ;;  %v3773_v50 = vadd.f32 %v3772_v51, %v3771_v43  ;;  %vm3929_vm10 = vcmp.eq.s32.totalorder %v8406_v17, %v5624_v2  ;;  %v8850_v36 = vsel %vm3926_vm6, 1.0, %v11054_v20  ;;  %v8856_v32 = vsel %vm3927_vm7, 1.0, %v11054_v20  ;;  %v8864_v52 = vpop.f32.mrf.mxu2 }
 0x842   : > { %vm3914_vm11 = vcmp.eq.s32.totalorder %v11066_v11, %v5508_v56  ;;  %vm3915_vm12 = vcmp.eq.s32.totalorder %v11067_v31, %v5508_v56  ;;  %vm3916_vm13 = vcmp.eq.s32.totalorder %v11068_v15, %v5508_v56  ;;  %vm3917_vm14 = vcmp.eq.s32.totalorder %v8406_v17, %v5508_v56  ;;  %11090 = vst [vmem:[#allocation46_spill] sm:$0xff] %v8850_v36 }
 0x843   : > { %v8841_v29 = vsel %vm3914_vm11, 1.0, %v11054_v20  ;;  %v8844_v10 = vsel %vm3915_vm12, 1.0, %v11054_v20  ;;  %v8847_v0 = vsel %vm3916_vm13, 1.0, %v11054_v20  ;;  %v8853_v4 = vsel %vm3917_vm14, 1.0, %v11054_v20  ;;  %11092 = vst [vmem:[#allocation61_spill] sm:$0xff] %v8856_v32 }
 0x844   : > { %11087 = vst [vmem:[#allocation54_spill] sm:$0xff] %v8841_v29  ;;  %v8859_v43 = vsel %vm3928_vm9, 1.0, %v11054_v20  ;;  %v8862_v57 = vsel %vm3929_vm10, 1.0, %v11054_v20  ;;  %v3938_v30 = vmul.f32 %v8841_v29, %v8756_v42  ;;  %v3939_v27 = vmul.f32 %v8844_v10, %v8759_v55 }
 0x845   : > { %11088 = vst [vmem:[#allocation24_spill] sm:$0xff] %v8844_v10  ;;  %v3940_v9 = vmul.f32 %v8847_v0, %v8762_v61  ;;  %v3941_v24 = vmul.f32 %v8853_v4, %v3868_v39  ;;  %v3951_v51 = vmul.f32 %v8850_v36, %v8756_v42  ;;  %v3952_v33 = vmul.f32 %v8856_v32, %v8759_v55 }
 0x846   : > { %11089 = vst [vmem:[#allocation28_spill] sm:$0xff] %v8847_v0  ;;  %v3953_v8 = vmul.f32 %v8859_v43, %v8762_v61  ;;  %v3954_v2 = vmul.f32 %v8862_v57, %v3868_v39  ;;  %v3942_v56 = vadd.f32 %v3939_v27, %v3938_v30  ;;  %v3774_v42 = vrot.slane %v3773_v50, 1 }
 0x847   : > { %11091 = vst [vmem:[#allocation60_spill] sm:$0xff] %v8853_v4  ;;  %v3955_v6 = vadd.f32 %v3952_v33, %v3951_v51  ;;  %v4130_v61 = vperm.slane %v8446_v49, 3  ;;  %v8890_v39 = vadd.f32 %v3524_v58, %v3523_v18  ;;  %v8895_v27 = vadd.f32 %v4097_v5, %v8431_v45 }
 0x848   : > { %11093 = vst [vmem:[#allocation62_spill] sm:$0xff] %v8859_v43  ;;  %v3943_v34 = vadd.f32 %v3942_v56, %v3940_v9  ;;  %v8898_v48 = vadd.f32 %v4098_v22, %v8433_v14  ;;  %v8906_v58 = vadd.f32 %v4099_v13, %v8441_v7  ;;  %v3066_v22 = vpop.f32.mrf.mxu3  ;;  %v8927_v51 = vadd.f32 %v3063_v35, %v8668_v44  ;;  %v1777_v35 = vpop.permute.xlu1 %1776 }
 0x849   : > { %11094 = vst [vmem:[#allocation63_spill] sm:$0xff] %v8862_v57  ;;  %3264 = vmatmul.f32.gmra.mxu2 %v5999_v1  ;;  %v4095_v1 = vmul.f32 0.97, %v8784_v59  ;;  %v3471_v59 = vadd.f32 %v3470_v54, %v3469_v19  ;;  %v8911_v5 = vpop.f32.mrf.mxu2  ;;  %v3777_v54 = vand.u32 2147483647, %v8885_v47  ;;  %vm4131_vm15 = vcmp.ge.f32.partialorder %v4130_v61, %v8895_v27 }
 0x84a   : > { %11095 = vst [vmem:[#allocation64_spill] sm:$0xff] %v8864_v52  ;;  %v3956_v52 = vadd.f32 %v3955_v6, %v3953_v8  ;;  %v8887_v55 = vadd.f32 %v3943_v34, %v3941_v24  ;;  %v6000_v34 = vld [vmem:[%s10676_s5 + $0xc8] sm:$0xff]  ;;  %v3484_v6 = vadd.f32 %v3483_v37, %v3482_v38  ;;  %vm4132_vm0 = vcmp.ge.f32.partialorder %v4130_v61, %v8898_v48  ;;  %v6001_v8 = vld [vmem:[%s10676_s5 + $0xd8] sm:$0xff] }
 0x84b   : > { %v4100_v28 = vmul.f32 %v4096_v53, %v4095_v1  ;;  %v8903_v53 = vadd.f32 %v3774_v42, %v3773_v50  ;;  %11096 = vst [vmem:[#allocation65_spill] sm:$0xff] %v8911_v5  ;;  %v3540_v19 = vand.u32 2147483647, %v8890_v39  ;;  %v8920_v38 = vadd.f32 %v3537_v21, %v3536_v46 }
 0x84c   : > { %v8892_v30 = vadd.f32 %v3956_v52, %v3954_v2  ;;  %v3472_v13 = vrot.slane %v3471_v59, 1  ;;  %vm4133_vm2 = vcmp.ge.f32.partialorder %v4130_v61, %v8906_v58  ;;  %v5518_v23 = vsel %vm4132_vm0, 1.0, %v11054_v20 }
 0x84d   : > { %v8909_v62 = vadd.f32 %v4100_v28, %v8443_v26  ;;  %v5517_v28 = vsel %vm4131_vm15, 1.0, %v11054_v20  ;;  %v3485_v18 = vrot.slane %v3484_v6, 1  ;;  %v3778_v50 = vsub.f32 0.0, %v3777_v54 }
 0x84e   : > { %v3787_v52 = vand.u32 2147483647, %v8903_v53  ;;  %v3541_v9 = vsub.f32 0.0, %v3540_v19  ;;  %v4143_v24 = vadd.f32 %v5518_v23, %v5517_v28  ;;  %v8930_v46 = vadd.f32 %v3066_v22, %v8682_v41 }
 0x84f   : > { %v4112_v37 = vsel %vm3344_vm8, 1.000001, %v8909_v62  ;;  %v5519_v33 = vsel %vm4133_vm2, 1.0, %v11054_v20  ;;  %v3550_v2 = vand.u32 2147483647, %v8920_v38  ;;  %v3473_v56 = vadd.f32 %v3472_v13, %v3471_v59 }
 0x850   : > { %vm4134_vm3 = vcmp.ge.f32.partialorder %v4130_v61, %v4112_v37  ;;  %v4144_v1 = vadd.f32 %v5519_v33, %v4143_v24  ;;  %5880 = vrcp.f32 %v8927_v51  ;;  %v3069_v44 = vpop.f32.mrf.mxu3  ;;  %v3486_v21 = vadd.f32 %v3485_v18, %v3484_v6  ;;  %v6002_v61 = vld [vmem:[%s10676_s5 + $0xe8] sm:$0xff] }
 0x851   : > { %3267 = vmatmul.f32.gmra.mxu2 %v6000_v34  ;;  %v8938_v42 = vpop.f32.mrf.mxu2  ;;  %v3779_v41 = vmul.f32 1.442695, %v3778_v50  ;;  %v3788_v34 = vsub.f32 0.0, %v3787_v52  ;;  %v5520_v22 = vsel %vm4134_vm3, 1.0, %v11054_v20  ;;  %v3542_v19 = vmul.f32 1.442695, %v3541_v9 }
 0x852   : > { %v4145_v54 = vadd.f32 %v5520_v22, %v4144_v1  ;;  %v3551_v28 = vsub.f32 0.0, %v3550_v2  ;;  %v3559_v13 = vsub.f32 %v3486_v21, %v3473_v56  ;;  %v3563_v2 = vsub.f32 %v8446_v49, %v3473_v56 }
 0x853   : > { %5882 = vpow2.f32 %v3779_v41  ;;  %v3789_v59 = vmul.f32 1.442695, %v3788_v34  ;;  %v1782_v41 = vpop.permute.xlu2 %1781  ;;  %v8956_v34 = vpop.permute.xlu1 %1791  ;;  %vm4307_vm1 = vweird.f32 %v8927_v51 }
 0x854   : > { %v4146_v23 = vrot.slane %v4145_v54, 4  ;;  %5884 = vpow2.f32 %v3542_v19  ;;  %v3552_v37 = vmul.f32 1.442695, %v3551_v28 }
 0x855   : > { %5886 = vrcp.f32 %v3559_v13 }
 0x856   : > { %v5881_v24 = vpop.eup %5880  ;;  %v4147_v33 = vadd.f32 %v4146_v23, %v4145_v54  ;;  %5888 = vpow2.f32 %v3789_v59  ;;  %v4311_v54 = vand.u32 2147483647, %v8927_v51  ;;  %v11098_v23 = vld [vmem:[#allocation19_spill] sm:$0xff] }
 0x857   : > { %v4303_v6 = vmul.f32 %v5881_v24, %v8927_v51  ;;  %vm4308_vm4 = vweird.f32 %v5881_v24  ;;  %5890 = vpow2.f32 %v3552_v37  ;;  %v8960_v59 = vadd.f32 %v11098_v23, %v1777_v35  ;;  %v6003_v37 = vld [vmem:[%s10676_s5 + $0xf8] sm:$0xff] }
 0x858   : > { %v4148_v18 = vrot.slane %v4147_v33, 2  ;;  %v3072_v52 = vpop.f32.mrf.mxu3  ;;  %vm4309_vm5 = vmor %vm4307_vm1, %vm4308_vm4  ;;  %vm4312_vm6 = vcmp.eq.f32.partialorder %v4311_v54, 8.507059e+37  ;;  %v4333_v54 = vmul.f32 0.97, %v8795_v63  ;;  %v4334_v23 = vmul.f32 0.97, %v8808_v12 }
 0x859   : > { %3270 = vmatmul.f32.gmra.mxu2 %v6001_v8  ;;  %v8943_v8 = vadd.f32 %v3069_v44, %v8743_v40  ;;  %v8949_v50 = vpop.f32.mrf.mxu2  ;;  %v4304_v40 = vsub.f32 1.0, %v4303_v6  ;;  %v8952_v9 = vadd.f32 %v3072_v52, %v8779_v60  ;;  %v4313_v44 = vand.u32 2147483648, %v8927_v51  ;;  %v5883_v21 = vpop.eup %5882 }
 0x85a   : > { %11097 = vst [vmem:[#allocation66_spill] sm:$0xff] %v8949_v50  ;;  %v4149_v1 = vadd.f32 %v4148_v18, %v4147_v33  ;;  %v5885_v19 = vpop.eup %5884  ;;  %v3781_v56 = vadd.f32 1.0, %v5883_v21  ;;  %v4332_v33 = vmul.f32 0.97, %v8787_v16 }
 0x85b   : > { %v4305_v22 = vmul.f32 %v5881_v24, %v4304_v40  ;;  %v8963_v49 = vpop.eup %5886  ;;  %v4314_v6 = vor.u32 1.1754944e-38, %v4313_v44  ;;  %v3544_v35 = vadd.f32 1.0, %v5885_v19  ;;  %v1797_v12 = vpop.permute.xlu2 %1796 }
 0x85c   : > { %v4150_v28 = vrot.slane %v4149_v1, 1  ;;  %11099 = vst [vmem:[#allocation19_spill] sm:$0xff] %v8963_v49  ;;  %v8970_v52 = vmul.f32 %v8963_v49, %v3563_v2  ;;  %5892 = vlog2.f32 %v3781_v56  ;;  %v4108_v2 = vsel %vm3344_vm8, 1.0, %v8909_v62  ;;  %v1807_v56 = vpop.permute.xlu1 %1806 }
 0x85d   : > { %v4306_v60 = vadd.f32 %v5881_v24, %v4305_v22  ;;  %5894 = vlog2.f32 %v3544_v35 }
 0x85e   : > { %v4151_v13 = vadd.f32 %v4150_v28, %v4149_v1  ;;  %11100 = vst [vmem:[#allocation67_spill] sm:$0xff] %v8970_v52  ;;  %v11102_v28 = vld [vmem:[#allocation8_spill] sm:$0xff] }
 0x85f   : > { %v4310_v18 = vsel %vm4309_vm5, %v5881_v24, %v4306_v60  ;;  %v8975_v24 = vadd.f32 %v11102_v28, %v1782_v41  ;;  %v4335_v41 = vmul.f32 0.97, %v8927_v51 }
 0x860   : > { %vm5625_vm7 = vcmp.lt.s32.totalorder %v4151_v13, 0  ;;  %v5626_v40 = vceil.f32 %v4151_v13  ;;  %v5627_v21 = vfloor.f32 %v4151_v13  ;;  %v4315_v1 = vsel %vm4312_vm6, %v4314_v6, %v4310_v18  ;;  %v3075_v16 = vpop.f32.mrf.mxu3  ;;  %v1787_v6 = vpop.permute.xlu0 %1786 }
 0x861   : > { %3273 = vmatmul.f32.gmra.mxu2 %v6002_v61  ;;  %v5889_v61 = vpop.eup %5888  ;;  %v8972_v22 = vpop.f32.mrf.mxu2  ;;  %v4336_v60 = vperm.slane %v4315_v1, 6  ;;  %v8984_v28 = vadd.f32 %v3075_v16, %v8792_v3 }
 0x862   : > { %11101 = vst [vmem:[#allocation68_spill] sm:$0xff] %v8972_v22  ;;  %v5891_v44 = vpop.eup %5890  ;;  %v3791_v19 = vadd.f32 1.0, %v5889_v61  ;;  %v5628_v13 = vsel %vm5625_vm7, %v5626_v40, %v5627_v21 }
 0x863   : > { %v5629_v18 = vcvt.f32.s32 %v5628_v13  ;;  %v4338_v49 = vmul.f32 %v4336_v60, %v4333_v54  ;;  %v4339_v22 = vmul.f32 %v4336_v60, %v4334_v23  ;;  %v3554_v63 = vadd.f32 1.0, %v5891_v44  ;;  %v5893_v35 = vpop.eup %5892 }
 0x864   : > { %v5895_v50 = vpop.eup %5894  ;;  %vm4547_vm6 = vweird.f32 %v8984_v28 }
 0x865   : > { %v5521_v61 = vadd.s32 4294967295, %v5629_v18  ;;  %vm4166_vm9 = vcmp.eq.s32.totalorder %v11066_v11, %v5629_v18  ;;  %vm4167_vm10 = vcmp.eq.s32.totalorder %v11067_v31, %v5629_v18  ;;  %vm4168_vm11 = vcmp.eq.s32.totalorder %v11068_v15, %v5629_v18 }
 0x866   : > { %vm4169_vm12 = vcmp.eq.s32.totalorder %v8406_v17, %v5629_v18  ;;  %v8991_v62 = vsel %vm4166_vm9, 1.0, %v11054_v20  ;;  %v8994_v51 = vsel %vm4167_vm10, 1.0, %v11054_v20  ;;  %v8997_v3 = vsel %vm4168_vm11, 1.0, %v11054_v20 }
 0x867   : > { %11103 = vst [vmem:[#allocation8_spill] sm:$0xff] %v8991_v62  ;;  %vm4154_vm13 = vcmp.eq.s32.totalorder %v11066_v11, %v5521_v61  ;;  %vm4155_vm14 = vcmp.eq.s32.totalorder %v11067_v31, %v5521_v61  ;;  %vm4156_vm15 = vcmp.eq.s32.totalorder %v11068_v15, %v5521_v61  ;;  %vm4157_vm0 = vcmp.eq.s32.totalorder %v8406_v17, %v5521_v61  ;;  %v11112_v15 = vld [vmem:[#allocation21_spill] sm:$0xff] }
 0x868   : > { %11104 = vst [vmem:[#allocation69_spill] sm:$0xff] %v8994_v51  ;;  %v9007_v40 = vsel %vm4154_vm13, 1.0, %v11054_v20  ;;  %v9010_v21 = vsel %vm4155_vm14, 1.0, %v11054_v20  ;;  %v9013_v1 = vsel %vm4156_vm15, 1.0, %v11054_v20  ;;  %v9016_v16 = vsel %vm4157_vm0, 1.0, %v11054_v20  ;;  %v9020_v54 = vpop.f32.mrf.mxu3 }
 0x869   : > { %3276 = vmatmul.f32.gmra.mxu2 %v6003_v37  ;;  %v4337_v37 = vmul.f32 %v4336_v60, %v4332_v33  ;;  %11105 = vst [vmem:[#allocation70_spill] sm:$0xff] %v8997_v3  ;;  %v6004_v33 = vld [vmem:[%s10676_s5 + $0x108] sm:$0xff]  ;;  %v9018_v44 = vpop.f32.mrf.mxu2  ;;  %v9025_v23 = vsel %vm4169_vm12, 1.0, %v11054_v20  ;;  %v4178_v13 = vmul.f32 %v9007_v40, %v8895_v27  ;;  %v4179_v61 = vmul.f32 %v9010_v21, %v8898_v48 }
 0x86a   : > { %11106 = vst [vmem:[#allocation71_spill] sm:$0xff] %v9007_v40  ;;  %v4191_v5 = vmul.f32 %v8991_v62, %v8895_v27  ;;  %v4192_v18 = vmul.f32 %v8994_v51, %v8898_v48  ;;  %v2422_v40 = vadd.f32 %v11112_v15, %v1787_v6  ;;  %5896 = vlog2.f32 %v3554_v63  ;;  %v1802_v27 = vpop.permute.xlu0 %1801  ;;  %v11113_v62 = vld [vmem:[#allocation10_spill] sm:$0xff]  ;;  %v11114_v51 = vld [vmem:[#allocation25_spill] sm:$0xff]  ;;  %v1812_v63 = vpop.permute.xlu1 %1811 }
 0x86b   : > { %11107 = vst [vmem:[#allocation72_spill] sm:$0xff] %v9010_v21  ;;  %v4182_v31 = vadd.f32 %v4179_v61, %v4178_v13  ;;  %v4194_v21 = vmul.f32 %v9025_v23, %v4108_v2  ;;  %5898 = vlog2.f32 %v3791_v19  ;;  %v4340_v11 = vmul.f32 %v4336_v60, %v4335_v41  ;;  %v1817_v41 = vpop.permute.xlu2 %1816  ;;  %v11117_v61 = vld [vmem:[#allocation12_spill] sm:$0xff] }
 0x86c   : > { %11108 = vst [vmem:[#allocation73_spill] sm:$0xff] %v9013_v1  ;;  %v9048_v48 = vadd.f32 %v11113_v62, %v8956_v34  ;;  %5900 = vrcp.f32 %v8984_v28  ;;  %v9058_v60 = vadd.f32 %v4337_v37, %v8431_v45  ;;  %v9061_v19 = vadd.f32 %v4338_v49, %v8433_v14  ;;  %v6006_v37 = vld [vmem:[%s10676_s5 + $0x118] sm:$0xff] }
 0x86d   : > { %11109 = vst [vmem:[#allocation74_spill] sm:$0xff] %v9016_v16  ;;  %v3990_v34 = vmul.f32 %v8841_v29, %v8960_v59  ;;  %v9070_v62 = vadd.f32 %v4339_v22, %v8441_v7  ;;  %v11116_v49 = vld [vmem:[#allocation23_spill] sm:$0xff] }
 0x86e   : > { %11110 = vst [vmem:[#allocation75_spill] sm:$0xff] %v9018_v44  ;;  %v4181_v44 = vmul.f32 %v9016_v16, %v4108_v2  ;;  %v4370_v16 = vperm.slane %v9043_v25, 4  ;;  %v11115_v2 = vld [vmem:[#allocation11_spill] sm:$0xff] }
 0x86f   : > { %11111 = vst [vmem:[#allocation76_spill] sm:$0xff] %v9020_v54  ;;  %v4193_v54 = vmul.f32 %v8997_v3, %v8906_v58  ;;  %v9055_v6 = vadd.f32 %v11115_v2, %v1802_v27 }
 0x870   : > { %vm4371_vm2 = vcmp.ge.f32.partialorder %v4370_v16, %v9058_v60  ;;  %v9086_v13 = vpop.f32.mrf.mxu3  ;;  %v5897_v22 = vpop.eup %5896  ;;  %vm4372_vm3 = vcmp.ge.f32.partialorder %v4370_v16, %v9061_v19  ;;  %vm4373_vm4 = vcmp.ge.f32.partialorder %v4370_v16, %v9070_v62 }
 0x871   : > { %3279 = vmatmul.f32.gmra.mxu2 %v6004_v33  ;;  %v4180_v33 = vmul.f32 %v9013_v1, %v8906_v58  ;;  %v4195_v1 = vadd.f32 %v4192_v18, %v4191_v5  ;;  %v9051_v58 = vadd.f32 %v11114_v51, %v1797_v12  ;;  %v9076_v51 = vadd.f32 %v11116_v49, %v1807_v56  ;;  %v11118_v18 = vld [vmem:[#allocation29_spill] sm:$0xff] }
 0x872   : > { %v9092_v27 = vadd.f32 %v11118_v18, %v1817_v41  ;;  %v3546_v56 = vmul.f32 0.6931472, %v5895_v50  ;;  %v3539_v41 = vmax.f32 %v8890_v39, 0.0  ;;  %v3549_v49 = vmax.f32 %v8920_v38, 0.0 }
 0x873   : > { %v4183_v15 = vadd.f32 %v4182_v31, %v4180_v33  ;;  %v4196_v5 = vadd.f32 %v4195_v1, %v4193_v54  ;;  %v3991_v31 = vmul.f32 %v8844_v10, %v8975_v24  ;;  %v9081_v54 = vadd.f32 %v4340_v11, %v8443_v26 }
 0x874   : > { %v9089_v33 = vadd.f32 %v11117_v61, %v1812_v63  ;;  %11119 = vst [vmem:[#allocation21_spill] sm:$0xff] %v9092_v27  ;;  %v3776_v11 = vmax.f32 %v8885_v47, 0.0  ;;  %v3783_v50 = vmul.f32 0.6931472, %v5893_v35  ;;  %v3992_v61 = vmul.f32 %v8847_v0, %v2422_v40 }
 0x875   : > { %v9067_v12 = vadd.f32 %v4183_v15, %v4181_v44  ;;  %v9078_v1 = vadd.f32 %v4196_v5, %v4194_v21  ;;  %v9084_v44 = vpop.f32.mrf.mxu2  ;;  %v5899_v21 = vpop.eup %5898  ;;  %v3786_v15 = vmax.f32 %v8903_v53, 0.0  ;;  %v4352_v2 = vsel %vm3344_vm8, 1.000001, %v9081_v54 }
 0x876   : > { %v5530_v5 = vsel %vm4371_vm2, 1.0, %v11054_v20  ;;  %v3994_v63 = vadd.f32 %v3991_v31, %v3990_v34  ;;  %v5531_v47 = vsel %vm4372_vm3, 1.0, %v11054_v20  ;;  %v3556_v53 = vmul.f32 0.6931472, %v5897_v22 }
 0x877   : > { %v3793_v18 = vmul.f32 0.6931472, %v5899_v21  ;;  %vm4374_vm1 = vcmp.ge.f32.partialorder %v4370_v16, %v4352_v2  ;;  %v4383_v10 = vadd.f32 %v5531_v47, %v5530_v5  ;;  %v3547_v29 = vadd.f32 %v3546_v56, %v3539_v41  ;;  %v6007_v16 = vld [vmem:[%s10676_s5 + $0x128] sm:$0xff]  ;;  %v3119_v41 = vpop.f32.mrf.mxu0 }
 0x878   : > { %v3993_v27 = vmul.f32 %v8853_v4, %v9048_v48  ;;  %v4003_v34 = vmul.f32 %v8850_v36, %v8960_v59  ;;  %v5532_v39 = vsel %vm4373_vm4, 1.0, %v11054_v20  ;;  %v3995_v35 = vadd.f32 %v3994_v63, %v3992_v61  ;;  %v9119_v5 = vpop.f32.mrf.mxu3  ;;  %v6008_v63 = vld [vmem:[%s10676_s5 + $0x180] sm:$0xff] }
 0x879   : > { %3282 = vmatmul.f32.gmra.mxu2 %v6006_v37  ;;  %v5901_v37 = vpop.eup %5900  ;;  %v4004_v31 = vmul.f32 %v8856_v32, %v8975_v24  ;;  %v4005_v22 = vmul.f32 %v8859_v43, %v2422_v40  ;;  %v4384_v21 = vadd.f32 %v5532_v39, %v4383_v10  ;;  %v3784_v56 = vadd.f32 %v3783_v50, %v3776_v11 }
 0x87a   : > { %v4543_v38 = vmul.f32 %v5901_v37, %v8984_v28  ;;  %v5533_v2 = vsel %vm4374_vm1, 1.0, %v11054_v20  ;;  %3190 = vmatmul.f32.gmra.mxu0 %v6008_v63  ;;  %v3557_v24 = vadd.f32 %v3556_v53, %v3549_v49  ;;  %v3794_v40 = vadd.f32 %v3793_v18, %v3786_v15 }
 0x87b   : > { %v4385_v10 = vadd.f32 %v5533_v2, %v4384_v21  ;;  %v4553_v61 = vand.u32 2147483648, %v8984_v28  ;;  %v3548_v39 = vadd.f32 0.001, %v3547_v29  ;;  %vm4548_vm5 = vweird.f32 %v5901_v37 }
 0x87c   : > { %v4544_v59 = vsub.f32 1.0, %v4543_v38  ;;  %v4551_v11 = vand.u32 2147483647, %v8984_v28  ;;  %v3565_v50 = vsub.f32 1.0, %v8970_v52  ;;  %v3945_v38 = vrot.slane %v8887_v55, 4  ;;  %vm4549_vm7 = vmor %vm4547_vm6, %vm4548_vm5 }
 0x87d   : > { %v3232_v47 = vpop.f32.mrf.mxu2  ;;  %v9128_v43 = vadd.f32 %v3995_v35, %v3993_v27  ;;  %v4007_v32 = vadd.f32 %v4004_v31, %v4003_v34  ;;  %v4386_v36 = vrot.slane %v4385_v10, 4  ;;  %v3558_v49 = vadd.f32 0.001, %v3557_v24 }
 0x87e   : > { %v9131_v15 = vadd.f32 %v3232_v47, %v3119_v41  ;;  %v3795_v53 = vadd.f32 0.001, %v3794_v40  ;;  %v4572_v18 = vmul.f32 0.97, %v8930_v46  ;;  %v4554_v21 = vor.u32 1.1754944e-38, %v4553_v61  ;;  %v6009_v41 = vld [vmem:[%s10676_s5 + $0x138] sm:$0xff] }
 0x87f   : > { %v4387_v29 = vadd.f32 %v4386_v36, %v4385_v10  ;;  %vm4552_vm9 = vcmp.eq.f32.partialorder %v4551_v11, 8.507059e+37  ;;  %v9137_v27 = vadd.f32 %v3558_v49, %v3548_v39  ;;  %v4573_v35 = vmul.f32 0.97, %v8943_v8  ;;  %v3122_v10 = vpop.f32.mrf.mxu0  ;;  %v6010_v61 = vld [vmem:[%s10676_s5 + $0x190] sm:$0xff] }
 0x880   : > { %v3785_v36 = vadd.f32 0.001, %v3784_v56  ;;  %v4574_v46 = vmul.f32 0.97, %v8952_v9  ;;  %v3087_v40 = vpop.f32.mrf.mxu3 }
 0x881   : > { %3285 = vmatmul.f32.gmra.mxu2 %v6007_v16  ;;  %v4545_v16 = vmul.f32 %v5901_v37, %v4544_v59  ;;  %v9135_v59 = vmul.f32 %v3565_v50, %v8970_v52  ;;  %11121 = vst [vmem:[#allocation25_spill] sm:$0xff] %v9137_v27  ;;  %v4388_v34 = vrot.slane %v4387_v29, 2  ;;  %v9155_v56 = vadd.f32 %v3087_v40, %v8938_v42 }
 0x882   : > { %3193 = vmatmul.f32.gmra.mxu0 %v6010_v61 }
 0x883   : > { %v4546_v63 = vadd.f32 %v5901_v37, %v4545_v16  ;;  %11120 = vst [vmem:[#allocation10_spill] sm:$0xff] %v9135_v59  ;;  %v9149_v8 = vmul.f32 %v9135_v59, %v3548_v39  ;;  %v4389_v47 = vadd.f32 %v4388_v34, %v4387_v29  ;;  %v9152_v16 = vperm.slane %v9043_v25, 5  ;;  %v11124_v34 = vld [vmem:[#allocation20_spill] sm:$0xff]  ;;  %v6014_v59 = vld [vmem:[%s10676_s5 + $0x1b0] sm:$0xff] }
 0x884   : > { %5902 = vrcp.f32 %v9155_v56 }
 0x885   : > { %v4550_v2 = vsel %vm4549_vm7, %v5901_v37, %v4546_v63  ;;  %v4575_v37 = vmul.f32 0.97, %v8984_v28  ;;  %11122 = vst [vmem:[#allocation11_spill] sm:$0xff] %v9149_v8  ;;  %v3235_v9 = vpop.f32.mrf.mxu2  ;;  %v9157_v28 = vadd.f32 %v3795_v53, %v3785_v36 }
 0x886   : > { %v4555_v31 = vsel %vm4552_vm9, %v4554_v21, %v4550_v2  ;;  %v3958_v21 = vrot.slane %v8892_v30, 4  ;;  %v4008_v2 = vadd.f32 %v4007_v32, %v4005_v22  ;;  %v4006_v32 = vmul.f32 %v8862_v57, %v9048_v48 }
 0x887   : > { %v4576_v24 = vperm.slane %v4555_v31, 6  ;;  %11123 = vst [vmem:[#allocation23_spill] sm:$0xff] %v9157_v28  ;;  %v4390_v31 = vrot.slane %v4389_v47, 1  ;;  %vm4787_vm9 = vweird.f32 %v9155_v56 }
 0x888   : > { %v9197_v40 = vadd.f32 %v3958_v21, %v8892_v30  ;;  %v9199_v61 = vadd.f32 %v4008_v2, %v4006_v32 }
 0x889   : > { %3288 = vmatmul.f32.gmra.mxu2 %v6009_v41  ;;  %v4577_v11 = vmul.f32 %v4576_v24, %v4572_v18  ;;  %v4578_v50 = vmul.f32 %v4576_v24, %v4573_v35  ;;  %v4579_v63 = vmul.f32 %v4576_v24, %v4574_v46  ;;  %v4580_v49 = vmul.f32 %v4576_v24, %v4575_v37  ;;  %v6011_v37 = vld [vmem:[%s10676_s5 + $0x148] sm:$0xff]  ;;  %v1822_v24 = vpop.permute.xlu0 %1821 }
 0x88a   : > { %v9174_v18 = vadd.f32 %v3945_v38, %v8887_v55  ;;  %v4391_v22 = vadd.f32 %v4390_v31, %v4389_v47  ;;  %v3802_v35 = vsub.f32 1.0, %v11124_v34  ;;  %v9189_v55 = vpop.permute.xlu2 %1826  ;;  %v4348_v31 = vsel %vm3344_vm8, 1.0, %v9081_v54 }
 0x88b   : > { %v9162_v39 = vadd.f32 %v4577_v11, %v8431_v45  ;;  %v9165_v29 = vadd.f32 %v4578_v50, %v8433_v14  ;;  %v9168_v42 = vadd.f32 %v4579_v63, %v8441_v7  ;;  %v9171_v53 = vadd.f32 %v4580_v49, %v8443_v26  ;;  %v3125_v50 = vpop.f32.mrf.mxu0  ;;  %v6012_v63 = vld [vmem:[%s10676_s5 + $0x1a0] sm:$0xff]  ;;  %v9206_v49 = vpop.eup %5902 }
 0x88c   : > { %vm5630_vm12 = vcmp.lt.s32.totalorder %v4391_v22, 0  ;;  %v5631_v48 = vceil.f32 %v4391_v22  ;;  %v5632_v38 = vfloor.f32 %v4391_v22  ;;  %3196 = vmatmul.f32.gmra.mxu0 %v6012_v63  ;;  %v9213_v32 = vmul.f32 %v3802_v35, %v11124_v34 }
 0x88d   : > { %v9183_v46 = vsel %vm3344_vm8, 1.000001, %v9171_v53  ;;  %vm4611_vm10 = vcmp.ge.f32.partialorder %v9152_v16, %v9162_v39  ;;  %vm4612_vm11 = vcmp.ge.f32.partialorder %v9152_v16, %v9165_v29  ;;  %vm4613_vm13 = vcmp.ge.f32.partialorder %v9152_v16, %v9168_v42  ;;  %v3238_v2 = vpop.f32.mrf.mxu2 }
 0x88e   : > { %v5543_v47 = vsel %vm4611_vm10, 1.0, %v11054_v20  ;;  %v5544_v11 = vsel %vm4612_vm11, 1.0, %v11054_v20  ;;  %v5633_v30 = vsel %vm5630_vm12, %v5631_v48, %v5632_v38  ;;  %11125 = vst [vmem:[#allocation12_spill] sm:$0xff] %v9213_v32  ;;  %vm4614_vm14 = vcmp.ge.f32.partialorder %v9152_v16, %v9183_v46  ;;  %v11128_v38 = vld [vmem:[#allocation36_spill] sm:$0xff] }
 0x88f   : > { %v4623_v21 = vadd.f32 %v5544_v11, %v5543_v47  ;;  %v5545_v63 = vsel %vm4613_vm13, 1.0, %v11054_v20  ;;  %v9221_v41 = vadd.f32 %v3235_v9, %v3122_v10  ;;  %v4783_v54 = vmul.f32 %v9206_v49, %v9155_v56  ;;  %v11129_v47 = vld [vmem:[#allocation34_spill] sm:$0xff]  ;;  %v11130_v11 = vld [vmem:[#allocation32_spill] sm:$0xff] }
 0x890   : > { %v9225_v22 = vadd.f32 %v3238_v2, %v3125_v50  ;;  %v9228_v35 = vmul.f32 %v9213_v32, %v3785_v36  ;;  %vm4788_vm7 = vweird.f32 %v9206_v49 }
 0x891   : > { %3291 = vmatmul.f32.gmra.mxu2 %v6011_v37  ;;  %v5634_v37 = vcvt.f32.s32 %v5633_v30  ;;  %v4624_v28 = vadd.f32 %v5545_v63, %v4623_v21  ;;  %v1837_v0 = vpop.permute.xlu0 %1836  ;;  %vm4789_vm10 = vmor %vm4787_vm9, %vm4788_vm7 }
 0x892   : > { %11126 = vst [vmem:[#allocation29_spill] sm:$0xff] %v9225_v22  ;;  %v1832_v4 = vpop.permute.xlu2 %1831  ;;  %v11141_v22 = vld [vmem:[#allocation26_spill] sm:$0xff] }
 0x893   : > { %11127 = vst [vmem:[#allocation77_spill] sm:$0xff] %v9228_v35  ;;  %v5534_v48 = vadd.s32 4294967295, %v5634_v37  ;;  %vm4406_vm15 = vcmp.eq.s32.totalorder %v11128_v38, %v5634_v37  ;;  %vm4407_vm0 = vcmp.eq.s32.totalorder %v11129_v47, %v5634_v37  ;;  %vm4408_vm2 = vcmp.eq.s32.totalorder %v11130_v11, %v5634_v37  ;;  %v3128_v34 = vpop.f32.mrf.mxu0 }
 0x894   : > { %vm4409_vm3 = vcmp.eq.s32.totalorder %v8406_v17, %v5634_v37  ;;  %v9235_v10 = vsel %vm4406_vm15, 1.0, %v11054_v20  ;;  %v9238_v9 = vsel %vm4407_vm0, 1.0, %v11054_v20  ;;  %v9241_v50 = vsel %vm4408_vm2, 1.0, %v11054_v20  ;;  %v6013_v37 = vld [vmem:[%s10676_s5 + $0x158] sm:$0xff]  ;;  %3199 = vmatmul.f32.gmra.mxu0 %v6014_v59 }
 0x895   : > { %11131 = vst [vmem:[#allocation78_spill] sm:$0xff] %v9235_v10  ;;  %vm4394_vm4 = vcmp.eq.s32.totalorder %v11128_v38, %v5534_v48  ;;  %vm4395_vm1 = vcmp.eq.s32.totalorder %v11129_v47, %v5534_v48  ;;  %vm4396_vm5 = vcmp.eq.s32.totalorder %v11130_v11, %v5534_v48  ;;  %vm4397_vm6 = vcmp.eq.s32.totalorder %v8406_v17, %v5534_v48  ;;  %v3241_v57 = vpop.f32.mrf.mxu2 }
 0x896   : > { %11132 = vst [vmem:[#allocation79_spill] sm:$0xff] %v9238_v9  ;;  %v9248_v36 = vsel %vm4394_vm4, 1.0, %v11054_v20  ;;  %v9251_v30 = vsel %vm4395_vm1, 1.0, %v11054_v20  ;;  %v9254_v21 = vsel %vm4396_vm5, 1.0, %v11054_v20  ;;  %v9257_v2 = vsel %vm4397_vm6, 1.0, %v11054_v20 }
 0x897   : > { %11133 = vst [vmem:[#allocation80_spill] sm:$0xff] %v9241_v50  ;;  %v9263_v63 = vsel %vm4409_vm3, 1.0, %v11054_v20  ;;  %v4418_v48 = vmul.f32 %v9248_v36, %v9058_v60  ;;  %v4419_v32 = vmul.f32 %v9251_v30, %v9061_v19  ;;  %v4420_v35 = vmul.f32 %v9254_v21, %v9070_v62 }
 0x898   : > { %11134 = vst [vmem:[#allocation81_spill] sm:$0xff] %v9248_v36  ;;  %v4431_v8 = vmul.f32 %v9235_v10, %v9058_v60  ;;  %v4432_v27 = vmul.f32 %v9238_v9, %v9061_v19  ;;  %v4433_v52 = vmul.f32 %v9241_v50, %v9070_v62  ;;  %v3947_v36 = vrot.slane %v9174_v18, 2  ;;  %v11143_v10 = vld [vmem:[#allocation14_spill] sm:$0xff]  ;;  %v11145_v9 = vld [vmem:[#allocation15_spill] sm:$0xff] }
 0x899   : > { %11135 = vst [vmem:[#allocation82_spill] sm:$0xff] %v9251_v30  ;;  %3294 = vmatmul.f32.gmra.mxu2 %v6013_v37  ;;  %v4421_v37 = vmul.f32 %v9257_v2, %v4348_v31  ;;  %v4422_v59 = vadd.f32 %v4419_v32, %v4418_v48  ;;  %v9288_v60 = vadd.f32 %v11141_v22, %v9189_v55  ;;  %v4010_v32 = vrot.slane %v9199_v61, 4 }
 0x89a   : > { %11136 = vst [vmem:[#allocation83_spill] sm:$0xff] %v9254_v21  ;;  %v11139_v21 = vld [vmem:[#allocation13_spill] sm:$0xff]  ;;  %v9291_v19 = vadd.f32 %v11143_v10, %v1832_v4  ;;  %v9294_v62 = vadd.f32 %v11145_v9, %v1837_v0  ;;  %v4435_v50 = vadd.f32 %v4432_v27, %v4431_v8  ;;  %v5546_v55 = vsel %vm4614_vm14, 1.0, %v11054_v20  ;;  %v9307_v10 = vpop.f32.mrf.mxu3 }
 0x89b   : > { %11137 = vst [vmem:[#allocation84_spill] sm:$0xff] %v9257_v2  ;;  %v9282_v30 = vadd.f32 %v11139_v21, %v1822_v24  ;;  %v4434_v2 = vmul.f32 %v9263_v63, %v4348_v31  ;;  %v11147_v24 = vrot.slane %v9128_v43, 4  ;;  %v4423_v48 = vadd.f32 %v4422_v59, %v4420_v35 }
 0x89c   : > { %11138 = vst [vmem:[#allocation85_spill] sm:$0xff] %v9263_v63  ;;  %v3960_v4 = vrot.slane %v9197_v40, 2  ;;  %v4436_v31 = vadd.f32 %v4435_v50, %v4433_v52  ;;  %v4625_v22 = vadd.f32 %v5546_v55, %v4624_v28  ;;  %v4784_v0 = vsub.f32 1.0, %v4783_v54  ;;  %v6015_v52 = vld [vmem:[%s10676_s5 + $0x168] sm:$0xff] }
 0x89d   : > { %11140 = vst [vmem:[#allocation13_spill] sm:$0xff] %v9282_v30  ;;  %v9299_v21 = vadd.f32 %v11147_v24, %v9128_v43  ;;  %v9310_v27 = vadd.f32 %v3947_v36, %v9174_v18  ;;  %v9312_v43 = vadd.f32 %v4423_v48, %v4421_v37  ;;  %v4791_v8 = vand.u32 2147483647, %v9155_v56  ;;  %v11150_v18 = vld [vmem:[#allocation71_spill] sm:$0xff]  ;;  %v11151_v50 = vld [vmem:[#allocation72_spill] sm:$0xff]  ;;  %v9330_v24 = vpop.f32.mrf.mxu0  ;;  %v9339_v28 = vpop.f32.mrf.mxu2 }
 0x89e   : > { %11142 = vst [vmem:[#allocation26_spill] sm:$0xff] %v9288_v60  ;;  %v4793_v35 = vand.u32 2147483648, %v9155_v56  ;;  %v9316_v9 = vadd.f32 %v4436_v31, %v4434_v2  ;;  %v4626_v16 = vrot.slane %v4625_v22, 4  ;;  %v4785_v46 = vmul.f32 %v9206_v49, %v4784_v0  ;;  %v11152_v2 = vld [vmem:[#allocation50_spill] sm:$0xff]  ;;  %v11153_v37 = vld [vmem:[#allocation76_spill] sm:$0xff] }
 0x89f   : > { %11144 = vst [vmem:[#allocation14_spill] sm:$0xff] %v9291_v19  ;;  %v4230_v54 = vmul.f32 %v11150_v18, %v9051_v58  ;;  %v4231_v36 = vmul.f32 %v11151_v50, %v9055_v6  ;;  %v3079_v59 = vadd.f32 %v11153_v37, %v11152_v2  ;;  %v6016_v48 = vld [vmem:[%s10676_s5 + $0x1c0] sm:$0xff]  ;;  %v9342_v50 = vadd.f32 %v3960_v4, %v9197_v40  ;;  %v11155_v37 = vld [vmem:[#allocation65_spill] sm:$0xff] }
 0x8a0   : > { %11146 = vst [vmem:[#allocation15_spill] sm:$0xff] %v9294_v62  ;;  %3202 = vmatmul.f32.gmra.mxu0 %v6016_v48  ;;  %v4627_v55 = vadd.f32 %v4626_v16, %v4625_v22  ;;  %v11154_v31 = vld [vmem:[#allocation64_spill] sm:$0xff]  ;;  %v9345_v2 = vadd.f32 %v4010_v32, %v9199_v61  ;;  %v3085_v18 = vadd.f32 %v9119_v5, %v11155_v37  ;;  %v4794_v22 = vor.u32 1.1754944e-38, %v4793_v35  ;;  %v11156_v48 = vld [vmem:[#allocation73_spill] sm:$0xff] }
 0x8a1   : > { %11148 = vst [vmem:[#allocation86_spill] sm:$0xff] %v9312_v43  ;;  %3297 = vmatmul.f32.gmra.mxu2 %v6015_v52  ;;  %v3082_v0 = vadd.f32 %v9086_v13, %v11154_v31  ;;  %v4786_v52 = vadd.f32 %v9206_v49, %v4785_v46  ;;  %vm4792_vm11 = vcmp.eq.f32.partialorder %v4791_v8, 8.507059e+37  ;;  %v9352_v46 = vadd.f32 %v3241_v57, %v3128_v34  ;;  %v11157_v61 = vld [vmem:[#allocation8_spill] sm:$0xff]  ;;  %v11158_v35 = vld [vmem:[#allocation69_spill] sm:$0xff] }
 0x8a2   : > { %11149 = vst [vmem:[#allocation87_spill] sm:$0xff] %v9316_v9  ;;  %v4628_v13 = vrot.slane %v4627_v55, 2  ;;  %v4232_v40 = vmul.f32 %v11156_v48, %v9076_v51  ;;  %v4234_v4 = vadd.f32 %v4231_v36, %v4230_v54  ;;  %v4243_v32 = vmul.f32 %v11157_v61, %v9051_v58  ;;  %v9365_v58 = vpop.f32.mrf.mxu3  ;;  %v6017_v36 = vld [vmem:[%s10676_s5 + $0x178] sm:$0xff] }
 0x8a3   : > { %v4790_v16 = vsel %vm4789_vm10, %v9206_v49, %v4786_v52  ;;  %v4812_v5 = vmul.f32 0.97, %v3079_v59  ;;  %v4813_v37 = vmul.f32 0.97, %v3082_v0  ;;  %v4244_v43 = vmul.f32 %v11158_v35, %v9055_v6  ;;  %v6018_v0 = vld [vmem:[%s10676_s5 + $0x1d0] sm:$0xff] }
 0x8a4   : > { %v4795_v31 = vsel %vm4792_vm11, %v4794_v22, %v4790_v16  ;;  %v4629_v62 = vadd.f32 %v4628_v13, %v4627_v55  ;;  %v4814_v63 = vmul.f32 0.97, %v3085_v18  ;;  %v4815_v49 = vmul.f32 0.97, %v9155_v56 }
 0x8a5   : > { %v4816_v9 = vperm.slane %v4795_v31, 6  ;;  %5904 = vrcp.f32 %v9352_v46  ;;  %v9363_v54 = vperm.slane %v9043_v25, 6  ;;  %v9372_v55 = vpop.f32.mrf.mxu0  ;;  %v4235_v52 = vadd.f32 %v4234_v4, %v4232_v40  ;;  %v9383_v31 = vpop.f32.mrf.mxu2 }
 0x8a6   : > { %v4630_v57 = vrot.slane %v4629_v62, 1  ;;  %v4588_v6 = vsel %vm3344_vm8, 1.0, %v9171_v53  ;;  %vm3365_vm11 = vweird.f32 %v9352_v46 }
 0x8a7   : > { %v4817_v34 = vmul.f32 %v4816_v9, %v4812_v5  ;;  %v4818_v8 = vmul.f32 %v4816_v9, %v4813_v37  ;;  %v4819_v56 = vmul.f32 %v4816_v9, %v4814_v63  ;;  %v4820_v59 = vmul.f32 %v4816_v9, %v4815_v49  ;;  %v11161_v63 = vld [vmem:[#allocation74_spill] sm:$0xff] }
 0x8a8   : > { %3205 = vmatmul.f32.gmra.mxu0 %v6018_v0  ;;  %v4631_v22 = vadd.f32 %v4630_v57, %v4629_v62  ;;  %v4233_v9 = vmul.f32 %v11161_v63, %v9089_v33  ;;  %v4247_v5 = vadd.f32 %v4244_v43, %v4243_v32  ;;  %v4245_v43 = vmul.f32 %v8997_v3, %v9076_v51 }
 0x8a9   : > { %3300 = vmatmul.f32.gmra.mxu2 %v6017_v36  ;;  %v9378_v13 = vadd.f32 %v4817_v34, %v8431_v45  ;;  %v9381_v16 = vadd.f32 %v4818_v8, %v8433_v14  ;;  %v9388_v37 = vadd.f32 %v4819_v56, %v8441_v7  ;;  %v9391_v49 = vadd.f32 %v4820_v59, %v8443_v26 }
 0x8aa   : > { %vm5635_vm12 = vcmp.lt.s32.totalorder %v4631_v22, 0  ;;  %v5636_v62 = vceil.f32 %v4631_v22  ;;  %v5637_v40 = vfloor.f32 %v4631_v22  ;;  %v4185_v34 = vrot.slane %v9067_v12, 4 }
 0x8ab   : > { %11159 = vst [vmem:[#allocation50_spill] sm:$0xff] %v9378_v13  ;;  %vm4851_vm13 = vcmp.ge.f32.partialorder %v9363_v54, %v9378_v13  ;;  %v9395_v4 = vpop.eup %5904  ;;  %vm4852_vm14 = vcmp.ge.f32.partialorder %v9363_v54, %v9381_v16  ;;  %v9403_v32 = vadd.f32 %v4235_v52, %v4233_v9  ;;  %v4198_v59 = vrot.slane %v9078_v1, 4  ;;  %v6019_v9 = vld [vmem:[%s10676_s5 + $0x188] sm:$0xff] }
 0x8ac   : > { %11160 = vst [vmem:[#allocation76_spill] sm:$0xff] %v9381_v16  ;;  %v5638_v8 = vsel %vm5635_vm12, %v5636_v62, %v5637_v40  ;;  %v5556_v36 = vsel %vm4851_vm13, 1.0, %v11054_v20  ;;  %v5557_v56 = vsel %vm4852_vm14, 1.0, %v11054_v20  ;;  %v4248_v0 = vadd.f32 %v4247_v5, %v4245_v43  ;;  %v6020_v62 = vld [vmem:[%s10676_s5 + $0x1e0] sm:$0xff] }
 0x8ad   : > { %11162 = vst [vmem:[#allocation64_spill] sm:$0xff] %v9388_v37  ;;  %v5639_v22 = vcvt.f32.s32 %v5638_v8  ;;  %v4863_v57 = vadd.f32 %v5557_v56, %v5556_v36  ;;  %v4832_v51 = vsel %vm3344_vm8, 1.000001, %v9391_v49  ;;  %vm4853_vm15 = vcmp.ge.f32.partialorder %v9363_v54, %v9388_v37  ;;  %v9424_v53 = vpop.f32.mrf.mxu0  ;;  %v9439_v36 = vpop.f32.mrf.mxu3 }
 0x8ae   : > { %v3361_v52 = vmul.f32 %v9395_v4, %v9352_v46  ;;  %v9441_v56 = vpop.f32.mrf.mxu2  ;;  %vm4854_vm9 = vcmp.ge.f32.partialorder %v9363_v54, %v4832_v51  ;;  %vm3366_vm10 = vweird.f32 %v9395_v4  ;;  %v11173_v54 = vrot.slane %v9342_v50, 1 }
 0x8af   : > { %v5547_v5 = vadd.s32 4294967295, %v5639_v22  ;;  %vm4646_vm0 = vcmp.eq.s32.totalorder %v11128_v38, %v5639_v22  ;;  %vm4647_vm2 = vcmp.eq.s32.totalorder %v11129_v47, %v5639_v22  ;;  %vm4648_vm3 = vcmp.eq.s32.totalorder %v11130_v11, %v5639_v22  ;;  %vm3367_vm12 = vmor %vm3365_vm11, %vm3366_vm10 }
 0x8b0   : > { %3208 = vmatmul.f32.gmra.mxu0 %v6020_v62  ;;  %vm4649_vm4 = vcmp.eq.s32.totalorder %v8406_v17, %v5639_v22  ;;  %v9431_v40 = vsel %vm4646_vm0, 1.0, %v11054_v20  ;;  %v9434_v43 = vsel %vm4647_vm2, 1.0, %v11054_v20  ;;  %v9437_v8 = vsel %vm4648_vm3, 1.0, %v11054_v20 }
 0x8b1   : > { %3303 = vmatmul.f32.gmra.mxu2 %v6019_v9  ;;  %11163 = vst [vmem:[#allocation65_spill] sm:$0xff] %v9431_v40  ;;  %vm4634_vm1 = vcmp.eq.s32.totalorder %v11128_v38, %v5547_v5  ;;  %vm4635_vm5 = vcmp.eq.s32.totalorder %v11129_v47, %v5547_v5  ;;  %vm4636_vm6 = vcmp.eq.s32.totalorder %v11130_v11, %v5547_v5  ;;  %v9460_v48 = vsel %vm4649_vm4, 1.0, %v11054_v20 }
 0x8b2   : > { %11164 = vst [vmem:[#allocation88_spill] sm:$0xff] %v9434_v43  ;;  %vm4637_vm7 = vcmp.eq.s32.totalorder %v8406_v17, %v5547_v5  ;;  %v9448_v22 = vsel %vm4634_vm1, 1.0, %v11054_v20  ;;  %v9451_v9 = vsel %vm4635_vm5, 1.0, %v11054_v20  ;;  %v9454_v62 = vsel %vm4636_vm6, 1.0, %v11054_v20 }
 0x8b3   : > { %11165 = vst [vmem:[#allocation89_spill] sm:$0xff] %v9437_v8  ;;  %v9457_v18 = vsel %vm4637_vm7, 1.0, %v11054_v20  ;;  %v4658_v63 = vmul.f32 %v9448_v22, %v9162_v39  ;;  %v4659_v5 = vmul.f32 %v9451_v9, %v9165_v29  ;;  %v4660_v3 = vmul.f32 %v9454_v62, %v9168_v42 }
 0x8b4   : > { %11166 = vst [vmem:[#allocation90_spill] sm:$0xff] %v9448_v22  ;;  %v4661_v35 = vmul.f32 %v9457_v18, %v4588_v6  ;;  %v4671_v61 = vmul.f32 %v9431_v40, %v9162_v39  ;;  %v4672_v19 = vmul.f32 %v9434_v43, %v9165_v29  ;;  %v4673_v60 = vmul.f32 %v9437_v8, %v9168_v42  ;;  %v6021_v29 = vld [vmem:[%s10676_s5 + $0x198] sm:$0xff] }
 0x8b5   : > { %11167 = vst [vmem:[#allocation91_spill] sm:$0xff] %v9451_v9  ;;  %v11171_v22 = vrot.slane %v9345_v2, 2  ;;  %v4246_v9 = vmul.f32 %v9025_v23, %v9089_v33  ;;  %v4662_v16 = vadd.f32 %v4659_v5, %v4658_v63  ;;  %v4237_v39 = vrot.slane %v9403_v32, 4 }
 0x8b6   : > { %11168 = vst [vmem:[#allocation92_spill] sm:$0xff] %v9454_v62  ;;  %v4674_v62 = vmul.f32 %v9460_v48, %v4588_v6  ;;  %v4675_v40 = vadd.f32 %v4672_v19, %v4671_v61  ;;  %v4199_v42 = vadd.f32 %v4198_v59, %v9078_v1  ;;  %v5558_v33 = vsel %vm4853_vm15, 1.0, %v11054_v20  ;;  %v6022_v19 = vld [vmem:[%s10676_s5 + $0x1f0] sm:$0xff]  ;;  %v3253_v1 = vpop.f32.mrf.mxu2 }
 0x8b7   : > { %11169 = vst [vmem:[#allocation93_spill] sm:$0xff] %v9457_v18  ;;  %v4013_v30 = vadd.f32 %v11171_v22, %v9345_v2  ;;  %v4186_v18 = vadd.f32 %v4185_v34, %v9067_v12  ;;  %v4249_v2 = vadd.f32 %v4248_v0, %v4246_v9  ;;  %v4663_v22 = vadd.f32 %v4662_v16, %v4660_v3  ;;  %v9492_v12 = vpop.f32.mrf.mxu0 }
 0x8b8   : > { %11170 = vst [vmem:[#allocation94_spill] sm:$0xff] %v9460_v48  ;;  %3211 = vmatmul.f32.gmra.mxu0 %v6022_v19  ;;  %v4676_v61 = vadd.f32 %v4675_v40, %v4673_v60  ;;  %v4864_v6 = vadd.f32 %v5558_v33, %v4863_v57  ;;  %v3362_v63 = vsub.f32 1.0, %v3361_v52  ;;  %v3369_v34 = vand.u32 2147483647, %v9352_v46  ;;  %v3099_v52 = vpop.f32.mrf.mxu3 }
 0x8b9   : > { %3306 = vmatmul.f32.gmra.mxu2 %v6021_v29  ;;  %v9498_v59 = vadd.f32 %v4663_v22, %v4661_v35  ;;  %v5559_v3 = vsel %vm4854_vm9, 1.0, %v11054_v20  ;;  %v3371_v16 = vand.u32 2147483648, %v9352_v46  ;;  %v9510_v57 = vadd.f32 %v9339_v28, %v9330_v24 }
 0x8ba   : > { %v9505_v0 = vadd.f32 %v4676_v61, %v4674_v62  ;;  %v4865_v9 = vadd.f32 %v5559_v3, %v4864_v6  ;;  %v3363_v60 = vmul.f32 %v9395_v4, %v3362_v63  ;;  %v11172_v35 = vrot.slane %v9310_v27, 1  ;;  %v6023_v63 = vld [vmem:[%s10676_s5 + $0x1a8] sm:$0xff] }
 0x8bb   : > { %v9520_v51 = vadd.f32 %v11173_v54, %v9342_v50  ;;  %v11174_v62 = vrot.slane %v9299_v21, 2  ;;  %v4187_v29 = vrot.slane %v4186_v18, 2  ;;  %v4014_v22 = vrot.slane %v4013_v30, 1  ;;  %v11184_v54 = vld [vmem:[#allocation75_spill] sm:$0xff] }
 0x8bc   : > { %v9515_v40 = vadd.f32 %v11172_v35, %v9310_v27  ;;  %v4866_v28 = vrot.slane %v4865_v9, 4  ;;  %v3364_v24 = vadd.f32 %v9395_v4, %v3363_v60  ;;  %v9530_v27 = vadd.f32 %v4237_v39, %v9403_v32 }
 0x8bd   : > { %v9525_v5 = vadd.f32 %v11174_v62, %v9299_v21  ;;  %v4250_v33 = vrot.slane %v4249_v2, 4  ;;  %v3372_v50 = vor.u32 1.1754944e-38, %v3371_v16  ;;  %v9535_v19 = vadd.f32 %v3099_v52, %v9084_v44 }
 0x8be   : > { %v4200_v21 = vrot.slane %v4199_v42, 2  ;;  %v4867_v61 = vadd.f32 %v4866_v28, %v4865_v9  ;;  %v3368_v6 = vsel %vm3367_vm12, %v9395_v4, %v3364_v24  ;;  %vm3370_vm13 = vcmp.eq.f32.partialorder %v3369_v34, 8.507059e+37  ;;  %v11175_v9 = vld [vmem:[#allocation29_spill] sm:$0xff]  ;;  %v3256_v34 = vpop.f32.mrf.mxu2 }
 0x8bf   : > { %v9541_v32 = vadd.f32 %v4187_v29, %v4186_v18  ;;  %v3396_v39 = vmul.f32 0.97, %v9131_v15  ;;  %v3373_v3 = vsel %vm3370_vm13, %v3372_v50, %v3368_v6  ;;  %5906 = vrcp.f32 %v9535_v19  ;;  %v3143_v16 = vpop.f32.mrf.mxu0 }
 0x8c0   : > { %v4868_v44 = vrot.slane %v4867_v61, 2  ;;  %v3397_v60 = vmul.f32 0.97, %v9221_v41  ;;  %v3398_v52 = vmul.f32 0.97, %v11175_v9  ;;  %v3400_v4 = vperm.slane %v3373_v3, 6 }
 0x8c1   : > { %3309 = vmatmul.f32.gmra.mxu2 %v6023_v63  ;;  %v9547_v35 = vadd.f32 %v4014_v22, %v4013_v30  ;;  %v3399_v15 = vmul.f32 0.97, %v9352_v46  ;;  %v9554_v41 = vadd.f32 %v4200_v21, %v4199_v42  ;;  %v9556_v6 = vadd.f32 %v4250_v33, %v4249_v2  ;;  %v11177_v9 = vld [vmem:[#allocation57_spill] sm:$0xff] }
 0x8c2   : > { %v4869_v62 = vadd.f32 %v4868_v44, %v4867_v61  ;;  %v3401_v29 = vmul.f32 %v3400_v4, %v3396_v39  ;;  %v3402_v28 = vmul.f32 %v3400_v4, %v3397_v60  ;;  %v3403_v24 = vmul.f32 %v3400_v4, %v3398_v52  ;;  %v11176_v44 = vld [vmem:[#allocation49_spill] sm:$0xff] }
 0x8c3   : > { %v3404_v63 = vmul.f32 %v3400_v4, %v3399_v15  ;;  %v9572_v42 = vadd.f32 %v9383_v31, %v9372_v55  ;;  %v9576_v2 = vadd.f32 %v9441_v56, %v9424_v53  ;;  %v9579_v33 = vadd.f32 %v3253_v1, %v9492_v12  ;;  %v11178_v4 = vld [vmem:[#allocation38_spill] sm:$0xff] }
 0x8c4   : > { %v4870_v30 = vrot.slane %v4869_v62, 1  ;;  %v9559_v22 = vadd.f32 %v3401_v29, %v8431_v45  ;;  %v9562_v3 = vadd.f32 %v3402_v28, %v8433_v14  ;;  %v9565_v46 = vadd.f32 %v3403_v24, %v8441_v7  ;;  %v6024_v55 = vld [vmem:[%s10676_s5 + $0x1b8] sm:$0xff]  ;;  %v11180_v24 = vld [vmem:[#allocation37_spill] sm:$0xff] }
 0x8c5   : > { %v9567_v61 = vpop.eup %5906  ;;  %v3408_v39 = vadd.f32 %v3404_v63, %v8443_v26  ;;  %v11179_v53 = vld [vmem:[#allocation66_spill] sm:$0xff]  ;;  %5908 = vrcp.f32 %v9579_v33  ;;  %vm5027_vm1 = vweird.f32 %v9535_v19  ;;  %vm3602_vm9 = vweird.f32 %v9579_v33 }
 0x8c6   : > { %v4871_v21 = vadd.f32 %v4870_v30, %v4869_v62  ;;  %v3500_v60 = vmul.f32 %v11176_v44, %v9559_v22  ;;  %v3501_v52 = vmul.f32 %v11177_v9, %v9562_v3  ;;  %v3502_v15 = vmul.f32 %v11178_v4, %v9565_v46  ;;  %v3259_v30 = vpop.f32.mrf.mxu2  ;;  %v11181_v44 = vld [vmem:[#allocation68_spill] sm:$0xff]  ;;  %v11182_v4 = vld [vmem:[#allocation43_spill] sm:$0xff] }
 0x8c7   : > { %v3091_v56 = vadd.f32 %v9307_v10, %v11179_v53  ;;  %v3412_v12 = vsel %vm3344_vm8, 1.0, %v3408_v39  ;;  %v5023_v1 = vmul.f32 %v9567_v61, %v9535_v19  ;;  %v3146_v62 = vpop.f32.mrf.mxu0  ;;  %v3094_v9 = vadd.f32 %v9365_v58, %v11181_v44 }
 0x8c8   : > { %vm5640_vm14 = vcmp.lt.s32.totalorder %v4871_v21, 0  ;;  %v5641_v29 = vceil.f32 %v4871_v21  ;;  %v5642_v28 = vfloor.f32 %v4871_v21  ;;  %v9598_v63 = vmul.f32 %v11180_v24, %v3412_v12 }
 0x8c9   : > { %3312 = vmatmul.f32.gmra.mxu2 %v6024_v55  ;;  %v3503_v55 = vmul.f32 %v11182_v4, %v3412_v12  ;;  %v3504_v10 = vadd.f32 %v3501_v52, %v3500_v60  ;;  %v5024_v53 = vsub.f32 1.0, %v5023_v1  ;;  %v9606_v39 = vsel %vm3344_vm8, 1.0, %v9391_v49  ;;  %v11190_v1 = vld [vmem:[#allocation76_spill] sm:$0xff] }
 0x8ca   : > { %11183 = vst [vmem:[#allocation29_spill] sm:$0xff] %v9606_v39  ;;  %v5643_v50 = vsel %vm5640_vm14, %v5641_v29, %v5642_v28  ;;  %v3097_v21 = vadd.f32 %v9439_v36, %v11184_v54  ;;  %v5031_v58 = vand.u32 2147483647, %v9535_v19  ;;  %v5033_v12 = vand.u32 2147483648, %v9535_v19 }
 0x8cb   : > { %v9611_v24 = vcvt.f32.s32 %v5643_v50  ;;  %v3505_v18 = vadd.f32 %v3504_v10, %v3502_v15  ;;  %v5025_v60 = vmul.f32 %v9567_v61, %v5024_v53  ;;  %vm5028_vm15 = vweird.f32 %v9567_v61  ;;  %v6025_v50 = vld [vmem:[%s10676_s5 + $0x1c8] sm:$0xff]  ;;  %v5909_v44 = vpop.eup %5908 }
 0x8cc   : > { %v9617_v52 = vadd.f32 %v3256_v34, %v3143_v16  ;;  %v9619_v49 = vadd.f32 %v3259_v30, %v3146_v62  ;;  %v5052_v10 = vmul.f32 0.97, %v3091_v56  ;;  %v5053_v53 = vmul.f32 0.97, %v3094_v9  ;;  %vm5029_vm5 = vmor %vm5027_vm1, %vm5028_vm15 }
 0x8cd   : > { %11185 = vst [vmem:[#allocation49_spill] sm:$0xff] %v9611_v24  ;;  %vm4886_vm0 = vcmp.eq.s32.totalorder %v11128_v38, %v9611_v24  ;;  %vm4887_vm2 = vcmp.eq.s32.totalorder %v11129_v47, %v9611_v24  ;;  %vm4888_vm3 = vcmp.eq.s32.totalorder %v11130_v11, %v9611_v24  ;;  %vm4889_vm4 = vcmp.eq.s32.totalorder %v8406_v17, %v9611_v24  ;;  %v11192_v47 = vld [vmem:[#allocation81_spill] sm:$0xff] }
 0x8ce   : > { %v9630_v36 = vsel %vm4886_vm0, 1.0, %v11054_v20  ;;  %v9633_v16 = vsel %vm4887_vm2, 1.0, %v11054_v20  ;;  %v9636_v34 = vsel %vm4888_vm3, 1.0, %v11054_v20  ;;  %v9639_v54 = vsel %vm4889_vm4, 1.0, %v11054_v20 }
 0x8cf   : > { %11186 = vst [vmem:[#allocation57_spill] sm:$0xff] %v9630_v36  ;;  %v4911_v15 = vmul.f32 %v9630_v36, %v9378_v13  ;;  %v4912_v62 = vmul.f32 %v9633_v16, %v11190_v1  ;;  %v4913_v29 = vmul.f32 %v9636_v34, %v9388_v37  ;;  %v4914_v28 = vmul.f32 %v9639_v54, %v9606_v39  ;;  %v3149_v30 = vpop.f32.mrf.mxu0  ;;  %v11191_v37 = vld [vmem:[#allocation21_spill] sm:$0xff]  ;;  %v11231_v36 = vld [vmem:[#allocation63_spill] sm:$0xff] }
 0x8d0   : > { %11187 = vst [vmem:[#allocation38_spill] sm:$0xff] %v9633_v16  ;;  %v9654_v13 = vadd.f32 %v3505_v18, %v3503_v55  ;;  %v5026_v1 = vadd.f32 %v9567_v61, %v5025_v60  ;;  %v3598_v11 = vmul.f32 %v5909_v44, %v9579_v33  ;;  %v9660_v38 = vmul.f32 %v11192_v47, %v11191_v37 }
 0x8d1   : > { %11188 = vst [vmem:[#allocation66_spill] sm:$0xff] %v9636_v34  ;;  %3315 = vmatmul.f32.gmra.mxu2 %v6025_v50  ;;  %v3262_v50 = vpop.f32.mrf.mxu2  ;;  %v4915_v31 = vadd.f32 %v4912_v62, %v4911_v15  ;;  %v5054_v39 = vmul.f32 0.97, %v3097_v21  ;;  %v5034_v56 = vor.u32 1.1754944e-38, %v5033_v12  ;;  %vm5032_vm6 = vcmp.eq.f32.partialorder %v5031_v58, 8.507059e+37  ;;  %v11194_v34 = vld [vmem:[#allocation22_spill] sm:$0xff] }
 0x8d2   : > { %11189 = vst [vmem:[#allocation37_spill] sm:$0xff] %v9639_v54  ;;  %v3633_v54 = vmul.f32 0.97, %v9510_v57  ;;  %v5030_v15 = vsel %vm5029_vm5, %v9567_v61, %v5026_v1  ;;  %v3599_v18 = vsub.f32 1.0, %v3598_v11  ;;  %v5055_v60 = vmul.f32 0.97, %v9535_v19 }
 0x8d3   : > { %v4916_v9 = vadd.f32 %v4915_v31, %v4913_v29  ;;  %v5035_v55 = vsel %vm5032_vm6, %v5034_v56, %v5030_v15  ;;  %v3608_v62 = vand.u32 2147483648, %v9579_v33  ;;  %v9668_v4 = vadd.f32 %v3262_v50, %v3149_v30  ;;  %v6026_v11 = vld [vmem:[%s10676_s5 + $0x1d8] sm:$0xff]  ;;  %v11195_v19 = vld [vmem:[#allocation56_spill] sm:$0xff] }
 0x8d4   : > { %v5056_v21 = vperm.slane %v5035_v55, 6  ;;  %v3600_v57 = vmul.f32 %v5909_v44, %v3599_v18  ;;  %v3487_v24 = vmul.f32 %v11194_v34, %v9559_v22  ;;  %vm3603_vm7 = vweird.f32 %v5909_v44  ;;  %v11196_v58 = vld [vmem:[#allocation55_spill] sm:$0xff] }
 0x8d5   : > { %v9670_v47 = vadd.f32 %v4916_v9, %v4914_v28  ;;  %v3606_v31 = vand.u32 2147483647, %v9579_v33  ;;  %v3488_v61 = vmul.f32 %v11195_v19, %v9562_v3  ;;  %v3489_v12 = vmul.f32 %v11196_v58, %v9565_v46  ;;  %vm3604_vm10 = vmor %vm3602_vm9, %vm3603_vm7  ;;  %v11202_v19 = vld [vmem:[#allocation82_spill] sm:$0xff] }
 0x8d6   : > { %v5057_v1 = vmul.f32 %v5056_v21, %v5052_v10  ;;  %v5058_v29 = vmul.f32 %v5056_v21, %v5053_v53  ;;  %v5059_v28 = vmul.f32 %v5056_v21, %v5054_v39  ;;  %v5090_v30 = vperm.slane %v9043_v25, 7 }
 0x8d7   : > { %11193 = vst [vmem:[#allocation68_spill] sm:$0xff] %v9670_v47  ;;  %v3152_v22 = vpop.f32.mrf.mxu0  ;;  %v5060_v34 = vmul.f32 %v5056_v21, %v5055_v60  ;;  %v3601_v50 = vadd.f32 %v5909_v44, %v3600_v57  ;;  %v3491_v9 = vadd.f32 %v3488_v61, %v3487_v24  ;;  %v3609_v39 = vor.u32 1.1754944e-38, %v3608_v62 }
 0x8d8   : > { %v9685_v15 = vadd.f32 %v5057_v1, %v8431_v45  ;;  %v9688_v3 = vadd.f32 %v5058_v29, %v8433_v14  ;;  %v9691_v46 = vadd.f32 %v5059_v28, %v8441_v7  ;;  %vm3607_vm11 = vcmp.eq.f32.partialorder %v3606_v31, 8.507059e+37  ;;  %v6027_v29 = vld [vmem:[%s10676_s5 + $0x1e8] sm:$0xff] }
 0x8d9   : > { %3318 = vmatmul.f32.gmra.mxu2 %v6026_v11  ;;  %v3265_v56 = vpop.f32.mrf.mxu2  ;;  %v9695_v10 = vadd.f32 %v5060_v34, %v8443_v26  ;;  %v3605_v53 = vsel %vm3604_vm10, %v5909_v44, %v3601_v50  ;;  %v3634_v44 = vmul.f32 0.97, %v9572_v42  ;;  %v3635_v57 = vmul.f32 0.97, %v9576_v2  ;;  %v11201_v11 = vld [vmem:[#allocation13_spill] sm:$0xff] }
 0x8da   : > { %11197 = vst [vmem:[#allocation43_spill] sm:$0xff] %v9685_v15  ;;  %v9697_v18 = vadd.f32 %v3265_v56, %v3152_v22  ;;  %vm5091_vm12 = vcmp.ge.f32.partialorder %v5090_v30, %v9685_v15  ;;  %vm5092_vm13 = vcmp.ge.f32.partialorder %v5090_v30, %v9688_v3  ;;  %vm5093_vm14 = vcmp.ge.f32.partialorder %v5090_v30, %v9691_v46  ;;  %v11215_v15 = vld [vmem:[#allocation84_spill] sm:$0xff] }
 0x8db   : > { %11198 = vst [vmem:[#allocation75_spill] sm:$0xff] %v9688_v3  ;;  %v3610_v24 = vsel %vm3607_vm11, %v3609_v39, %v3605_v53  ;;  %v5072_v55 = vsel %vm3344_vm8, 1.000001, %v9695_v10  ;;  %v5569_v60 = vsel %vm5091_vm12, 1.0, %v11054_v20  ;;  %v5570_v62 = vsel %vm5092_vm13, 1.0, %v11054_v20 }
 0x8dc   : > { %11199 = vst [vmem:[#allocation21_spill] sm:$0xff] %v9691_v46  ;;  %vm5094_vm15 = vcmp.ge.f32.partialorder %v5090_v30, %v5072_v55  ;;  %v5103_v21 = vadd.f32 %v5570_v62, %v5569_v60  ;;  %v3637_v31 = vperm.slane %v3610_v24, 6  ;;  %v4471_v61 = vmul.f32 %v11202_v19, %v11201_v11 }
 0x8dd   : > { %11200 = vst [vmem:[#allocation22_spill] sm:$0xff] %v9695_v10  ;;  %v5571_v58 = vsel %vm5093_vm14, 1.0, %v11054_v20  ;;  %v3636_v1 = vmul.f32 0.97, %v9579_v33  ;;  %5910 = vrcp.f32 %v9697_v18  ;;  %v11203_v50 = vrot.slane %v9556_v6, 2  ;;  %v11216_v10 = vld [vmem:[#allocation78_spill] sm:$0xff] }
 0x8de   : > { %v5104_v42 = vadd.f32 %v5571_v58, %v5103_v21  ;;  %v3638_v28 = vmul.f32 %v3637_v31, %v3633_v54  ;;  %v3639_v22 = vmul.f32 %v3637_v31, %v3634_v44  ;;  %v3640_v34 = vmul.f32 %v3637_v31, %v3635_v57  ;;  %v11204_v21 = vld [vmem:[#allocation26_spill] sm:$0xff]  ;;  %v11205_v57 = vld [vmem:[#allocation83_spill] sm:$0xff] }
 0x8df   : > { %v3155_v2 = vpop.f32.mrf.mxu0  ;;  %v9720_v56 = vadd.f32 %v11203_v50, %v9556_v6  ;;  %v5572_v33 = vsel %vm5094_vm15, 1.0, %v11054_v20  ;;  %v3641_v39 = vmul.f32 %v3637_v31, %v3636_v1  ;;  %v4001_v24 = vrot.slane %v9525_v5, 1  ;;  %v11206_v31 = vld [vmem:[#allocation41_spill] sm:$0xff] }
 0x8e0   : > { %v9725_v60 = vadd.f32 %v5572_v33, %v5104_v42  ;;  %v3642_v62 = vadd.f32 %v3638_v28, %v8431_v45  ;;  %v3643_v54 = vadd.f32 %v3639_v22, %v8433_v14  ;;  %v3644_v44 = vadd.f32 %v3640_v34, %v8441_v7  ;;  %v11207_v42 = vld [vmem:[#allocation6_spill] sm:$0xff]  ;;  %v11208_v33 = vld [vmem:[#allocation7_spill] sm:$0xff]  ;;  %v11209_v34 = vld [vmem:[#allocation53_spill] sm:$0xff] }
 0x8e1   : > { %3321 = vmatmul.f32.gmra.mxu2 %v6027_v29  ;;  %v3268_v53 = vpop.f32.mrf.mxu2  ;;  %v4472_v58 = vmul.f32 %v11205_v57, %v11204_v21  ;;  %v3645_v6 = vadd.f32 %v3641_v39, %v8443_v26  ;;  %v3492_v30 = vadd.f32 %v3491_v9, %v3489_v12  ;;  %v4474_v55 = vadd.f32 %v4471_v61, %v9660_v38  ;;  %v11210_v57 = vld [vmem:[#allocation52_spill] sm:$0xff]  ;;  %v11211_v39 = vld [vmem:[#allocation42_spill] sm:$0xff] }
 0x8e2   : > { %v9733_v29 = vadd.f32 %v3268_v53, %v3155_v2  ;;  %v3724_v1 = vmul.f32 %v11206_v31, %v3642_v62  ;;  %v3725_v50 = vmul.f32 %v11207_v42, %v3643_v54  ;;  %v3726_v28 = vmul.f32 %v11208_v33, %v3644_v44  ;;  %v11212_v9 = vld [vmem:[#allocation58_spill] sm:$0xff]  ;;  %v11213_v53 = vld [vmem:[#allocation59_spill] sm:$0xff] }
 0x8e3   : > { %v5911_v19 = vpop.eup %5910  ;;  %v3649_v22 = vsel %vm3344_vm8, 1.0, %v3645_v6  ;;  %v3737_v46 = vmul.f32 %v11209_v34, %v3642_v62  ;;  %v3738_v3 = vmul.f32 %v11210_v57, %v3643_v54  ;;  %v3739_v2 = vmul.f32 %v11211_v39, %v3644_v44  ;;  %v11214_v42 = vld [vmem:[#allocation14_spill] sm:$0xff]  ;;  %v11217_v57 = vld [vmem:[#allocation79_spill] sm:$0xff] }
 0x8e4   : > { %v3507_v12 = vrot.slane %v9654_v13, 4  ;;  %v3727_v38 = vmul.f32 %v11212_v9, %v3649_v22  ;;  %v3728_v61 = vadd.f32 %v3725_v50, %v3724_v1  ;;  %v3740_v31 = vmul.f32 %v11213_v53, %v3649_v22  ;;  %v6028_v54 = vld [vmem:[%s10676_s5 + $0x1f8] sm:$0xff] }
 0x8e5   : > { %v4473_v33 = vmul.f32 %v11215_v15, %v11214_v42  ;;  %v4483_v20 = vmul.f32 %v11216_v10, %v11191_v37  ;;  %v3741_v6 = vadd.f32 %v3738_v3, %v3737_v46  ;;  %v3838_v62 = vmul.f32 %v5911_v19, %v9697_v18 }
 0x8e6   : > { %v4475_v44 = vadd.f32 %v4474_v55, %v4472_v58  ;;  %v4484_v1 = vmul.f32 %v11217_v57, %v11201_v11  ;;  %v3729_v50 = vadd.f32 %v3728_v61, %v3726_v28  ;;  %v3493_v34 = vadd.f32 %v3492_v30, %v9598_v63  ;;  %v11218_v30 = vld [vmem:[#allocation80_spill] sm:$0xff]  ;;  %v11219_v61 = vld [vmem:[#allocation85_spill] sm:$0xff] }
 0x8e7   : > { %v3158_v22 = vpop.f32.mrf.mxu0  ;;  %v3742_v39 = vadd.f32 %v3741_v6, %v3739_v2  ;;  %v3839_v9 = vsub.f32 1.0, %v3838_v62  ;;  %v3848_v37 = vand.u32 2147483648, %v9697_v18  ;;  %v9760_v46 = vadd.f32 %v4001_v24, %v9525_v5 }
 0x8e8   : > { %v9762_v53 = vadd.f32 %v3729_v50, %v3727_v38  ;;  %v3494_v58 = vrot.slane %v3493_v34, 4  ;;  %v3508_v55 = vadd.f32 %v3507_v12, %v9654_v13  ;;  %vm3843_vm0 = vweird.f32 %v5911_v19 }
 0x8e9   : > { %3324 = vmatmul.f32.gmra.mxu2 %v6028_v54  ;;  %v3271_v3 = vpop.f32.mrf.mxu2  ;;  %v9767_v11 = vadd.f32 %v3742_v39, %v3740_v31  ;;  %v3840_v28 = vmul.f32 %v5911_v19, %v3839_v9  ;;  %v3846_v63 = vand.u32 2147483647, %v9697_v18  ;;  %v4485_v2 = vmul.f32 %v11218_v30, %v11204_v21 }
 0x8ea   : > { %v9764_v47 = vadd.f32 %v3271_v3, %v3158_v22  ;;  %v4486_v5 = vmul.f32 %v11219_v61, %v11214_v42  ;;  %v3495_v24 = vadd.f32 %v3494_v58, %v3493_v34  ;;  %v4017_v38 = vand.u32 2147483647, %v9760_v46  ;;  %v11220_v22 = vld [vmem:[#allocation86_spill] sm:$0xff] }
 0x8eb   : > { %v4487_v6 = vadd.f32 %v4484_v1, %v4483_v20  ;;  %v3841_v62 = vadd.f32 %v5911_v19, %v3840_v28  ;;  %vm3842_vm2 = vweird.f32 %v9697_v18  ;;  %v3849_v13 = vor.u32 1.1754944e-38, %v3848_v37 }
 0x8ec   : > { %vm3844_vm3 = vmor %vm3842_vm2, %vm3843_vm0  ;;  %v3496_v12 = vrot.slane %v3495_v24, 2  ;;  %v3509_v31 = vrot.slane %v3508_v55, 2  ;;  %v4018_v54 = vsub.f32 0.0, %v4017_v38  ;;  %v4036_v50 = vsub.f32 %v9520_v51, %v9515_v40 }
 0x8ed   : > { %v4425_v21 = vrot.slane %v11220_v22, 4  ;;  %v9779_v39 = vadd.f32 %v4475_v44, %v4473_v33  ;;  %v3845_v42 = vsel %vm3844_vm3, %v5911_v19, %v3841_v62  ;;  %vm3847_vm4 = vcmp.eq.f32.partialorder %v3846_v63, 8.507059e+37 }
 0x8ee   : > { %v3873_v34 = vmul.f32 0.97, %v9617_v52  ;;  %v3874_v20 = vmul.f32 0.97, %v9619_v49  ;;  %v3875_v1 = vmul.f32 0.97, %v9668_v4  ;;  %v3850_v9 = vsel %vm3847_vm4, %v3849_v13, %v3845_v42  ;;  %v1847_v49 = vpop.permute.xlu0 %1846 }
 0x8ef   : > { %v3161_v37 = vpop.f32.mrf.mxu0  ;;  %v4488_v3 = vadd.f32 %v4487_v6, %v4485_v2  ;;  %v3876_v58 = vmul.f32 0.97, %v9697_v18  ;;  %v3877_v28 = vperm.slane %v3850_v9, 6  ;;  %v4019_v51 = vmul.f32 1.442695, %v4018_v54  ;;  %v11221_v13 = vld [vmem:[#allocation87_spill] sm:$0xff] }
 0x8f0   : > { %v3497_v33 = vadd.f32 %v3496_v12, %v3495_v24  ;;  %v3510_v44 = vadd.f32 %v3509_v31, %v3508_v55  ;;  %5912 = vrcp.f32 %v4036_v50  ;;  %v4426_v4 = vadd.f32 %v4425_v21, %v11220_v22  ;;  %v11223_v21 = vld [vmem:[#allocation54_spill] sm:$0xff] }
 0x8f1   : > { %v3274_v38 = vpop.f32.mrf.mxu2  ;;  %v3878_v19 = vmul.f32 %v3877_v28, %v3873_v34  ;;  %v3879_v63 = vmul.f32 %v3877_v28, %v3874_v20  ;;  %v3880_v52 = vmul.f32 %v3877_v28, %v3875_v1  ;;  %v3881_v62 = vmul.f32 %v3877_v28, %v3876_v58  ;;  %v11224_v1 = vld [vmem:[#allocation24_spill] sm:$0xff] }
 0x8f2   : > { %v9785_v16 = vadd.f32 %v3274_v38, %v3161_v37  ;;  %v4438_v42 = vrot.slane %v11221_v13, 4  ;;  %5914 = vpow2.f32 %v4019_v51  ;;  %v11222_v18 = vrot.slane %v9530_v27, 2  ;;  %v11227_v28 = vld [vmem:[#allocation60_spill] sm:$0xff]  ;;  %v11228_v51 = vld [vmem:[#allocation46_spill] sm:$0xff] }
 0x8f3   : > { %v3882_v6 = vadd.f32 %v3878_v19, %v8431_v45  ;;  %v3883_v24 = vadd.f32 %v3879_v63, %v8433_v14  ;;  %v3884_v55 = vadd.f32 %v3880_v52, %v8441_v7  ;;  %v3885_v12 = vadd.f32 %v3881_v62, %v8443_v26  ;;  %v11229_v63 = vld [vmem:[#allocation61_spill] sm:$0xff] }
 0x8f4   : > { %v4240_v2 = vadd.f32 %v11222_v18, %v9530_v27  ;;  %v4489_v31 = vadd.f32 %v4488_v3, %v4486_v5  ;;  %v3498_v54 = vrot.slane %v3497_v33, 1  ;;  %v3511_v50 = vrot.slane %v3510_v44, 1  ;;  %v11225_v27 = vld [vmem:[#allocation28_spill] sm:$0xff]  ;;  %v11230_v3 = vld [vmem:[#allocation62_spill] sm:$0xff] }
 0x8f5   : > { %v3889_v22 = vsel %vm3344_vm8, 1.0, %v3885_v12  ;;  %v3964_v20 = vmul.f32 %v11223_v21, %v3882_v6  ;;  %v3965_v9 = vmul.f32 %v11224_v1, %v3883_v24  ;;  %v3966_v37 = vmul.f32 %v11225_v27, %v3884_v55 }
 0x8f6   : > { %v4241_v34 = vrot.slane %v4240_v2, 1  ;;  %v9801_v58 = vpop.eup %5912  ;;  %v3967_v38 = vmul.f32 %v11227_v28, %v3889_v22  ;;  %v3977_v19 = vmul.f32 %v11228_v51, %v3882_v6  ;;  %v3978_v5 = vmul.f32 %v11229_v63, %v3883_v24 }
 0x8f7   : > { %11226 = vst [vmem:[#allocation56_spill] sm:$0xff] %v9801_v58  ;;  %v3979_v52 = vmul.f32 %v11230_v3, %v3884_v55  ;;  %v3164_v62 = vpop.f32.mrf.mxu0  ;;  %v4439_v18 = vadd.f32 %v4438_v42, %v11221_v13  ;;  %v3968_v12 = vadd.f32 %v3965_v9, %v3964_v20  ;;  %v3980_v21 = vmul.f32 %v11231_v36, %v3889_v22  ;;  %v1842_v20 = vpop.permute.xlu1 %1841  ;;  %v11239_v3 = vld [vmem:[#allocation17_spill] sm:$0xff] }
 0x8f8   : > { %v11232_v1 = vsub.f32 %v9043_v25, %v9515_v40  ;;  %v5915_v28 = vpop.eup %5914  ;;  %v4490_v15 = vrot.slane %v4489_v31, 4  ;;  %v3981_v6 = vadd.f32 %v3978_v5, %v3977_v19  ;;  %v3512_v24 = vadd.f32 %v3511_v50, %v3510_v44 }
 0x8f9   : > { %v3277_v61 = vpop.f32.mrf.mxu2  ;;  %v3969_v55 = vadd.f32 %v3968_v12, %v3966_v37  ;;  %v9817_v63 = vadd.f32 %v3498_v54, %v3497_v33  ;;  %v4021_v13 = vadd.f32 1.0, %v5915_v28  ;;  %v9819_v42 = vadd.f32 %v4241_v34, %v4240_v2  ;;  %v1852_v33 = vpop.permute.xlu0 %1851  ;;  %v11235_v54 = vld [vmem:[#allocation30_spill] sm:$0xff] }
 0x8fa   : > { %v9813_v27 = vmul.f32 %v9801_v58, %v11232_v1  ;;  %v9815_v51 = vadd.f32 %v3277_v61, %v3164_v62  ;;  %v4477_v36 = vrot.slane %v9779_v39, 4  ;;  %v3982_v22 = vadd.f32 %v3981_v6, %v3979_v52  ;;  %v11240_v6 = vld [vmem:[#allocation19_spill] sm:$0xff] }
 0x8fb   : > { %v11233_v25 = vrot.slane %v9541_v32, 1  ;;  %v4427_v61 = vrot.slane %v4426_v4, 2  ;;  %v4440_v9 = vrot.slane %v4439_v18, 2  ;;  %v9828_v44 = vadd.f32 %v3969_v55, %v3967_v38 }
 0x8fc   : > { %5916 = vrcp.f32 %v9815_v51  ;;  %v9831_v2 = vadd.f32 %v11235_v54, %v1842_v20  ;;  %v9833_v50 = vadd.f32 %v4490_v15, %v4489_v31  ;;  %v9835_v34 = vadd.f32 %v3982_v22, %v3980_v21  ;;  %v11242_v20 = vld [vmem:[#allocation90_spill] sm:$0xff] }
 0x8fd   : > { %v9826_v40 = vadd.f32 %v11233_v25, %v9541_v32  ;;  %11234 = vst [vmem:[#allocation55_spill] sm:$0xff] %v9828_v44  ;;  %5918 = vlog2.f32 %v4021_v13  ;;  %v11237_v37 = vrot.slane %v9554_v41, 1  ;;  %v11238_v32 = vld [vmem:[#allocation16_spill] sm:$0xff]  ;;  %v9844_v52 = vadd.f32 %v11239_v3, %v1852_v33  ;;  %v11241_v25 = vld [vmem:[#allocation15_spill] sm:$0xff]  ;;  %v11247_v44 = vld [vmem:[#allocation10_spill] sm:$0xff] }
 0x8fe   : > { %11236 = vst [vmem:[#allocation13_spill] sm:$0xff] %v9835_v34  ;;  %v9841_v5 = vadd.f32 %v11238_v32, %v1847_v49  ;;  %v3560_v38 = vsub.f32 %v3512_v24, %v9817_v63  ;;  %v4257_v62 = vand.u32 2147483647, %v9819_v42  ;;  %v4478_v31 = vadd.f32 %v4477_v36, %v9779_v39  ;;  %v11243_v36 = vld [vmem:[#allocation91_spill] sm:$0xff] }
 0x8ff   : > { %v4203_v19 = vadd.f32 %v11237_v37, %v9554_v41  ;;  %v3167_v21 = vpop.f32.mrf.mxu0  ;;  %v9852_v41 = vadd.f32 %v4427_v61, %v4426_v4  ;;  %v9854_v49 = vadd.f32 %v4440_v9, %v4439_v18  ;;  %v4710_v33 = vmul.f32 %v11242_v20, %v11241_v25  ;;  %v11244_v61 = vld [vmem:[#allocation67_spill] sm:$0xff] }
 0x900   : > { %v3562_v55 = vmul.f32 %v11240_v6, %v3560_v38  ;;  %v4258_v13 = vsub.f32 0.0, %v4257_v62  ;;  %v4711_v4 = vmul.f32 %v11243_v36, %v9831_v2  ;;  %v4016_v32 = vmax.f32 %v9760_v46, 0.0  ;;  %v9873_v36 = vld [vmem:[%s6201_s9] sm:$0xff] }
 0x901   : > { %v4276_v1 = vsub.f32 %v4203_v19, %v9826_v40  ;;  %v3280_v28 = vpop.f32.mrf.mxu2  ;;  %v4086_v19 = vand.u32 2147483647, %v9815_v51  ;;  %v4042_v62 = vsub.f32 1.0, %v9813_v27  ;;  %v4088_v15 = vand.u32 2147483648, %v9815_v51  ;;  %v11246_v46 = vld [vmem:[#allocation11_spill] sm:$0xff] }
 0x902   : > { %v5917_v24 = vpop.eup %5916  ;;  %v9860_v54 = vadd.f32 %v3280_v28, %v3167_v21  ;;  %v3567_v9 = vmul.f32 %v11244_v61, %v3562_v55  ;;  %v3573_v37 = vmul.f32 2.0, %v3562_v55  ;;  %v11245_v28 = vld [vmem:[#allocation25_spill] sm:$0xff]  ;;  %v4259_v22 = vmul.f32 1.442695, %v4258_v13 }
 0x903   : > { %5920 = vrcp.f32 %v4276_v1  ;;  %v5919_v39 = vpop.eup %5918  ;;  %v4078_v18 = vmul.f32 %v5917_v24, %v9815_v51  ;;  %vm4083_vm1 = vweird.f32 %v5917_v24  ;;  %v4280_v20 = vsub.f32 %v9873_v36, %v9826_v40 }
 0x904   : > { %v4023_v3 = vmul.f32 0.6931472, %v5919_v39  ;;  %v3568_v1 = vmul.f32 %v3567_v9, %v11244_v61  ;;  %v3574_v6 = vsub.f32 %v11245_v28, %v3573_v37  ;;  %5922 = vpow2.f32 %v4259_v22  ;;  %v11249_v61 = vld [vmem:[#allocation92_spill] sm:$0xff] }
 0x905   : > { %v4079_v21 = vsub.f32 1.0, %v4078_v18  ;;  %v9883_v13 = vmul.f32 %v11249_v61, %v9841_v5  ;;  %vm4082_vm5 = vweird.f32 %v9815_v51  ;;  %v4089_v22 = vor.u32 1.1754944e-38, %v4088_v15  ;;  %v11253_v15 = vld [vmem:[#allocation65_spill] sm:$0xff] }
 0x906   : > { %v4024_v12 = vadd.f32 %v4023_v3, %v4016_v32  ;;  %v3570_v39 = vadd.f32 %v11246_v46, %v3568_v1  ;;  %v3575_v34 = vmul.f32 %v3574_v6, %v11247_v44  ;;  %v9889_v32 = vmul.f32 %v4042_v62, %v9813_v27  ;;  %vm4084_vm6 = vmor %vm4082_vm5, %vm4083_vm1 }
 0x907   : > { %v4080_v58 = vmul.f32 %v5917_v24, %v4079_v21  ;;  %v3170_v9 = vpop.f32.mrf.mxu0  ;;  %v4113_v62 = vmul.f32 0.97, %v9733_v29  ;;  %vm4087_vm7 = vcmp.eq.f32.partialorder %v4086_v19, 8.507059e+37  ;;  %v4724_v29 = vmul.f32 %v9434_v43, %v9831_v2 }
 0x908   : > { %v9886_v37 = vadd.f32 0.001, %v4024_v12  ;;  %11250 = vst [vmem:[#allocation41_spill] sm:$0xff] %v9889_v32  ;;  %v3571_v21 = vmul.f32 %v3570_v39, %v3560_v38  ;;  %v3576_v1 = vadd.f32 %v3575_v34, %v3562_v55  ;;  %v4479_v12 = vrot.slane %v4478_v31, 2 }
 0x909   : > { %v9879_v18 = vpop.eup %5920  ;;  %v4081_v40 = vadd.f32 %v5917_v24, %v4080_v58  ;;  %v3283_v3 = vpop.f32.mrf.mxu2  ;;  %v3744_v58 = vrot.slane %v9767_v11, 4  ;;  %v4114_v34 = vmul.f32 0.97, %v9764_v47  ;;  %v4723_v39 = vmul.f32 %v11253_v15, %v11241_v25 }
 0x90a   : > { %11248 = vst [vmem:[#allocation26_spill] sm:$0xff] %v9879_v18  ;;  %v9892_v44 = vmul.f32 %v9879_v18, %v4280_v20  ;;  %v9895_v28 = vadd.f32 %v3283_v3, %v3170_v9  ;;  %v9899_v6 = vmul.f32 %v9889_v32, %v9886_v37  ;;  %5924 = vrcp.f32 %v3576_v1  ;;  %v5923_v20 = vpop.eup %5922 }
 0x90b   : > { %v4085_v46 = vsel %vm4084_vm6, %v5917_v24, %v4081_v40  ;;  %v4480_v55 = vadd.f32 %v4479_v12, %v4478_v31  ;;  %v4115_v9 = vmul.f32 0.97, %v9785_v16  ;;  %v4116_v3 = vmul.f32 0.97, %v9815_v51 }
 0x90c   : > { %11251 = vst [vmem:[#allocation6_spill] sm:$0xff] %v9892_v44  ;;  %v4090_v38 = vsel %vm4087_vm7, %v4089_v22, %v4085_v46  ;;  %v4714_v18 = vadd.f32 %v4711_v4, %v4710_v33  ;;  %v4261_v24 = vadd.f32 1.0, %v5923_v20  ;;  %v3745_v31 = vadd.f32 %v3744_v58, %v9767_v11 }
 0x90d   : > { %11252 = vst [vmem:[#allocation7_spill] sm:$0xff] %v9899_v6  ;;  %v4117_v61 = vperm.slane %v4090_v38, 6  ;;  %v4481_v19 = vrot.slane %v4480_v55, 1  ;;  %v4429_v25 = vrot.slane %v9852_v41, 1  ;;  %v4442_v58 = vrot.slane %v9854_v49, 1 }
 0x90e   : > { %5926 = vlog2.f32 %v4261_v24  ;;  %v11256_v24 = vld [vmem:[#allocation70_spill] sm:$0xff]  ;;  %v4727_v43 = vadd.f32 %v4724_v29, %v4723_v39  ;;  %v11260_v29 = vand.u32 2147483647, %v9547_v35  ;;  %vm3580_vm13 = vcmp.eq.f32.partialorder %v9873_v36, 1.0 }
 0x90f   : > { %v4118_v40 = vmul.f32 %v4117_v61, %v4113_v62  ;;  %v4119_v1 = vmul.f32 %v4117_v61, %v4114_v34  ;;  %v4120_v47 = vmul.f32 %v4117_v61, %v4115_v9  ;;  %v4121_v22 = vmul.f32 %v4117_v61, %v4116_v3  ;;  %v3173_v12 = vpop.f32.mrf.mxu0  ;;  %v11255_v9 = vld [vmem:[#allocation69_spill] sm:$0xff] }
 0x910   : > { %v9912_v16 = vadd.f32 %v4481_v19, %v4480_v55  ;;  %v5925_v51 = vpop.eup %5924  ;;  %v11254_v55 = vld [vmem:[#allocation8_spill] sm:$0xff] }
 0x911   : > { %v9915_v33 = vadd.f32 %v4118_v40, %v8431_v45  ;;  %v9918_v2 = vadd.f32 %v4119_v1, %v8433_v14  ;;  %v9921_v4 = vadd.f32 %v4120_v47, %v8441_v7  ;;  %v4125_v61 = vadd.f32 %v4121_v22, %v8443_v26  ;;  %v3286_v62 = vpop.f32.mrf.mxu2  ;;  %v11257_v40 = vld [vmem:[#allocation74_spill] sm:$0xff] }
 0x912   : > { %v9924_v11 = vadd.f32 %v3286_v62, %v3173_v12  ;;  %v3578_v46 = vmul.f32 %v5925_v51, %v3571_v21  ;;  %v4497_v34 = vand.u32 2147483647, %v9912_v16  ;;  %v9944_v22 = vadd.f32 %v4429_v25, %v9852_v41  ;;  %v11258_v12 = vld [vmem:[#allocation93_spill] sm:$0xff] }
 0x913   : > { %v4129_v38 = vsel %vm3344_vm8, 1.0, %v4125_v61  ;;  %v4217_v20 = vmul.f32 %v11254_v55, %v9915_v33  ;;  %v4218_v3 = vmul.f32 %v11255_v9, %v9918_v2  ;;  %v4219_v19 = vmul.f32 %v11256_v24, %v9921_v4 }
 0x914   : > { %v9937_v1 = vmul.f32 %v11257_v40, %v4129_v38  ;;  %v4220_v21 = vmul.f32 %v9025_v23, %v4129_v38  ;;  %v9941_v47 = vadd.f32 %v3578_v46, %v9817_v63  ;;  %v4713_v51 = vmul.f32 %v11258_v12, %v9844_v52  ;;  %v5927_v9 = vpop.eup %5926 }
 0x915   : > { %v4725_v61 = vmul.f32 %v9437_v8, %v9841_v5  ;;  %v4221_v62 = vadd.f32 %v4218_v3, %v4217_v20  ;;  %v3731_v55 = vrot.slane %v9762_v53, 4  ;;  %v4256_v24 = vmax.f32 %v9819_v42, 0.0 }
 0x916   : > { %v4282_v23 = vsub.f32 1.0, %v9892_v44  ;;  %v4443_v63 = vadd.f32 %v4442_v58, %v9854_v49  ;;  %v4498_v46 = vsub.f32 0.0, %v4497_v34  ;;  %v3746_v25 = vrot.slane %v3745_v31, 2 }
 0x917   : > { %v4222_v38 = vadd.f32 %v4221_v62, %v4219_v19  ;;  %v3732_v41 = vadd.f32 %v3731_v55, %v9762_v53  ;;  %v4263_v40 = vmul.f32 0.6931472, %v5927_v9  ;;  %v4715_v12 = vadd.f32 %v4714_v18, %v9883_v13  ;;  %v3176_v5 = vpop.f32.mrf.mxu0 }
 0x918   : > { %v4499_v20 = vmul.f32 1.442695, %v4498_v46  ;;  %v4516_v3 = vsub.f32 %v4443_v63, %v9944_v22  ;;  %v3747_v32 = vadd.f32 %v3746_v25, %v3745_v31  ;;  %v4665_v49 = vrot.slane %v9498_v59, 4  ;;  %v1862_v63 = vpop.permute.xlu2 %1861  ;;  %v11264_v46 = vld [vmem:[#allocation31_spill] sm:$0xff] }
 0x919   : > { %v9957_v8 = vadd.f32 %v4222_v38, %v4220_v21  ;;  %v3289_v42 = vpop.f32.mrf.mxu2  ;;  %v3733_v15 = vrot.slane %v3732_v41, 2  ;;  %v4264_v6 = vadd.f32 %v4263_v40, %v4256_v24  ;;  %v4678_v58 = vrot.slane %v9505_v0, 4 }
 0x91a   : > { %v9961_v53 = vadd.f32 %v3289_v42, %v3176_v5  ;;  %5928 = vpow2.f32 %v4499_v20  ;;  %v3748_v18 = vrot.slane %v3747_v32, 1  ;;  %v9966_v39 = vmul.f32 %v4282_v23, %v9892_v44 }
 0x91b   : > { %v3734_v34 = vadd.f32 %v3733_v15, %v3732_v41  ;;  %v9963_v13 = vadd.f32 0.001, %v4264_v6  ;;  %v4028_v19 = vsub.f32 0.0, %v11260_v29  ;;  %v4716_v21 = vadd.f32 %v4715_v12, %v4713_v51  ;;  %v11265_v41 = vld [vmem:[#allocation27_spill] sm:$0xff] }
 0x91c   : > { %11259 = vst [vmem:[#allocation53_spill] sm:$0xff] %v9966_v39  ;;  %5930 = vrcp.f32 %v9961_v53  ;;  %v11261_v31 = vrot.slane %v9720_v56, 1  ;;  %v4728_v55 = vadd.f32 %v4727_v43, %v4725_v61  ;;  %v3749_v15 = vadd.f32 %v3748_v18, %v3747_v32 }
 0x91d   : > { %v3735_v9 = vrot.slane %v3734_v34, 1  ;;  %v9978_v6 = vmul.f32 %v9966_v39, %v9963_v13  ;;  %v11263_v24 = vrot.slane %v9833_v50, 2  ;;  %v9984_v12 = vadd.f32 %v4665_v49, %v9498_v59 }
 0x91e   : > { %v9974_v62 = vadd.f32 %v11261_v31, %v9720_v56  ;;  %v9987_v51 = vadd.f32 %v4678_v58, %v9505_v0  ;;  %v1857_v56 = vpop.permute.xlu1 %1856  ;;  %v4726_v43 = vmul.f32 %v9460_v48, %v9844_v52  ;;  %5932 = vrcp.f32 %v4516_v3  ;;  %v11266_v31 = vld [vmem:[#allocation18_spill] sm:$0xff] }
 0x91f   : > { %11262 = vst [vmem:[#allocation52_spill] sm:$0xff] %v9978_v6  ;;  %v4493_v23 = vadd.f32 %v11263_v24, %v9833_v50  ;;  %v9991_v32 = vadd.f32 %v3735_v9, %v3734_v34  ;;  %v9994_v38 = vadd.f32 %v11264_v46, %v1857_v56  ;;  %v9997_v50 = vadd.f32 %v11265_v41, %v1862_v63  ;;  %v3179_v59 = vpop.f32.mrf.mxu0  ;;  %v11274_v6 = vld [vmem:[#allocation12_spill] sm:$0xff] }
 0x920   : > { %v5929_v61 = vpop.eup %5928  ;;  %v4029_v25 = vmul.f32 1.442695, %v4028_v19  ;;  %v4267_v0 = vand.u32 2147483647, %v9974_v62  ;;  %v4717_v40 = vrot.slane %v4716_v21, 4  ;;  %v10000_v5 = vadd.f32 %v4728_v55, %v4726_v43 }
 0x921   : > { %v3292_v20 = vpop.f32.mrf.mxu2  ;;  %v3797_v52 = vsub.f32 %v3749_v15, %v9991_v32  ;;  %v4501_v42 = vadd.f32 1.0, %v5929_v61  ;;  %v4667_v3 = vrot.slane %v9984_v12, 2  ;;  %v4680_v58 = vrot.slane %v9987_v51, 2  ;;  %v11268_v61 = vld [vmem:[#allocation20_spill] sm:$0xff] }
 0x922   : > { %v5931_v49 = vpop.eup %5930  ;;  %v10005_v34 = vadd.f32 %v3292_v20, %v3179_v59  ;;  %v4494_v18 = vrot.slane %v4493_v23, 1  ;;  %v4326_v55 = vand.u32 2147483647, %v9961_v53  ;;  %v4268_v15 = vsub.f32 0.0, %v4267_v0 }
 0x923   : > { %v4318_v19 = vmul.f32 %v5931_v49, %v9961_v53  ;;  %v3799_v9 = vmul.f32 %v11266_v31, %v3797_v52  ;;  %5934 = vlog2.f32 %v4501_v42  ;;  %v4520_v24 = vsub.f32 %v9873_v36, %v9944_v22  ;;  %v11270_v31 = vld [vmem:[#allocation23_spill] sm:$0xff] }
 0x924   : > { %5936 = vpow2.f32 %v4029_v25  ;;  %v10013_v63 = vpop.eup %5932  ;;  %v4328_v43 = vand.u32 2147483648, %v9961_v53  ;;  %v4353_v59 = vmul.f32 0.97, %v9860_v54  ;;  %v4354_v20 = vmul.f32 0.97, %v9895_v28 }
 0x925   : > { %11267 = vst [vmem:[#allocation42_spill] sm:$0xff] %v10013_v63  ;;  %v4319_v56 = vsub.f32 1.0, %v4318_v19  ;;  %v3804_v46 = vmul.f32 %v11268_v61, %v3799_v9  ;;  %v3810_v41 = vmul.f32 2.0, %v3799_v9  ;;  %v10019_v42 = vadd.f32 %v4494_v18, %v4493_v23 }
 0x926   : > { %v10022_v25 = vmul.f32 %v10013_v63, %v4520_v24  ;;  %vm4323_vm9 = vweird.f32 %v5931_v49  ;;  %vm4322_vm10 = vweird.f32 %v9961_v53  ;;  %vm10027_vm11 = vcmp.eq.f32.partialorder %v4326_v55, 8.507059e+37 }
 0x927   : > { %v4320_v0 = vmul.f32 %v5931_v49, %v4319_v56  ;;  %v3805_v22 = vmul.f32 %v3804_v46, %v11268_v61  ;;  %v3811_v19 = vsub.f32 %v11270_v31, %v3810_v41  ;;  %v3182_v54 = vpop.f32.mrf.mxu0  ;;  %v4496_v28 = vmax.f32 %v9912_v16, 0.0  ;;  %v11273_v56 = vld [vmem:[#allocation77_spill] sm:$0xff]  ;;  %vm4324_vm12 = vmor %vm4322_vm10, %vm4323_vm9 }
 0x928   : > { %11269 = vst [vmem:[#allocation58_spill] sm:$0xff] %v10022_v25  ;;  %v4718_v23 = vadd.f32 %v4717_v40, %v4716_v21  ;;  %v4329_v24 = vor.u32 1.1754944e-38, %v4328_v43  ;;  %v4522_v31 = vsub.f32 1.0, %v10022_v25  ;;  %v4668_v43 = vadd.f32 %v4667_v3, %v9984_v12 }
 0x929   : > { %v5935_v18 = vpop.eup %5934  ;;  %v4321_v48 = vadd.f32 %v5931_v49, %v4320_v0  ;;  %v3295_v63 = vpop.f32.mrf.mxu2  ;;  %v3807_v39 = vadd.f32 %v11273_v56, %v3805_v22  ;;  %v3812_v61 = vmul.f32 %v3811_v19, %v11274_v6  ;;  %v4355_v0 = vmul.f32 0.97, %v9924_v11 }
 0x92a   : > { %v10034_v46 = vpop.eup %5936  ;;  %v10037_v55 = vadd.f32 %v3295_v63, %v3182_v54  ;;  %v4503_v41 = vmul.f32 0.6931472, %v5935_v18  ;;  %v4719_v44 = vrot.slane %v4718_v23, 2  ;;  %v4681_v19 = vadd.f32 %v4680_v58, %v9987_v51  ;;  %v1867_v58 = vpop.permute.xlu1 %1866 }
 0x92b   : > { %v4325_v16 = vsel %vm4324_vm12, %v5931_v49, %v4321_v48  ;;  %v3808_v21 = vmul.f32 %v3807_v39, %v3797_v52  ;;  %v3813_v40 = vadd.f32 %v3812_v61, %v3799_v9  ;;  %v4356_v63 = vmul.f32 0.97, %v9961_v53 }
 0x92c   : > { %v4330_v6 = vsel %vm10027_vm11, %v4329_v24, %v4325_v16  ;;  %v4504_v22 = vadd.f32 %v4503_v41, %v4496_v28  ;;  %v4720_v18 = vadd.f32 %v4719_v44, %v4718_v23  ;;  %v4507_v48 = vand.u32 2147483647, %v10019_v42 }
 0x92d   : > { %v4357_v54 = vperm.slane %v4330_v6, 6  ;;  %5938 = vrcp.f32 %v3813_v40  ;;  %v10050_v39 = vmul.f32 %v4522_v31, %v10022_v25  ;;  %v4669_v12 = vrot.slane %v4668_v43, 1 }
 0x92e   : > { %v10046_v56 = vadd.f32 0.001, %v4504_v22  ;;  %v4269_v9 = vmul.f32 1.442695, %v4268_v15  ;;  %v4682_v51 = vrot.slane %v4681_v19, 1  ;;  %v4721_v44 = vrot.slane %v4720_v18, 1 }
 0x92f   : > { %11275 = vst [vmem:[#allocation59_spill] sm:$0xff] %v10050_v39  ;;  %v4358_v11 = vmul.f32 %v4357_v54, %v4353_v59  ;;  %v4359_v52 = vmul.f32 %v4357_v54, %v4354_v20  ;;  %v4360_v49 = vmul.f32 %v4357_v54, %v4355_v0  ;;  %v4361_v3 = vmul.f32 %v4357_v54, %v4356_v63  ;;  %v3185_v29 = vpop.f32.mrf.mxu0  ;;  %v11279_v63 = vld [vmem:[#allocation84_spill] sm:$0xff] }
 0x930   : > { %v10054_v53 = vmul.f32 %v10050_v39, %v10046_v56  ;;  %v4508_v61 = vsub.f32 0.0, %v4507_v48  ;;  %v4670_v41 = vadd.f32 %v4669_v12, %v4668_v43  ;;  %v10068_v31 = vadd.f32 %v4721_v44, %v4720_v18  ;;  %v11281_v48 = vld [vmem:[#allocation85_spill] sm:$0xff] }
 0x931   : > { %v10057_v28 = vadd.f32 %v4358_v11, %v8431_v45  ;;  %v10060_v23 = vadd.f32 %v4359_v52, %v8433_v14  ;;  %v10063_v59 = vadd.f32 %v4360_v49, %v8441_v7  ;;  %v4365_v20 = vadd.f32 %v4361_v3, %v8443_v26  ;;  %v3298_v24 = vpop.f32.mrf.mxu2  ;;  %v11282_v52 = vld [vmem:[#allocation57_spill] sm:$0xff] }
 0x932   : > { %11276 = vst [vmem:[#allocation14_spill] sm:$0xff] %v10054_v53  ;;  %v10066_v15 = vadd.f32 %v3298_v24, %v3185_v29  ;;  %v4683_v12 = vadd.f32 %v4682_v51, %v4681_v19  ;;  %v4730_v11 = vrot.slane %v10000_v5, 4  ;;  %v4963_v49 = vmul.f32 %v11282_v52, %v9994_v38  ;;  %v11305_v53 = vld [vmem:[#allocation64_spill] sm:$0xff]  ;;  %v11306_v7 = vld [vmem:[#allocation29_spill] sm:$0xff] }
 0x933   : > { %11277 = vst [vmem:[#allocation78_spill] sm:$0xff] %v10060_v23  ;;  %v5939_v16 = vpop.eup %5938  ;;  %v4369_v40 = vsel %vm3344_vm8, 1.0, %v4365_v20  ;;  %v4457_v0 = vmul.f32 %v11216_v10, %v10057_v28  ;;  %v4458_v6 = vmul.f32 %v11217_v57, %v10060_v23  ;;  %v4459_v22 = vmul.f32 %v11218_v30, %v10063_v59  ;;  %v11283_v10 = vld [vmem:[#allocation38_spill] sm:$0xff] }
 0x934   : > { %11278 = vst [vmem:[#allocation79_spill] sm:$0xff] %v10063_v59  ;;  %v10079_v54 = vmul.f32 %v11279_v63, %v4369_v40  ;;  %v4460_v43 = vmul.f32 %v11281_v48, %v4369_v40  ;;  %v3815_v18 = vmul.f32 %v5939_v16, %v3808_v21  ;;  %v4964_v29 = vmul.f32 %v11283_v10, %v9997_v50  ;;  %v11286_v48 = vld [vmem:[#allocation35_spill] sm:$0xff] }
 0x935   : > { %v4461_v3 = vadd.f32 %v4458_v6, %v4457_v0  ;;  %v4737_v30 = vand.u32 2147483647, %v10068_v31  ;;  %v4756_v44 = vsub.f32 %v4683_v12, %v4670_v41  ;;  %v11284_v20 = vrot.slane %v9725_v60, 4  ;;  %v1872_v12 = vpop.permute.xlu1 %1871 }
 0x936   : > { %11280 = vst [vmem:[#allocation80_spill] sm:$0xff] %v10079_v54  ;;  %v3816_v57 = vadd.f32 %v3815_v18, %v9991_v32  ;;  %5940 = vpow2.f32 %v4269_v9  ;;  %v4509_v16 = vmul.f32 1.442695, %v4508_v61  ;;  %v4731_v32 = vadd.f32 %v4730_v11, %v10000_v5  ;;  %v11288_v61 = vld [vmem:[#allocation49_spill] sm:$0xff] }
 0x937   : > { %v5107_v24 = vadd.f32 %v11284_v20, %v9725_v60  ;;  %v4462_v21 = vadd.f32 %v4461_v3, %v4459_v22  ;;  %v3188_v19 = vpop.f32.mrf.mxu0  ;;  %v4738_v40 = vsub.f32 0.0, %v4737_v30  ;;  %5942 = vrcp.f32 %v4756_v44  ;;  %v11289_v44 = vld [vmem:[#allocation48_spill] sm:$0xff] }
 0x938   : > { %v3817_v51 = vsel %vm3580_vm13, 1.0, %v3816_v57  ;;  %v2470_v18 = vadd.f32 %v11286_v48, %v1867_v58  ;;  %v4967_v60 = vadd.f32 %v4964_v29, %v4963_v49  ;;  %v3581_v9 = vsel %vm3580_vm13, 1.0, %v9941_v47 }
 0x939   : > { %v10096_v0 = vadd.f32 %v4462_v21, %v4460_v43  ;;  %v3301_v6 = vpop.f32.mrf.mxu2  ;;  %v3819_v63 = vrot.slane %v3817_v51, 1  ;;  %v4739_v22 = vmul.f32 1.442695, %v4738_v40  ;;  %v5108_v3 = vrot.slane %v5107_v24, 2  ;;  %v11290_v43 = vld [vmem:[#allocation66_spill] sm:$0xff]  ;;  %v11292_v21 = vld [vmem:[#allocation68_spill] sm:$0xff] }
 0x93a   : > { %v5560_v30 = vadd.s32 4294967295, %v11288_v61  ;;  %v2473_v5 = vadd.f32 %v11289_v44, %v1872_v12  ;;  %v4965_v11 = vmul.f32 %v11290_v43, %v2470_v18  ;;  %v4031_v20 = vadd.f32 1.0, %v10034_v46  ;;  %v11293_v40 = vld [vmem:[#allocation37_spill] sm:$0xff]  ;;  %v1877_v12 = vpop.permute.xlu2 %1876  ;;  %v11296_v46 = vld [vmem:[#allocation34_spill] sm:$0xff] }
 0x93b   : > { %11285 = vst [vmem:[#allocation86_spill] sm:$0xff] %v10096_v0  ;;  %v10102_v57 = vmul.f32 %v3819_v63, %v3581_v9  ;;  %5944 = vpow2.f32 %v4509_v16  ;;  %v4732_v49 = vrot.slane %v4731_v32, 2  ;;  %v4760_v29 = vsub.f32 %v9873_v36, %v4670_v41  ;;  %v11294_v9 = vld [vmem:[#allocation36_spill] sm:$0xff] }
 0x93c   : > { %v5941_v58 = vpop.eup %5940  ;;  %5946 = vpow2.f32 %v4739_v22  ;;  %v4918_v51 = vrot.slane %v11292_v21, 4  ;;  %v4966_v63 = vmul.f32 %v11293_v40, %v2473_v5  ;;  %v4968_v48 = vadd.f32 %v4967_v60, %v4965_v11  ;;  %v11297_v16 = vld [vmem:[#allocation32_spill] sm:$0xff]  ;;  %v1882_v22 = vpop.permute.xlu0 %1881 }
 0x93d   : > { %11287 = vst [vmem:[#allocation87_spill] sm:$0xff] %v10102_v57  ;;  %v10109_v47 = vpop.eup %5942  ;;  %vm4874_vm14 = vcmp.eq.s32.totalorder %v11294_v9, %v5560_v30  ;;  %v5109_v61 = vadd.f32 %v5108_v3, %v5107_v24  ;;  %vm4875_vm15 = vcmp.eq.s32.totalorder %v11296_v46, %v5560_v30  ;;  %vm4876_vm0 = vcmp.eq.s32.totalorder %v11297_v16, %v5560_v30 }
 0x93e   : > { %11291 = vst [vmem:[#allocation54_spill] sm:$0xff] %v10109_v47  ;;  %v10115_v44 = vmul.f32 %v10109_v47, %v4760_v29  ;;  %5948 = vlog2.f32 %v4031_v20  ;;  %vm4877_vm2 = vcmp.eq.s32.totalorder %v8406_v17, %v5560_v30  ;;  %v11298_v43 = vmov 0.0   ;;  %v11303_v47 = vld [vmem:[#allocation50_spill] sm:$0xff]  ;;  %v11304_v30 = vld [vmem:[#allocation76_spill] sm:$0xff] }
 0x93f   : > { %v3191_v41 = vpop.f32.mrf.mxu0  ;;  %v10121_v10 = vsel %vm4874_vm14, 1.0, %v11298_v43  ;;  %v10124_v60 = vsel %vm4875_vm15, 1.0, %v11298_v43  ;;  %v4271_v24 = vadd.f32 1.0, %v5941_v58  ;;  %v10127_v3 = vsel %vm4876_vm0, 1.0, %v11298_v43 }
 0x940   : > { %11295 = vst [vmem:[#allocation24_spill] sm:$0xff] %v10115_v44  ;;  %v10130_v29 = vsel %vm4877_vm2, 1.0, %v11298_v43  ;;  %v4898_v40 = vmul.f32 %v10121_v10, %v11303_v47  ;;  %v4899_v39 = vmul.f32 %v10124_v60, %v11304_v30  ;;  %v4900_v25 = vmul.f32 %v10127_v3, %v11305_v53 }
 0x941   : > { %11299 = vst [vmem:[#allocation28_spill] sm:$0xff] %v10121_v10  ;;  %v3304_v11 = vpop.f32.mrf.mxu2  ;;  %v5945_v20 = vpop.eup %5944  ;;  %v4901_v58 = vmul.f32 %v10130_v29, %v11306_v7  ;;  %v4969_v45 = vadd.f32 %v4968_v48, %v4966_v63  ;;  %v10142_v57 = vadd.f32 %v3301_v6, %v3188_v19  ;;  %v4733_v26 = vadd.f32 %v4732_v49, %v4731_v32 }
 0x942   : > { %11300 = vst [vmem:[#allocation60_spill] sm:$0xff] %v10124_v60  ;;  %v10134_v52 = vadd.f32 %v3304_v11, %v3191_v41  ;;  %v5947_v14 = vpop.eup %5946  ;;  %v4950_v47 = vmul.f32 %v10121_v10, %v9994_v38  ;;  %v5110_v54 = vrot.slane %v5109_v61, 1  ;;  %v4902_v11 = vadd.f32 %v4899_v39, %v4898_v40  ;;  %v11307_v40 = vld [vmem:[#allocation44_spill] sm:$0xff] }
 0x943   : > { %11301 = vst [vmem:[#allocation46_spill] sm:$0xff] %v10127_v3  ;;  %v4741_v41 = vadd.f32 1.0, %v5947_v14  ;;  %v4951_v30 = vmul.f32 %v10124_v60, %v9997_v50  ;;  %v4919_v0 = vadd.f32 %v4918_v51, %v11292_v21  ;;  %5950 = vlog2.f32 %v4271_v24  ;;  %v1887_v51 = vpop.permute.xlu2 %1886  ;;  %v11308_v24 = vld [vmem:[#allocation45_spill] sm:$0xff] }
 0x944   : > { %11302 = vst [vmem:[#allocation61_spill] sm:$0xff] %v10130_v29  ;;  %v4511_v53 = vadd.f32 1.0, %v5945_v20  ;;  %v5949_v59 = vpop.eup %5948  ;;  %v4903_v7 = vadd.f32 %v4902_v11, %v4900_v25  ;;  %v4952_v19 = vmul.f32 %v10127_v3, %v2470_v18  ;;  %v4970_v32 = vrot.slane %v4969_v45, 4  ;;  %v1892_v48 = vpop.permute.xlu0 %1891 }
 0x945   : > { %5952 = vlog2.f32 %v4741_v41  ;;  %v4954_v6 = vadd.f32 %v4951_v30, %v4950_v47  ;;  %v4734_v38 = vrot.slane %v4733_v26, 1  ;;  %v10151_v49 = vadd.f32 %v5110_v54, %v5109_v61  ;;  %v11309_v54 = vld [vmem:[#allocation47_spill] sm:$0xff] }
 0x946   : > { %5954 = vrcp.f32 %v10142_v57  ;;  %v4904_v39 = vadd.f32 %v4903_v7, %v4901_v58  ;;  %v4953_v50 = vmul.f32 %v10130_v29, %v2473_v5  ;;  %v10157_v63 = vadd.f32 %v11307_v40, %v1877_v12  ;;  %v11310_v5 = vld [vmem:[#allocation40_spill] sm:$0xff] }
 0x947   : > { %v10153_v14 = vpop.f32.mrf.mxu0  ;;  %v4955_v21 = vadd.f32 %v4954_v6, %v4952_v19  ;;  %5956 = vlog2.f32 %v4511_v53  ;;  %v4920_v18 = vrot.slane %v4919_v0, 2  ;;  %v10162_v20 = vadd.f32 %v11308_v24, %v1882_v22 }
 0x948   : > { %v10165_v61 = vadd.f32 %v11309_v54, %v1887_v51  ;;  %v4905_v47 = vrot.slane %v4904_v39, 4  ;;  %v10168_v11 = vadd.f32 %v11310_v5, %v1892_v48  ;;  %v10170_v30 = vadd.f32 %v4970_v32, %v4969_v45  ;;  %v11312_v54 = vld [vmem:[#allocation55_spill] sm:$0xff] }
 0x949   : > { %v10159_v25 = vpop.f32.mrf.mxu2  ;;  %v4956_v58 = vadd.f32 %v4955_v21, %v4953_v50  ;;  %v5951_v41 = vpop.eup %5950  ;;  %v4033_v12 = vmul.f32 0.6931472, %v5949_v59  ;;  %v10172_v7 = vadd.f32 %v4734_v38, %v4733_v26  ;;  %vm5645_vm3 = vcmp.lt.s32.totalorder %v10151_v49, 0  ;;  %v11311_v21 = vld [vmem:[#allocation13_spill] sm:$0xff] }
 0x94a   : > { %v4026_v22 = vmax.f32 %v9547_v35, 0.0  ;;  %v4906_v19 = vadd.f32 %v4905_v47, %v4904_v39  ;;  %v5646_v50 = vceil.f32 %v10151_v49  ;;  %v3984_v40 = vrot.slane %v11311_v21, 4 }
 0x94b   : > { %v5953_v53 = vpop.eup %5952  ;;  %v4957_v6 = vrot.slane %v4956_v58, 4  ;;  %v4921_v24 = vadd.f32 %v4920_v18, %v4919_v0  ;;  %v4736_v45 = vmax.f32 %v10068_v31, 0.0  ;;  %v4762_v26 = vsub.f32 1.0, %v10115_v44 }
 0x94c   : > { %v10176_v51 = vpop.eup %5954  ;;  %v4743_v48 = vmul.f32 0.6931472, %v5953_v53  ;;  %v4907_v59 = vrot.slane %v4906_v19, 2  ;;  %v3971_v5 = vrot.slane %v11312_v54, 4  ;;  %v4034_v35 = vadd.f32 %v4033_v12, %v4026_v22 }
 0x94d   : > { %v4958_v32 = vadd.f32 %v4957_v6, %v4956_v58  ;;  %v5957_v38 = vpop.eup %5956  ;;  %v4273_v39 = vmul.f32 0.6931472, %v5951_v41  ;;  %v4747_v47 = vand.u32 2147483647, %v10172_v7  ;;  %v4558_v29 = vmul.f32 %v10176_v51, %v10142_v57 }
 0x94e   : > { %v4744_v53 = vadd.f32 %v4743_v48, %v4736_v45  ;;  %v4908_v0 = vadd.f32 %v4907_v59, %v4906_v19  ;;  %v5647_v31 = vfloor.f32 %v10151_v49  ;;  %v3985_v60 = vadd.f32 %v3984_v40, %v11311_v21 }
 0x94f   : > { %v10186_v3 = vpop.f32.mrf.mxu0  ;;  %v4959_v18 = vrot.slane %v4958_v32, 2  ;;  %v4266_v6 = vmax.f32 %v9974_v62, 0.0  ;;  %v4922_v12 = vrot.slane %v4921_v24, 1  ;;  %v4513_v41 = vmul.f32 0.6931472, %v5957_v38  ;;  %v11318_v38 = vld [vmem:[#allocation22_spill] sm:$0xff] }
 0x950   : > { %11313 = vst [vmem:[#allocation62_spill] sm:$0xff] %v10186_v3  ;;  %v10193_v22 = vadd.f32 0.001, %v4744_v53  ;;  %v10196_v10 = vmul.f32 %v4762_v26, %v10115_v44  ;;  %v4909_v23 = vrot.slane %v4908_v0, 1  ;;  %v3972_v48 = vadd.f32 %v3971_v5, %v11312_v54 }
 0x951   : > { %v10190_v58 = vpop.f32.mrf.mxu2  ;;  %v4035_v19 = vadd.f32 0.001, %v4034_v35  ;;  %v4274_v45 = vadd.f32 %v4273_v39, %v4266_v6  ;;  %v4960_v59 = vadd.f32 %v4959_v18, %v4958_v32  ;;  %v4559_v3 = vsub.f32 1.0, %v4558_v29 }
 0x952   : > { %11314 = vst [vmem:[#allocation63_spill] sm:$0xff] %v10190_v58  ;;  %v4506_v21 = vmax.f32 %v10019_v42, 0.0  ;;  %v4748_v40 = vsub.f32 0.0, %v4747_v47  ;;  %v10202_v62 = vmul.f32 %v10196_v10, %v10193_v22  ;;  %v10207_v53 = vsel %vm3344_vm8, 1.0, %v11318_v38 }
 0x953   : > { %11315 = vst [vmem:[#allocation30_spill] sm:$0xff] %v10193_v22  ;;  %v4910_v26 = vadd.f32 %v4909_v23, %v4908_v0  ;;  %v4923_v44 = vadd.f32 %v4922_v12, %v4921_v24  ;;  %v4961_v58 = vrot.slane %v4960_v59, 1  ;;  %v3986_v54 = vrot.slane %v3985_v60, 2 }
 0x954   : > { %11316 = vst [vmem:[#allocation16_spill] sm:$0xff] %v10196_v10  ;;  %v10210_v5 = vadd.f32 %v4035_v19, %v9886_v37  ;;  %v4514_v29 = vadd.f32 %v4513_v41, %v4506_v21  ;;  %v5648_v42 = vsel %vm5645_vm3, %v5646_v50, %v5647_v31  ;;  %v3973_v32 = vrot.slane %v3972_v48, 2 }
 0x955   : > { %11317 = vst [vmem:[#allocation17_spill] sm:$0xff] %v10202_v62  ;;  %v4275_v35 = vadd.f32 0.001, %v4274_v45  ;;  %v10214_v39 = vadd.f32 %v4961_v58, %v4960_v59  ;;  %v4996_v47 = vsub.f32 %v4923_v44, %v4910_v26  ;;  %v4560_v6 = vmul.f32 %v10176_v51, %v4559_v3 }
 0x956   : > { %v4749_v23 = vmul.f32 1.442695, %v4748_v40  ;;  %v5649_v24 = vcvt.f32.s32 %v5648_v42  ;;  %v10219_v0 = vmul.f32 0.97, %v10005_v34  ;;  %v10226_v50 = vmul.f32 0.97, %v10037_v55 }
 0x957   : > { %v3200_v37 = vpop.f32.mrf.mxu0  ;;  %v10222_v41 = vadd.f32 %v4275_v35, %v9963_v13  ;;  %v4977_v49 = vand.u32 2147483647, %v10214_v39  ;;  %5958 = vrcp.f32 %v4996_v47  ;;  %v10228_v44 = vadd.f32 %v3986_v54, %v3985_v60 }
 0x958   : > { %v10230_v31 = vadd.f32 0.001, %v4514_v29  ;;  %v5573_v3 = vadd.s32 4294967295, %v5649_v24  ;;  %v4566_v58 = vand.u32 2147483647, %v10142_v57  ;;  %v4568_v34 = vand.u32 2147483648, %v10142_v57 }
 0x959   : > { %v3313_v12 = vpop.f32.mrf.mxu2  ;;  %v10234_v19 = vadd.f32 %v3973_v32, %v3972_v48  ;;  %v4978_v45 = vsub.f32 0.0, %v4977_v49  ;;  %v4561_v13 = vadd.f32 %v10176_v51, %v4560_v6  ;;  %vm4563_vm4 = vweird.f32 %v10176_v51  ;;  %v11321_v29 = vld [vmem:[#allocation43_spill] sm:$0xff]  ;;  %v11324_v49 = vld [vmem:[#allocation21_spill] sm:$0xff] }
 0x95a   : > { %5960 = vpow2.f32 %v4749_v23  ;;  %v5000_v55 = vsub.f32 %v9873_v36, %v4910_v26  ;;  %vm5114_vm1 = vcmp.eq.s32.totalorder %v11294_v9, %v5573_v3  ;;  %vm5115_vm5 = vcmp.eq.s32.totalorder %v11296_v46, %v5573_v3  ;;  %v11323_v6 = vld [vmem:[#allocation75_spill] sm:$0xff] }
 0x95b   : > { %v4979_v59 = vmul.f32 1.442695, %v4978_v45  ;;  %vm5126_vm6 = vcmp.eq.s32.totalorder %v11294_v9, %v5649_v24  ;;  %vm5116_vm7 = vcmp.eq.s32.totalorder %v11297_v16, %v5573_v3  ;;  %vm5127_vm9 = vcmp.eq.s32.totalorder %v11296_v46, %v5649_v24 }
 0x95c   : > { %vm5128_vm10 = vcmp.eq.s32.totalorder %v11297_v16, %v5649_v24  ;;  %vm5129_vm11 = vcmp.eq.s32.totalorder %v8406_v17, %v5649_v24  ;;  %vm5117_vm12 = vcmp.eq.s32.totalorder %v8406_v17, %v5573_v3  ;;  %v10250_v48 = vsel %vm5114_vm1, 1.0, %v11298_v43 }
 0x95d   : > { %v10246_v60 = vpop.eup %5958  ;;  %5962 = vpow2.f32 %v4979_v59  ;;  %v10253_v21 = vsel %vm5115_vm5, 1.0, %v11298_v43  ;;  %v10259_v46 = vsel %vm5116_vm7, 1.0, %v11298_v43  ;;  %v10262_v40 = vsel %vm5117_vm12, 1.0, %v11298_v43 }
 0x95e   : > { %11319 = vst [vmem:[#allocation19_spill] sm:$0xff] %v10246_v60  ;;  %v10256_v9 = vmul.f32 %v10246_v60, %v5000_v55  ;;  %v10265_v38 = vsel %vm5126_vm6, 1.0, %v11298_v43  ;;  %vm4562_vm14 = vweird.f32 %v10142_v57  ;;  %v4972_v26 = vrot.slane %v10170_v30, 2 }
 0x95f   : > { %v10270_v54 = vsel %vm5127_vm9, 1.0, %v11298_v43  ;;  %v5138_v42 = vmul.f32 %v10250_v48, %v11321_v29  ;;  %v10277_v35 = vsel %vm5128_vm10, 1.0, %v11298_v43  ;;  %v10282_v47 = vsel %vm5129_vm11, 1.0, %v11298_v43  ;;  %vm10290_vm15 = vmor %vm4562_vm14, %vm4563_vm4  ;;  %v10300_v43 = vpop.f32.mrf.mxu0 }
 0x960   : > { %11320 = vst [vmem:[#allocation15_spill] sm:$0xff] %v10256_v9  ;;  %v5961_v32 = vpop.eup %5960  ;;  %v5139_v23 = vmul.f32 %v10253_v21, %v11323_v6  ;;  %v5140_v3 = vmul.f32 %v10259_v46, %v11324_v49  ;;  %vm10294_vm0 = vcmp.eq.f32.partialorder %v4566_v58, 8.507059e+37  ;;  %v10298_v55 = vadd.f32 %v3313_v12, %v3200_v37 }
 0x961   : > { %11322 = vst [vmem:[#allocation67_spill] sm:$0xff] %v10282_v47  ;;  %v10302_v24 = vpop.f32.mrf.mxu2  ;;  %v5141_v59 = vmul.f32 %v10262_v40, %v10207_v53  ;;  %v5151_v18 = vmul.f32 %v10265_v38, %v11321_v29  ;;  %v4565_v60 = vsel %vm10290_vm15, %v10176_v51, %v4561_v13  ;;  %v4569_v58 = vor.u32 1.1754944e-38, %v4568_v34 }
 0x962   : > { %11329 = vst [vmem:[#allocation25_spill] sm:$0xff] %v10300_v43  ;;  %v5142_v10 = vadd.f32 %v5139_v23, %v5138_v42  ;;  %v5152_v37 = vmul.f32 %v10270_v54, %v11323_v6  ;;  %v4973_v62 = vadd.f32 %v4972_v26, %v10170_v30  ;;  %v5154_v43 = vmul.f32 %v10282_v47, %v10207_v53 }
 0x963   : > { %11330 = vst [vmem:[#allocation11_spill] sm:$0xff] %v10302_v24  ;;  %v5963_v12 = vpop.eup %5962  ;;  %v5153_v24 = vmul.f32 %v10277_v35, %v11324_v49  ;;  %v5190_v29 = vmul.f32 %v10250_v48, %v10157_v63  ;;  %v5191_v34 = vmul.f32 %v10253_v21, %v10162_v20  ;;  %v4570_v13 = vsel %vm10294_vm0, %v4569_v58, %v4565_v60 }
 0x964   : > { %v4981_v22 = vadd.f32 1.0, %v5963_v12  ;;  %v5143_v45 = vadd.f32 %v5142_v10, %v5140_v3  ;;  %v5155_v51 = vadd.f32 %v5152_v37, %v5151_v18  ;;  %5964 = vrcp.f32 %v10298_v55 }
 0x965   : > { %v3988_v30 = vrot.slane %v10228_v44, 1  ;;  %v5192_v26 = vmul.f32 %v10259_v46, %v10165_v61  ;;  %v5194_v6 = vadd.f32 %v5191_v34, %v5190_v29  ;;  %v10329_v10 = vmul.f32 0.97, %v10066_v15 }
 0x966   : > { %5966 = vlog2.f32 %v4981_v22  ;;  %v5144_v53 = vadd.f32 %v5143_v45, %v5141_v59  ;;  %v5156_v42 = vadd.f32 %v5155_v51, %v5153_v24  ;;  %v3308_v18 = vadd.f32 %v10159_v25, %v10153_v14 }
 0x967   : > { %v3975_v23 = vrot.slane %v10234_v19, 1  ;;  %v4751_v60 = vadd.f32 1.0, %v5961_v32  ;;  %v4974_v49 = vrot.slane %v4973_v62, 1  ;;  %v5195_v58 = vadd.f32 %v5194_v6, %v5192_v26  ;;  %v10352_v29 = vpop.f32.mrf.mxu0 }
 0x968   : > { %v5145_v3 = vrot.slane %v5144_v53, 4  ;;  %v5157_v16 = vadd.f32 %v5156_v42, %v5154_v43  ;;  %v10334_v37 = vperm.slane %v4570_v13, 6  ;;  %v10338_v22 = vadd.f32 %v10230_v31, %v10046_v56 }
 0x969   : > { %v5193_v15 = vmul.f32 %v10262_v40, %v10168_v11  ;;  %v10344_v14 = vmul.f32 0.97, %v10142_v57  ;;  %v3989_v25 = vadd.f32 %v3988_v30, %v10228_v44  ;;  %v10350_v12 = vmul.f32 0.97, %v10134_v52  ;;  %v10354_v56 = vpop.f32.mrf.mxu2 }
 0x96a   : > { %v5146_v32 = vadd.f32 %v5145_v3, %v5144_v53  ;;  %v5158_v59 = vrot.slane %v5157_v16, 4  ;;  %v10347_v43 = vpop.eup %5964  ;;  %v10357_v31 = vadd.f32 %v3975_v23, %v10234_v19  ;;  %5968 = vlog2.f32 %v4751_v60  ;;  %v11331_v23 = vld [vmem:[#allocation71_spill] sm:$0xff]  ;;  %v11333_v3 = vld [vmem:[#allocation73_spill] sm:$0xff] }
 0x96b   : > { %v5196_v45 = vadd.f32 %v5195_v58, %v5193_v15  ;;  %v10359_v51 = vmul.f32 0.97, %v3308_v18  ;;  %v10361_v44 = vadd.f32 %v4974_v49, %v4973_v62  ;;  %v10365_v52 = vmul.f32 %v10334_v37, %v10219_v0  ;;  %v11332_v49 = vld [vmem:[#allocation72_spill] sm:$0xff] }
 0x96c   : > { %v5967_v57 = vpop.eup %5966  ;;  %v5147_v34 = vrot.slane %v5146_v32, 2  ;;  %v5159_v13 = vadd.f32 %v5158_v59, %v5157_v16  ;;  %v4976_v30 = vmax.f32 %v10214_v39, 0.0  ;;  %v5002_v53 = vsub.f32 1.0, %v10256_v9 }
 0x96d   : > { %v4983_v26 = vmul.f32 0.6931472, %v5967_v57  ;;  %v4798_v19 = vmul.f32 %v10347_v43, %v10298_v55  ;;  %v5197_v18 = vrot.slane %v5196_v45, 4  ;;  %v4037_v62 = vsub.f32 %v3989_v25, %v10357_v31 }
 0x96e   : > { %v5148_v42 = vadd.f32 %v5147_v34, %v5146_v32  ;;  %v5160_v6 = vrot.slane %v5159_v13, 2  ;;  %v4204_v60 = vmul.f32 %v11331_v23, %v9915_v33  ;;  %v4205_v0 = vmul.f32 %v11332_v49, %v9918_v2  ;;  %v11335_v33 = vld [vmem:[#allocation56_spill] sm:$0xff] }
 0x96f   : > { %v5203_v39 = vmul.f32 %v10265_v38, %v10157_v63  ;;  %v4206_v16 = vmul.f32 %v11333_v3, %v9921_v4  ;;  %v11334_v58 = vrot.slane %v9957_v8, 4  ;;  %v4984_v32 = vadd.f32 %v4983_v26, %v4976_v30 }
 0x970   : > { %v5204_v25 = vmul.f32 %v10270_v54, %v10162_v20  ;;  %v10385_v59 = vpop.eup %5968  ;;  %v4039_v57 = vmul.f32 %v11335_v33, %v4037_v62  ;;  %v4208_v34 = vadd.f32 %v4205_v0, %v4204_v60  ;;  %v5149_v2 = vrot.slane %v5148_v42, 1 }
 0x971   : > { %v4225_v15 = vadd.f32 %v11334_v58, %v9957_v8  ;;  %v5161_v23 = vadd.f32 %v5160_v6, %v5159_v13  ;;  %v10388_v63 = vadd.f32 0.001, %v4984_v32  ;;  %v10391_v4 = vmul.f32 %v5002_v53, %v10256_v9  ;;  %v10400_v6 = vpop.f32.mrf.mxu0  ;;  %v10402_v0 = vpop.f32.mrf.mxu2  ;;  %v11367_v9 = vld [vmem:[#allocation88_spill] sm:$0xff] }
 0x972   : > { %v5198_v3 = vadd.f32 %v5197_v18, %v5196_v45  ;;  %v4799_v24 = vsub.f32 1.0, %v4798_v19  ;;  %v4044_v8 = vmul.f32 %v9813_v27, %v4039_v57  ;;  %v4050_v30 = vmul.f32 2.0, %v4039_v57 }
 0x973   : > { %v4226_v49 = vrot.slane %v4225_v15, 2  ;;  %11336 = vst [vmem:[#allocation10_spill] sm:$0xff] %v10388_v63  ;;  %v4209_v26 = vadd.f32 %v4208_v34, %v4206_v16  ;;  %v10396_v20 = vmul.f32 %v10391_v4, %v10388_v63  ;;  %v10398_v58 = vadd.f32 %v5149_v2, %v5148_v42  ;;  %v11339_v34 = vld [vmem:[#allocation7_spill] sm:$0xff] }
 0x974   : > { %11337 = vst [vmem:[#allocation8_spill] sm:$0xff] %v10391_v4  ;;  %v5162_v60 = vrot.slane %v5161_v23, 1  ;;  %v5207_v13 = vadd.f32 %v5204_v25, %v5203_v39  ;;  %v4045_v53 = vmul.f32 %v4044_v8, %v9813_v27  ;;  %v4051_v45 = vsub.f32 %v10210_v5, %v4050_v30  ;;  %v11340_v25 = vld [vmem:[#allocation41_spill] sm:$0xff] }
 0x975   : > { %11338 = vst [vmem:[#allocation69_spill] sm:$0xff] %v10396_v20  ;;  %v4210_v19 = vadd.f32 %v4209_v26, %v9937_v1  ;;  %v5199_v18 = vrot.slane %v5198_v3, 2  ;;  %v4227_v16 = vadd.f32 %v4226_v49, %v4225_v15  ;;  %v4987_v32 = vand.u32 2147483647, %v10361_v44 }
 0x976   : > { %v5163_v33 = vadd.f32 %v5162_v60, %v5161_v23  ;;  %v5205_v42 = vmul.f32 %v10277_v35, %v10165_v61  ;;  %v4047_v39 = vadd.f32 %v11339_v34, %v4045_v53  ;;  %v4052_v2 = vmul.f32 %v4051_v45, %v11340_v25  ;;  %v11342_v45 = vld [vmem:[#allocation78_spill] sm:$0xff] }
 0x977   : > { %v4211_v4 = vrot.slane %v4210_v19, 4  ;;  %v5200_v20 = vadd.f32 %v5199_v18, %v5198_v3  ;;  %v10414_v27 = vmul.f32 %v10334_v37, %v10226_v50  ;;  %v4800_v1 = vmul.f32 %v10347_v43, %v4799_v24 }
 0x978   : > { %v5208_v5 = vadd.f32 %v5207_v13, %v5205_v42  ;;  %v5236_v15 = vsub.f32 %v5163_v33, %v10398_v58  ;;  %v4048_v49 = vmul.f32 %v4047_v39, %v4037_v62  ;;  %v4053_v23 = vadd.f32 %v4052_v2, %v4039_v57 }
 0x979   : > { %v4212_v8 = vadd.f32 %v4211_v4, %v4210_v19  ;;  %v5201_v30 = vrot.slane %v5200_v20, 1  ;;  %v4601_v61 = vmul.f32 %v10334_v37, %v10344_v14  ;;  %v4808_v26 = vand.u32 2147483648, %v10298_v55  ;;  %v11341_v14 = vld [vmem:[#allocation81_spill] sm:$0xff]  ;;  %v11343_v19 = vld [vmem:[#allocation82_spill] sm:$0xff]  ;;  %v3212_v2 = vpop.f32.mrf.mxu0 }
 0x97a   : > { %v4988_v60 = vsub.f32 0.0, %v4987_v32  ;;  %v5206_v3 = vmul.f32 %v10282_v47, %v10168_v11  ;;  %5970 = vrcp.f32 %v4053_v23  ;;  %v4228_v53 = vrot.slane %v4227_v16, 1  ;;  %v11344_v32 = vld [vmem:[#allocation79_spill] sm:$0xff] }
 0x97b   : > { %v4213_v50 = vrot.slane %v4212_v8, 2  ;;  %v10423_v24 = vadd.f32 %v5201_v30, %v5200_v20  ;;  %v4801_v13 = vadd.f32 %v10347_v43, %v4800_v1  ;;  %vm4803_vm2 = vweird.f32 %v10347_v43  ;;  %v11345_v11 = vld [vmem:[#allocation83_spill] sm:$0xff]  ;;  %v11346_v20 = vld [vmem:[#allocation86_spill] sm:$0xff]  ;;  %v3325_v1 = vpop.f32.mrf.mxu2 }
 0x97c   : > { %v5209_v62 = vadd.f32 %v5208_v5, %v5206_v3  ;;  %5972 = vrcp.f32 %v5236_v15  ;;  %v4444_v4 = vmul.f32 %v11341_v14, %v10057_v28  ;;  %v4445_v18 = vmul.f32 %v11343_v19, %v11342_v45 }
 0x97d   : > { %v4214_v57 = vadd.f32 %v4213_v50, %v4212_v8  ;;  %v4446_v33 = vmul.f32 %v11345_v11, %v11344_v32  ;;  %vm4802_vm3 = vweird.f32 %v10298_v55  ;;  %v4464_v42 = vrot.slane %v11346_v20, 4 }
 0x97e   : > { %v4989_v34 = vmul.f32 1.442695, %v4988_v60  ;;  %v5217_v39 = vand.u32 2147483647, %v10423_v24  ;;  %v4806_v25 = vand.u32 2147483647, %v10298_v55  ;;  %v4229_v28 = vadd.f32 %v4228_v53, %v4227_v16  ;;  %vm10439_vm4 = vmor %vm4802_vm3, %vm4803_vm2 }
 0x97f   : > { %v4215_v5 = vrot.slane %v4214_v57, 1  ;;  %v4448_v15 = vadd.f32 %v4445_v18, %v4444_v4  ;;  %v4809_v8 = vor.u32 1.1754944e-38, %v4808_v26  ;;  %v4465_v30 = vadd.f32 %v4464_v42, %v11346_v20  ;;  %v6030_v53 = vld [vmem:[%s6201_s9] sm:$0xff] }
 0x980   : > { %v5210_v60 = vrot.slane %v5209_v62, 4  ;;  %v5218_v3 = vsub.f32 0.0, %v5217_v39  ;;  %v5971_v50 = vpop.eup %5970  ;;  %v4805_v14 = vsel %vm10439_vm4, %v10347_v43, %v4801_v13  ;;  %v5240_v4 = vsub.f32 %v6030_v53, %v10398_v58  ;;  %v11350_v42 = vld [vmem:[#allocation80_spill] sm:$0xff] }
 0x981   : > { %v10447_v45 = vadd.f32 %v4215_v5, %v4214_v57  ;;  %v4449_v16 = vadd.f32 %v4448_v15, %v4446_v33  ;;  %v10453_v18 = vadd.f32 %v3325_v1, %v3212_v2  ;;  %v4055_v26 = vmul.f32 %v5971_v50, %v4048_v49  ;;  %v11351_v2 = vld [vmem:[#allocation26_spill] sm:$0xff]  ;;  %v11354_v50 = vld [vmem:[#allocation87_spill] sm:$0xff] }
 0x982   : > { %v10451_v19 = vpop.eup %5972  ;;  %v4466_v32 = vrot.slane %v4465_v30, 2  ;;  %v5219_v11 = vmul.f32 1.442695, %v5218_v3  ;;  %vm4807_vm1 = vcmp.eq.f32.partialorder %v4806_v25, 8.507059e+37  ;;  %v5211_v33 = vadd.f32 %v5210_v60, %v5209_v62  ;;  %v11352_v25 = vld [vmem:[#allocation9_spill] sm:$0xff]  ;;  %v11353_v62 = vld [vmem:[#allocation6_spill] sm:$0xff] }
 0x983   : > { %11349 = vst [vmem:[#allocation70_spill] sm:$0xff] %v10451_v19  ;;  %v4277_v20 = vsub.f32 %v4229_v28, %v10447_v45  ;;  %v4450_v39 = vadd.f32 %v4449_v16, %v11350_v42  ;;  %v10458_v43 = vmul.f32 %v10451_v19, %v5240_v4  ;;  %v4810_v13 = vsel %vm4807_vm1, %v4809_v8, %v4805_v14  ;;  %v11365_v19 = vld [vmem:[#allocation92_spill] sm:$0xff] }
 0x984   : > { %v4056_v57 = vadd.f32 %v4055_v26, %v10357_v31  ;;  %5974 = vpow2.f32 %v5219_v11  ;;  %v4600_v58 = vmul.f32 %v10334_v37, %v10329_v10  ;;  %v4467_v5 = vadd.f32 %v4466_v32, %v4465_v30  ;;  %v11355_v26 = vld [vmem:[#allocation62_spill] sm:$0xff]  ;;  %v11356_v32 = vld [vmem:[#allocation63_spill] sm:$0xff] }
 0x985   : > { %v4279_v49 = vmul.f32 %v11351_v2, %v4277_v20  ;;  %v4451_v1 = vrot.slane %v4450_v39, 4  ;;  %v4605_v15 = vadd.f32 %v4601_v61, %v11352_v25  ;;  %5976 = vrcp.f32 %v10453_v18  ;;  %v11359_v2 = vld [vmem:[#allocation53_spill] sm:$0xff] }
 0x986   : > { %v4057_v28 = vsel %vm3580_vm13, 1.0, %v4056_v57  ;;  %v4753_v23 = vmul.f32 0.6931472, %v10385_v59  ;;  %v10469_v8 = vperm.slane %v4810_v13, 6  ;;  %v4836_v10 = vmul.f32 0.97, %v10298_v55 }
 0x987   : > { %v4059_v31 = vrot.slane %v4057_v28, 2  ;;  %v4284_v60 = vmul.f32 %v11353_v62, %v4279_v49  ;;  %v4290_v3 = vmul.f32 2.0, %v4279_v49  ;;  %v4452_v37 = vadd.f32 %v4451_v1, %v4450_v39  ;;  %v11358_v13 = vld [vmem:[#allocation52_spill] sm:$0xff] }
 0x988   : > { %5978 = vpow2.f32 %v4989_v34  ;;  %v5212_v30 = vrot.slane %v5211_v33, 2  ;;  %v4468_v53 = vrot.slane %v4467_v5, 1  ;;  %v4609_v4 = vsel %vm3344_vm8, 1.0, %v4605_v15 }
 0x989   : > { %v10474_v61 = vmul.f32 %v4059_v31, %v11354_v50  ;;  %v4285_v14 = vmul.f32 %v4284_v60, %v11353_v62  ;;  %v4291_v16 = vsub.f32 %v10222_v41, %v4290_v3  ;;  %v3311_v11 = vadd.f32 %v11356_v32, %v11355_v26  ;;  %v11360_v62 = vld [vmem:[#allocation33_spill] sm:$0xff]  ;;  %v11361_v60 = vld [vmem:[#allocation39_spill] sm:$0xff] }
 0x98a   : > { %v5975_v59 = vpop.eup %5974  ;;  %v4453_v42 = vrot.slane %v4452_v37, 2  ;;  %v11357_v55 = vmax.f32 %v10172_v7, 0.0  ;;  %v4841_v39 = vmul.f32 %v10469_v8, %v4836_v10  ;;  %v4602_v15 = vadd.f32 %v10365_v52, %v11360_v62  ;;  %v11362_v50 = vld [vmem:[#allocation51_spill] sm:$0xff] }
 0x98b   : > { %v4287_v57 = vadd.f32 %v11358_v13, %v4285_v14  ;;  %v4292_v1 = vmul.f32 %v4291_v16, %v11359_v2  ;;  %v5221_v41 = vadd.f32 1.0, %v5975_v59  ;;  %v10489_v28 = vpop.eup %5976  ;;  %v4603_v3 = vadd.f32 %v10414_v27, %v11361_v60  ;;  %v11363_v13 = vld [vmem:[#allocation90_spill] sm:$0xff]  ;;  %v11364_v59 = vld [vmem:[#allocation91_spill] sm:$0xff] }
 0x98c   : > { %v10484_v34 = vadd.f32 %v4753_v23, %v11357_v55  ;;  %v4454_v31 = vadd.f32 %v4453_v42, %v4452_v37  ;;  %v4604_v7 = vadd.f32 %v4600_v58, %v11362_v50  ;;  %v4469_v32 = vadd.f32 %v4468_v53, %v4467_v5  ;;  %v11366_v42 = vld [vmem:[#allocation65_spill] sm:$0xff] }
 0x98d   : > { %v4288_v23 = vmul.f32 %v4287_v57, %v4277_v20  ;;  %v4293_v26 = vadd.f32 %v4292_v1, %v4279_v49  ;;  %v5213_v10 = vadd.f32 %v5212_v30, %v5211_v33  ;;  %v4684_v16 = vmul.f32 %v11363_v13, %v4602_v15  ;;  %v11368_v33 = vld [vmem:[#allocation89_spill] sm:$0xff]  ;;  %v11369_v30 = vld [vmem:[#allocation94_spill] sm:$0xff] }
 0x98e   : > { %v5979_v55 = vpop.eup %5978  ;;  %v4455_v14 = vrot.slane %v4454_v31, 1  ;;  %v4685_v2 = vmul.f32 %v11364_v59, %v4603_v3  ;;  %v4686_v37 = vmul.f32 %v11365_v19, %v4604_v7  ;;  %v5038_v52 = vmul.f32 %v10489_v28, %v10453_v18  ;;  %v11370_v59 = vld [vmem:[#allocation93_spill] sm:$0xff] }
 0x98f   : > { %5980 = vrcp.f32 %v4293_v26  ;;  %v4697_v27 = vmul.f32 %v11366_v42, %v4602_v15  ;;  %v4698_v58 = vmul.f32 %v11367_v9, %v4603_v3  ;;  %v4699_v5 = vmul.f32 %v11368_v33, %v4604_v7  ;;  %v11371_v7 = vld [vmem:[#allocation42_spill] sm:$0xff] }
 0x990   : > { %v10503_v20 = vadd.f32 %v4455_v14, %v4454_v31  ;;  %v4688_v49 = vadd.f32 %v4685_v2, %v4684_v16  ;;  %5982 = vlog2.f32 %v5221_v41  ;;  %v4700_v53 = vmul.f32 %v11369_v30, %v4609_v4 }
 0x991   : > { %v4835_v57 = vmul.f32 0.97, %v3311_v11  ;;  %v4701_v1 = vadd.f32 %v4698_v58, %v4697_v27  ;;  %v5214_v13 = vrot.slane %v5213_v10, 1  ;;  %v4687_v47 = vmul.f32 %v11370_v59, %v4609_v4 }
 0x992   : > { %v4517_v19 = vsub.f32 %v4469_v32, %v10503_v20  ;;  %v4689_v26 = vadd.f32 %v4688_v49, %v4686_v37  ;;  %v10509_v63 = vadd.f32 1.0, %v5979_v55  ;;  %v4838_v9 = vmul.f32 %v10469_v8, %v10350_v12 }
 0x993   : > { %v4839_v31 = vmul.f32 %v10469_v8, %v10359_v51  ;;  %v5039_v15 = vsub.f32 1.0, %v5038_v52  ;;  %v4702_v41 = vadd.f32 %v4701_v1, %v4699_v5  ;;  %v4845_v3 = vadd.f32 %v4841_v39, %v11352_v25  ;;  %v11372_v52 = vld [vmem:[#allocation58_spill] sm:$0xff] }
 0x994   : > { %v5046_v11 = vand.u32 2147483647, %v10453_v18  ;;  %v4519_v14 = vmul.f32 %v11371_v7, %v4517_v19  ;;  %v4690_v32 = vadd.f32 %v4689_v26, %v4687_v47  ;;  %vm5042_vm5 = vweird.f32 %v10453_v18  ;;  %v11375_v26 = vld [vmem:[#allocation14_spill] sm:$0xff] }
 0x995   : > { %v5981_v16 = vpop.eup %5980  ;;  %v5048_v4 = vand.u32 2147483648, %v10453_v18  ;;  %v4703_v55 = vadd.f32 %v4702_v41, %v4700_v53  ;;  %v10520_v2 = vadd.f32 %v5214_v13, %v5213_v10  ;;  %v5216_v12 = vmax.f32 %v10423_v24, 0.0  ;;  %v11389_v13 = vld [vmem:[#allocation25_spill] sm:$0xff] }
 0x996   : > { %v5983_v51 = vpop.eup %5982  ;;  %v4295_v37 = vmul.f32 %v5981_v16, %v4288_v23  ;;  %v4524_v42 = vmul.f32 %v11372_v52, %v4519_v14  ;;  %v4530_v39 = vmul.f32 2.0, %v4519_v14  ;;  %v4691_v27 = vrot.slane %v4690_v32, 4 }
 0x997   : > { %v5040_v58 = vmul.f32 %v10489_v28, %v5039_v15  ;;  %v4704_v49 = vrot.slane %v4703_v55, 4  ;;  %v5223_v47 = vmul.f32 0.6931472, %v5983_v51  ;;  %v5242_v33 = vsub.f32 1.0, %v10458_v43 }
 0x998   : > { %v4296_v5 = vadd.f32 %v4295_v37, %v10447_v45  ;;  %v4525_v30 = vmul.f32 %v4524_v42, %v11372_v52  ;;  %v4531_v10 = vsub.f32 %v10338_v22, %v4530_v39  ;;  %v4692_v53 = vadd.f32 %v4691_v27, %v4690_v32  ;;  %v11376_v45 = vld [vmem:[#allocation59_spill] sm:$0xff] }
 0x999   : > { %vm5043_vm6 = vweird.f32 %v10489_v28  ;;  %v5049_v24 = vor.u32 1.1754944e-38, %v5048_v4  ;;  %v4705_v23 = vadd.f32 %v4704_v49, %v4703_v55  ;;  %v5224_v1 = vadd.f32 %v5223_v47, %v5216_v12 }
 0x99a   : > { %vm10530_vm7 = vcmp.eq.f32.partialorder %v5046_v11, 8.507059e+37  ;;  %v4297_v59 = vsel %vm3580_vm13, 1.0, %v4296_v5  ;;  %v4527_v15 = vadd.f32 %v11375_v26, %v4525_v30  ;;  %v4532_v41 = vmul.f32 %v4531_v10, %v11376_v45  ;;  %vm10552_vm9 = vmor %vm5042_vm5, %vm5043_vm6  ;;  %v11381_v30 = vld [vmem:[#allocation57_spill] sm:$0xff]  ;;  %v11384_v45 = vld [vmem:[#allocation66_spill] sm:$0xff] }
 0x99b   : > { %v4693_v7 = vrot.slane %v4692_v53, 2  ;;  %v5041_v22 = vadd.f32 %v10489_v28, %v5040_v58  ;;  %v4299_v32 = vrot.slane %v4297_v59, 3  ;;  %v4706_v16 = vrot.slane %v4705_v23, 2  ;;  %v11383_v59 = vld [vmem:[#allocation46_spill] sm:$0xff] }
 0x99c   : > { %v5227_v4 = vand.u32 2147483647, %v10520_v2  ;;  %v4528_v55 = vmul.f32 %v4527_v15, %v4517_v19  ;;  %v4533_v12 = vadd.f32 %v4532_v41, %v4519_v14  ;;  %v10541_v51 = vmul.f32 %v5242_v33, %v10458_v43  ;;  %v11380_v33 = vld [vmem:[#allocation60_spill] sm:$0xff] }
 0x99d   : > { %v4694_v11 = vadd.f32 %v4693_v7, %v4692_v53  ;;  %v10544_v37 = vmul.f32 %v4299_v32, %v10474_v61  ;;  %v4707_v52 = vadd.f32 %v4706_v16, %v4705_v23  ;;  %v4840_v42 = vmul.f32 %v10469_v8, %v4835_v57  ;;  %v11382_v53 = vld [vmem:[#allocation38_spill] sm:$0xff] }
 0x99e   : > { %v4842_v39 = vadd.f32 %v4838_v9, %v11360_v62  ;;  %5984 = vrcp.f32 %v4533_v12  ;;  %v4843_v14 = vadd.f32 %v4839_v31, %v11361_v60  ;;  %v10557_v58 = vadd.f32 0.001, %v5224_v1  ;;  %v11379_v9 = vld [vmem:[#allocation28_spill] sm:$0xff] }
 0x99f   : > { %v4695_v19 = vrot.slane %v4694_v11, 1  ;;  %v5045_v8 = vsel %vm10552_vm9, %v10489_v28, %v5041_v22  ;;  %v4708_v61 = vrot.slane %v4707_v52, 1  ;;  %v4844_v57 = vadd.f32 %v4840_v42, %v11362_v50  ;;  %v11386_v42 = vld [vmem:[#allocation37_spill] sm:$0xff] }
 0x9a0   : > { %v4924_v49 = vmul.f32 %v11379_v9, %v4842_v39  ;;  %v4925_v5 = vmul.f32 %v11380_v33, %v4843_v14  ;;  %v4937_v10 = vmul.f32 %v11381_v30, %v4842_v39  ;;  %v4938_v23 = vmul.f32 %v11382_v53, %v4843_v14  ;;  %v11387_v14 = vld [vmem:[#allocation54_spill] sm:$0xff]  ;;  %v11391_v30 = vld [vmem:[#allocation24_spill] sm:$0xff] }
 0x9a1   : > { %v10564_v47 = vadd.f32 %v4695_v19, %v4694_v11  ;;  %v4709_v31 = vadd.f32 %v4708_v61, %v4707_v52  ;;  %v4849_v1 = vsel %vm3344_vm8, 1.0, %v4845_v3  ;;  %v4926_v26 = vmul.f32 %v11383_v59, %v4844_v57  ;;  %v11385_v11 = vld [vmem:[#allocation61_spill] sm:$0xff] }
 0x9a2   : > { %v5228_v28 = vsub.f32 0.0, %v5227_v4  ;;  %v4928_v15 = vadd.f32 %v4925_v5, %v4924_v49  ;;  %v4939_v41 = vmul.f32 %v11384_v45, %v4844_v57  ;;  %v4941_v7 = vadd.f32 %v4938_v23, %v4937_v10  ;;  %v11388_v57 = vld [vmem:[#allocation30_spill] sm:$0xff] }
 0x9a3   : > { %v10575_v22 = vmul.f32 %v10541_v51, %v10557_v58  ;;  %v5050_v32 = vsel %vm10530_vm7, %v5049_v24, %v5045_v8  ;;  %v4755_v16 = vadd.f32 0.001, %v10484_v34  ;;  %v4757_v12 = vsub.f32 %v4709_v31, %v10564_v47  ;;  %v11390_v24 = vld [vmem:[#allocation11_spill] sm:$0xff] }
 0x9a4   : > { %5986 = vlog2.f32 %v10509_v63  ;;  %v5985_v3 = vpop.eup %5984  ;;  %v4927_v4 = vmul.f32 %v11385_v11, %v4849_v1  ;;  %v4929_v52 = vadd.f32 %v4928_v15, %v4926_v26  ;;  %v4940_v39 = vmul.f32 %v11386_v42, %v4849_v1 }
 0x9a5   : > { %v4942_v27 = vadd.f32 %v4941_v7, %v4939_v41  ;;  %v4535_v19 = vmul.f32 %v5985_v3, %v4528_v55  ;;  %v4759_v61 = vmul.f32 %v11387_v14, %v4757_v12  ;;  %v4769_v9 = vadd.f32 %v4755_v16, %v11388_v57 }
 0x9a6   : > { %v3317_v8 = vadd.f32 %v11390_v24, %v11389_v13  ;;  %v4930_v34 = vadd.f32 %v4929_v52, %v4927_v4  ;;  %v5229_v33 = vmul.f32 1.442695, %v5228_v28  ;;  %v5077_v5 = vperm.slane %v5050_v32, 6 }
 0x9a7   : > { %v4943_v49 = vadd.f32 %v4942_v27, %v4940_v39  ;;  %v4536_v63 = vadd.f32 %v4535_v19, %v10503_v20  ;;  %v4764_v10 = vmul.f32 %v11391_v30, %v4759_v61  ;;  %v4770_v53 = vmul.f32 2.0, %v4759_v61 }
 0x9a8   : > { %v3320_v23 = vadd.f32 %v10354_v56, %v10352_v29  ;;  %v3323_v55 = vadd.f32 %v10402_v0, %v10400_v6  ;;  %v4931_v31 = vrot.slane %v4930_v34, 4  ;;  %v5076_v26 = vmul.f32 0.97, %v10453_v18  ;;  %v11392_v56 = vld [vmem:[#allocation17_spill] sm:$0xff]  ;;  %v11393_v6 = vld [vmem:[#allocation16_spill] sm:$0xff] }
 0x9a9   : > { %v4944_v1 = vrot.slane %v4943_v49, 4  ;;  %v4537_v28 = vsel %vm3580_vm13, 1.0, %v4536_v63  ;;  %v4765_v15 = vmul.f32 %v4764_v10, %v11391_v30  ;;  %v4771_v20 = vsub.f32 %v4769_v9, %v4770_v53 }
 0x9aa   : > { %v5987_v59 = vpop.eup %5986  ;;  %v4539_v45 = vrot.slane %v4537_v28, 4  ;;  %v4932_v41 = vadd.f32 %v4931_v31, %v4930_v34  ;;  %5988 = vpow2.f32 %v5229_v33  ;;  %v5073_v32 = vmul.f32 0.97, %v3317_v8  ;;  %v11394_v28 = vld [vmem:[#allocation19_spill] sm:$0xff] }
 0x9ab   : > { %v4945_v7 = vadd.f32 %v4944_v1, %v4943_v49  ;;  %v5081_v29 = vmul.f32 %v5077_v5, %v5076_v26  ;;  %v4767_v16 = vadd.f32 %v11392_v56, %v4765_v15  ;;  %v4772_v0 = vmul.f32 %v4771_v20, %v11393_v6  ;;  %v11395_v20 = vld [vmem:[#allocation10_spill] sm:$0xff] }
 0x9ac   : > { %v5074_v3 = vmul.f32 0.97, %v3320_v23  ;;  %v4541_v11 = vmul.f32 %v4539_v45, %v10544_v37  ;;  %v4933_v18 = vrot.slane %v4932_v41, 2  ;;  %v5075_v52 = vmul.f32 0.97, %v3323_v55  ;;  %v11396_v45 = vld [vmem:[#allocation67_spill] sm:$0xff] }
 0x9ad   : > { %v4946_v4 = vrot.slane %v4945_v7, 2  ;;  %v4768_v42 = vmul.f32 %v4767_v16, %v4757_v12  ;;  %v4773_v39 = vadd.f32 %v4772_v0, %v4759_v61  ;;  %v4993_v27 = vmul.f32 0.6931472, %v5987_v59 }
 0x9ae   : > { %v4934_v19 = vadd.f32 %v4933_v18, %v4932_v41  ;;  %v5078_v57 = vmul.f32 %v5077_v5, %v5073_v32  ;;  %v5079_v9 = vmul.f32 %v5077_v5, %v5074_v3  ;;  %v5085_v13 = vadd.f32 %v5081_v29, %v11352_v25 }
 0x9af   : > { %v4947_v14 = vadd.f32 %v4946_v4, %v4945_v7  ;;  %5990 = vrcp.f32 %v4773_v39  ;;  %v4986_v24 = vmax.f32 %v10361_v44, 0.0  ;;  %v5080_v8 = vmul.f32 %v5077_v5, %v5075_v52  ;;  %v11397_v7 = vld [vmem:[#allocation15_spill] sm:$0xff]  ;;  %v11398_v4 = vld [vmem:[#allocation69_spill] sm:$0xff] }
 0x9b0   : > { %v5989_v34 = vpop.eup %5988  ;;  %v4935_v49 = vrot.slane %v4934_v19, 1  ;;  %v5082_v37 = vadd.f32 %v5078_v57, %v11360_v62  ;;  %v5083_v63 = vadd.f32 %v5079_v9, %v11361_v60  ;;  %v5089_v44 = vsel %vm3344_vm8, 1.0, %v5085_v13 }
 0x9b1   : > { %v4948_v33 = vrot.slane %v4947_v14, 1  ;;  %v4994_v12 = vadd.f32 %v4993_v27, %v4986_v24  ;;  %v5084_v61 = vadd.f32 %v5080_v8, %v11362_v50  ;;  %v5231_v55 = vadd.f32 1.0, %v5989_v34 }
 0x9b2   : > { %v4936_v30 = vadd.f32 %v4935_v49, %v4934_v19  ;;  %v5164_v53 = vmul.f32 %v10250_v48, %v5082_v37  ;;  %v5165_v25 = vmul.f32 %v10253_v21, %v5083_v63  ;;  %v5177_v5 = vmul.f32 %v10265_v38, %v5082_v37 }
 0x9b3   : > { %v4949_v10 = vadd.f32 %v4948_v33, %v4947_v14  ;;  %v5178_v23 = vmul.f32 %v10270_v54, %v5083_v63  ;;  %v5166_v60 = vmul.f32 %v10259_v46, %v5084_v61  ;;  %v4995_v50 = vadd.f32 0.001, %v4994_v12 }
 0x9b4   : > { %v5168_v31 = vadd.f32 %v5165_v25, %v5164_v53  ;;  %v5179_v59 = vmul.f32 %v10277_v35, %v5084_v61  ;;  %v5167_v17 = vmul.f32 %v10262_v40, %v5089_v44  ;;  %v5180_v54 = vmul.f32 %v11396_v45, %v5089_v44 }
 0x9b5   : > { %v4997_v62 = vsub.f32 %v4949_v10, %v4936_v30  ;;  %v5991_v1 = vpop.eup %5990  ;;  %v5181_v26 = vadd.f32 %v5178_v23, %v5177_v5  ;;  %v5009_v38 = vadd.f32 %v4995_v50, %v11395_v20  ;;  %5992 = vlog2.f32 %v5231_v55  ;;  %v11400_v23 = vld [vmem:[#allocation70_spill] sm:$0xff] }
 0x9b6   : > { %v4775_v48 = vmul.f32 %v5991_v1, %v4768_v42  ;;  %v5169_v15 = vadd.f32 %v5168_v31, %v5166_v60  ;;  %v11399_v42 = vld [vmem:[#allocation8_spill] sm:$0xff]  ;;  %v5226_v63 = vmax.f32 %v10520_v2, 0.0 }
 0x9b7   : > { %v4999_v21 = vmul.f32 %v11394_v28, %v4997_v62  ;;  %v5182_v41 = vadd.f32 %v5181_v26, %v5179_v59 }
 0x9b8   : > { %v4776_v46 = vadd.f32 %v4775_v48, %v10564_v47  ;;  %v5170_v56 = vadd.f32 %v5169_v15, %v5167_v17 }
 0x9b9   : > { %v5004_v32 = vmul.f32 %v11397_v7, %v4999_v21  ;;  %v5010_v29 = vmul.f32 2.0, %v4999_v21  ;;  %v5183_v35 = vadd.f32 %v5182_v41, %v5180_v54 }
 0x9ba   : > { %v4777_v16 = vsel %vm3580_vm13, 1.0, %v4776_v46  ;;  %v5171_v0 = vrot.slane %v5170_v56, 4 }
 0x9bb   : > { %v5005_v6 = vmul.f32 %v5004_v32, %v11397_v7  ;;  %v5011_v40 = vsub.f32 %v5009_v38, %v5010_v29  ;;  %v4779_v3 = vrot.slane %v4777_v16, 5  ;;  %v5184_v18 = vrot.slane %v5183_v35, 4  ;;  %v5993_v47 = vpop.eup %5992 }
 0x9bc   : > { %v5172_v27 = vadd.f32 %v5171_v0, %v5170_v56  ;;  %v5233_v49 = vmul.f32 0.6931472, %v5993_v47 }
 0x9bd   : > { %v5007_v52 = vadd.f32 %v11398_v4, %v5005_v6  ;;  %v5012_v39 = vmul.f32 %v5011_v40, %v11399_v42  ;;  %v4781_v19 = vmul.f32 %v4779_v3, %v4541_v11  ;;  %v5185_v14 = vadd.f32 %v5184_v18, %v5183_v35 }
 0x9be   : > { %v5173_v13 = vrot.slane %v5172_v27, 2  ;;  %v5234_v10 = vadd.f32 %v5233_v49, %v5226_v63 }
 0x9bf   : > { %v5008_v57 = vmul.f32 %v5007_v52, %v4997_v62  ;;  %v5013_v9 = vadd.f32 %v5012_v39, %v4999_v21  ;;  %v5186_v24 = vrot.slane %v5185_v14, 2 }
 0x9c0   : > { %v5174_v8 = vadd.f32 %v5173_v13, %v5172_v27  ;;  %v5235_v5 = vadd.f32 0.001, %v5234_v10 }
 0x9c1   : > { %5994 = vrcp.f32 %v5013_v9  ;;  %v5187_v34 = vadd.f32 %v5186_v24, %v5185_v14 }
 0x9c2   : > { %v5175_v33 = vrot.slane %v5174_v8, 1  ;;  %v5249_v31 = vadd.f32 %v5235_v5, %v10557_v58 }
 0x9c3   : > { %v5188_v37 = vrot.slane %v5187_v34, 1 }
 0x9c4   : > { %v5176_v12 = vadd.f32 %v5175_v33, %v5174_v8 }
 0x9c5   : > { %v5189_v61 = vadd.f32 %v5188_v37, %v5187_v34 }
 0x9c7   : > { %v5995_v53 = vpop.eup %5994  ;;  %v5237_v44 = vsub.f32 %v5189_v61, %v5176_v12 }
 0x9c8   : > { %v5015_v25 = vmul.f32 %v5995_v53, %v5008_v57 }
 0x9c9   : > { %v5239_v55 = vmul.f32 %v11400_v23, %v5237_v44 }
 0x9ca   : > { %v5016_v11 = vadd.f32 %v5015_v25, %v4936_v30 }
 0x9cb   : > { %v5244_v60 = vmul.f32 %v10458_v43, %v5239_v55  ;;  %v5250_v2 = vmul.f32 2.0, %v5239_v55 }
 0x9cc   : > { %v5017_v62 = vsel %vm3580_vm13, 1.0, %v5016_v11 }
 0x9cd   : > { %v5019_v1 = vrot.slane %v5017_v62, 6  ;;  %v5245_v50 = vmul.f32 %v5244_v60, %v10458_v43  ;;  %v5251_v59 = vsub.f32 %v5249_v31, %v5250_v2 }
 0x9cf   : > { %v5021_v26 = vmul.f32 %v5019_v1, %v4781_v19  ;;  %v5247_v30 = vadd.f32 %v10575_v22, %v5245_v50  ;;  %v5252_v48 = vmul.f32 %v5251_v59, %v10541_v51 }
 0x9d1   : > { %v5248_v28 = vmul.f32 %v5247_v30, %v5237_v44  ;;  %v5253_v21 = vadd.f32 %v5252_v48, %v5239_v55 }
 0x9d3   : > { %5996 = vrcp.f32 %v5253_v21 }
 0x9d9   : > { %v5997_v17 = vpop.eup %5996 }
 0x9da   : > { %v5255_v15 = vmul.f32 %v5997_v17, %v5248_v28 }
 0x9dc   : > { %v5256_v58 = vadd.f32 %v5255_v15, %v5176_v12 }
 0x9de   : > { %v5257_v43 = vsel %vm3580_vm13, 1.0, %v5256_v58 }
 0x9df   : > { %v5259_v51 = vrot.slane %v5257_v43, 7 }
 0x9e1   : > { %v5261_v22 = vmul.f32 %v5259_v51, %v5021_v26 }
 0x9e3   : > { %5262 = vst [vmem:[%s299_s26] sm:$0x1] %v5261_v22 }
 0x9e4   : > { %6058 = shalt.err (!%p6055_p5)
}
 0x9e5   : > { %5650 = dma.vmem_to_hbm [thread:$0]  (%p6170_p6), %s5275_s29, 16, %s5277_s10, %s5264_s11  }
 0x9e6 PF: > { %s5288_s28 = sand.u32 1, %s6081_s21   ;;  %p5653_p7 = pnand %p5339_p9, %p6174_p8 }
 0x9e7   : > { %s5289_s18 = scalar_lea.sflag [#allocation4], %s5288_s28 }
 0x9e8   : > { %p5654_p10 = pneg %p5653_p7 }
 0x9ea   : > { %6076 = dma.done.wait (%p5654_p10), %s5289_s18, 16  }
 0x9eb   : > { %6078 = vsyncadd (%p5654_p10), %s5289_s18, 4294967280  ;;  %p16_p11 = scmp.ge.s32.totalorder %s6155_s27, 4   ;;  %s11401_s21 = smov %s6085_s22 }
 0x9ec   : > { %s11402_s22 = smov %s6089_s23  ;;  %s11403_s23 = smov %s6168_s30 }
 0x9ed   : > { %s11404_s24 = smov %s6155_s27  ;;  %18 = sbr.rel (!%p16_p11) target bundleno = 3 (0x3), region = 122 }
 0x9f2   :  { %5294 = vsyncpa [#allocation4], 1 }
 0x9f3   :  { %5296 = vsyncpa [#allocation4 + $0x1], 1 }

</bundles_post_ra>
